<compile_context>
chip_gen: v7x
topology: tpu7x:2x2x1
jax: 0.10.0
libtpu: 0.0.40
codegen_flags: <defaults>
</compile_context>

<pallas_src>
import functools
import math

import jax
import jax.numpy as jnp
from jax.experimental import pallas as pl
from jax.experimental.pallas import tpu as pltpu


def _mha_kernel(q_ref, k_ref, v_ref, w_ref, b_ref, out_ref, *,
                num_heads: int, head_dim: int, q_len: int, kv_len: int,
                batch_block: int, batched_heads: bool):
    """One grid step == `batch_block` batch elements.

    Refs (VMEM blocks):
      q_ref        : (batch_block * q_len,  E)  bf16 input rows, batch-major
      k_ref, v_ref : (batch_block * kv_len, E)  bf16
      w_ref        : (4, E, E) bf16, pre-transposed to (in, out): [Wq, Wk, Wv, Wo]
      b_ref        : (4, 1, E) f32:                               [bq, bk, bv, bo]
      out_ref      : (batch_block * q_len,  E)  f32
    """
    f32, bf16 = jnp.float32, jnp.bfloat16
    H, hd = num_heads, head_dim
    E = H * hd
    Sq, Skv, bblk = q_len, kv_len, batch_block
    scale = 1.0 / math.sqrt(hd)

    # Projections: one MXU matmul each over all packed rows (M = batch_block * seq),
    # bf16 operands (cast at the call boundary), f32 accumulation, no weight .T.
    # The attention scale is folded into q here (cheap: scales (rows, E), not scores).
    q = (jnp.dot(q_ref[...], w_ref[0], preferred_element_type=f32) + b_ref[0]) * scale
    k = jnp.dot(k_ref[...], w_ref[1], preferred_element_type=f32) + b_ref[1]
    v = jnp.dot(v_ref[...], w_ref[2], preferred_element_type=f32) + b_ref[2]

    def softmax_rows(s):
        s = s - jnp.max(s, axis=-1, keepdims=True)
        p = jnp.exp(s)
        return p * pl.reciprocal(jnp.sum(p, axis=-1, keepdims=True), approx=True)

    if batched_heads:
        def split_heads(x, s):
            # (bblk*s, E) -> (bblk*H, s, hd). Materialized relayout (hd < 128 lanes),
            # accepted: it feeds ONE batched MXU stream instead of bblk*H tiny dots.
            x4 = x.reshape(bblk, s, H, hd)
            return jnp.transpose(x4, (0, 2, 1, 3)).reshape(bblk * H, s, hd)

        q3 = split_heads(q, Sq).astype(bf16)
        k3 = split_heads(k, Skv).astype(bf16)
        v3 = split_heads(v, Skv).astype(bf16)
        s = jnp.einsum("bqd,bkd->bqk", q3, k3, preferred_element_type=f32)
        p = softmax_rows(s)
        ctx = jnp.einsum("bqk,bkd->bqd", p.astype(bf16), v3, preferred_element_type=f32)
        # (bblk*H, Sq, hd) -> (bblk*Sq, E) for a single lane-dense output projection.
        ctx = jnp.transpose(ctx.reshape(bblk, H, Sq, hd), (0, 2, 1, 3)).reshape(bblk * Sq, E)
    else:
        # Conservative fallback (2-D slices / 2-D dots only); only used if the batched
        # path fails to lower on the running Mosaic version.
        rows = []
        for b in range(bblk):
            qb = q[b * Sq:(b + 1) * Sq]
            kb = k[b * Skv:(b + 1) * Skv]
            vb = v[b * Skv:(b + 1) * Skv]
            outs = []
            for h in range(H):
                sl = slice(h * hd, (h + 1) * hd)
                s = jnp.dot(qb[:, sl].astype(bf16), kb[:, sl].astype(bf16).T,
                            preferred_element_type=f32)
                p = softmax_rows(s)
                outs.append(jnp.dot(p.astype(bf16), vb[:, sl].astype(bf16),
                                    preferred_element_type=f32))
            rows.append(jnp.concatenate(outs, axis=-1))
        ctx = rows[0] if bblk == 1 else jnp.concatenate(rows, axis=0)

    # TODO(synk): dropout on attention weights is identity (eval mode).
    out = jnp.dot(ctx.astype(bf16), w_ref[3], preferred_element_type=f32) + b_ref[3]
    out_ref[...] = out.astype(out_ref.dtype)


def _pack_params(params):
    """Pre-transpose weights to (in, out), pack into one bf16 tensor; biases -> (4,1,E) f32."""
    w_all = jnp.stack(
        [params["wq"].T, params["wk"].T, params["wv"].T, params["wo"].T], axis=0)
    b_all = jnp.stack(
        [params["bq"], params["bk"], params["bv"], params["bo"]], axis=0)[:, None, :]
    return w_all.astype(jnp.bfloat16), b_all.astype(jnp.float32)


def _pick_batch_block(batch, q_len, target_rows=512):
    """Pack batch elements per grid step so the matmul M dim is large, while keeping
    >= 2 grid steps (v7x megacore) and bblk*q_len a multiple of 16 (bf16 sublanes)."""
    bblk = max(1, min(batch, target_rows // max(q_len, 1)))
    if batch >= 2:
        bblk = min(bblk, batch // 2)
    while bblk > 1 and not (batch % bblk == 0 and (bblk * q_len) % 16 == 0):
        bblk -= 1
    return max(1, bblk)


def _vmem_limit_bytes():
    """Per-generation scoped-VMEM limit with safe fallback (v7x physical VMEM is 64 MiB)."""
    try:
        cap = int(pltpu.get_tpu_info().vmem_capacity_bytes)
        return min(100 * 1024 * 1024, (cap * 3) // 4)
    except Exception:  # noqa: BLE001 - hardware query unavailable; conservative default
        return 48 * 1024 * 1024


def _mha_pallas(query, key, value, w_all, b_all, *, num_heads, batch_block,
                batched_heads, single_buffer_weights):
    B, Sq, E = query.shape
    _, Skv, _ = key.shape
    head_dim = E // num_heads
    bblk = batch_block
    assert B % bblk == 0, "batch_block must divide batch"

    # Flatten (B, S, E) -> (B*S, E) and cast activations to bf16 in the wrapper:
    # halves HBM DMA bytes and the double-buffered activation VMEM footprint.
    bf16 = jnp.bfloat16
    q2 = query.reshape(B * Sq, E).astype(bf16)
    k2 = key.reshape(B * Skv, E).astype(bf16)
    v2 = value.reshape(B * Skv, E).astype(bf16)

    kernel = functools.partial(
        _mha_kernel, num_heads=num_heads, head_dim=head_dim,
        q_len=Sq, kv_len=Skv, batch_block=bblk, batched_heads=batched_heads)

    # Weight/bias blocks have constant index_maps -> single-buffer them to halve
    # their VMEM residency (graceful fallback if pipeline_mode is unsupported).
    const_kwargs = {}
    if single_buffer_weights:
        try:
            const_kwargs = dict(pipeline_mode=pl.Buffered(1))
            pl.BlockSpec((4, E, E), lambda i: (0, 0, 0), **const_kwargs)  # probe
        except TypeError:
            const_kwargs = {}
    w_spec = pl.BlockSpec((4, E, E), lambda i: (0, 0, 0), **const_kwargs)
    b_spec = pl.BlockSpec((4, 1, E), lambda i: (0, 0, 0), **const_kwargs)

    # Advisory cost hint so XLA schedules around the custom call.
    flops = (2 * E * E * (2 * B * Sq + 2 * B * Skv)          # q,k,v,out projections
             + 4 * B * num_heads * Sq * Skv * head_dim)       # QK^T + PV
    bytes_accessed = ((q2.size + k2.size + v2.size) * 2      # bf16 activations
                      + w_all.size * 2 + b_all.size * 4      # weights + biases
                      + B * Sq * E * 4)                      # f32 output
    cost = pl.CostEstimate(flops=int(flops),
                           transcendentals=int(B * num_heads * Sq * Skv),
                           bytes_accessed=int(bytes_accessed))

    out2 = pl.pallas_call(
        kernel,
        out_shape=jax.ShapeDtypeStruct((B * Sq, E), query.dtype),
        grid_spec=pltpu.PrefetchScalarGridSpec(
            num_scalar_prefetch=0,
            grid=(B // bblk,),
            in_specs=[
                pl.BlockSpec((bblk * Sq, E), lambda i: (i, 0)),
                pl.BlockSpec((bblk * Skv, E), lambda i: (i, 0)),
                pl.BlockSpec((bblk * Skv, E), lambda i: (i, 0)),
                w_spec,
                b_spec,
            ],
            out_specs=pl.BlockSpec((bblk * Sq, E), lambda i: (i, 0)),
        ),
        compiler_params=pltpu.CompilerParams(
            dimension_semantics=("parallel",),
            vmem_limit_bytes=_vmem_limit_bytes()),
        cost_estimate=cost,
    )(q2, k2, v2, w_all, b_all)
    return out2.reshape(B, Sq, E)


def multihead_attention(query, key, value, params, *, num_heads, batch_block=None):
    """query: (B, Sq, E); key/value: (B, Skv, E); params: PyTorch-layout weights/biases."""
    B, Sq, _ = query.shape
    bblk = batch_block if batch_block is not None else _pick_batch_block(B, Sq)
    w_all, b_all = _pack_params(params)

    # Preferred configuration first; fall back only if an optional feature
    # (pl.Buffered single-buffering, head-batched in-kernel reshape/transpose) is
    # unsupported by the running JAX/Mosaic. All configurations compute identical
    # math (verified against the f32 reference below), so a fallback can only cost
    # performance, never correctness. If everything fails, the first error is raised.
    attempts = (
        dict(batched_heads=True, single_buffer_weights=True),
        dict(batched_heads=True, single_buffer_weights=False),
        dict(batched_heads=False, single_buffer_weights=False),
    )
    first_err = None
    for cfg in attempts:
        try:
            return _mha_pallas(query, key, value, w_all, b_all,
                               num_heads=num_heads, batch_block=bblk, **cfg)
        except Exception as e:  # noqa: BLE001 - feature-availability fallback
            if first_err is None:
                first_err = e
    raise first_err


def _reference(query, key, value, params, *, num_heads):
    """Pure-JAX f32 reference mirroring the PyTorch forward (dropout = identity)."""
    B, _, E = query.shape
    hd = E // num_heads

    def lin(x, w, b):
        return x @ w.T + b

    q = lin(query, params["wq"], params["bq"]).reshape(B, -1, num_heads, hd).transpose(0, 2, 1, 3)
    k = lin(key, params["wk"], params["bk"]).reshape(B, -1, num_heads, hd).transpose(0, 2, 1, 3)
    v = lin(value, params["wv"], params["bv"]).reshape(B, -1, num_heads, hd).transpose(0, 2, 1, 3)

    scores = jnp.einsum("bhqd,bhkd->bhqk", q, k) / math.sqrt(hd)
    weights = jax.nn.softmax(scores, axis=-1)
    attn = jnp.einsum("bhqk,bhkd->bhqd", weights, v)
    attn = attn.transpose(0, 2, 1, 3).reshape(B, -1, E)
    return lin(attn, params["wo"], params["bo"])


def init_params(key, embed_dim):
    keys = jax.random.split(key, 8)
    scale = 1.0 / math.sqrt(embed_dim)

    def w(k):
        return jax.random.uniform(k, (embed_dim, embed_dim), jnp.float32, -scale, scale)

    def b(k):
        return jax.random.uniform(k, (embed_dim,), jnp.float32, -scale, scale)

    return {
        "wq": w(keys[0]), "bq": b(keys[1]),
        "wk": w(keys[2]), "bk": b(keys[3]),
        "wv": w(keys[4]), "bv": b(keys[5]),
        "wo": w(keys[6]), "bo": b(keys[7]),
    }


if __name__ == "__main__":
    # batch, seq, embed_dim, num_heads (head_dim = 16). E is a multiple of 128 so the
    # output block stores are lane-dense; batch/seq chosen so the grid has 2 steps
    # (both v7x TensorCores) with bblk*S rows a multiple of 16 (bf16 sublane packing).
    B, S, E, H = 4, 16, 128, 8

    root = jax.random.PRNGKey(0)
    k_params, k_q, k_k, k_v = jax.random.split(root, 4)

    params = init_params(k_params, E)
    query = jax.random.normal(k_q, (B, S, E), jnp.float32)
    key_in = jax.random.normal(k_k, (B, S, E), jnp.float32)
    value = jax.random.normal(k_v, (B, S, E), jnp.float32)

    out = jax.block_until_ready(
        multihead_attention(query, key_in, value, params, num_heads=H))
    ref = _reference(query, key_in, value, params, num_heads=H)

    assert out.shape == (B, S, E)
    max_err = float(jnp.max(jnp.abs(out - ref)))
    # Tolerance accounts for bf16 activations/weights on the MXU (f32 accumulation)
    # and the approx-reciprocal softmax denominator, vs. the f32 reference.
    assert jnp.allclose(out, ref, atol=2e-2, rtol=2e-2), \
        f"mismatch vs reference (max abs err {max_err})"

    print("KERNEL_OK")
</pallas_src>

<mosaic_0001>
module attributes {stable_mosaic.version = 11 : i64} {
  func.func @_mha_kernel(%arg0: i32, %arg1: memref<32x128xbf16, #tpu.memory_space<vmem>>, %arg2: memref<32x128xbf16, #tpu.memory_space<vmem>>, %arg3: memref<32x128xbf16, #tpu.memory_space<vmem>>, %arg4: memref<4x128x128xbf16, #tpu.memory_space<vmem>>, %arg5: memref<4x1x128xf32, #tpu.memory_space<vmem>>, %arg6: memref<32x128xf32, #tpu.memory_space<vmem>>) attributes {dimension_semantics = [#tpu.dimension_semantics<parallel>], iteration_bounds = array<i64: 2>, scalar_prefetch = 0 : i64, scratch_operands = 0 : i64, tpu.core_type = #tpu.core_type<tc>, window_params = [{transform_indices = @transform_0, window_bounds = array<i64: 32, 128>}, {transform_indices = @transform_1, window_bounds = array<i64: 32, 128>}, {transform_indices = @transform_2, window_bounds = array<i64: 32, 128>}, {pipeline_mode = #tpu.pipeline_mode<synchronous>, transform_indices = @transform_3, window_bounds = array<i64: 4, 128, 128>}, {pipeline_mode = #tpu.pipeline_mode<synchronous>, transform_indices = @transform_4, window_bounds = array<i64: 4, 1, 128>}, {transform_indices = @transform_5, window_bounds = array<i64: 32, 128>}]} {
    %c0 = arith.constant 0 : index
    %c0_0 = arith.constant 0 : index
    %0 = vector.load %arg1[%c0, %c0_0] : memref<32x128xbf16, #tpu.memory_space<vmem>>, vector<32x128xbf16>
    %c0_1 = arith.constant 0 : index
    %c0_2 = arith.constant 0 : index
    %c0_3 = arith.constant 0 : index
    %1 = vector.load %arg4[%c0_1, %c0_2, %c0_3] : memref<4x128x128xbf16, #tpu.memory_space<vmem>>, vector<1x128x128xbf16>
    %2 = vector.shape_cast %1 : vector<1x128x128xbf16> to vector<128x128xbf16>
    %cst = arith.constant dense<0.000000e+00> : vector<32x128xf32>
    %3 = tpu.matmul %0, %2, %cst {dimension_numbers = #tpu.dot_dimension_numbers<[1], [0], [0], [1], [0, 0, 1, 1], [], []>} : vector<32x128xbf16>, vector<128x128xbf16>, vector<32x128xf32> -> vector<32x128xf32>
    %c0_4 = arith.constant 0 : index
    %c0_5 = arith.constant 0 : index
    %c0_6 = arith.constant 0 : index
    %4 = vector.load %arg5[%c0_4, %c0_5, %c0_6] : memref<4x1x128xf32, #tpu.memory_space<vmem>>, vector<1x1x128xf32>
    %5 = vector.shape_cast %4 : vector<1x1x128xf32> to vector<1x128xf32>
    %6 = vector.broadcast %5 : vector<1x128xf32> to vector<32x128xf32>
    %7 = arith.addf %3, %6 : vector<32x128xf32>
    %cst_7 = arith.constant 2.500000e-01 : f32
    %8 = vector.broadcast %cst_7 : f32 to vector<32x128xf32>
    %9 = arith.mulf %7, %8 : vector<32x128xf32>
    %c0_8 = arith.constant 0 : index
    %c0_9 = arith.constant 0 : index
    %10 = vector.load %arg2[%c0_8, %c0_9] : memref<32x128xbf16, #tpu.memory_space<vmem>>, vector<32x128xbf16>
    %c1 = arith.constant 1 : index
    %c0_10 = arith.constant 0 : index
    %c0_11 = arith.constant 0 : index
    %11 = vector.load %arg4[%c1, %c0_10, %c0_11] : memref<4x128x128xbf16, #tpu.memory_space<vmem>>, vector<1x128x128xbf16>
    %12 = vector.shape_cast %11 : vector<1x128x128xbf16> to vector<128x128xbf16>
    %cst_12 = arith.constant dense<0.000000e+00> : vector<32x128xf32>
    %13 = tpu.matmul %10, %12, %cst_12 {dimension_numbers = #tpu.dot_dimension_numbers<[1], [0], [0], [1], [0, 0, 1, 1], [], []>} : vector<32x128xbf16>, vector<128x128xbf16>, vector<32x128xf32> -> vector<32x128xf32>
    %c1_13 = arith.constant 1 : index
    %c0_14 = arith.constant 0 : index
    %c0_15 = arith.constant 0 : index
    %14 = vector.load %arg5[%c1_13, %c0_14, %c0_15] : memref<4x1x128xf32, #tpu.memory_space<vmem>>, vector<1x1x128xf32>
    %15 = vector.shape_cast %14 : vector<1x1x128xf32> to vector<1x128xf32>
    %16 = vector.broadcast %15 : vector<1x128xf32> to vector<32x128xf32>
    %17 = arith.addf %13, %16 : vector<32x128xf32>
    %c0_16 = arith.constant 0 : index
    %c0_17 = arith.constant 0 : index
    %18 = vector.load %arg3[%c0_16, %c0_17] : memref<32x128xbf16, #tpu.memory_space<vmem>>, vector<32x128xbf16>
    %c2 = arith.constant 2 : index
    %c0_18 = arith.constant 0 : index
    %c0_19 = arith.constant 0 : index
    %19 = vector.load %arg4[%c2, %c0_18, %c0_19] : memref<4x128x128xbf16, #tpu.memory_space<vmem>>, vector<1x128x128xbf16>
    %20 = vector.shape_cast %19 : vector<1x128x128xbf16> to vector<128x128xbf16>
    %cst_20 = arith.constant dense<0.000000e+00> : vector<32x128xf32>
    %21 = tpu.matmul %18, %20, %cst_20 {dimension_numbers = #tpu.dot_dimension_numbers<[1], [0], [0], [1], [0, 0, 1, 1], [], []>} : vector<32x128xbf16>, vector<128x128xbf16>, vector<32x128xf32> -> vector<32x128xf32>
    %c2_21 = arith.constant 2 : index
    %c0_22 = arith.constant 0 : index
    %c0_23 = arith.constant 0 : index
    %22 = vector.load %arg5[%c2_21, %c0_22, %c0_23] : memref<4x1x128xf32, #tpu.memory_space<vmem>>, vector<1x1x128xf32>
    %23 = vector.shape_cast %22 : vector<1x1x128xf32> to vector<1x128xf32>
    %24 = vector.broadcast %23 : vector<1x128xf32> to vector<32x128xf32>
    %25 = arith.addf %21, %24 : vector<32x128xf32>
    %26 = vector.shape_cast %9 : vector<32x128xf32> to vector<2x16x8x16xf32>
    %27 = tpu.transpose %26, [0, 2, 1, 3] : vector<2x16x8x16xf32> -> vector<2x8x16x16xf32>
    %28 = vector.shape_cast %27 : vector<2x8x16x16xf32> to vector<16x16x16xf32>
    %29 = arith.truncf %28 : vector<16x16x16xf32> to vector<16x16x16xbf16>
    %30 = vector.shape_cast %17 : vector<32x128xf32> to vector<2x16x8x16xf32>
    %31 = tpu.transpose %30, [0, 2, 1, 3] : vector<2x16x8x16xf32> -> vector<2x8x16x16xf32>
    %32 = vector.shape_cast %31 : vector<2x8x16x16xf32> to vector<16x16x16xf32>
    %33 = arith.truncf %32 : vector<16x16x16xf32> to vector<16x16x16xbf16>
    %34 = vector.shape_cast %25 : vector<32x128xf32> to vector<2x16x8x16xf32>
    %35 = tpu.transpose %34, [0, 2, 1, 3] : vector<2x16x8x16xf32> -> vector<2x8x16x16xf32>
    %36 = vector.shape_cast %35 : vector<2x8x16x16xf32> to vector<16x16x16xf32>
    %37 = arith.truncf %36 : vector<16x16x16xf32> to vector<16x16x16xbf16>
    "tpu.trace_start"() <{level = 10 : i32, message = "bqd,bkd->bqk"}> : () -> ()
    %cst_24 = arith.constant dense<0.000000e+00> : vector<16x16x16xf32>
    %38 = tpu.matmul %29, %33, %cst_24 {dimension_numbers = #tpu.dot_dimension_numbers<[2], [2], [1], [1], [0, 0, 0, 1, 1, 1], [0], [0]>} : vector<16x16x16xbf16>, vector<16x16x16xbf16>, vector<16x16x16xf32> -> vector<16x16x16xf32>
    "tpu.trace_stop"() : () -> ()
    %cst_25 = arith.constant dense<0xFF800000> : vector<16x16xf32>
    %39 = vector.multi_reduction <maximumf>, %38, %cst_25 [2] : vector<16x16x16xf32> to vector<16x16xf32>
    %40 = vector.shape_cast %39 : vector<16x16xf32> to vector<16x16x1xf32>
    %41 = vector.broadcast %40 : vector<16x16x1xf32> to vector<16x16x16xf32>
    %42 = arith.subf %38, %41 : vector<16x16x16xf32>
    %43 = math.exp %42 : vector<16x16x16xf32>
    %cst_26 = arith.constant dense<0.000000e+00> : vector<16x16xf32>
    %44 = vector.multi_reduction <add>, %43, %cst_26 [2] : vector<16x16x16xf32> to vector<16x16xf32>
    %45 = vector.shape_cast %44 : vector<16x16xf32> to vector<16x16x1xf32>
    %46 = tpu.reciprocal %45 {approx = true} : vector<16x16x1xf32> -> vector<16x16x1xf32>
    %47 = vector.broadcast %46 : vector<16x16x1xf32> to vector<16x16x16xf32>
    %48 = arith.mulf %43, %47 : vector<16x16x16xf32>
    %49 = arith.truncf %48 : vector<16x16x16xf32> to vector<16x16x16xbf16>
    "tpu.trace_start"() <{level = 10 : i32, message = "bqk,bkd->bqd"}> : () -> ()
    %cst_27 = arith.constant dense<0.000000e+00> : vector<16x16x16xf32>
    %50 = tpu.matmul %49, %37, %cst_27 {dimension_numbers = #tpu.dot_dimension_numbers<[2], [1], [1], [2], [0, 0, 0, 1, 1, 2], [0], [0]>} : vector<16x16x16xbf16>, vector<16x16x16xbf16>, vector<16x16x16xf32> -> vector<16x16x16xf32>
    "tpu.trace_stop"() : () -> ()
    %51 = vector.shape_cast %50 : vector<16x16x16xf32> to vector<2x8x16x16xf32>
    %52 = tpu.transpose %51, [0, 2, 1, 3] : vector<2x8x16x16xf32> -> vector<2x16x8x16xf32>
    %53 = vector.shape_cast %52 : vector<2x16x8x16xf32> to vector<32x128xf32>
    %54 = arith.truncf %53 : vector<32x128xf32> to vector<32x128xbf16>
    %c3 = arith.constant 3 : index
    %c0_28 = arith.constant 0 : index
    %c0_29 = arith.constant 0 : index
    %55 = vector.load %arg4[%c3, %c0_28, %c0_29] : memref<4x128x128xbf16, #tpu.memory_space<vmem>>, vector<1x128x128xbf16>
    %56 = vector.shape_cast %55 : vector<1x128x128xbf16> to vector<128x128xbf16>
    %cst_30 = arith.constant dense<0.000000e+00> : vector<32x128xf32>
    %57 = tpu.matmul %54, %56, %cst_30 {dimension_numbers = #tpu.dot_dimension_numbers<[1], [0], [0], [1], [0, 0, 1, 1], [], []>} : vector<32x128xbf16>, vector<128x128xbf16>, vector<32x128xf32> -> vector<32x128xf32>
    %c3_31 = arith.constant 3 : index
    %c0_32 = arith.constant 0 : index
    %c0_33 = arith.constant 0 : index
    %58 = vector.load %arg5[%c3_31, %c0_32, %c0_33] : memref<4x1x128xf32, #tpu.memory_space<vmem>>, vector<1x1x128xf32>
    %59 = vector.shape_cast %58 : vector<1x1x128xf32> to vector<1x128xf32>
    %60 = vector.broadcast %59 : vector<1x128xf32> to vector<32x128xf32>
    %61 = arith.addf %57, %60 : vector<32x128xf32>
    %c0_34 = arith.constant 0 : index
    %c0_35 = arith.constant 0 : index
    %62 = vector.load %arg6[%c0_34, %c0_35] : memref<32x128xf32, #tpu.memory_space<vmem>>, vector<32x128xf32>
    tpu.vector_store %arg6[%c0_34, %c0_35], %61 {strides = array<i32>} : memref<32x128xf32, #tpu.memory_space<vmem>>, vector<32x128xf32>,
    return
  }
  func.func @transform_0(%arg0: i32) -> (i32, i32) {
    %c0_i32 = arith.constant 0 : i32
    %c0_i32_0 = arith.constant 0 : i32
    return %arg0, %c0_i32 : i32, i32
  }
  func.func @transform_1(%arg0: i32) -> (i32, i32) {
    %c0_i32 = arith.constant 0 : i32
    %c0_i32_0 = arith.constant 0 : i32
    return %arg0, %c0_i32 : i32, i32
  }
  func.func @transform_2(%arg0: i32) -> (i32, i32) {
    %c0_i32 = arith.constant 0 : i32
    %c0_i32_0 = arith.constant 0 : i32
    return %arg0, %c0_i32 : i32, i32
  }
  func.func @transform_3(%arg0: i32) -> (i32, i32, i32) {
    %c0_i32 = arith.constant 0 : i32
    %c0_i32_0 = arith.constant 0 : i32
    %c0_i32_1 = arith.constant 0 : i32
    %c0_i32_2 = arith.constant 0 : i32
    return %c0_i32, %c0_i32_0, %c0_i32_1 : i32, i32, i32
  }
  func.func @transform_4(%arg0: i32) -> (i32, i32, i32) {
    %c0_i32 = arith.constant 0 : i32
    %c0_i32_0 = arith.constant 0 : i32
    %c0_i32_1 = arith.constant 0 : i32
    %c0_i32_2 = arith.constant 0 : i32
    return %c0_i32, %c0_i32_0, %c0_i32_1 : i32, i32, i32
  }
  func.func @transform_5(%arg0: i32) -> (i32, i32) {
    %c0_i32 = arith.constant 0 : i32
    %c0_i32_0 = arith.constant 0 : i32
    return %arg0, %c0_i32 : i32, i32
  }
}

module attributes {stable_mosaic.version = 11 : i64} {
  func.func @_mha_kernel(%arg0: i32, %arg1: memref<32x128xbf16, #tpu.memory_space<vmem>>, %arg2: memref<32x128xbf16, #tpu.memory_space<vmem>>, %arg3: memref<32x128xbf16, #tpu.memory_space<vmem>>, %arg4: memref<4x128x128xbf16, #tpu.memory_space<vmem>>, %arg5: memref<4x1x128xf32, #tpu.memory_space<vmem>>, %arg6: memref<32x128xf32, #tpu.memory_space<vmem>>) attributes {dimension_semantics = [#tpu.dimension_semantics<parallel>], iteration_bounds = array<i64: 2>, scalar_prefetch = 0 : i64, scratch_operands = 0 : i64, tpu.core_type = #tpu.core_type<tc>, window_params = [{transform_indices = @transform_0, window_bounds = array<i64: 32, 128>}, {transform_indices = @transform_1, window_bounds = array<i64: 32, 128>}, {transform_indices = @transform_2, window_bounds = array<i64: 32, 128>}, {pipeline_mode = #tpu.pipeline_mode<synchronous>, transform_indices = @transform_3, window_bounds = array<i64: 4, 128, 128>}, {pipeline_mode = #tpu.pipeline_mode<synchronous>, transform_indices = @transform_4, window_bounds = array<i64: 4, 1, 128>}, {transform_indices = @transform_5, window_bounds = array<i64: 32, 128>}]} {
    %c0 = arith.constant 0 : index
    %c0_0 = arith.constant 0 : index
    %0 = vector.load %arg1[%c0, %c0_0] : memref<32x128xbf16, #tpu.memory_space<vmem>>, vector<32x128xbf16>
    %c0_1 = arith.constant 0 : index
    %c0_2 = arith.constant 0 : index
    %c0_3 = arith.constant 0 : index
    %1 = vector.load %arg4[%c0_1, %c0_2, %c0_3] : memref<4x128x128xbf16, #tpu.memory_space<vmem>>, vector<1x128x128xbf16>
    %2 = vector.shape_cast %1 : vector<1x128x128xbf16> to vector<128x128xbf16>
    %cst = arith.constant dense<0.000000e+00> : vector<32x128xf32>
    %3 = tpu.matmul %0, %2, %cst {dimension_numbers = #tpu.dot_dimension_numbers<[1], [0], [0], [1], [0, 0, 1, 1], [], []>} : vector<32x128xbf16>, vector<128x128xbf16>, vector<32x128xf32> -> vector<32x128xf32>
    %c0_4 = arith.constant 0 : index
    %c0_5 = arith.constant 0 : index
    %c0_6 = arith.constant 0 : index
    %4 = vector.load %arg5[%c0_4, %c0_5, %c0_6] : memref<4x1x128xf32, #tpu.memory_space<vmem>>, vector<1x1x128xf32>
    %5 = vector.shape_cast %4 : vector<1x1x128xf32> to vector<1x128xf32>
    %6 = vector.broadcast %5 : vector<1x128xf32> to vector<32x128xf32>
    %7 = arith.addf %3, %6 : vector<32x128xf32>
    %cst_7 = arith.constant 2.500000e-01 : f32
    %8 = vector.broadcast %cst_7 : f32 to vector<32x128xf32>
    %9 = arith.mulf %7, %8 : vector<32x128xf32>
    %c0_8 = arith.constant 0 : index
    %c0_9 = arith.constant 0 : index
    %10 = vector.load %arg2[%c0_8, %c0_9] : memref<32x128xbf16, #tpu.memory_space<vmem>>, vector<32x128xbf16>
    %c1 = arith.constant 1 : index
    %c0_10 = arith.constant 0 : index
    %c0_11 = arith.constant 0 : index
    %11 = vector.load %arg4[%c1, %c0_10, %c0_11] : memref<4x128x128xbf16, #tpu.memory_space<vmem>>, vector<1x128x128xbf16>
    %12 = vector.shape_cast %11 : vector<1x128x128xbf16> to vector<128x128xbf16>
    %cst_12 = arith.constant dense<0.000000e+00> : vector<32x128xf32>
    %13 = tpu.matmul %10, %12, %cst_12 {dimension_numbers = #tpu.dot_dimension_numbers<[1], [0], [0], [1], [0, 0, 1, 1], [], []>} : vector<32x128xbf16>, vector<128x128xbf16>, vector<32x128xf32> -> vector<32x128xf32>
    %c1_13 = arith.constant 1 : index
    %c0_14 = arith.constant 0 : index
    %c0_15 = arith.constant 0 : index
    %14 = vector.load %arg5[%c1_13, %c0_14, %c0_15] : memref<4x1x128xf32, #tpu.memory_space<vmem>>, vector<1x1x128xf32>
    %15 = vector.shape_cast %14 : vector<1x1x128xf32> to vector<1x128xf32>
    %16 = vector.broadcast %15 : vector<1x128xf32> to vector<32x128xf32>
    %17 = arith.addf %13, %16 : vector<32x128xf32>
    %c0_16 = arith.constant 0 : index
    %c0_17 = arith.constant 0 : index
    %18 = vector.load %arg3[%c0_16, %c0_17] : memref<32x128xbf16, #tpu.memory_space<vmem>>, vector<32x128xbf16>
    %c2 = arith.constant 2 : index
    %c0_18 = arith.constant 0 : index
    %c0_19 = arith.constant 0 : index
    %19 = vector.load %arg4[%c2, %c0_18, %c0_19] : memref<4x128x128xbf16, #tpu.memory_space<vmem>>, vector<1x128x128xbf16>
    %20 = vector.shape_cast %19 : vector<1x128x128xbf16> to vector<128x128xbf16>
    %cst_20 = arith.constant dense<0.000000e+00> : vector<32x128xf32>
    %21 = tpu.matmul %18, %20, %cst_20 {dimension_numbers = #tpu.dot_dimension_numbers<[1], [0], [0], [1], [0, 0, 1, 1], [], []>} : vector<32x128xbf16>, vector<128x128xbf16>, vector<32x128xf32> -> vector<32x128xf32>
    %c2_21 = arith.constant 2 : index
    %c0_22 = arith.constant 0 : index
    %c0_23 = arith.constant 0 : index
    %22 = vector.load %arg5[%c2_21, %c0_22, %c0_23] : memref<4x1x128xf32, #tpu.memory_space<vmem>>, vector<1x1x128xf32>
    %23 = vector.shape_cast %22 : vector<1x1x128xf32> to vector<1x128xf32>
    %24 = vector.broadcast %23 : vector<1x128xf32> to vector<32x128xf32>
    %25 = arith.addf %21, %24 : vector<32x128xf32>
    %26 = vector.shape_cast %9 : vector<32x128xf32> to vector<2x16x8x16xf32>
    %27 = tpu.transpose %26, [0, 2, 1, 3] : vector<2x16x8x16xf32> -> vector<2x8x16x16xf32>
    %28 = vector.shape_cast %27 : vector<2x8x16x16xf32> to vector<16x16x16xf32>
    %29 = arith.truncf %28 : vector<16x16x16xf32> to vector<16x16x16xbf16>
    %30 = vector.shape_cast %17 : vector<32x128xf32> to vector<2x16x8x16xf32>
    %31 = tpu.transpose %30, [0, 2, 1, 3] : vector<2x16x8x16xf32> -> vector<2x8x16x16xf32>
    %32 = vector.shape_cast %31 : vector<2x8x16x16xf32> to vector<16x16x16xf32>
    %33 = arith.truncf %32 : vector<16x16x16xf32> to vector<16x16x16xbf16>
    %34 = vector.shape_cast %25 : vector<32x128xf32> to vector<2x16x8x16xf32>
    %35 = tpu.transpose %34, [0, 2, 1, 3] : vector<2x16x8x16xf32> -> vector<2x8x16x16xf32>
    %36 = vector.shape_cast %35 : vector<2x8x16x16xf32> to vector<16x16x16xf32>
    %37 = arith.truncf %36 : vector<16x16x16xf32> to vector<16x16x16xbf16>
    "tpu.trace_start"() <{level = 10 : i32, message = "bqd,bkd->bqk"}> : () -> ()
    %cst_24 = arith.constant dense<0.000000e+00> : vector<16x16x16xf32>
    %38 = tpu.matmul %29, %33, %cst_24 {dimension_numbers = #tpu.dot_dimension_numbers<[2], [2], [1], [1], [0, 0, 0, 1, 1, 1], [0], [0]>} : vector<16x16x16xbf16>, vector<16x16x16xbf16>, vector<16x16x16xf32> -> vector<16x16x16xf32>
    "tpu.trace_stop"() : () -> ()
    %cst_25 = arith.constant dense<0xFF800000> : vector<16x16xf32>
    %39 = vector.multi_reduction <maximumf>, %38, %cst_25 [2] : vector<16x16x16xf32> to vector<16x16xf32>
    %40 = vector.shape_cast %39 : vector<16x16xf32> to vector<16x16x1xf32>
    %41 = vector.broadcast %40 : vector<16x16x1xf32> to vector<16x16x16xf32>
    %42 = arith.subf %38, %41 : vector<16x16x16xf32>
    %43 = math.exp %42 : vector<16x16x16xf32>
    %cst_26 = arith.constant dense<0.000000e+00> : vector<16x16xf32>
    %44 = vector.multi_reduction <add>, %43, %cst_26 [2] : vector<16x16x16xf32> to vector<16x16xf32>
    %45 = vector.shape_cast %44 : vector<16x16xf32> to vector<16x16x1xf32>
    %46 = tpu.reciprocal %45 {approx = true} : vector<16x16x1xf32> -> vector<16x16x1xf32>
    %47 = vector.broadcast %46 : vector<16x16x1xf32> to vector<16x16x16xf32>
    %48 = arith.mulf %43, %47 : vector<16x16x16xf32>
    %49 = arith.truncf %48 : vector<16x16x16xf32> to vector<16x16x16xbf16>
    "tpu.trace_start"() <{level = 10 : i32, message = "bqk,bkd->bqd"}> : () -> ()
    %cst_27 = arith.constant dense<0.000000e+00> : vector<16x16x16xf32>
    %50 = tpu.matmul %49, %37, %cst_27 {dimension_numbers = #tpu.dot_dimension_numbers<[2], [1], [1], [2], [0, 0, 0, 1, 1, 2], [0], [0]>} : vector<16x16x16xbf16>, vector<16x16x16xbf16>, vector<16x16x16xf32> -> vector<16x16x16xf32>
    "tpu.trace_stop"() : () -> ()
    %51 = vector.shape_cast %50 : vector<16x16x16xf32> to vector<2x8x16x16xf32>
    %52 = tpu.transpose %51, [0, 2, 1, 3] : vector<2x8x16x16xf32> -> vector<2x16x8x16xf32>
    %53 = vector.shape_cast %52 : vector<2x16x8x16xf32> to vector<32x128xf32>
    %54 = arith.truncf %53 : vector<32x128xf32> to vector<32x128xbf16>
    %c3 = arith.constant 3 : index
    %c0_28 = arith.constant 0 : index
    %c0_29 = arith.constant 0 : index
    %55 = vector.load %arg4[%c3, %c0_28, %c0_29] : memref<4x128x128xbf16, #tpu.memory_space<vmem>>, vector<1x128x128xbf16>
    %56 = vector.shape_cast %55 : vector<1x128x128xbf16> to vector<128x128xbf16>
    %cst_30 = arith.constant dense<0.000000e+00> : vector<32x128xf32>
    %57 = tpu.matmul %54, %56, %cst_30 {dimension_numbers = #tpu.dot_dimension_numbers<[1], [0], [0], [1], [0, 0, 1, 1], [], []>} : vector<32x128xbf16>, vector<128x128xbf16>, vector<32x128xf32> -> vector<32x128xf32>
    %c3_31 = arith.constant 3 : index
    %c0_32 = arith.constant 0 : index
    %c0_33 = arith.constant 0 : index
    %58 = vector.load %arg5[%c3_31, %c0_32, %c0_33] : memref<4x1x128xf32, #tpu.memory_space<vmem>>, vector<1x1x128xf32>
    %59 = vector.shape_cast %58 : vector<1x1x128xf32> to vector<1x128xf32>
    %60 = vector.broadcast %59 : vector<1x128xf32> to vector<32x128xf32>
    %61 = arith.addf %57, %60 : vector<32x128xf32>
    %c0_34 = arith.constant 0 : index
    %c0_35 = arith.constant 0 : index
    %62 = vector.load %arg6[%c0_34, %c0_35] : memref<32x128xf32, #tpu.memory_space<vmem>>, vector<32x128xf32>
    tpu.vector_store %arg6[%c0_34, %c0_35], %61 {strides = array<i32>} : memref<32x128xf32, #tpu.memory_space<vmem>>, vector<32x128xf32>,
    return
  }
  func.func @transform_0(%arg0: i32) -> (i32, i32) {
    %c0_i32 = arith.constant 0 : i32
    %c0_i32_0 = arith.constant 0 : i32
    return %arg0, %c0_i32 : i32, i32
  }
  func.func @transform_1(%arg0: i32) -> (i32, i32) {
    %c0_i32 = arith.constant 0 : i32
    %c0_i32_0 = arith.constant 0 : i32
    return %arg0, %c0_i32 : i32, i32
  }
  func.func @transform_2(%arg0: i32) -> (i32, i32) {
    %c0_i32 = arith.constant 0 : i32
    %c0_i32_0 = arith.constant 0 : i32
    return %arg0, %c0_i32 : i32, i32
  }
  func.func @transform_3(%arg0: i32) -> (i32, i32, i32) {
    %c0_i32 = arith.constant 0 : i32
    %c0_i32_0 = arith.constant 0 : i32
    %c0_i32_1 = arith.constant 0 : i32
    %c0_i32_2 = arith.constant 0 : i32
    return %c0_i32, %c0_i32_0, %c0_i32_1 : i32, i32, i32
  }
  func.func @transform_4(%arg0: i32) -> (i32, i32, i32) {
    %c0_i32 = arith.constant 0 : i32
    %c0_i32_0 = arith.constant 0 : i32
    %c0_i32_1 = arith.constant 0 : i32
    %c0_i32_2 = arith.constant 0 : i32
    return %c0_i32, %c0_i32_0, %c0_i32_1 : i32, i32, i32
  }
  func.func @transform_5(%arg0: i32) -> (i32, i32) {
    %c0_i32 = arith.constant 0 : i32
    %c0_i32_0 = arith.constant 0 : i32
    return %arg0, %c0_i32 : i32, i32
  }
}

module attributes {stable_mosaic.version = 11 : i64} {
  func.func @_mha_kernel(%arg0: i32, %arg1: memref<32x128xbf16, #tpu.memory_space<vmem>>, %arg2: memref<32x128xbf16, #tpu.memory_space<vmem>>, %arg3: memref<32x128xbf16, #tpu.memory_space<vmem>>, %arg4: memref<4x128x128xbf16, #tpu.memory_space<vmem>>, %arg5: memref<4x1x128xf32, #tpu.memory_space<vmem>>, %arg6: memref<32x128xf32, #tpu.memory_space<vmem>>) attributes {dimension_semantics = [#tpu.dimension_semantics<parallel>], iteration_bounds = array<i64: 2>, scalar_prefetch = 0 : i64, scratch_operands = 0 : i64, tpu.core_type = #tpu.core_type<tc>, window_params = [{transform_indices = @transform_0, window_bounds = array<i64: 32, 128>}, {transform_indices = @transform_1, window_bounds = array<i64: 32, 128>}, {transform_indices = @transform_2, window_bounds = array<i64: 32, 128>}, {pipeline_mode = #tpu.pipeline_mode<synchronous>, transform_indices = @transform_3, window_bounds = array<i64: 4, 128, 128>}, {pipeline_mode = #tpu.pipeline_mode<synchronous>, transform_indices = @transform_4, window_bounds = array<i64: 4, 1, 128>}, {transform_indices = @transform_5, window_bounds = array<i64: 32, 128>}]} {
    %c0 = arith.constant 0 : index
    %c0_0 = arith.constant 0 : index
    %0 = vector.load %arg1[%c0, %c0_0] : memref<32x128xbf16, #tpu.memory_space<vmem>>, vector<32x128xbf16>
    %c0_1 = arith.constant 0 : index
    %c0_2 = arith.constant 0 : index
    %c0_3 = arith.constant 0 : index
    %1 = vector.load %arg4[%c0_1, %c0_2, %c0_3] : memref<4x128x128xbf16, #tpu.memory_space<vmem>>, vector<1x128x128xbf16>
    %2 = vector.shape_cast %1 : vector<1x128x128xbf16> to vector<128x128xbf16>
    %cst = arith.constant dense<0.000000e+00> : vector<32x128xf32>
    %3 = tpu.matmul %0, %2, %cst {dimension_numbers = #tpu.dot_dimension_numbers<[1], [0], [0], [1], [0, 0, 1, 1], [], []>} : vector<32x128xbf16>, vector<128x128xbf16>, vector<32x128xf32> -> vector<32x128xf32>
    %c0_4 = arith.constant 0 : index
    %c0_5 = arith.constant 0 : index
    %c0_6 = arith.constant 0 : index
    %4 = vector.load %arg5[%c0_4, %c0_5, %c0_6] : memref<4x1x128xf32, #tpu.memory_space<vmem>>, vector<1x1x128xf32>
    %5 = vector.shape_cast %4 : vector<1x1x128xf32> to vector<1x128xf32>
    %6 = vector.broadcast %5 : vector<1x128xf32> to vector<32x128xf32>
    %7 = arith.addf %3, %6 : vector<32x128xf32>
    %cst_7 = arith.constant 2.500000e-01 : f32
    %8 = vector.broadcast %cst_7 : f32 to vector<32x128xf32>
    %9 = arith.mulf %7, %8 : vector<32x128xf32>
    %c0_8 = arith.constant 0 : index
    %c0_9 = arith.constant 0 : index
    %10 = vector.load %arg2[%c0_8, %c0_9] : memref<32x128xbf16, #tpu.memory_space<vmem>>, vector<32x128xbf16>
    %c1 = arith.constant 1 : index
    %c0_10 = arith.constant 0 : index
    %c0_11 = arith.constant 0 : index
    %11 = vector.load %arg4[%c1, %c0_10, %c0_11] : memref<4x128x128xbf16, #tpu.memory_space<vmem>>, vector<1x128x128xbf16>
    %12 = vector.shape_cast %11 : vector<1x128x128xbf16> to vector<128x128xbf16>
    %cst_12 = arith.constant dense<0.000000e+00> : vector<32x128xf32>
    %13 = tpu.matmul %10, %12, %cst_12 {dimension_numbers = #tpu.dot_dimension_numbers<[1], [0], [0], [1], [0, 0, 1, 1], [], []>} : vector<32x128xbf16>, vector<128x128xbf16>, vector<32x128xf32> -> vector<32x128xf32>
    %c1_13 = arith.constant 1 : index
    %c0_14 = arith.constant 0 : index
    %c0_15 = arith.constant 0 : index
    %14 = vector.load %arg5[%c1_13, %c0_14, %c0_15] : memref<4x1x128xf32, #tpu.memory_space<vmem>>, vector<1x1x128xf32>
    %15 = vector.shape_cast %14 : vector<1x1x128xf32> to vector<1x128xf32>
    %16 = vector.broadcast %15 : vector<1x128xf32> to vector<32x128xf32>
    %17 = arith.addf %13, %16 : vector<32x128xf32>
    %c0_16 = arith.constant 0 : index
    %c0_17 = arith.constant 0 : index
    %18 = vector.load %arg3[%c0_16, %c0_17] : memref<32x128xbf16, #tpu.memory_space<vmem>>, vector<32x128xbf16>
    %c2 = arith.constant 2 : index
    %c0_18 = arith.constant 0 : index
    %c0_19 = arith.constant 0 : index
    %19 = vector.load %arg4[%c2, %c0_18, %c0_19] : memref<4x128x128xbf16, #tpu.memory_space<vmem>>, vector<1x128x128xbf16>
    %20 = vector.shape_cast %19 : vector<1x128x128xbf16> to vector<128x128xbf16>
    %cst_20 = arith.constant dense<0.000000e+00> : vector<32x128xf32>
    %21 = tpu.matmul %18, %20, %cst_20 {dimension_numbers = #tpu.dot_dimension_numbers<[1], [0], [0], [1], [0, 0, 1, 1], [], []>} : vector<32x128xbf16>, vector<128x128xbf16>, vector<32x128xf32> -> vector<32x128xf32>
    %c2_21 = arith.constant 2 : index
    %c0_22 = arith.constant 0 : index
    %c0_23 = arith.constant 0 : index
    %22 = vector.load %arg5[%c2_21, %c0_22, %c0_23] : memref<4x1x128xf32, #tpu.memory_space<vmem>>, vector<1x1x128xf32>
    %23 = vector.shape_cast %22 : vector<1x1x128xf32> to vector<1x128xf32>
    %24 = vector.broadcast %23 : vector<1x128xf32> to vector<32x128xf32>
    %25 = arith.addf %21, %24 : vector<32x128xf32>
    %26 = vector.extract_strided_slice %9 {offsets = [0, 0], sizes = [16, 128], strides = [1, 1]} : vector<32x128xf32> to vector<16x128xf32>
    %27 = vector.extract_strided_slice %17 {offsets = [0, 0], sizes = [16, 128], strides = [1, 1]} : vector<32x128xf32> to vector<16x128xf32>
    %28 = vector.extract_strided_slice %25 {offsets = [0, 0], sizes = [16, 128], strides = [1, 1]} : vector<32x128xf32> to vector<16x128xf32>
    %29 = vector.extract_strided_slice %26 {offsets = [0, 0], sizes = [16, 16], strides = [1, 1]} : vector<16x128xf32> to vector<16x16xf32>
    %30 = arith.truncf %29 : vector<16x16xf32> to vector<16x16xbf16>
    %31 = vector.extract_strided_slice %27 {offsets = [0, 0], sizes = [16, 16], strides = [1, 1]} : vector<16x128xf32> to vector<16x16xf32>
    %32 = arith.truncf %31 : vector<16x16xf32> to vector<16x16xbf16>
    %33 = tpu.transpose %32, [1, 0] : vector<16x16xbf16> -> vector<16x16xbf16>
    %cst_24 = arith.constant dense<0.000000e+00> : vector<16x16xf32>
    %34 = tpu.matmul %30, %33, %cst_24 {dimension_numbers = #tpu.dot_dimension_numbers<[1], [0], [0], [1], [0, 0, 1, 1], [], []>} : vector<16x16xbf16>, vector<16x16xbf16>, vector<16x16xf32> -> vector<16x16xf32>
    %cst_25 = arith.constant dense<0xFF800000> : vector<16xf32>
    %35 = vector.multi_reduction <maximumf>, %34, %cst_25 [1] : vector<16x16xf32> to vector<16xf32>
    %36 = vector.shape_cast %35 : vector<16xf32> to vector<16x1xf32>
    %37 = vector.broadcast %36 : vector<16x1xf32> to vector<16x16xf32>
    %38 = arith.subf %34, %37 : vector<16x16xf32>
    %39 = math.exp %38 : vector<16x16xf32>
    %cst_26 = arith.constant dense<0.000000e+00> : vector<16xf32>
    %40 = vector.multi_reduction <add>, %39, %cst_26 [1] : vector<16x16xf32> to vector<16xf32>
    %41 = vector.shape_cast %40 : vector<16xf32> to vector<16x1xf32>
    %42 = tpu.reciprocal %41 {approx = true} : vector<16x1xf32> -> vector<16x1xf32>
    %43 = vector.broadcast %42 : vector<16x1xf32> to vector<16x16xf32>
    %44 = arith.mulf %39, %43 : vector<16x16xf32>
    %45 = arith.truncf %44 : vector<16x16xf32> to vector<16x16xbf16>
    %46 = vector.extract_strided_slice %28 {offsets = [0, 0], sizes = [16, 16], strides = [1, 1]} : vector<16x128xf32> to vector<16x16xf32>
    %47 = arith.truncf %46 : vector<16x16xf32> to vector<16x16xbf16>
    %cst_27 = arith.constant dense<0.000000e+00> : vector<16x16xf32>
    %48 = tpu.matmul %45, %47, %cst_27 {dimension_numbers = #tpu.dot_dimension_numbers<[1], [0], [0], [1], [0, 0, 1, 1], [], []>} : vector<16x16xbf16>, vector<16x16xbf16>, vector<16x16xf32> -> vector<16x16xf32>
    %49 = vector.extract_strided_slice %26 {offsets = [0, 16], sizes = [16, 16], strides = [1, 1]} : vector<16x128xf32> to vector<16x16xf32>
    %50 = arith.truncf %49 : vector<16x16xf32> to vector<16x16xbf16>
    %51 = vector.extract_strided_slice %27 {offsets = [0, 16], sizes = [16, 16], strides = [1, 1]} : vector<16x128xf32> to vector<16x16xf32>
    %52 = arith.truncf %51 : vector<16x16xf32> to vector<16x16xbf16>
    %53 = tpu.transpose %52, [1, 0] : vector<16x16xbf16> -> vector<16x16xbf16>
    %cst_28 = arith.constant dense<0.000000e+00> : vector<16x16xf32>
    %54 = tpu.matmul %50, %53, %cst_28 {dimension_numbers = #tpu.dot_dimension_numbers<[1], [0], [0], [1], [0, 0, 1, 1], [], []>} : vector<16x16xbf16>, vector<16x16xbf16>, vector<16x16xf32> -> vector<16x16xf32>
    %cst_29 = arith.constant dense<0xFF800000> : vector<16xf32>
    %55 = vector.multi_reduction <maximumf>, %54, %cst_29 [1] : vector<16x16xf32> to vector<16xf32>
    %56 = vector.shape_cast %55 : vector<16xf32> to vector<16x1xf32>
    %57 = vector.broadcast %56 : vector<16x1xf32> to vector<16x16xf32>
    %58 = arith.subf %54, %57 : vector<16x16xf32>
    %59 = math.exp %58 : vector<16x16xf32>
    %cst_30 = arith.constant dense<0.000000e+00> : vector<16xf32>
    %60 = vector.multi_reduction <add>, %59, %cst_30 [1] : vector<16x16xf32> to vector<16xf32>
    %61 = vector.shape_cast %60 : vector<16xf32> to vector<16x1xf32>
    %62 = tpu.reciprocal %61 {approx = true} : vector<16x1xf32> -> vector<16x1xf32>
    %63 = vector.broadcast %62 : vector<16x1xf32> to vector<16x16xf32>
    %64 = arith.mulf %59, %63 : vector<16x16xf32>
    %65 = arith.truncf %64 : vector<16x16xf32> to vector<16x16xbf16>
    %66 = vector.extract_strided_slice %28 {offsets = [0, 16], sizes = [16, 16], strides = [1, 1]} : vector<16x128xf32> to vector<16x16xf32>
    %67 = arith.truncf %66 : vector<16x16xf32> to vector<16x16xbf16>
    %cst_31 = arith.constant dense<0.000000e+00> : vector<16x16xf32>
    %68 = tpu.matmul %65, %67, %cst_31 {dimension_numbers = #tpu.dot_dimension_numbers<[1], [0], [0], [1], [0, 0, 1, 1], [], []>} : vector<16x16xbf16>, vector<16x16xbf16>, vector<16x16xf32> -> vector<16x16xf32>
    %69 = vector.extract_strided_slice %26 {offsets = [0, 32], sizes = [16, 16], strides = [1, 1]} : vector<16x128xf32> to vector<16x16xf32>
    %70 = arith.truncf %69 : vector<16x16xf32> to vector<16x16xbf16>
    %71 = vector.extract_strided_slice %27 {offsets = [0, 32], sizes = [16, 16], strides = [1, 1]} : vector<16x128xf32> to vector<16x16xf32>
    %72 = arith.truncf %71 : vector<16x16xf32> to vector<16x16xbf16>
    %73 = tpu.transpose %72, [1, 0] : vector<16x16xbf16> -> vector<16x16xbf16>
    %cst_32 = arith.constant dense<0.000000e+00> : vector<16x16xf32>
    %74 = tpu.matmul %70, %73, %cst_32 {dimension_numbers = #tpu.dot_dimension_numbers<[1], [0], [0], [1], [0, 0, 1, 1], [], []>} : vector<16x16xbf16>, vector<16x16xbf16>, vector<16x16xf32> -> vector<16x16xf32>
    %cst_33 = arith.constant dense<0xFF800000> : vector<16xf32>
    %75 = vector.multi_reduction <maximumf>, %74, %cst_33 [1] : vector<16x16xf32> to vector<16xf32>
    %76 = vector.shape_cast %75 : vector<16xf32> to vector<16x1xf32>
    %77 = vector.broadcast %76 : vector<16x1xf32> to vector<16x16xf32>
    %78 = arith.subf %74, %77 : vector<16x16xf32>
    %79 = math.exp %78 : vector<16x16xf32>
    %cst_34 = arith.constant dense<0.000000e+00> : vector<16xf32>
    %80 = vector.multi_reduction <add>, %79, %cst_34 [1] : vector<16x16xf32> to vector<16xf32>
    %81 = vector.shape_cast %80 : vector<16xf32> to vector<16x1xf32>
    %82 = tpu.reciprocal %81 {approx = true} : vector<16x1xf32> -> vector<16x1xf32>
    %83 = vector.broadcast %82 : vector<16x1xf32> to vector<16x16xf32>
    %84 = arith.mulf %79, %83 : vector<16x16xf32>
    %85 = arith.truncf %84 : vector<16x16xf32> to vector<16x16xbf16>
    %86 = vector.extract_strided_slice %28 {offsets = [0, 32], sizes = [16, 16], strides = [1, 1]} : vector<16x128xf32> to vector<16x16xf32>
    %87 = arith.truncf %86 : vector<16x16xf32> to vector<16x16xbf16>
    %cst_35 = arith.constant dense<0.000000e+00> : vector<16x16xf32>
    %88 = tpu.matmul %85, %87, %cst_35 {dimension_numbers = #tpu.dot_dimension_numbers<[1], [0], [0], [1], [0, 0, 1, 1], [], []>} : vector<16x16xbf16>, vector<16x16xbf16>, vector<16x16xf32> -> vector<16x16xf32>
    %89 = vector.extract_strided_slice %26 {offsets = [0, 48], sizes = [16, 16], strides = [1, 1]} : vector<16x128xf32> to vector<16x16xf32>
    %90 = arith.truncf %89 : vector<16x16xf32> to vector<16x16xbf16>
    %91 = vector.extract_strided_slice %27 {offsets = [0, 48], sizes = [16, 16], strides = [1, 1]} : vector<16x128xf32> to vector<16x16xf32>
    %92 = arith.truncf %91 : vector<16x16xf32> to vector<16x16xbf16>
    %93 = tpu.transpose %92, [1, 0] : vector<16x16xbf16> -> vector<16x16xbf16>
    %cst_36 = arith.constant dense<0.000000e+00> : vector<16x16xf32>
    %94 = tpu.matmul %90, %93, %cst_36 {dimension_numbers = #tpu.dot_dimension_numbers<[1], [0], [0], [1], [0, 0, 1, 1], [], []>} : vector<16x16xbf16>, vector<16x16xbf16>, vector<16x16xf32> -> vector<16x16xf32>
    %cst_37 = arith.constant dense<0xFF800000> : vector<16xf32>
    %95 = vector.multi_reduction <maximumf>, %94, %cst_37 [1] : vector<16x16xf32> to vector<16xf32>
    %96 = vector.shape_cast %95 : vector<16xf32> to vector<16x1xf32>
    %97 = vector.broadcast %96 : vector<16x1xf32> to vector<16x16xf32>
    %98 = arith.subf %94, %97 : vector<16x16xf32>
    %99 = math.exp %98 : vector<16x16xf32>
    %cst_38 = arith.constant dense<0.000000e+00> : vector<16xf32>
    %100 = vector.multi_reduction <add>, %99, %cst_38 [1] : vector<16x16xf32> to vector<16xf32>
    %101 = vector.shape_cast %100 : vector<16xf32> to vector<16x1xf32>
    %102 = tpu.reciprocal %101 {approx = true} : vector<16x1xf32> -> vector<16x1xf32>
    %103 = vector.broadcast %102 : vector<16x1xf32> to vector<16x16xf32>
    %104 = arith.mulf %99, %103 : vector<16x16xf32>
    %105 = arith.truncf %104 : vector<16x16xf32> to vector<16x16xbf16>
    %106 = vector.extract_strided_slice %28 {offsets = [0, 48], sizes = [16, 16], strides = [1, 1]} : vector<16x128xf32> to vector<16x16xf32>
    %107 = arith.truncf %106 : vector<16x16xf32> to vector<16x16xbf16>
    %cst_39 = arith.constant dense<0.000000e+00> : vector<16x16xf32>
    %108 = tpu.matmul %105, %107, %cst_39 {dimension_numbers = #tpu.dot_dimension_numbers<[1], [0], [0], [1], [0, 0, 1, 1], [], []>} : vector<16x16xbf16>, vector<16x16xbf16>, vector<16x16xf32> -> vector<16x16xf32>
    %109 = vector.extract_strided_slice %26 {offsets = [0, 64], sizes = [16, 16], strides = [1, 1]} : vector<16x128xf32> to vector<16x16xf32>
    %110 = arith.truncf %109 : vector<16x16xf32> to vector<16x16xbf16>
    %111 = vector.extract_strided_slice %27 {offsets = [0, 64], sizes = [16, 16], strides = [1, 1]} : vector<16x128xf32> to vector<16x16xf32>
    %112 = arith.truncf %111 : vector<16x16xf32> to vector<16x16xbf16>
    %113 = tpu.transpose %112, [1, 0] : vector<16x16xbf16> -> vector<16x16xbf16>
    %cst_40 = arith.constant dense<0.000000e+00> : vector<16x16xf32>
    %114 = tpu.matmul %110, %113, %cst_40 {dimension_numbers = #tpu.dot_dimension_numbers<[1], [0], [0], [1], [0, 0, 1, 1], [], []>} : vector<16x16xbf16>, vector<16x16xbf16>, vector<16x16xf32> -> vector<16x16xf32>
    %cst_41 = arith.constant dense<0xFF800000> : vector<16xf32>
    %115 = vector.multi_reduction <maximumf>, %114, %cst_41 [1] : vector<16x16xf32> to vector<16xf32>
    %116 = vector.shape_cast %115 : vector<16xf32> to vector<16x1xf32>
    %117 = vector.broadcast %116 : vector<16x1xf32> to vector<16x16xf32>
    %118 = arith.subf %114, %117 : vector<16x16xf32>
    %119 = math.exp %118 : vector<16x16xf32>
    %cst_42 = arith.constant dense<0.000000e+00> : vector<16xf32>
    %120 = vector.multi_reduction <add>, %119, %cst_42 [1] : vector<16x16xf32> to vector<16xf32>
    %121 = vector.shape_cast %120 : vector<16xf32> to vector<16x1xf32>
    %122 = tpu.reciprocal %121 {approx = true} : vector<16x1xf32> -> vector<16x1xf32>
    %123 = vector.broadcast %122 : vector<16x1xf32> to vector<16x16xf32>
    %124 = arith.mulf %119, %123 : vector<16x16xf32>
    %125 = arith.truncf %124 : vector<16x16xf32> to vector<16x16xbf16>
    %126 = vector.extract_strided_slice %28 {offsets = [0, 64], sizes = [16, 16], strides = [1, 1]} : vector<16x128xf32> to vector<16x16xf32>
    %127 = arith.truncf %126 : vector<16x16xf32> to vector<16x16xbf16>
    %cst_43 = arith.constant dense<0.000000e+00> : vector<16x16xf32>
    %128 = tpu.matmul %125, %127, %cst_43 {dimension_numbers = #tpu.dot_dimension_numbers<[1], [0], [0], [1], [0, 0, 1, 1], [], []>} : vector<16x16xbf16>, vector<16x16xbf16>, vector<16x16xf32> -> vector<16x16xf32>
    %129 = vector.extract_strided_slice %26 {offsets = [0, 80], sizes = [16, 16], strides = [1, 1]} : vector<16x128xf32> to vector<16x16xf32>
    %130 = arith.truncf %129 : vector<16x16xf32> to vector<16x16xbf16>
    %131 = vector.extract_strided_slice %27 {offsets = [0, 80], sizes = [16, 16], strides = [1, 1]} : vector<16x128xf32> to vector<16x16xf32>
    %132 = arith.truncf %131 : vector<16x16xf32> to vector<16x16xbf16>
    %133 = tpu.transpose %132, [1, 0] : vector<16x16xbf16> -> vector<16x16xbf16>
    %cst_44 = arith.constant dense<0.000000e+00> : vector<16x16xf32>
    %134 = tpu.matmul %130, %133, %cst_44 {dimension_numbers = #tpu.dot_dimension_numbers<[1], [0], [0], [1], [0, 0, 1, 1], [], []>} : vector<16x16xbf16>, vector<16x16xbf16>, vector<16x16xf32> -> vector<16x16xf32>
    %cst_45 = arith.constant dense<0xFF800000> : vector<16xf32>
    %135 = vector.multi_reduction <maximumf>, %134, %cst_45 [1] : vector<16x16xf32> to vector<16xf32>
    %136 = vector.shape_cast %135 : vector<16xf32> to vector<16x1xf32>
    %137 = vector.broadcast %136 : vector<16x1xf32> to vector<16x16xf32>
    %138 = arith.subf %134, %137 : vector<16x16xf32>
    %139 = math.exp %138 : vector<16x16xf32>
    %cst_46 = arith.constant dense<0.000000e+00> : vector<16xf32>
    %140 = vector.multi_reduction <add>, %139, %cst_46 [1] : vector<16x16xf32> to vector<16xf32>
    %141 = vector.shape_cast %140 : vector<16xf32> to vector<16x1xf32>
    %142 = tpu.reciprocal %141 {approx = true} : vector<16x1xf32> -> vector<16x1xf32>
    %143 = vector.broadcast %142 : vector<16x1xf32> to vector<16x16xf32>
    %144 = arith.mulf %139, %143 : vector<16x16xf32>
    %145 = arith.truncf %144 : vector<16x16xf32> to vector<16x16xbf16>
    %146 = vector.extract_strided_slice %28 {offsets = [0, 80], sizes = [16, 16], strides = [1, 1]} : vector<16x128xf32> to vector<16x16xf32>
    %147 = arith.truncf %146 : vector<16x16xf32> to vector<16x16xbf16>
    %cst_47 = arith.constant dense<0.000000e+00> : vector<16x16xf32>
    %148 = tpu.matmul %145, %147, %cst_47 {dimension_numbers = #tpu.dot_dimension_numbers<[1], [0], [0], [1], [0, 0, 1, 1], [], []>} : vector<16x16xbf16>, vector<16x16xbf16>, vector<16x16xf32> -> vector<16x16xf32>
    %149 = vector.extract_strided_slice %26 {offsets = [0, 96], sizes = [16, 16], strides = [1, 1]} : vector<16x128xf32> to vector<16x16xf32>
    %150 = arith.truncf %149 : vector<16x16xf32> to vector<16x16xbf16>
    %151 = vector.extract_strided_slice %27 {offsets = [0, 96], sizes = [16, 16], strides = [1, 1]} : vector<16x128xf32> to vector<16x16xf32>
    %152 = arith.truncf %151 : vector<16x16xf32> to vector<16x16xbf16>
    %153 = tpu.transpose %152, [1, 0] : vector<16x16xbf16> -> vector<16x16xbf16>
    %cst_48 = arith.constant dense<0.000000e+00> : vector<16x16xf32>
    %154 = tpu.matmul %150, %153, %cst_48 {dimension_numbers = #tpu.dot_dimension_numbers<[1], [0], [0], [1], [0, 0, 1, 1], [], []>} : vector<16x16xbf16>, vector<16x16xbf16>, vector<16x16xf32> -> vector<16x16xf32>
    %cst_49 = arith.constant dense<0xFF800000> : vector<16xf32>
    %155 = vector.multi_reduction <maximumf>, %154, %cst_49 [1] : vector<16x16xf32> to vector<16xf32>
    %156 = vector.shape_cast %155 : vector<16xf32> to vector<16x1xf32>
    %157 = vector.broadcast %156 : vector<16x1xf32> to vector<16x16xf32>
    %158 = arith.subf %154, %157 : vector<16x16xf32>
    %159 = math.exp %158 : vector<16x16xf32>
    %cst_50 = arith.constant dense<0.000000e+00> : vector<16xf32>
    %160 = vector.multi_reduction <add>, %159, %cst_50 [1] : vector<16x16xf32> to vector<16xf32>
    %161 = vector.shape_cast %160 : vector<16xf32> to vector<16x1xf32>
    %162 = tpu.reciprocal %161 {approx = true} : vector<16x1xf32> -> vector<16x1xf32>
    %163 = vector.broadcast %162 : vector<16x1xf32> to vector<16x16xf32>
    %164 = arith.mulf %159, %163 : vector<16x16xf32>
    %165 = arith.truncf %164 : vector<16x16xf32> to vector<16x16xbf16>
    %166 = vector.extract_strided_slice %28 {offsets = [0, 96], sizes = [16, 16], strides = [1, 1]} : vector<16x128xf32> to vector<16x16xf32>
    %167 = arith.truncf %166 : vector<16x16xf32> to vector<16x16xbf16>
    %cst_51 = arith.constant dense<0.000000e+00> : vector<16x16xf32>
    %168 = tpu.matmul %165, %167, %cst_51 {dimension_numbers = #tpu.dot_dimension_numbers<[1], [0], [0], [1], [0, 0, 1, 1], [], []>} : vector<16x16xbf16>, vector<16x16xbf16>, vector<16x16xf32> -> vector<16x16xf32>
    %169 = vector.extract_strided_slice %26 {offsets = [0, 112], sizes = [16, 16], strides = [1, 1]} : vector<16x128xf32> to vector<16x16xf32>
    %170 = arith.truncf %169 : vector<16x16xf32> to vector<16x16xbf16>
    %171 = vector.extract_strided_slice %27 {offsets = [0, 112], sizes = [16, 16], strides = [1, 1]} : vector<16x128xf32> to vector<16x16xf32>
    %172 = arith.truncf %171 : vector<16x16xf32> to vector<16x16xbf16>
    %173 = tpu.transpose %172, [1, 0] : vector<16x16xbf16> -> vector<16x16xbf16>
    %cst_52 = arith.constant dense<0.000000e+00> : vector<16x16xf32>
    %174 = tpu.matmul %170, %173, %cst_52 {dimension_numbers = #tpu.dot_dimension_numbers<[1], [0], [0], [1], [0, 0, 1, 1], [], []>} : vector<16x16xbf16>, vector<16x16xbf16>, vector<16x16xf32> -> vector<16x16xf32>
    %cst_53 = arith.constant dense<0xFF800000> : vector<16xf32>
    %175 = vector.multi_reduction <maximumf>, %174, %cst_53 [1] : vector<16x16xf32> to vector<16xf32>
    %176 = vector.shape_cast %175 : vector<16xf32> to vector<16x1xf32>
    %177 = vector.broadcast %176 : vector<16x1xf32> to vector<16x16xf32>
    %178 = arith.subf %174, %177 : vector<16x16xf32>
    %179 = math.exp %178 : vector<16x16xf32>
    %cst_54 = arith.constant dense<0.000000e+00> : vector<16xf32>
    %180 = vector.multi_reduction <add>, %179, %cst_54 [1] : vector<16x16xf32> to vector<16xf32>
    %181 = vector.shape_cast %180 : vector<16xf32> to vector<16x1xf32>
    %182 = tpu.reciprocal %181 {approx = true} : vector<16x1xf32> -> vector<16x1xf32>
    %183 = vector.broadcast %182 : vector<16x1xf32> to vector<16x16xf32>
    %184 = arith.mulf %179, %183 : vector<16x16xf32>
    %185 = arith.truncf %184 : vector<16x16xf32> to vector<16x16xbf16>
    %186 = vector.extract_strided_slice %28 {offsets = [0, 112], sizes = [16, 16], strides = [1, 1]} : vector<16x128xf32> to vector<16x16xf32>
    %187 = arith.truncf %186 : vector<16x16xf32> to vector<16x16xbf16>
    %cst_55 = arith.constant dense<0.000000e+00> : vector<16x16xf32>
    %188 = tpu.matmul %185, %187, %cst_55 {dimension_numbers = #tpu.dot_dimension_numbers<[1], [0], [0], [1], [0, 0, 1, 1], [], []>} : vector<16x16xbf16>, vector<16x16xbf16>, vector<16x16xf32> -> vector<16x16xf32>
    %189 = tpu.concatenate %48, %68, %88, %108, %128, %148, %168, %188 in 1 : vector<16x16xf32>, vector<16x16xf32>, vector<16x16xf32>, vector<16x16xf32>, vector<16x16xf32>, vector<16x16xf32>, vector<16x16xf32>, vector<16x16xf32> -> vector<16x128xf32>
    %190 = vector.extract_strided_slice %9 {offsets = [16, 0], sizes = [16, 128], strides = [1, 1]} : vector<32x128xf32> to vector<16x128xf32>
    %191 = vector.extract_strided_slice %17 {offsets = [16, 0], sizes = [16, 128], strides = [1, 1]} : vector<32x128xf32> to vector<16x128xf32>
    %192 = vector.extract_strided_slice %25 {offsets = [16, 0], sizes = [16, 128], strides = [1, 1]} : vector<32x128xf32> to vector<16x128xf32>
    %193 = vector.extract_strided_slice %190 {offsets = [0, 0], sizes = [16, 16], strides = [1, 1]} : vector<16x128xf32> to vector<16x16xf32>
    %194 = arith.truncf %193 : vector<16x16xf32> to vector<16x16xbf16>
    %195 = vector.extract_strided_slice %191 {offsets = [0, 0], sizes = [16, 16], strides = [1, 1]} : vector<16x128xf32> to vector<16x16xf32>
    %196 = arith.truncf %195 : vector<16x16xf32> to vector<16x16xbf16>
    %197 = tpu.transpose %196, [1, 0] : vector<16x16xbf16> -> vector<16x16xbf16>
    %cst_56 = arith.constant dense<0.000000e+00> : vector<16x16xf32>
    %198 = tpu.matmul %194, %197, %cst_56 {dimension_numbers = #tpu.dot_dimension_numbers<[1], [0], [0], [1], [0, 0, 1, 1], [], []>} : vector<16x16xbf16>, vector<16x16xbf16>, vector<16x16xf32> -> vector<16x16xf32>
    %cst_57 = arith.constant dense<0xFF800000> : vector<16xf32>
    %199 = vector.multi_reduction <maximumf>, %198, %cst_57 [1] : vector<16x16xf32> to vector<16xf32>
    %200 = vector.shape_cast %199 : vector<16xf32> to vector<16x1xf32>
    %201 = vector.broadcast %200 : vector<16x1xf32> to vector<16x16xf32>
    %202 = arith.subf %198, %201 : vector<16x16xf32>
    %203 = math.exp %202 : vector<16x16xf32>
    %cst_58 = arith.constant dense<0.000000e+00> : vector<16xf32>
    %204 = vector.multi_reduction <add>, %203, %cst_58 [1] : vector<16x16xf32> to vector<16xf32>
    %205 = vector.shape_cast %204 : vector<16xf32> to vector<16x1xf32>
    %206 = tpu.reciprocal %205 {approx = true} : vector<16x1xf32> -> vector<16x1xf32>
    %207 = vector.broadcast %206 : vector<16x1xf32> to vector<16x16xf32>
    %208 = arith.mulf %203, %207 : vector<16x16xf32>
    %209 = arith.truncf %208 : vector<16x16xf32> to vector<16x16xbf16>
    %210 = vector.extract_strided_slice %192 {offsets = [0, 0], sizes = [16, 16], strides = [1, 1]} : vector<16x128xf32> to vector<16x16xf32>
    %211 = arith.truncf %210 : vector<16x16xf32> to vector<16x16xbf16>
    %cst_59 = arith.constant dense<0.000000e+00> : vector<16x16xf32>
    %212 = tpu.matmul %209, %211, %cst_59 {dimension_numbers = #tpu.dot_dimension_numbers<[1], [0], [0], [1], [0, 0, 1, 1], [], []>} : vector<16x16xbf16>, vector<16x16xbf16>, vector<16x16xf32> -> vector<16x16xf32>
    %213 = vector.extract_strided_slice %190 {offsets = [0, 16], sizes = [16, 16], strides = [1, 1]} : vector<16x128xf32> to vector<16x16xf32>
    %214 = arith.truncf %213 : vector<16x16xf32> to vector<16x16xbf16>
    %215 = vector.extract_strided_slice %191 {offsets = [0, 16], sizes = [16, 16], strides = [1, 1]} : vector<16x128xf32> to vector<16x16xf32>
    %216 = arith.truncf %215 : vector<16x16xf32> to vector<16x16xbf16>
    %217 = tpu.transpose %216, [1, 0] : vector<16x16xbf16> -> vector<16x16xbf16>
    %cst_60 = arith.constant dense<0.000000e+00> : vector<16x16xf32>
    %218 = tpu.matmul %214, %217, %cst_60 {dimension_numbers = #tpu.dot_dimension_numbers<[1], [0], [0], [1], [0, 0, 1, 1], [], []>} : vector<16x16xbf16>, vector<16x16xbf16>, vector<16x16xf32> -> vector<16x16xf32>
    %cst_61 = arith.constant dense<0xFF800000> : vector<16xf32>
    %219 = vector.multi_reduction <maximumf>, %218, %cst_61 [1] : vector<16x16xf32> to vector<16xf32>
    %220 = vector.shape_cast %219 : vector<16xf32> to vector<16x1xf32>
    %221 = vector.broadcast %220 : vector<16x1xf32> to vector<16x16xf32>
    %222 = arith.subf %218, %221 : vector<16x16xf32>
    %223 = math.exp %222 : vector<16x16xf32>
    %cst_62 = arith.constant dense<0.000000e+00> : vector<16xf32>
    %224 = vector.multi_reduction <add>, %223, %cst_62 [1] : vector<16x16xf32> to vector<16xf32>
    %225 = vector.shape_cast %224 : vector<16xf32> to vector<16x1xf32>
    %226 = tpu.reciprocal %225 {approx = true} : vector<16x1xf32> -> vector<16x1xf32>
    %227 = vector.broadcast %226 : vector<16x1xf32> to vector<16x16xf32>
    %228 = arith.mulf %223, %227 : vector<16x16xf32>
    %229 = arith.truncf %228 : vector<16x16xf32> to vector<16x16xbf16>
    %230 = vector.extract_strided_slice %192 {offsets = [0, 16], sizes = [16, 16], strides = [1, 1]} : vector<16x128xf32> to vector<16x16xf32>
    %231 = arith.truncf %230 : vector<16x16xf32> to vector<16x16xbf16>
    %cst_63 = arith.constant dense<0.000000e+00> : vector<16x16xf32>
    %232 = tpu.matmul %229, %231, %cst_63 {dimension_numbers = #tpu.dot_dimension_numbers<[1], [0], [0], [1], [0, 0, 1, 1], [], []>} : vector<16x16xbf16>, vector<16x16xbf16>, vector<16x16xf32> -> vector<16x16xf32>
    %233 = vector.extract_strided_slice %190 {offsets = [0, 32], sizes = [16, 16], strides = [1, 1]} : vector<16x128xf32> to vector<16x16xf32>
    %234 = arith.truncf %233 : vector<16x16xf32> to vector<16x16xbf16>
    %235 = vector.extract_strided_slice %191 {offsets = [0, 32], sizes = [16, 16], strides = [1, 1]} : vector<16x128xf32> to vector<16x16xf32>
    %236 = arith.truncf %235 : vector<16x16xf32> to vector<16x16xbf16>
    %237 = tpu.transpose %236, [1, 0] : vector<16x16xbf16> -> vector<16x16xbf16>
    %cst_64 = arith.constant dense<0.000000e+00> : vector<16x16xf32>
    %238 = tpu.matmul %234, %237, %cst_64 {dimension_numbers = #tpu.dot_dimension_numbers<[1], [0], [0], [1], [0, 0, 1, 1], [], []>} : vector<16x16xbf16>, vector<16x16xbf16>, vector<16x16xf32> -> vector<16x16xf32>
    %cst_65 = arith.constant dense<0xFF800000> : vector<16xf32>
    %239 = vector.multi_reduction <maximumf>, %238, %cst_65 [1] : vector<16x16xf32> to vector<16xf32>
    %240 = vector.shape_cast %239 : vector<16xf32> to vector<16x1xf32>
    %241 = vector.broadcast %240 : vector<16x1xf32> to vector<16x16xf32>
    %242 = arith.subf %238, %241 : vector<16x16xf32>
    %243 = math.exp %242 : vector<16x16xf32>
    %cst_66 = arith.constant dense<0.000000e+00> : vector<16xf32>
    %244 = vector.multi_reduction <add>, %243, %cst_66 [1] : vector<16x16xf32> to vector<16xf32>
    %245 = vector.shape_cast %244 : vector<16xf32> to vector<16x1xf32>
    %246 = tpu.reciprocal %245 {approx = true} : vector<16x1xf32> -> vector<16x1xf32>
    %247 = vector.broadcast %246 : vector<16x1xf32> to vector<16x16xf32>
    %248 = arith.mulf %243, %247 : vector<16x16xf32>
    %249 = arith.truncf %248 : vector<16x16xf32> to vector<16x16xbf16>
    %250 = vector.extract_strided_slice %192 {offsets = [0, 32], sizes = [16, 16], strides = [1, 1]} : vector<16x128xf32> to vector<16x16xf32>
    %251 = arith.truncf %250 : vector<16x16xf32> to vector<16x16xbf16>
    %cst_67 = arith.constant dense<0.000000e+00> : vector<16x16xf32>
    %252 = tpu.matmul %249, %251, %cst_67 {dimension_numbers = #tpu.dot_dimension_numbers<[1], [0], [0], [1], [0, 0, 1, 1], [], []>} : vector<16x16xbf16>, vector<16x16xbf16>, vector<16x16xf32> -> vector<16x16xf32>
    %253 = vector.extract_strided_slice %190 {offsets = [0, 48], sizes = [16, 16], strides = [1, 1]} : vector<16x128xf32> to vector<16x16xf32>
    %254 = arith.truncf %253 : vector<16x16xf32> to vector<16x16xbf16>
    %255 = vector.extract_strided_slice %191 {offsets = [0, 48], sizes = [16, 16], strides = [1, 1]} : vector<16x128xf32> to vector<16x16xf32>
    %256 = arith.truncf %255 : vector<16x16xf32> to vector<16x16xbf16>
    %257 = tpu.transpose %256, [1, 0] : vector<16x16xbf16> -> vector<16x16xbf16>
    %cst_68 = arith.constant dense<0.000000e+00> : vector<16x16xf32>
    %258 = tpu.matmul %254, %257, %cst_68 {dimension_numbers = #tpu.dot_dimension_numbers<[1], [0], [0], [1], [0, 0, 1, 1], [], []>} : vector<16x16xbf16>, vector<16x16xbf16>, vector<16x16xf32> -> vector<16x16xf32>
    %cst_69 = arith.constant dense<0xFF800000> : vector<16xf32>
    %259 = vector.multi_reduction <maximumf>, %258, %cst_69 [1] : vector<16x16xf32> to vector<16xf32>
    %260 = vector.shape_cast %259 : vector<16xf32> to vector<16x1xf32>
    %261 = vector.broadcast %260 : vector<16x1xf32> to vector<16x16xf32>
    %262 = arith.subf %258, %261 : vector<16x16xf32>
    %263 = math.exp %262 : vector<16x16xf32>
    %cst_70 = arith.constant dense<0.000000e+00> : vector<16xf32>
    %264 = vector.multi_reduction <add>, %263, %cst_70 [1] : vector<16x16xf32> to vector<16xf32>
    %265 = vector.shape_cast %264 : vector<16xf32> to vector<16x1xf32>
    %266 = tpu.reciprocal %265 {approx = true} : vector<16x1xf32> -> vector<16x1xf32>
    %267 = vector.broadcast %266 : vector<16x1xf32> to vector<16x16xf32>
    %268 = arith.mulf %263, %267 : vector<16x16xf32>
    %269 = arith.truncf %268 : vector<16x16xf32> to vector<16x16xbf16>
    %270 = vector.extract_strided_slice %192 {offsets = [0, 48], sizes = [16, 16], strides = [1, 1]} : vector<16x128xf32> to vector<16x16xf32>
    %271 = arith.truncf %270 : vector<16x16xf32> to vector<16x16xbf16>
    %cst_71 = arith.constant dense<0.000000e+00> : vector<16x16xf32>
    %272 = tpu.matmul %269, %271, %cst_71 {dimension_numbers = #tpu.dot_dimension_numbers<[1], [0], [0], [1], [0, 0, 1, 1], [], []>} : vector<16x16xbf16>, vector<16x16xbf16>, vector<16x16xf32> -> vector<16x16xf32>
    %273 = vector.extract_strided_slice %190 {offsets = [0, 64], sizes = [16, 16], strides = [1, 1]} : vector<16x128xf32> to vector<16x16xf32>
    %274 = arith.truncf %273 : vector<16x16xf32> to vector<16x16xbf16>
    %275 = vector.extract_strided_slice %191 {offsets = [0, 64], sizes = [16, 16], strides = [1, 1]} : vector<16x128xf32> to vector<16x16xf32>
    %276 = arith.truncf %275 : vector<16x16xf32> to vector<16x16xbf16>
    %277 = tpu.transpose %276, [1, 0] : vector<16x16xbf16> -> vector<16x16xbf16>
    %cst_72 = arith.constant dense<0.000000e+00> : vector<16x16xf32>
    %278 = tpu.matmul %274, %277, %cst_72 {dimension_numbers = #tpu.dot_dimension_numbers<[1], [0], [0], [1], [0, 0, 1, 1], [], []>} : vector<16x16xbf16>, vector<16x16xbf16>, vector<16x16xf32> -> vector<16x16xf32>
    %cst_73 = arith.constant dense<0xFF800000> : vector<16xf32>
    %279 = vector.multi_reduction <maximumf>, %278, %cst_73 [1] : vector<16x16xf32> to vector<16xf32>
    %280 = vector.shape_cast %279 : vector<16xf32> to vector<16x1xf32>
    %281 = vector.broadcast %280 : vector<16x1xf32> to vector<16x16xf32>
    %282 = arith.subf %278, %281 : vector<16x16xf32>
    %283 = math.exp %282 : vector<16x16xf32>
    %cst_74 = arith.constant dense<0.000000e+00> : vector<16xf32>
    %284 = vector.multi_reduction <add>, %283, %cst_74 [1] : vector<16x16xf32> to vector<16xf32>
    %285 = vector.shape_cast %284 : vector<16xf32> to vector<16x1xf32>
    %286 = tpu.reciprocal %285 {approx = true} : vector<16x1xf32> -> vector<16x1xf32>
    %287 = vector.broadcast %286 : vector<16x1xf32> to vector<16x16xf32>
    %288 = arith.mulf %283, %287 : vector<16x16xf32>
    %289 = arith.truncf %288 : vector<16x16xf32> to vector<16x16xbf16>
    %290 = vector.extract_strided_slice %192 {offsets = [0, 64], sizes = [16, 16], strides = [1, 1]} : vector<16x128xf32> to vector<16x16xf32>
    %291 = arith.truncf %290 : vector<16x16xf32> to vector<16x16xbf16>
    %cst_75 = arith.constant dense<0.000000e+00> : vector<16x16xf32>
    %292 = tpu.matmul %289, %291, %cst_75 {dimension_numbers = #tpu.dot_dimension_numbers<[1], [0], [0], [1], [0, 0, 1, 1], [], []>} : vector<16x16xbf16>, vector<16x16xbf16>, vector<16x16xf32> -> vector<16x16xf32>
    %293 = vector.extract_strided_slice %190 {offsets = [0, 80], sizes = [16, 16], strides = [1, 1]} : vector<16x128xf32> to vector<16x16xf32>
    %294 = arith.truncf %293 : vector<16x16xf32> to vector<16x16xbf16>
    %295 = vector.extract_strided_slice %191 {offsets = [0, 80], sizes = [16, 16], strides = [1, 1]} : vector<16x128xf32> to vector<16x16xf32>
    %296 = arith.truncf %295 : vector<16x16xf32> to vector<16x16xbf16>
    %297 = tpu.transpose %296, [1, 0] : vector<16x16xbf16> -> vector<16x16xbf16>
    %cst_76 = arith.constant dense<0.000000e+00> : vector<16x16xf32>
    %298 = tpu.matmul %294, %297, %cst_76 {dimension_numbers = #tpu.dot_dimension_numbers<[1], [0], [0], [1], [0, 0, 1, 1], [], []>} : vector<16x16xbf16>, vector<16x16xbf16>, vector<16x16xf32> -> vector<16x16xf32>
    %cst_77 = arith.constant dense<0xFF800000> : vector<16xf32>
    %299 = vector.multi_reduction <maximumf>, %298, %cst_77 [1] : vector<16x16xf32> to vector<16xf32>
    %300 = vector.shape_cast %299 : vector<16xf32> to vector<16x1xf32>
    %301 = vector.broadcast %300 : vector<16x1xf32> to vector<16x16xf32>
    %302 = arith.subf %298, %301 : vector<16x16xf32>
    %303 = math.exp %302 : vector<16x16xf32>
    %cst_78 = arith.constant dense<0.000000e+00> : vector<16xf32>
    %304 = vector.multi_reduction <add>, %303, %cst_78 [1] : vector<16x16xf32> to vector<16xf32>
    %305 = vector.shape_cast %304 : vector<16xf32> to vector<16x1xf32>
    %306 = tpu.reciprocal %305 {approx = true} : vector<16x1xf32> -> vector<16x1xf32>
    %307 = vector.broadcast %306 : vector<16x1xf32> to vector<16x16xf32>
    %308 = arith.mulf %303, %307 : vector<16x16xf32>
    %309 = arith.truncf %308 : vector<16x16xf32> to vector<16x16xbf16>
    %310 = vector.extract_strided_slice %192 {offsets = [0, 80], sizes = [16, 16], strides = [1, 1]} : vector<16x128xf32> to vector<16x16xf32>
    %311 = arith.truncf %310 : vector<16x16xf32> to vector<16x16xbf16>
    %cst_79 = arith.constant dense<0.000000e+00> : vector<16x16xf32>
    %312 = tpu.matmul %309, %311, %cst_79 {dimension_numbers = #tpu.dot_dimension_numbers<[1], [0], [0], [1], [0, 0, 1, 1], [], []>} : vector<16x16xbf16>, vector<16x16xbf16>, vector<16x16xf32> -> vector<16x16xf32>
    %313 = vector.extract_strided_slice %190 {offsets = [0, 96], sizes = [16, 16], strides = [1, 1]} : vector<16x128xf32> to vector<16x16xf32>
    %314 = arith.truncf %313 : vector<16x16xf32> to vector<16x16xbf16>
    %315 = vector.extract_strided_slice %191 {offsets = [0, 96], sizes = [16, 16], strides = [1, 1]} : vector<16x128xf32> to vector<16x16xf32>
    %316 = arith.truncf %315 : vector<16x16xf32> to vector<16x16xbf16>
    %317 = tpu.transpose %316, [1, 0] : vector<16x16xbf16> -> vector<16x16xbf16>
    %cst_80 = arith.constant dense<0.000000e+00> : vector<16x16xf32>
    %318 = tpu.matmul %314, %317, %cst_80 {dimension_numbers = #tpu.dot_dimension_numbers<[1], [0], [0], [1], [0, 0, 1, 1], [], []>} : vector<16x16xbf16>, vector<16x16xbf16>, vector<16x16xf32> -> vector<16x16xf32>
    %cst_81 = arith.constant dense<0xFF800000> : vector<16xf32>
    %319 = vector.multi_reduction <maximumf>, %318, %cst_81 [1] : vector<16x16xf32> to vector<16xf32>
    %320 = vector.shape_cast %319 : vector<16xf32> to vector<16x1xf32>
    %321 = vector.broadcast %320 : vector<16x1xf32> to vector<16x16xf32>
    %322 = arith.subf %318, %321 : vector<16x16xf32>
    %323 = math.exp %322 : vector<16x16xf32>
    %cst_82 = arith.constant dense<0.000000e+00> : vector<16xf32>
    %324 = vector.multi_reduction <add>, %323, %cst_82 [1] : vector<16x16xf32> to vector<16xf32>
    %325 = vector.shape_cast %324 : vector<16xf32> to vector<16x1xf32>
    %326 = tpu.reciprocal %325 {approx = true} : vector<16x1xf32> -> vector<16x1xf32>
    %327 = vector.broadcast %326 : vector<16x1xf32> to vector<16x16xf32>
    %328 = arith.mulf %323, %327 : vector<16x16xf32>
    %329 = arith.truncf %328 : vector<16x16xf32> to vector<16x16xbf16>
    %330 = vector.extract_strided_slice %192 {offsets = [0, 96], sizes = [16, 16], strides = [1, 1]} : vector<16x128xf32> to vector<16x16xf32>
    %331 = arith.truncf %330 : vector<16x16xf32> to vector<16x16xbf16>
    %cst_83 = arith.constant dense<0.000000e+00> : vector<16x16xf32>
    %332 = tpu.matmul %329, %331, %cst_83 {dimension_numbers = #tpu.dot_dimension_numbers<[1], [0], [0], [1], [0, 0, 1, 1], [], []>} : vector<16x16xbf16>, vector<16x16xbf16>, vector<16x16xf32> -> vector<16x16xf32>
    %333 = vector.extract_strided_slice %190 {offsets = [0, 112], sizes = [16, 16], strides = [1, 1]} : vector<16x128xf32> to vector<16x16xf32>
    %334 = arith.truncf %333 : vector<16x16xf32> to vector<16x16xbf16>
    %335 = vector.extract_strided_slice %191 {offsets = [0, 112], sizes = [16, 16], strides = [1, 1]} : vector<16x128xf32> to vector<16x16xf32>
    %336 = arith.truncf %335 : vector<16x16xf32> to vector<16x16xbf16>
    %337 = tpu.transpose %336, [1, 0] : vector<16x16xbf16> -> vector<16x16xbf16>
    %cst_84 = arith.constant dense<0.000000e+00> : vector<16x16xf32>
    %338 = tpu.matmul %334, %337, %cst_84 {dimension_numbers = #tpu.dot_dimension_numbers<[1], [0], [0], [1], [0, 0, 1, 1], [], []>} : vector<16x16xbf16>, vector<16x16xbf16>, vector<16x16xf32> -> vector<16x16xf32>
    %cst_85 = arith.constant dense<0xFF800000> : vector<16xf32>
    %339 = vector.multi_reduction <maximumf>, %338, %cst_85 [1] : vector<16x16xf32> to vector<16xf32>
    %340 = vector.shape_cast %339 : vector<16xf32> to vector<16x1xf32>
    %341 = vector.broadcast %340 : vector<16x1xf32> to vector<16x16xf32>
    %342 = arith.subf %338, %341 : vector<16x16xf32>
    %343 = math.exp %342 : vector<16x16xf32>
    %cst_86 = arith.constant dense<0.000000e+00> : vector<16xf32>
    %344 = vector.multi_reduction <add>, %343, %cst_86 [1] : vector<16x16xf32> to vector<16xf32>
    %345 = vector.shape_cast %344 : vector<16xf32> to vector<16x1xf32>
    %346 = tpu.reciprocal %345 {approx = true} : vector<16x1xf32> -> vector<16x1xf32>
    %347 = vector.broadcast %346 : vector<16x1xf32> to vector<16x16xf32>
    %348 = arith.mulf %343, %347 : vector<16x16xf32>
    %349 = arith.truncf %348 : vector<16x16xf32> to vector<16x16xbf16>
    %350 = vector.extract_strided_slice %192 {offsets = [0, 112], sizes = [16, 16], strides = [1, 1]} : vector<16x128xf32> to vector<16x16xf32>
    %351 = arith.truncf %350 : vector<16x16xf32> to vector<16x16xbf16>
    %cst_87 = arith.constant dense<0.000000e+00> : vector<16x16xf32>
    %352 = tpu.matmul %349, %351, %cst_87 {dimension_numbers = #tpu.dot_dimension_numbers<[1], [0], [0], [1], [0, 0, 1, 1], [], []>} : vector<16x16xbf16>, vector<16x16xbf16>, vector<16x16xf32> -> vector<16x16xf32>
    %353 = tpu.concatenate %212, %232, %252, %272, %292, %312, %332, %352 in 1 : vector<16x16xf32>, vector<16x16xf32>, vector<16x16xf32>, vector<16x16xf32>, vector<16x16xf32>, vector<16x16xf32>, vector<16x16xf32>, vector<16x16xf32> -> vector<16x128xf32>
    %354 = tpu.concatenate %189, %353 in 0 : vector<16x128xf32>, vector<16x128xf32> -> vector<32x128xf32>
    %355 = arith.truncf %354 : vector<32x128xf32> to vector<32x128xbf16>
    %c3 = arith.constant 3 : index
    %c0_88 = arith.constant 0 : index
    %c0_89 = arith.constant 0 : index
    %356 = vector.load %arg4[%c3, %c0_88, %c0_89] : memref<4x128x128xbf16, #tpu.memory_space<vmem>>, vector<1x128x128xbf16>
    %357 = vector.shape_cast %356 : vector<1x128x128xbf16> to vector<128x128xbf16>
    %cst_90 = arith.constant dense<0.000000e+00> : vector<32x128xf32>
    %358 = tpu.matmul %355, %357, %cst_90 {dimension_numbers = #tpu.dot_dimension_numbers<[1], [0], [0], [1], [0, 0, 1, 1], [], []>} : vector<32x128xbf16>, vector<128x128xbf16>, vector<32x128xf32> -> vector<32x128xf32>
    %c3_91 = arith.constant 3 : index
    %c0_92 = arith.constant 0 : index
    %c0_93 = arith.constant 0 : index
    %359 = vector.load %arg5[%c3_91, %c0_92, %c0_93] : memref<4x1x128xf32, #tpu.memory_space<vmem>>, vector<1x1x128xf32>
    %360 = vector.shape_cast %359 : vector<1x1x128xf32> to vector<1x128xf32>
    %361 = vector.broadcast %360 : vector<1x128xf32> to vector<32x128xf32>
    %362 = arith.addf %358, %361 : vector<32x128xf32>
    %c0_94 = arith.constant 0 : index
    %c0_95 = arith.constant 0 : index
    %363 = vector.load %arg6[%c0_94, %c0_95] : memref<32x128xf32, #tpu.memory_space<vmem>>, vector<32x128xf32>
    tpu.vector_store %arg6[%c0_94, %c0_95], %362 {strides = array<i32>} : memref<32x128xf32, #tpu.memory_space<vmem>>, vector<32x128xf32>,
    return
  }
  func.func @transform_0(%arg0: i32) -> (i32, i32) {
    %c0_i32 = arith.constant 0 : i32
    %c0_i32_0 = arith.constant 0 : i32
    return %arg0, %c0_i32 : i32, i32
  }
  func.func @transform_1(%arg0: i32) -> (i32, i32) {
    %c0_i32 = arith.constant 0 : i32
    %c0_i32_0 = arith.constant 0 : i32
    return %arg0, %c0_i32 : i32, i32
  }
  func.func @transform_2(%arg0: i32) -> (i32, i32) {
    %c0_i32 = arith.constant 0 : i32
    %c0_i32_0 = arith.constant 0 : i32
    return %arg0, %c0_i32 : i32, i32
  }
  func.func @transform_3(%arg0: i32) -> (i32, i32, i32) {
    %c0_i32 = arith.constant 0 : i32
    %c0_i32_0 = arith.constant 0 : i32
    %c0_i32_1 = arith.constant 0 : i32
    %c0_i32_2 = arith.constant 0 : i32
    return %c0_i32, %c0_i32_0, %c0_i32_1 : i32, i32, i32
  }
  func.func @transform_4(%arg0: i32) -> (i32, i32, i32) {
    %c0_i32 = arith.constant 0 : i32
    %c0_i32_0 = arith.constant 0 : i32
    %c0_i32_1 = arith.constant 0 : i32
    %c0_i32_2 = arith.constant 0 : i32
    return %c0_i32, %c0_i32_0, %c0_i32_1 : i32, i32, i32
  }
  func.func @transform_5(%arg0: i32) -> (i32, i32) {
    %c0_i32 = arith.constant 0 : i32
    %c0_i32_0 = arith.constant 0 : i32
    return %arg0, %c0_i32 : i32, i32
  }
}

</mosaic_0001>

<bundles_post_ra>
// kernel: tpu_custom_call.1
= control target key start
LH: loop header
LB: loop body
LE: loop exit
PB: predicated region body
PF: predicated region fallthrough
CT: control target
= control target key end

     0   :  { %s11328_s0 = inlined_call_operand.hbm [shape: bf16[64,128], index: 0, kind: input, shape index: {}]   ;;  %s11329_s1 = inlined_call_operand.hbm [shape: bf16[64,128], index: 1, kind: input, shape index: {}]   ;;  %s11330_s2 = inlined_call_operand.hbm [shape: bf16[64,128], index: 2, kind: input, shape index: {}]   ;;  %s11331_s3 = inlined_call_operand.hbm [shape: bf16[4,128,128], index: 3, kind: input, shape index: {}]   ;;  %s11332_s4 = inlined_call_operand.vmem [shape: f32[4,1,128], index: 4, kind: input, shape index: {}]   ;;  %s11333_s5 = inlined_call_operand.hbm [shape: f32[64,128], index: 5, kind: output, shape index: {}]  }
   0x1   :  { %11366 = sst [smem:[#allocation29_spill]] %s11328_s0 }
   0x2   :  { %11367 = sst [smem:[#allocation30_spill]] %s11329_s1 }
   0x3   :  { %10 = vsyncpa [#allocation3], 0 }
   0x4   :  { %12 = vsyncpa [#allocation3 + $0x1], 0 }
   0x5   :  { %13 = vsyncpa [#allocation6], 0 }
   0x6   :  { %15 = vsyncpa [#allocation6 + $0x1], 0 }
   0x7   :  { %16 = vsyncpa [#allocation9], 0 }
   0x8   :  { %17 = vsyncpa [#allocation4], 0 }
   0x9   :  { %19 = vsyncpa [#allocation4 + $0x1], 0  ;;  %s8831_s18 = smov 0   ;;  %s8833_s19 = smov 0  }
   0xa   :  { %s8835_s20 = smov 0   ;;  %s8837_s21 = smov 0  }
   0xb LB: > { %11368 = sst [smem:[#allocation15_spill]] %s8767_s18  ;;  %s8852_s22 = sadd.s32 1, %s8779_s21   ;;  %s8779_s21 = sphi %s8837_s21, %s11454_s21   ;;  %s8775_s20 = sphi %s8835_s20, %s11456_s20   ;;  %s8771_s19 = sphi %s8833_s19, %s11458_s19   ;;  %s8767_s18 = sphi %s8831_s18, %s11457_s18  }
   0xc   : > { %11369 = sst [smem:[#allocation16_spill]] %s8775_s20  ;;  %s32_s23 = sadd.s32 1, %s8775_s20 }
   0xd   : > { %11370 = sst [smem:[#allocation17_spill]] %s8779_s21  ;;  %s29_s24 = ssub.s32 %s8779_s21, %s8852_s22 }
   0xe   : > { %11371 = sst [smem:[#allocation18_spill]] %s8852_s22  ;;  %p11334_p0 = scmp.ne.s32.totalorder %s8775_s20, %s8771_s19 }
   0xf   : > { %p30_p1 = scmp.eq.s32.totalorder %s29_s24, 0  ;;  %p40_p2 = scmp.eq.s32.totalorder %s8779_s21, 0 }
  0x10   : > { %p8299_p5 = scmp.lt.s32.totalorder %s8779_s21, 2  ;;  %s205_s26 = sand.u32 1, %s8775_s20  }
  0x11   : > { %s8861_s25 = scalar_select %p30_p1, %s8775_s20, %s32_s23  }
  0x12   : > { %p41_p3 = por %p40_p2, %p11334_p0  ;;  %s8871_s27 = sshll.u32 %s205_s26, 4 }
  0x13   : > { %11372 = sst [smem:[#allocation19_spill]] %s8861_s25  ;;  %s8874_s28 = sshll.u32 %s8779_s21, 8 }
  0x14   : > { %p8876_p6 = pnand %p8299_p5, %p41_p3  ;;  %s226_s30 = sand.u32 1, %s8779_s21  }
  0x15   : > { %s11374_s1 = sld [smem:[#allocation30_spill]]  ;;  %s230_s9 = scalar_lea.vmem [#allocation5], %s8871_s27 }
  0x16   : > { %s11373_s29 = scalar_select %p8876_p6, 1, 0 }
  0x17   : > { %s237_s10 = sshll.u32 %s230_s9, 4  ;;  %s8890_s11 = scalar_lea.sflag [#allocation6], %s226_s30  ;;  %s8888_s10 = int_to_ptr.vmem [resolvable:$true] %s237_s10 }
  0x18   : > { %p8896_p8 = pneg %p8876_p6 }
  0x1a   : > { %s11375_s13 = scalar_select %p8896_p8, 1, 0 }
  0x1b   : > { %s8885_s8 = scalar_lea.hbm %s11374_s1, %s8874_s28  ;;  %s8592_s16 = scalar_lea.hbm %s11374_s1, 512 }
  0x1c   : > { %s8587_s12 = scalar_lea.hbm %s8885_s8, 256  ;;  %p8593_p11 = scmp.lt.u32.totalorder %s8885_s8, %s11374_s1 }
  0x1d   : > { %p8588_p7 = scmp.ne.s32.totalorder %s8885_s8, %s8587_s12  ;;  %p8594_p12 = scmp.lt.u32.totalorder %s8592_s16, %s8587_s12 }
  0x1e   : > { %p8596_p1 = scmp.lt.u32.totalorder %s8587_s12, %s8885_s8 }
  0x1f   : > { %p8590_p9 = pnand %p8896_p8, %p8588_p7  ;;  %p8595_p13 = por %p8594_p12, %p8593_p11 }
  0x21   : > { %p8591_p10 = pneg %p8590_p9  ;;  %p8597_p2 = por %p8596_p1, %p8595_p13 }
  0x23   : > { %p8598_p3 = pnand %p8597_p2, %p8591_p10 }
  0x25   : > { %8601 = shalt.err (!%p8598_p3)
}
  0x26   : > { %s8602_s24 = scalar_lea.vmem %s8888_s10, 256  ;;  %s8781_s30 = smov [#allocation5]  }
  0x27   : > { %p8603_p5 = scmp.ne.s32.totalorder %s8888_s10, %s8602_s24  ;;  %s8607_s6 = sshll.u32 %s8781_s30, 4  ;;  %s8608_s6 = int_to_ptr.vmem [resolvable:$false] %s8607_s6 }
  0x28   : > { %s8609_s7 = scalar_lea.vmem %s8608_s6, 512  ;;  %p8610_p4 = scmp.lt.s32.totalorder %s8888_s10, %s8608_s6 }
  0x29   : > { %p8605_p7 = pnand %p8603_p5, %p8896_p8  ;;  %p8611_p0 = scmp.lt.s32.totalorder %s8609_s7, %s8602_s24 }
  0x2b   : > { %p8606_p9 = pneg %p8605_p7  ;;  %p8612_p11 = por %p8611_p0, %p8610_p4 }
  0x2d   : > { %p8613_p12 = pnand %p8612_p11, %p8606_p9 }
  0x2f   : > { %8616 = shalt.err (!%p8613_p12)
}
  0x30   : > { %s11335_s9 = smov 64   ;;  %s11337_s12 = smov 4  }
  0x31   : > { %8290 = dma.hbm_to_vmem [thread:$0]  (!%p8876_p6), %s8885_s8, 256, %s8888_s10, %s8890_s11, %s11335_s9, %s11335_s9, %s11337_s12  }
  0x32   : > { %s8924_s14 = sadd.s32 4294967295, %s8779_s21   ;;  %s7659_s15 = sadd.s32 4294967294, %s8779_s21  }
  0x33   : > { %p45_p0 = scmp.ne.s32.totalorder %s8771_s19, %s8767_s18  ;;  %p11341_p4 = scmp.eq.s32.totalorder %s8924_s14, 0 }
  0x34   : > { %p163_p10 = scmp.eq.s32.totalorder %s8924_s14, 1  ;;  %p169_p13 = scmp.eq.s32.totalorder %s7659_s15, 1 }
  0x35   : > { %p8933_p1 = por %p11341_p4, %p45_p0  ;;  %p7660_p2 = scmp.ge.s32.totalorder %s8779_s21, 1 }
  0x36   : > { %p11377_p3 = scmp.ne.s32.totalorder %s8775_s20, %s8771_s19  ;;  %p8945_p7 = por %p169_p13, %p45_p0 }
  0x37   : > { %s11376_s16 = scalar_select %p8933_p1, 1, 0 }
  0x38   : > { %p8941_p5 = por %p163_p10, %p11377_p3  ;;  %p176_p9 = scmp.lt.s32.totalorder %s8779_s21, 3 }
  0x39   : > { %s11379_s10 = scalar_select %p8945_p7, 1, 0 }
  0x3a   : > { %s11378_s8 = scalar_select %p8941_p5, 1, 0 }
  0x3b   : > { %11380 = sst [smem:[#allocation20_spill]] %s11379_s10  ;;  %p8950_p11 = pnand %p7660_p2, %p176_p9 }
  0x3c   : > { %s8784_s23 = smov [#allocation8]   ;;  %s11382_s0 = sld [smem:[#allocation29_spill]] }
  0x3d   : > { %s11381_s17 = scalar_select %p8950_p11, 1, 0 }
  0x3e   : > { %s188_s24 = sshll.u32 %s8784_s23, 4  ;;  %p8280_p12 = pneg %p8950_p11  ;;  %s8954_s24 = int_to_ptr.vmem [resolvable:$true] %s188_s24 }
  0x3f   : > { %s209_s15 = scalar_lea.vmem [#allocation2], %s8871_s27  ;;  %s8975_s23 = scalar_lea.sflag [#allocation3], %s205_s26 }
  0x40   : > { %s216_s9 = sshll.u32 %s209_s15, 4  ;;  %p8967_p0 = pnand %p8280_p12, %p11341_p4  ;;  %s8971_s9 = int_to_ptr.vmem [resolvable:$true] %s216_s9 }
  0x42   : > { %s8962_s7 = scalar_lea.hbm %s11382_s0, %s8874_s28  ;;  %s8622_s25 = scalar_lea.hbm %s11382_s0, 512 }
  0x43   : > { %s11383_s12 = scalar_select %p8967_p0, 1, 0 }
  0x44   : > { %s8617_s1 = scalar_lea.hbm %s8962_s7, 256  ;;  %p8623_p3 = scmp.lt.u32.totalorder %s8962_s7, %s11382_s0 }
  0x45   : > { %p8618_p10 = scmp.ne.s32.totalorder %s8962_s7, %s8617_s1  ;;  %p8624_p9 = scmp.lt.u32.totalorder %s8622_s25, %s8617_s1 }
  0x46   : > { %p8626_p4 = scmp.lt.u32.totalorder %s8617_s1, %s8962_s7 }
  0x47   : > { %p8620_p13 = pnand %p8618_p10, %p8896_p8  ;;  %p8625_p12 = por %p8624_p9, %p8623_p3 }
  0x49   : > { %p8621_p2 = pneg %p8620_p13  ;;  %p8627_p7 = por %p8626_p4, %p8625_p12 }
  0x4b   : > { %p8628_p5 = pnand %p8627_p7, %p8621_p2 }
  0x4d   : > { %8631 = shalt.err (!%p8628_p5)
}
  0x4e   : > { %s8632_s26 = scalar_lea.vmem %s8971_s9, 256  ;;  %s8785_s30 = smov [#allocation2]  }
  0x4f   : > { %p8633_p10 = scmp.ne.s32.totalorder %s8971_s9, %s8632_s26  ;;  %s8637_s6 = sshll.u32 %s8785_s30, 4  ;;  %s8638_s6 = int_to_ptr.vmem [resolvable:$false] %s8637_s6 }
  0x50   : > { %s8639_s22 = scalar_lea.vmem %s8638_s6, 512  ;;  %p8640_p11 = scmp.lt.s32.totalorder %s8971_s9, %s8638_s6 }
  0x51   : > { %p8635_p13 = pnand %p8633_p10, %p8896_p8  ;;  %p8641_p0 = scmp.lt.s32.totalorder %s8639_s22, %s8632_s26 }
  0x53   : > { %p8636_p1 = pneg %p8635_p13  ;;  %p8642_p3 = por %p8641_p0, %p8640_p11 }
  0x55   : > { %p8643_p9 = pnand %p8642_p3, %p8636_p1 }
  0x57   : > { %8646 = shalt.err (!%p8643_p9)
}
  0x58   : > { %s11384_s1 = smov 4   ;;  %s11385_s25 = smov 64  }
  0x59   : > { %8287 = dma.hbm_to_vmem [thread:$0]  (!%p8876_p6), %s8962_s7, 256, %s8971_s9, %s8975_s23, %s11385_s25, %s11385_s25, %s11384_s1  }
  0x5a   : > { %s9006_s0 = scalar_lea.hbm %s11330_s2, %s8874_s28  ;;  %s8647_s22 = scalar_lea.hbm %s11331_s3, 4096 }
  0x5b   : > { %p8648_p4 = scmp.ne.s32.totalorder %s11331_s3, %s8647_s22  ;;  %p11386_p1 = scmp.ne.s32.totalorder %s11383_s12, 0 }
  0x5c   : > { %p8654_p0 = scmp.lt.u32.totalorder %s8647_s22, %s11331_s3 }
  0x5d   : > { %p8649_p5 = pneg %p11386_p1 }
  0x5f   : > { %p8650_p7 = pnand %p8649_p5, %p8648_p4 }
  0x61   : > { %p8651_p11 = pneg %p8650_p7 }
  0x63   : > { %p8656_p2 = pnand %p8654_p0, %p8651_p11 }
  0x65   : > { %8659 = shalt.err (!%p8656_p2)
}
  0x66   : > { %s8660_s28 = scalar_lea.vmem %s8954_s24, 4096  ;;  %p8668_p3 = scmp.lt.s32.totalorder %s8954_s24, %s8954_s24 }
  0x67   : > { %p8661_p12 = scmp.ne.s32.totalorder %s8954_s24, %s8660_s28  ;;  %p8669_p9 = scmp.lt.s32.totalorder %s8660_s28, %s8660_s28 }
  0x69   : > { %p8663_p10 = pnand %p8661_p12, %p8649_p5  ;;  %p8670_p6 = por %p8669_p9, %p8668_p3 }
  0x6b   : > { %p8664_p13 = pneg %p8663_p10 }
  0x6d   : > { %p8671_p8 = pnand %p8670_p6, %p8664_p13 }
  0x6f   : > { %8674 = shalt.err (!%p8671_p8)
}
  0x70   : > { %8283 = dma.hbm_to_vmem [thread:$0]  (!%p11386_p1), %s11331_s3, 4096, %s8954_s24, [#allocation9], %s11385_s25, %s11385_s25, %s11384_s1  }
  0x71   : > { %s251_s21 = scalar_lea.vmem [#allocation7], %s8871_s27  ;;  %s8675_s10 = scalar_lea.hbm %s9006_s0, 256 }
  0x72   : > { %s258_s9 = sshll.u32 %s251_s21, 4  ;;  %p8676_p6 = scmp.ne.s32.totalorder %s9006_s0, %s8675_s10  ;;  %s9033_s9 = int_to_ptr.vmem [resolvable:$true] %s258_s9 }
  0x73   : > { %p11387_p8 = scmp.ne.s32.totalorder %s11375_s13, 0  ;;  %s8680_s23 = scalar_lea.hbm %s11330_s2, 512 }
  0x74   : > { %p8681_p7 = scmp.lt.u32.totalorder %s9006_s0, %s11330_s2  ;;  %p8682_p11 = scmp.lt.u32.totalorder %s8680_s23, %s8675_s10 }
  0x75   : > { %p8678_p4 = pnand %p8676_p6, %p11387_p8  ;;  %p8684_p1 = scmp.lt.u32.totalorder %s8675_s10, %s9006_s0 }
  0x76   : > { %p8683_p0 = por %p8682_p11, %p8681_p7 }
  0x77   : > { %p8679_p5 = pneg %p8678_p4 }
  0x78   : > { %p8685_p2 = por %p8684_p1, %p8683_p0 }
  0x7a   : > { %p8686_p12 = pnand %p8685_p2, %p8679_p5 }
  0x7c   : > { %8689 = shalt.err (!%p8686_p12)
}
  0x7d   : > { %s8690_s27 = scalar_lea.vmem %s9033_s9, 256  ;;  %s8786_s24 = smov [#allocation7]  }
  0x7e   : > { %p8691_p10 = scmp.ne.s32.totalorder %s9033_s9, %s8690_s27  ;;  %s8695_s26 = sshll.u32 %s8786_s24, 4  ;;  %s8696_s26 = int_to_ptr.vmem [resolvable:$false] %s8695_s26 }
  0x7f   : > { %s8697_s6 = scalar_lea.vmem %s8696_s26, 512  ;;  %p8698_p9 = scmp.lt.s32.totalorder %s9033_s9, %s8696_s26 }
  0x80   : > { %p8693_p13 = pnand %p8691_p10, %p11387_p8  ;;  %p8699_p6 = scmp.lt.s32.totalorder %s8697_s6, %s8690_s27 }
  0x82   : > { %p8694_p3 = pneg %p8693_p13  ;;  %p8700_p4 = por %p8699_p6, %p8698_p9 }
  0x84   : > { %p8701_p7 = pnand %p8700_p4, %p8694_p3 }
  0x86   : > { %8704 = shalt.err (!%p8701_p7)
}
  0x87   : > { %p11388_p5 = scmp.ne.s32.totalorder %s11373_s29, 0  ;;  %p11389_p8 = scmp.ne.s32.totalorder %s11381_s17, 0 }
  0x89   : > { %8293 = dma.hbm_to_vmem [thread:$0]  (!%p11388_p5), %s9006_s0, 256, %s9033_s9, %s8890_s11, %s11385_s25, %s11385_s25, %s11384_s1  }
  0x8a   : > { %270 = sbr.rel (%p11389_p8) target bundleno = 1961 (0x7a9), region = 40 }
  0x91   : > { %s9063_s13 = sand.u32 1, %s8771_s19   ;;  %p11390_p11 = scmp.ne.s32.totalorder %s11376_s16, 0 }
  0x92   : > { %s9066_s22 = sshll.u32 %s9063_s13, 4  ;;  %s273_s29 = scalar_lea.sflag [#allocation3], %s9063_s13 }
  0x93   : > { %s276_s28 = scalar_lea.vmem [#allocation2], %s9066_s22 }
  0x94   : > { %8750 = dma.done.wait (%p11390_p11), %s273_s29, 256  }
  0x95   : > { %8752 = vsyncadd (%p11390_p11), %s273_s29, 4294967040  ;;  %s281_s0 = sand.u32 1, %s8924_s14   ;;  %s285_s17 = scalar_lea.vmem [#allocation5], %s9066_s22 }
  0x96   : > { %s282_s11 = scalar_lea.sflag [#allocation6], %s281_s0 }
  0x97   : > { %8754 = dma.done.wait (%p11390_p11), %s282_s11, 512  }
  0x98   : > { %8756 = vsyncadd (%p11390_p11), %s282_s11, 4294966784  ;;  %s294_s1 = scalar_lea.vmem [#allocation7], %s9066_s22  ;;  %p11391_p0 = scmp.eq.s32.totalorder %s8924_s14, 0 }
  0x9a   : > { %8758 = dma.done.wait (%p11391_p0), [#allocation9], 4096   ;;  %p11392_p1 = pmov %p11391_p0 }
  0x9b   : > { %v8420_v0 = vld [vmem:[#allocation8 + $0x40] sm:$0xff]   ;;  %v8421_v1 = vld [vmem:[#allocation8 + $0x48] sm:$0xff]   ;;  %v8422_v2 = vld [vmem:[#allocation8 + $0x50] sm:$0xff]   ;;  %s8787_s18 = smov 96   ;;  %s8788_s20 = smov 112   ;;  %v11353_v46 = vmov 0.0   ;;  %v849_v59 = vlaneseq }
  0x9c   : > { %8760 = vsyncadd (%p11392_p1), [#allocation9], 4294963200  ;;  %8016 = vmatprep.subr.bf16.mxu1 %v8420_v0  ;;  %v8424_v3 = vld [vmem:[#allocation8] sm:$0xff]   ;;  %v8426_v4 = vld [vmem:[#allocation8 + $0x8] sm:$0xff]   ;;  %s8789_s21 = smov 80   ;;  %s8790_s9 = smov 64  }
  0x9d   : > { %8017 = vmatpush3.bf16.msra.mxu1 %v8420_v0  ;;  %7996 = vmatprep.subr.bf16.mxu0 %v8424_v3  ;;  %v8423_v5 = vld [vmem:[#allocation8 + $0x58] sm:$0xff]   ;;  %v8428_v6 = vld [vmem:[#allocation8 + $0x10] sm:$0xff]   ;;  %v8425_v7 = vld [vmem:[#allocation8 + $0x60] sm:$0xff]   ;;  %s8791_s7 = smov 48   ;;  %s8792_s23 = smov 32   ;;  %vm8795_vm0 = vmmov 0  }
  0x9e   : > { %8018 = vmatprep.subr.bf16.mxu1 %v8421_v1  ;;  %7997 = vmatpush3.bf16.msra.mxu0 %v8424_v3  ;;  %v8430_v8 = vld [vmem:[#allocation8 + $0x18] sm:$0xff]   ;;  %v8433_v9 = vld [vmem:[%s285_s17] sm:$0xff]   ;;  %v8427_v10 = vld [vmem:[#allocation8 + $0x68] sm:$0xff]   ;;  %s8794_s15 = smov 16   ;;  %v8796_v57 = vmov 1983009808  }
  0x9f   : > { %7998 = vmatprep.subr.bf16.mxu0 %v8426_v4  ;;  %v8432_v11 = vld [vmem:[#allocation8 + $0x20] sm:$0xff]   ;;  %8032 = vmatprep.mubr.bf16.mxu1 %v8433_v9  ;;  %v8429_v13 = vld [vmem:[#allocation8 + $0x70] sm:$0xff]   ;;  %v8435_v14 = vld [vmem:[#allocation8 + $0x28] sm:$0xff]   ;;  %v847_v58 = vunpack.c.l.s4 %v8796_v57  ;;  %v8797_v60 = vmov 1934713408   ;;  %v850_v63 = vshrl.u32 %v849_v59, 7 }
  0xa0   : > { %v8438_v12 = vld [vmem:[%s276_s28] sm:$0xff]   ;;  %v8431_v15 = vld [vmem:[#allocation8 + $0x78] sm:$0xff]   ;;  %v8441_v22 = vld [vmem:[#allocation8 + $0x88] sm:$0xff]   ;;  %v911_v61 = vunpack.c.l.s4 %v8797_v60  ;;  %vm4332_vm1 = vcmask 130048   ;;  %vm7361_vm2 = vcmask 261120   ;;  %vm7366_vm3 = vcmask 392192  }
  0xa1   : > { %8019 = vmatpush3.bf16.msra.mxu1 %v8421_v1  ;;  %8012 = vmatprep.mubr.bf16.mxu0 %v8438_v12  ;;  %v8436_v16 = vld [vmem:[#allocation8 + $0x30] sm:$0xff]   ;;  %v8437_v17 = vld [vmem:[#allocation8 + $0x38] sm:$0xff]   ;;  %v8440_v19 = vld [vmem:[#allocation8 + $0x80] sm:$0xff]   ;;  %v848_v62 = vunpack.c.0.s8 %v847_v58  ;;  %vm7371_vm4 = vcmask 523264   ;;  %vm7376_vm5 = vcmask 654336   ;;  %vm7381_vm6 = vcmask 785408  }
  0xa2   : > { %8020 = vmatprep.subr.bf16.mxu1 %v8422_v2  ;;  %7999 = vmatpush3.bf16.msra.mxu0 %v8426_v4  ;;  %v8434_v18 = vld [vmem:[%s285_s17 + $0x8] sm:$0xff]   ;;  %v8448_v21 = vld [vmem:[%s294_s1] sm:$0xff]   ;;  %vm7386_vm7 = vcmask 916480   ;;  %s7677_s6 = sshll.u32 %s9063_s13, 5  ;;  %s7891_s11 = sshll.u32 %s8924_s14, 9 }
  0xa3   : > { %8000 = vmatprep.subr.bf16.mxu0 %v8428_v6  ;;  %v8439_v20 = vld [vmem:[%s276_s28 + $0x8] sm:$0xff]   ;;  %v8442_v23 = vld [vmem:[#allocation8 + $0x90] sm:$0xff]   ;;  %v8444_v25 = vld [vmem:[#allocation8 + $0xa0] sm:$0xff]   ;;  %v9250_v3 = vsub.s32 %v848_v62, %v850_v63  ;;  %s334_s28 = scalar_lea.vmem [#allocation10], %s7677_s6  ;;  %s11284_s16 = scalar_lea.hbm %s11333_s5, %s7891_s11 }
  0xa4   : > { %v8443_v24 = vld [vmem:[#allocation8 + $0x98] sm:$0xff]   ;;  %v8445_v26 = vld [vmem:[#allocation8 + $0xa8] sm:$0xff]   ;;  %v8446_v27 = vld [vmem:[#allocation8 + $0xb0] sm:$0xff]   ;;  %s7533_s0 = sshll.u32 %s334_s28, 4  ;;  %s7520_s14 = scalar_lea.sflag [#allocation4], %s9063_s13  ;;  %s11279_s0 = int_to_ptr.vmem [resolvable:$true] %s7533_s0 }
  0xa5   : > { %8021 = vmatpush3.bf16.msra.mxu1 %v8422_v2  ;;  %v8447_v28 = vld [vmem:[#allocation8 + $0xb8] sm:$0xff]   ;;  %v7690_v30 = vld [vmem:[%s11332_s4 + $0x1] ss:$0 sm:$0xff]  ;;  %v7678_v41 = vld [vmem:[%s11332_s4] ss:$0 sm:$0xff]  ;;  %v912_v2 = vunpack.c.0.s8 %v911_v61  ;;  %s8705_s25 = scalar_lea.vmem %s11279_s0, 512 }
  0xa6   : > { %8022 = vmatprep.subr.bf16.mxu1 %v8423_v5  ;;  %8001 = vmatpush3.bf16.msra.mxu0 %v8428_v6  ;;  %v8449_v29 = vld [vmem:[%s294_s1 + $0x8] sm:$0xff]   ;;  %v7702_v55 = vld [vmem:[%s11332_s4 + $0x2] ss:$0 sm:$0xff]  ;;  %p8706_p2 = scmp.ne.s32.totalorder %s11279_s0, %s8705_s25  ;;  %p11448_p12 = scmp.ne.s32.totalorder %s11378_s8, 0 }
  0xa7   : > { %8002 = vmatprep.subr.bf16.mxu0 %v8430_v8 }
  0xa8   : > { %p8707_p10 = pnand %p8706_p2, %p11448_p12 }
  0xa9   : > { %8023 = vmatpush3.bf16.msra.mxu1 %v8423_v5 }
  0xaa   : > { %8024 = vmatprep.subr.bf16.mxu1 %v8425_v7  ;;  %8003 = vmatpush3.bf16.msra.mxu0 %v8430_v8  ;;  %p8708_p13 = pneg %p8707_p10 }
  0xab   : > { %8004 = vmatprep.subr.bf16.mxu0 %v8432_v11 }
  0xad   : > { %8025 = vmatpush3.bf16.msra.mxu1 %v8425_v7 }
  0xae   : > { %8026 = vmatprep.subr.bf16.mxu1 %v8427_v10  ;;  %8005 = vmatpush3.bf16.msra.mxu0 %v8432_v11  ;;  %v9256_v11 = vsub.s32 %v912_v2, %v850_v63 }
  0xaf   : > { %8006 = vmatprep.subr.bf16.mxu0 %v8435_v14 }
  0xb1   : > { %8027 = vmatpush3.bf16.msra.mxu1 %v8427_v10 }
  0xb2   : > { %8028 = vmatprep.subr.bf16.mxu1 %v8429_v13  ;;  %8007 = vmatpush3.bf16.msra.mxu0 %v8435_v14 }
  0xb3   : > { %8008 = vmatprep.subr.bf16.mxu0 %v8436_v16 }
  0xb5   : > { %8029 = vmatpush3.bf16.msra.mxu1 %v8429_v13 }
  0xb6   : > { %8030 = vmatprep.subr.bf16.mxu1 %v8431_v15  ;;  %8009 = vmatpush3.bf16.msra.mxu0 %v8436_v16 }
  0xb7   : > { %8010 = vmatprep.subr.bf16.mxu0 %v8437_v17 }
  0xb9   : > { %8031 = vmatpush3.bf16.msra.mxu1 %v8431_v15 }
  0xba   : > { %8011 = vmatpush3.bf16.msra.mxu0 %v8437_v17  ;;  %8056 = vmatprep.subr.bf16.mxu1 %v11353_v46 }
  0xbb   : > { %8036 = vmatprep.subr.bf16.mxu0 %v8440_v19 }
  0xbc   : > { %8033 = vmatmul.mubr.bf16.vlgmr.msra.gmra.mrb[0].mxu1 %v8434_v18 }
  0xbd   : > { %8013 = vmatmul.mubr.bf16.vlgmr.msra.gmra.mrb[0].mxu0 %v8439_v20  ;;  %8058 = vmatprep.mubr.msk.bf16.mxu1 %vm8795_vm0, %v11353_v46 }
  0xbe   : > { %8037 = vmatpush3.bf16.msra.mxu0 %v8440_v19  ;;  %8052 = vmatprep.mubr.bf16.mxu0 %v8448_v21 }
  0xbf   : > { %8038 = vmatprep.subr.bf16.mxu0 %v8441_v22 }
  0xc2   : > { %8039 = vmatpush3.bf16.msra.mxu0 %v8441_v22 }
  0xc3   : > { %8040 = vmatprep.subr.bf16.mxu0 %v8442_v23 }
  0xc6   : > { %8041 = vmatpush3.bf16.msra.mxu0 %v8442_v23 }
  0xc7   : > { %8042 = vmatprep.subr.bf16.mxu0 %v8443_v24 }
  0xca   : > { %8043 = vmatpush3.bf16.msra.mxu0 %v8443_v24 }
  0xcb   : > { %8044 = vmatprep.subr.bf16.mxu0 %v8444_v25 }
  0xce   : > { %8045 = vmatpush3.bf16.msra.mxu0 %v8444_v25 }
  0xcf   : > { %8046 = vmatprep.subr.bf16.mxu0 %v8445_v26 }
  0xd2   : > { %8047 = vmatpush3.bf16.msra.mxu0 %v8445_v26 }
  0xd3   : > { %8048 = vmatprep.subr.bf16.mxu0 %v8446_v27 }
  0xd6   : > { %8049 = vmatpush3.bf16.msra.mxu0 %v8446_v27 }
  0xd7   : > { %8050 = vmatprep.subr.bf16.mxu0 %v8447_v28 }
  0xda   : > { %8051 = vmatpush3.bf16.msra.mxu0 %v8447_v28 }
  0xdb   : > { %8104 = vmatprep.subr.bf16.mxu0 %v11353_v46 }
  0xdd   : > { %8053 = vmatmul.mubr.bf16.vlgmr.msra.gmra.mrb[4].mxu0 %v8449_v29 }
  0xde   : > { %8106 = vmatprep.mubr.msk.bf16.mxu0 %vm8795_vm0, %v11353_v46 }
 0x18f   : > { %v8034_v31 = vpop.f32.mrb[0].mxu1 }
 0x190   : > { %v603_v32 = vpop.f32.mrb[1].mxu1  ;;  %v8014_v36 = vpop.f32.mrb[0].mxu0  ;;  %v9175_v48 = vadd.f32 %v8034_v31, %v7690_v30 }
 0x191   : > { %v9100_v33 = vadd.f32 %v7690_v30, %v603_v32  ;;  %v8035_v34 = vpop.f32.mrb[2].mxu1  ;;  %v461_v37 = vpop.f32.mrb[1].mxu0  ;;  %v470_v49 = vadd.f32 %v8014_v36, %v7678_v41 }
 0x192   : > { %v606_v35 = vpop.f32.mrb[3].mxu1  ;;  %v8015_v39 = vpop.f32.mrb[2].mxu0  ;;  %v462_v42 = vadd.f32 %v7678_v41, %v461_v37  ;;  %v9153_v47 = vadd.f32 %v8035_v34, %v7690_v30 }
 0x193   : > { %1964 = vrot.lane.b32.xlu1 %v9100_v33, %s8787_s18  ;;  %1952 = vrot.lane.b32.xlu0 %v9100_v33, %s8788_s20  ;;  %v9106_v38 = vadd.f32 %v7690_v30, %v606_v35  ;;  %v464_v40 = vpop.f32.mrb[3].mxu0  ;;  %v473_v50 = vadd.f32 %v8015_v39, %v7678_v41  ;;  %v9189_v51 = vmul.f32 0.25, %v470_v49 }
 0x194   : > { %v465_v43 = vadd.f32 %v7678_v41, %v464_v40  ;;  %v9127_v44 = vmul.f32 0.25, %v462_v42 }
 0x195   : > { %v9191_v52 = vmul.f32 0.25, %v473_v50 }
 0x196   : > { %v9129_v45 = vmul.f32 0.25, %v465_v43 }
 0x197   : > { %1966 = vrot.lane.b32.xlu1 %v9106_v38, %s8787_s18  ;;  %1976 = vrot.lane.b32.xlu0 %v9100_v33, %s8789_s21 }
 0x19b   : > { %1978 = vrot.lane.b32.xlu1 %v9106_v38, %s8789_s21  ;;  %1988 = vrot.lane.b32.xlu0 %v9100_v33, %s8790_s9 }
 0x19f   : > { %1990 = vrot.lane.b32.xlu1 %v9106_v38, %s8790_s9  ;;  %2000 = vrot.lane.b32.xlu0 %v9100_v33, %s8791_s7 }
 0x1a3   : > { %2002 = vrot.lane.b32.xlu1 %v9106_v38, %s8791_s7  ;;  %1954 = vrot.lane.b32.xlu0 %v9106_v38, %s8788_s20 }
 0x1a7   : > { %762 = vrot.lane.b32.xlu1 %v9129_v45, %s8788_s20  ;;  %760 = vrot.lane.b32.xlu0 %v9127_v44, %s8788_s20 }
 0x1ab   : > { %774 = vrot.lane.b32.xlu1 %v9129_v45, %s8787_s18  ;;  %772 = vrot.lane.b32.xlu0 %v9127_v44, %s8787_s18 }
 0x1af   : > { %786 = vrot.lane.b32.xlu1 %v9129_v45, %s8789_s21  ;;  %784 = vrot.lane.b32.xlu0 %v9127_v44, %s8789_s21 }
 0x1b0   : > { %v8054_v53 = vpop.f32.mrb[4].mxu0 }
 0x1b1   : > { %v741_v54 = vpop.f32.mrb[5].mxu0  ;;  %v9240_v56 = vadd.f32 %v8054_v53, %v7702_v55 }
 0x1b2   : > { %v9254_v8 = vadd.f32 %v7702_v55, %v741_v54  ;;  %v8055_v32 = vpop.f32.mrb[6].mxu0 }
 0x1b3   : > { %2014 = vrot.lane.b32.xlu1 %v9106_v38, %s8792_s23  ;;  %2012 = vrot.lane.b32.xlu0 %v9100_v33, %s8792_s23  ;;  %11393 = vst [vmem:[#allocation21_spill] sm:$0xff] %v9240_v56  ;;  %v9292_v42 = vadd.f32 %v8055_v32, %v7702_v55 }
 0x1b5   : > { %11394 = vst [vmem:[#allocation22_spill] sm:$0xff] %v9292_v42 }
 0x1b7   : > { %2026 = vrot.lane.b32.xlu1 %v9106_v38, %s8794_s15  ;;  %2024 = vrot.lane.b32.xlu0 %v9100_v33, %s8794_s15 }
 0x1bb   : > { %1958 = vrot.lane.b32.xlu1 %v9153_v47, %s8788_s20  ;;  %796 = vrot.lane.b32.xlu0 %v9127_v44, %s8790_s9 }
 0x1bf   : > { %1970 = vrot.lane.b32.xlu1 %v9153_v47, %s8787_s18  ;;  %808 = vrot.lane.b32.xlu0 %v9127_v44, %s8791_s7 }
 0x1c3   : > { %798 = vrot.lane.b32.xlu1 %v9129_v45, %s8790_s9  ;;  %820 = vrot.lane.b32.xlu0 %v9127_v44, %s8792_s23 }
 0x1c7   : > { %810 = vrot.lane.b32.xlu1 %v9129_v45, %s8791_s7  ;;  %832 = vrot.lane.b32.xlu0 %v9127_v44, %s8794_s15 }
 0x1cb   : > { %822 = vrot.lane.b32.xlu1 %v9129_v45, %s8792_s23  ;;  %1956 = vrot.lane.b32.xlu0 %v9175_v48, %s8788_s20 }
 0x1cf   : > { %834 = vrot.lane.b32.xlu1 %v9129_v45, %s8794_s15  ;;  %1968 = vrot.lane.b32.xlu0 %v9175_v48, %s8787_s18 }
 0x1d3   : > { %1982 = vrot.lane.b32.xlu1 %v9153_v47, %s8789_s21  ;;  %1980 = vrot.lane.b32.xlu0 %v9175_v48, %s8789_s21 }
 0x1d7   : > { %766 = vrot.lane.b32.xlu1 %v9191_v52, %s8788_s20  ;;  %764 = vrot.lane.b32.xlu0 %v9189_v51, %s8788_s20 }
 0x1db   : > { %778 = vrot.lane.b32.xlu1 %v9191_v52, %s8787_s18  ;;  %776 = vrot.lane.b32.xlu0 %v9189_v51, %s8787_s18 }
 0x1df   : > { %790 = vrot.lane.b32.xlu1 %v9191_v52, %s8789_s21  ;;  %788 = vrot.lane.b32.xlu0 %v9189_v51, %s8789_s21 }
 0x1e3   : > { %1994 = vrot.lane.b32.xlu1 %v9153_v47, %s8790_s9  ;;  %1992 = vrot.lane.b32.xlu0 %v9175_v48, %s8790_s9 }
 0x1e7   : > { %2006 = vrot.lane.b32.xlu1 %v9153_v47, %s8791_s7  ;;  %2004 = vrot.lane.b32.xlu0 %v9175_v48, %s8791_s7 }
 0x1eb   : > { %2018 = vrot.lane.b32.xlu1 %v9153_v47, %s8792_s23  ;;  %2016 = vrot.lane.b32.xlu0 %v9175_v48, %s8792_s23 }
 0x1ef   : > { %2030 = vrot.lane.b32.xlu1 %v9153_v47, %s8794_s15  ;;  %2028 = vrot.lane.b32.xlu0 %v9175_v48, %s8794_s15 }
 0x1f3   : > { %802 = vrot.lane.b32.xlu1 %v9191_v52, %s8790_s9  ;;  %800 = vrot.lane.b32.xlu0 %v9189_v51, %s8790_s9 }
 0x1f7   : > { %814 = vrot.lane.b32.xlu1 %v9191_v52, %s8791_s7  ;;  %812 = vrot.lane.b32.xlu0 %v9189_v51, %s8791_s7 }
 0x1fb   : > { %826 = vrot.lane.b32.xlu1 %v9191_v52, %s8792_s23  ;;  %824 = vrot.lane.b32.xlu0 %v9189_v51, %s8792_s23 }
 0x1ff   : > { %838 = vrot.lane.b32.xlu1 %v9191_v52, %s8794_s15  ;;  %836 = vrot.lane.b32.xlu0 %v9189_v51, %s8794_s15 }
 0x203   : > { %3148 = vrot.lane.b32.xlu1 %v9240_v56, %s8788_s20  ;;  %3172 = vrot.lane.b32.xlu0 %v9240_v56, %s8789_s21 }
 0x205   : > { %v1965_v0 = vpop.permute.xlu1 %1964  ;;  %v1953_v1 = vpop.permute.xlu0 %1952 }
 0x206   : > { %v2036_v4 = vcombine.low %v9100_v33, %v1965_v0  ;;  %v2037_v5 = vcombine.high %v9100_v33, %v1965_v0 }
 0x207   : > { %3160 = vrot.lane.b32.xlu1 %v9240_v56, %s8787_s18  ;;  %3208 = vrot.lane.b32.xlu0 %v9240_v56, %s8792_s23 }
 0x208   : > { %v2044_v12 = vrot.slane %v2036_v4, %v9250_v3  ;;  %v2051_v13 = vrot.slane %v2037_v5, %v9250_v3 }
 0x209   : > { %v1967_v6 = vpop.permute.xlu1 %1966  ;;  %v1977_v7 = vpop.permute.xlu0 %1976 }
 0x20a   : > { %v2052_v9 = vcombine.low %v1953_v1, %v1977_v7  ;;  %v2053_v10 = vcombine.high %v1953_v1, %v1977_v7  ;;  %v2172_v33 = vcombine.low %v9106_v38, %v1967_v6  ;;  %v2173_v34 = vcombine.high %v9106_v38, %v1967_v6 }
 0x20b   : > { %3184 = vrot.lane.b32.xlu1 %v9240_v56, %s8790_s9  ;;  %3168 = vrot.lane.b32.xlu0 %v9254_v8, %s8789_s21 }
 0x20c   : > { %v2060_v14 = vrot.slane %v2052_v9, %v9250_v3  ;;  %v2067_v15 = vrot.slane %v2053_v10, %v9250_v3  ;;  %v2180_v53 = vrot.slane %v2172_v33, %v9250_v3  ;;  %v2187_v54 = vrot.slane %v2173_v34, %v9250_v3 }
 0x20d   : > { %v1979_v16 = vpop.permute.xlu1 %1978  ;;  %v9266_v17 = vpop.permute.xlu0 %1988 }
 0x20e   : > { %v2100_v18 = vcombine.low %v2044_v12, %v2060_v14  ;;  %v2101_v19 = vcombine.high %v2044_v12, %v2060_v14  ;;  %v2116_v20 = vcombine.low %v2051_v13, %v2067_v15  ;;  %v2117_v21 = vcombine.high %v2051_v13, %v2067_v15 }
 0x20f   : > { %3196 = vrot.lane.b32.xlu1 %v9240_v56, %s8791_s7  ;;  %3204 = vrot.lane.b32.xlu0 %v9254_v8, %s8792_s23 }
 0x210   : > { %v2108_v22 = vrot.slane %v2100_v18, %v9256_v11  ;;  %v2115_v23 = vrot.slane %v2101_v19, %v9256_v11  ;;  %v2124_v24 = vrot.slane %v2116_v20, %v9256_v11  ;;  %v2131_v25 = vrot.slane %v2117_v21, %v9256_v11  ;;  %v9316_v18 = vpop.f32.mrb[7].mxu0 }
 0x211   : > { %v9276_v26 = vpop.permute.xlu1 %1990  ;;  %v9278_v27 = vpop.permute.xlu0 %2000 }
 0x212   : > { %v7745_v28 = vcombine.low %v2108_v22, %v2115_v23  ;;  %v7747_v29 = vcombine.high %v2108_v22, %v2115_v23  ;;  %v7749_v30 = vcombine.low %v2124_v24, %v2131_v25  ;;  %v7751_v31 = vcombine.high %v2124_v24, %v2131_v25 }
 0x213   : > { %3144 = vrot.lane.b32.xlu1 %v9254_v8, %s8788_s20  ;;  %3216 = vrot.lane.b32.xlu0 %v9254_v8, %s8794_s15 }
 0x214   : > { %v2588_v35 = vrot.slane %v7745_v28, %v9250_v3  ;;  %v2604_v36 = vrot.slane %v7747_v29, %v9250_v3  ;;  %v2620_v37 = vrot.slane %v7749_v30, %v9250_v3  ;;  %v2636_v39 = vrot.slane %v7751_v31, %v9250_v3 }
 0x215   : > { %v9290_v40 = vpop.permute.xlu1 %2002  ;;  %v1955_v41 = vpop.permute.xlu0 %1954 }
 0x216   : > { %v2188_v38 = vcombine.low %v1955_v41, %v1979_v16  ;;  %v2189_v43 = vcombine.high %v1955_v41, %v1979_v16  ;;  %v2644_v49 = vcombine.low %v2588_v35, %v2604_v36  ;;  %v2676_v50 = vcombine.low %v2620_v37, %v2636_v39 }
 0x217   : > { %3156 = vrot.lane.b32.xlu1 %v9254_v8, %s8787_s18  ;;  %3150 = vrot.lane.b32.xlu0 %v9292_v42, %s8788_s20  ;;  %v2645_v2 = vcombine.high %v2588_v35, %v2604_v36  ;;  %v2677_v4 = vcombine.high %v2620_v37, %v2636_v39 }
 0x218   : > { %v2196_v57 = vrot.slane %v2188_v38, %v9250_v3  ;;  %v2203_v58 = vrot.slane %v2189_v43, %v9250_v3  ;;  %v9303_v0 = vrot.slane %v2644_v49, %v9256_v11  ;;  %v9306_v1 = vrot.slane %v2676_v50, %v9256_v11 }
 0x219   : > { %v763_v55 = vpop.permute.xlu1 %762  ;;  %v761_v59 = vpop.permute.xlu0 %760  ;;  %v9329_v25 = vrot.slane %v2645_v2, %v9256_v11  ;;  %v9332_v28 = vrot.slane %v2677_v4, %v9256_v11 }
 0x21a   : > { %v2236_v60 = vcombine.low %v2180_v53, %v2196_v57  ;;  %v2237_v61 = vcombine.high %v2180_v53, %v2196_v57  ;;  %v2252_v62 = vcombine.low %v2187_v54, %v2203_v58  ;;  %v2253_v63 = vcombine.high %v2187_v54, %v2203_v58 }
 0x21b   : > { %3180 = vrot.lane.b32.xlu1 %v9254_v8, %s8790_s9  ;;  %3186 = vrot.lane.b32.xlu0 %v9292_v42, %s8790_s9  ;;  %v2708_v23 = vcombine.low %v9303_v0, %v9306_v1  ;;  %v2709_v24 = vcombine.high %v9303_v0, %v9306_v1 }
 0x21c   : > { %v2244_v5 = vrot.slane %v2236_v60, %v9256_v11  ;;  %v2251_v6 = vrot.slane %v2237_v61, %v9256_v11  ;;  %v2260_v7 = vrot.slane %v2252_v62, %v9256_v11  ;;  %v2267_v9 = vrot.slane %v2253_v63, %v9256_v11 }
 0x21d   : > { %v775_v10 = vpop.permute.xlu1 %774  ;;  %v773_v12 = vpop.permute.xlu0 %772 }
 0x21e   : > { %v7753_v13 = vcombine.low %v2244_v5, %v2251_v6  ;;  %v7755_v14 = vcombine.high %v2244_v5, %v2251_v6  ;;  %v7757_v15 = vcombine.low %v2260_v7, %v2267_v9  ;;  %v7759_v16 = vcombine.high %v2260_v7, %v2267_v9 }
 0x21f   : > { %v980_v19 = vcombine.low %v9129_v45, %v775_v10  ;;  %v981_v20 = vcombine.high %v9129_v45, %v775_v10  ;;  %v844_v21 = vcombine.low %v9127_v44, %v773_v12  ;;  %v845_v22 = vcombine.high %v9127_v44, %v773_v12  ;;  %3192 = vrot.lane.b32.xlu1 %v9254_v8, %s8791_s7 }
 0x220   : > { %v2724_v30 = vrot.slane %v7753_v13, %v9250_v3  ;;  %v2740_v44 = vrot.slane %v7755_v14, %v9250_v3  ;;  %v2756_v31 = vrot.slane %v7757_v15, %v9250_v3  ;;  %v2772_v32 = vrot.slane %v7759_v16, %v9250_v3 }
 0x221   : > { %v787_v45 = vpop.permute.xlu1 %786  ;;  %v785_v29 = vpop.permute.xlu0 %784  ;;  %v988_v37 = vrot.slane %v980_v19, %v9250_v3  ;;  %v995_v39 = vrot.slane %v981_v20, %v9250_v3  ;;  %v852_v41 = vrot.slane %v844_v21, %v9250_v3  ;;  %v859_v38 = vrot.slane %v845_v22, %v9250_v3 }
 0x222   : > { %v996_v33 = vcombine.low %v763_v55, %v787_v45  ;;  %v997_v34 = vcombine.high %v763_v55, %v787_v45  ;;  %v860_v35 = vcombine.low %v761_v59, %v785_v29  ;;  %v861_v36 = vcombine.high %v761_v59, %v785_v29 }
 0x223   : > { %3162 = vrot.lane.b32.xlu1 %v9292_v42, %s8787_s18  ;;  %v2780_v58 = vcombine.low %v2724_v30, %v2740_v44  ;;  %v2812_v55 = vcombine.low %v2756_v31, %v2772_v32  ;;  %v2781_v59 = vcombine.high %v2724_v30, %v2740_v44  ;;  %v2813_v60 = vcombine.high %v2756_v31, %v2772_v32 }
 0x224   : > { %v1004_v43 = vrot.slane %v996_v33, %v9250_v3  ;;  %v1011_v49 = vrot.slane %v997_v34, %v9250_v3  ;;  %v868_v50 = vrot.slane %v860_v35, %v9250_v3  ;;  %v875_v53 = vrot.slane %v861_v36, %v9250_v3 }
 0x225   : > { %v9348_v54 = vpop.permute.xlu1 %2014  ;;  %v9350_v57 = vpop.permute.xlu0 %2012 }
 0x226   : > { %v1044_v61 = vcombine.low %v988_v37, %v1004_v43  ;;  %v1045_v62 = vcombine.high %v988_v37, %v1004_v43  ;;  %v1060_v63 = vcombine.low %v995_v39, %v1011_v49  ;;  %v1061_v2 = vcombine.high %v995_v39, %v1011_v49 }
 0x227   : > { %v908_v4 = vcombine.low %v852_v41, %v868_v50  ;;  %v909_v5 = vcombine.high %v852_v41, %v868_v50  ;;  %v924_v6 = vcombine.low %v859_v38, %v875_v53  ;;  %v925_v7 = vcombine.high %v859_v38, %v875_v53  ;;  %3174 = vrot.lane.b32.xlu1 %v9292_v42, %s8789_s21 }
 0x228   : > { %v1052_v9 = vrot.slane %v1044_v61, %v9256_v11  ;;  %v1059_v10 = vrot.slane %v1045_v62, %v9256_v11  ;;  %v1068_v12 = vrot.slane %v1060_v63, %v9256_v11  ;;  %v1075_v13 = vrot.slane %v1061_v2, %v9256_v11 }
 0x229   : > { %v916_v14 = vrot.slane %v908_v4, %v9256_v11  ;;  %v923_v15 = vrot.slane %v909_v5, %v9256_v11  ;;  %v932_v16 = vrot.slane %v924_v6, %v9256_v11  ;;  %v939_v19 = vrot.slane %v925_v7, %v9256_v11  ;;  %v2027_v20 = vpop.permute.xlu1 %2026  ;;  %v2025_v21 = vpop.permute.xlu0 %2024 }
 0x22a   : > { %v7721_v22 = vcombine.low %v1052_v9, %v1059_v10  ;;  %v7723_v45 = vcombine.high %v1052_v9, %v1059_v10  ;;  %v7725_v29 = vcombine.low %v1068_v12, %v1075_v13  ;;  %v7727_v30 = vcombine.high %v1068_v12, %v1075_v13 }
 0x22b   : > { %v7713_v44 = vcombine.low %v916_v14, %v923_v15  ;;  %v7715_v31 = vcombine.high %v916_v14, %v923_v15  ;;  %v7717_v32 = vcombine.low %v932_v16, %v939_v19  ;;  %v7719_v33 = vcombine.high %v932_v16, %v939_v19  ;;  %3198 = vrot.lane.b32.xlu1 %v9292_v42, %s8791_s7 }
 0x22c   : > { %v9365_v34 = vrot.slane %v7721_v22, %v9250_v3  ;;  %v9368_v35 = vrot.slane %v7723_v45, %v9250_v3  ;;  %v9375_v39 = vrot.slane %v2780_v58, %v9256_v11  ;;  %v9378_v41 = vrot.slane %v2812_v55, %v9256_v11 }
 0x22d   : > { %v9380_v38 = vpop.permute.xlu1 %1958  ;;  %v9382_v43 = vpop.permute.xlu0 %796  ;;  %v9385_v49 = vrot.slane %v2781_v59, %v9256_v11  ;;  %v9388_v50 = vrot.slane %v2813_v60, %v9256_v11  ;;  %v9391_v53 = vrot.slane %v7725_v29, %v9250_v3  ;;  %v9394_v61 = vrot.slane %v7727_v30, %v9250_v3 }
 0x22e   : > { %v9397_v58 = vrot.slane %v7713_v44, %v9250_v3  ;;  %v9400_v55 = vrot.slane %v7715_v31, %v9250_v3  ;;  %v1588_v62 = vcombine.low %v9365_v34, %v9368_v35  ;;  %v9407_v60 = vrot.slane %v7717_v32, %v9250_v3 }
 0x22f   : > { %v9410_v63 = vrot.slane %v7719_v33, %v9250_v3  ;;  %v2204_v2 = vcombine.low %v9276_v26, %v9348_v54  ;;  %v2205_v4 = vcombine.high %v9276_v26, %v9348_v54  ;;  %v2068_v5 = vcombine.low %v9266_v17, %v9350_v57 }
 0x230   : > { %v2069_v6 = vcombine.high %v9266_v17, %v9350_v57  ;;  %v2220_v7 = vcombine.low %v9290_v40, %v2027_v20  ;;  %v2221_v9 = vcombine.high %v9290_v40, %v2027_v20  ;;  %v2084_v10 = vcombine.low %v9278_v27, %v2025_v21 }
 0x231   : > { %v2085_v12 = vcombine.high %v9278_v27, %v2025_v21  ;;  %v9424_v13 = vpop.permute.xlu1 %1970  ;;  %v9426_v14 = vpop.permute.xlu0 %808  ;;  %v1620_v26 = vcombine.low %v9391_v53, %v9394_v61  ;;  %v2212_v17 = vrot.slane %v2204_v2, %v9250_v3  ;;  %v2219_v57 = vrot.slane %v2205_v4, %v9250_v3 }
 0x232   : > { %v2228_v40 = vrot.slane %v2220_v7, %v9250_v3  ;;  %v2235_v15 = vrot.slane %v2221_v9, %v9250_v3  ;;  %v2092_v27 = vrot.slane %v2084_v10, %v9250_v3  ;;  %v1452_v19 = vcombine.low %v9397_v58, %v9400_v55 }
 0x233   : > { %v2099_v16 = vrot.slane %v2085_v12, %v9250_v3  ;;  %v2076_v20 = vrot.slane %v2068_v5, %v9250_v3  ;;  %v2083_v21 = vrot.slane %v2069_v6, %v9250_v3  ;;  %v2844_v22 = vcombine.low %v9375_v39, %v9378_v41 }
 0x234   : > { %v2268_v45 = vcombine.low %v2212_v17, %v2228_v40  ;;  %v2269_v29 = vcombine.high %v2212_v17, %v2228_v40  ;;  %v2284_v30 = vcombine.low %v2219_v57, %v2235_v15  ;;  %v2285_v44 = vcombine.high %v2219_v57, %v2235_v15 }
 0x235   : > { %v9444_v31 = vpop.permute.xlu1 %798  ;;  %v821_v32 = vpop.permute.xlu0 %820  ;;  %v2132_v33 = vcombine.low %v2076_v20, %v2092_v27  ;;  %v2133_v2 = vcombine.high %v2076_v20, %v2092_v27  ;;  %v2148_v4 = vcombine.low %v2083_v21, %v2099_v16  ;;  %v2149_v7 = vcombine.high %v2083_v21, %v2099_v16 }
 0x236   : > { %v9447_v9 = vrot.slane %v2268_v45, %v9256_v11  ;;  %v9450_v5 = vrot.slane %v2269_v29, %v9256_v11  ;;  %v9453_v6 = vrot.slane %v2284_v30, %v9256_v11  ;;  %v9456_v10 = vrot.slane %v2285_v44, %v9256_v11 }
 0x237   : > { %v1484_v17 = vcombine.low %v9407_v60, %v9410_v63  ;;  %v9467_v15 = vrot.slane %v2132_v33, %v9256_v11  ;;  %v9470_v27 = vrot.slane %v2133_v2, %v9256_v11  ;;  %v9475_v20 = vrot.slane %v1452_v19, %v9256_v11 }
 0x238   : > { %v9484_v44 = vrot.slane %v2148_v4, %v9256_v11  ;;  %v9487_v33 = vrot.slane %v2149_v7, %v9256_v11  ;;  %v3124_v37 = vpack.c.bf16 %v2844_v22, %v2708_v23  ;;  %v876_v29 = vcombine.low %v9382_v43, %v821_v32 }
 0x239   : > { %v9477_v21 = vpop.permute.xlu1 %810  ;;  %v833_v45 = vpop.permute.xlu0 %832  ;;  %v877_v30 = vcombine.high %v9382_v43, %v821_v32  ;;  %v1492_v4 = vrot.slane %v1484_v17, %v9256_v11  ;;  %v1596_v54 = vrot.slane %v1588_v62, %v9256_v11  ;;  %v1628_v7 = vrot.slane %v1620_v26, %v9256_v11 }
 0x23a   : > { %v4337_v59 = vsel %vm4332_vm1, %v3124_v37, 0  ;;  %v2845_v19 = vcombine.high %v9375_v39, %v9378_v41  ;;  %v892_v23 = vcombine.low %v9426_v14, %v833_v45  ;;  %v893_v26 = vcombine.high %v9426_v14, %v833_v45 }
 0x23b   : > { %8057 = vmatpush3.bf16.xpose.msra.mxu1 %v4337_v59  ;;  %v1516_v32 = vcombine.low %v9475_v20, %v1492_v4  ;;  %v1652_v62 = vcombine.low %v1596_v54, %v1628_v7  ;;  %v884_v41 = vrot.slane %v876_v29, %v9250_v3  ;;  %v891_v59 = vrot.slane %v877_v30, %v9250_v3 }
 0x23c   : > { %8062 = vmatprep.subr.bf16.mxu1 %v11353_v46  ;;  %v900_v43 = vrot.slane %v892_v23, %v9250_v3  ;;  %v3125_v14 = vpack.c.bf16 %v2845_v19, %v2709_v24  ;;  %v907_v45 = vrot.slane %v893_v26, %v9250_v3  ;;  %v1517_v23 = vcombine.high %v9475_v20, %v1492_v4 }
 0x23d   : > { %v823_v22 = vpop.permute.xlu1 %822  ;;  %v9511_v17 = vpop.permute.xlu0 %1956  ;;  %v1932_v37 = vpack.c.bf16 %v1652_v62, %v1516_v32  ;;  %v1653_v36 = vcombine.high %v1596_v54, %v1628_v7  ;;  %v2846_v1 = vcombine.low %v9385_v49, %v9388_v50 }
 0x23e   : > { %v1012_v2 = vcombine.low %v9444_v31, %v823_v22  ;;  %v940_v57 = vcombine.low %v884_v41, %v900_v43  ;;  %v941_v12 = vcombine.high %v884_v41, %v900_v43  ;;  %v1013_v39 = vcombine.high %v9444_v31, %v823_v22 }
 0x23f   : > { %v956_v40 = vcombine.low %v891_v59, %v907_v45  ;;  %v957_v29 = vcombine.high %v891_v59, %v907_v45  ;;  %v4384_v19 = vsel %vm4332_vm1, %v3125_v14, 0  ;;  %v11397_v41 = vcombine.high %v9153_v47, %v9424_v13 }
 0x240   : > { %v948_v30 = vrot.slane %v940_v57, %v9256_v11  ;;  %v955_v0 = vrot.slane %v941_v12, %v9256_v11  ;;  %v1020_v12 = vrot.slane %v1012_v2, %v9250_v3  ;;  %v1027_v57 = vrot.slane %v1013_v39, %v9250_v3 }
 0x241   : > { %v835_v16 = vpop.permute.xlu1 %834  ;;  %v964_v43 = vrot.slane %v956_v40, %v9256_v11  ;;  %v971_v31 = vrot.slane %v957_v29, %v9256_v11  ;;  %v9537_v32 = vpop.permute.xlu0 %1968  ;;  %v11395_v40 = vcombine.low %v9329_v25, %v9332_v28  ;;  %v11396_v2 = vcombine.low %v9153_v47, %v9424_v13 }
 0x242   : > { %v1028_v24 = vcombine.low %v9477_v21, %v835_v16  ;;  %v1029_v22 = vcombine.high %v9477_v21, %v835_v16  ;;  %8059 = vmatmul.mubr.msk.bf16.vlgmr.msra.gmra.mrb[4].mxu1 %vm4332_vm1, %v1932_v37  ;;  %v7714_v54 = vcombine.low %v948_v30, %v955_v0  ;;  %v7716_v7 = vcombine.high %v948_v30, %v955_v0 }
 0x243   : > { %8063 = vmatpush3.bf16.xpose.msra.mxu1 %v4384_v19  ;;  %8064 = vmatprep.mubr.msk.bf16.mxu1 %vm8795_vm0, %v11353_v46  ;;  %v3126_v16 = vpack.c.bf16 %v2846_v1, %v11395_v40  ;;  %v2452_v62 = vrot.slane %v11396_v2, %v9250_v3  ;;  %v7718_v26 = vcombine.low %v964_v43, %v971_v31 }
 0x244   : > { %v1036_v20 = vrot.slane %v1028_v24, %v9250_v3  ;;  %v1043_v21 = vrot.slane %v1029_v22, %v9250_v3  ;;  %v7720_v37 = vcombine.high %v964_v43, %v971_v31  ;;  %8068 = vmatprep.subr.bf16.mxu1 %v11353_v46  ;;  %v2459_v59 = vrot.slane %v11397_v41, %v9250_v3 }
 0x245   : > { %v1983_v4 = vpop.permute.xlu1 %1982  ;;  %v1933_v14 = vpack.c.bf16 %v1653_v36, %v1517_v23  ;;  %v9559_v30 = vrot.slane %v7714_v54, %v9250_v3  ;;  %v2308_v24 = vcombine.low %v9175_v48, %v9537_v32  ;;  %v9567_v43 = vrot.slane %v7716_v7, %v9250_v3  ;;  %v1981_v23 = vpop.permute.xlu0 %1980 }
 0x246   : > { %v1076_v39 = vcombine.low %v1020_v12, %v1036_v20  ;;  %v1077_v45 = vcombine.high %v1020_v12, %v1036_v20  ;;  %v1092_v29 = vcombine.low %v1027_v57, %v1043_v21  ;;  %v1093_v1 = vcombine.high %v1027_v57, %v1043_v21 }
 0x247   : > { %v4431_v47 = vsel %vm4332_vm1, %v3126_v16, 0  ;;  %v9573_v31 = vrot.slane %v7718_v26, %v9250_v3  ;;  %v9576_v22 = vrot.slane %v7720_v37, %v9250_v3  ;;  %v2460_v12 = vcombine.low %v9380_v38, %v1983_v4 }
 0x248   : > { %v1084_v0 = vrot.slane %v1076_v39, %v9256_v11  ;;  %v1091_v36 = vrot.slane %v1077_v45, %v9256_v11  ;;  %v1100_v13 = vrot.slane %v1092_v29, %v9256_v11  ;;  %v1107_v54 = vrot.slane %v1093_v1, %v9256_v11 }
 0x249   : > { %v9564_v19 = vpop.permute.xlu1 %766  ;;  %v2309_v7 = vcombine.high %v9175_v48, %v9537_v32  ;;  %v2461_v40 = vcombine.high %v9380_v38, %v1983_v4  ;;  %v2468_v2 = vrot.slane %v2460_v12, %v9250_v3  ;;  %v2324_v26 = vcombine.low %v9511_v17, %v1981_v23 }
 0x24a   : > { %v7722_v57 = vcombine.low %v1084_v0, %v1091_v36  ;;  %v7724_v20 = vcombine.high %v1084_v0, %v1091_v36  ;;  %8065 = vmatmul.mubr.msk.bf16.vlgmr.msra.gmra.mrb[8].mxu1 %vm4332_vm1, %v1933_v14  ;;  %v7726_v16 = vcombine.low %v1100_v13, %v1107_v54  ;;  %v7728_v21 = vcombine.high %v1100_v13, %v1107_v54 }
 0x24b   : > { %8069 = vmatpush3.bf16.xpose.msra.mxu1 %v4431_v47  ;;  %v2475_v41 = vrot.slane %v2461_v40, %v9250_v3  ;;  %8070 = vmatprep.mubr.msk.bf16.mxu1 %vm8795_vm0, %v11353_v46  ;;  %v1468_v38 = vcombine.low %v9559_v30, %v9567_v43  ;;  %v2508_v4 = vcombine.low %v2452_v62, %v2468_v2  ;;  %v9604_v47 = vpop.permute.xlu0 %764 }
 0x24c   : > { %v9587_v37 = vrot.slane %v7722_v57, %v9250_v3  ;;  %v9590_v39 = vrot.slane %v7724_v20, %v9250_v3  ;;  %v2509_v14 = vcombine.high %v2452_v62, %v2468_v2  ;;  %8074 = vmatprep.subr.bf16.mxu1 %v11353_v46  ;;  %v1500_v45 = vcombine.low %v9573_v31, %v9576_v22 }
 0x24d   : > { %v779_v48 = vpop.permute.xlu1 %778  ;;  %v2524_v0 = vcombine.low %v2459_v59, %v2475_v41  ;;  %v2525_v1 = vcombine.high %v2459_v59, %v2475_v41  ;;  %v9607_v36 = vrot.slane %v7726_v16, %v9250_v3  ;;  %v9610_v13 = vrot.slane %v7728_v21, %v9250_v3 }
 0x24e   : > { %v2316_v62 = vrot.slane %v2308_v24, %v9250_v3  ;;  %v2323_v54 = vrot.slane %v2309_v7, %v9250_v3  ;;  %v2325_v59 = vcombine.high %v9511_v17, %v1981_v23  ;;  %v2332_v20 = vrot.slane %v2324_v26, %v9250_v3 }
 0x24f   : > { %v9621_v40 = vrot.slane %v2508_v4, %v9256_v11  ;;  %v9624_v16 = vrot.slane %v2509_v14, %v9256_v11  ;;  %v11398_v24 = vcombine.high %v9397_v58, %v9400_v55  ;;  %v11399_v21 = vcombine.high %v9407_v60, %v9410_v63 }
 0x250   : > { %v9635_v17 = vrot.slane %v2524_v0, %v9256_v11  ;;  %v9638_v23 = vrot.slane %v2525_v1, %v9256_v11  ;;  %v2339_v26 = vrot.slane %v2325_v59, %v9250_v3  ;;  %v2372_v41 = vcombine.low %v2316_v62, %v2332_v20 }
 0x251   : > { %v1467_v7 = vrot.slane %v11398_v24, %v9256_v11  ;;  %v1499_v2 = vrot.slane %v11399_v21, %v9256_v11  ;;  %v791_v4 = vpop.permute.xlu1 %790  ;;  %v2373_v14 = vcombine.high %v2316_v62, %v2332_v20  ;;  %v11400_v58 = vcombine.high %v9365_v34, %v9368_v35  ;;  %v777_v62 = vpop.permute.xlu0 %776 }
 0x252   : > { %v11401_v60 = vcombine.high %v9391_v53, %v9394_v61  ;;  %v2388_v1 = vcombine.low %v2323_v54, %v2339_v26  ;;  %v2389_v24 = vcombine.high %v2323_v54, %v2339_v26  ;;  %v2847_v59 = vcombine.high %v9385_v49, %v9388_v50 }
 0x253   : > { %v1518_v57 = vcombine.low %v1467_v7, %v1499_v2  ;;  %v1603_v55 = vrot.slane %v11400_v58, %v9256_v11  ;;  %v1252_v34 = vcombine.low %v9191_v52, %v779_v48  ;;  %v1253_v35 = vcombine.high %v9191_v52, %v779_v48 }
 0x254   : > { %v1635_v63 = vrot.slane %v11401_v60, %v9256_v11  ;;  %v11402_v49 = vcombine.high %v9329_v25, %v9332_v28  ;;  %v9667_v26 = vrot.slane %v2372_v41, %v9256_v11  ;;  %v9670_v58 = vrot.slane %v2373_v14, %v9256_v11 }
 0x255   : > { %v1116_v48 = vcombine.low %v9189_v51, %v777_v62  ;;  %v9674_v60 = vrot.slane %v2388_v1, %v9256_v11  ;;  %v9677_v20 = vrot.slane %v2389_v24, %v9256_v11  ;;  %v1260_v25 = vrot.slane %v1252_v34, %v9250_v3  ;;  %v9681_v28 = vpop.permute.xlu1 %1994 }
 0x256   : > { %v1654_v21 = vcombine.low %v1603_v55, %v1635_v63  ;;  %v3127_v50 = vpack.c.bf16 %v2847_v59, %v11402_v49  ;;  %v1267_v41 = vrot.slane %v1253_v35, %v9250_v3  ;;  %v1519_v14 = vcombine.high %v1467_v7, %v1499_v2  ;;  %v789_v7 = vpop.permute.xlu0 %788 }
 0x257   : > { %v1655_v59 = vcombine.high %v1603_v55, %v1635_v63  ;;  %v11403_v1 = vcombine.low %v9467_v15, %v9470_v27  ;;  %v1124_v2 = vrot.slane %v1116_v48, %v9250_v3  ;;  %v11406_v63 = vcombine.high %v9484_v44, %v9487_v33 }
 0x258   : > { %v1934_v52 = vpack.c.bf16 %v1654_v21, %v1518_v57  ;;  %v4478_v29 = vsel %vm4332_vm1, %v3127_v50, 0  ;;  %v1117_v57 = vcombine.high %v9189_v51, %v777_v62  ;;  %v11404_v21 = vcombine.high %v9467_v15, %v9470_v27 }
 0x259   : > { %v9692_v24 = vrot.slane %v11403_v1, %v9250_v3  ;;  %v11405_v51 = vcombine.low %v9484_v44, %v9487_v33  ;;  %v1935_v55 = vpack.c.bf16 %v1655_v59, %v1519_v14  ;;  %v9712_v62 = vrot.slane %v11406_v63, %v9250_v3 }
 0x25a   : > { %8071 = vmatmul.mubr.msk.bf16.vlgmr.msra.gmra.mrb[12].mxu1 %vm4332_vm1, %v1934_v52  ;;  %v9698_v34 = vrot.slane %v11404_v21, %v9250_v3  ;;  %v11407_v15 = vcombine.low %v9447_v9, %v9450_v5  ;;  %v11408_v49 = vcombine.high %v9447_v9, %v9450_v5  ;;  %v11409_v44 = vcombine.low %v9453_v6, %v9456_v10 }
 0x25b   : > { %8075 = vmatpush3.bf16.xpose.msra.mxu1 %v4478_v29  ;;  %8076 = vmatprep.mubr.msk.bf16.mxu1 %vm8795_vm0, %v11353_v46  ;;  %v9704_v29 = vrot.slane %v11405_v51, %v9250_v3  ;;  %v11410_v52 = vcombine.high %v9453_v6, %v9456_v10  ;;  %v1268_v59 = vcombine.low %v9564_v19, %v791_v4  ;;  %v9753_v51 = vpop.permute.xlu1 %2006 }
 0x25c   : > { %8080 = vmatprep.subr.bf16.mxu1 %v11353_v46  ;;  %v9718_v27 = vrot.slane %v11407_v15, %v9250_v3  ;;  %v2660_v35 = vcombine.low %v9692_v24, %v9698_v34  ;;  %v9726_v50 = vrot.slane %v11408_v49, %v9250_v3  ;;  %v9732_v33 = vrot.slane %v11409_v44, %v9250_v3 }
 0x25d   : > { %v9738_v48 = vrot.slane %v11410_v52, %v9250_v3  ;;  %v2692_v14 = vcombine.low %v9704_v29, %v9712_v62  ;;  %v1269_v9 = vcombine.high %v9564_v19, %v791_v4  ;;  %v1132_v5 = vcombine.low %v9604_v47, %v789_v7 }
 0x25e   : > { %v9746_v1 = vrot.slane %v2660_v35, %v9256_v11  ;;  %v2796_v21 = vcombine.low %v9718_v27, %v9726_v50  ;;  %v1133_v10 = vcombine.high %v9604_v47, %v789_v7  ;;  %v1276_v19 = vrot.slane %v1268_v59, %v9250_v3 }
 0x25f   : > { %v2828_v6 = vcombine.low %v9732_v33, %v9738_v48  ;;  %v9756_v63 = vrot.slane %v2692_v14, %v9256_v11  ;;  %v1283_v4 = vrot.slane %v1269_v9, %v9250_v3  ;;  %v1140_v15 = vrot.slane %v1132_v5, %v9250_v3  ;;  %v9772_v9 = vpop.permute.xlu0 %1992 }
 0x260   : > { %v1131_v35 = vrot.slane %v1117_v57, %v9250_v3  ;;  %v9763_v49 = vrot.slane %v2796_v21, %v9256_v11  ;;  %v1147_v47 = vrot.slane %v1133_v10, %v9250_v3  ;;  %v1316_v52 = vcombine.low %v1260_v25, %v1276_v19 }
 0x261   : > { %v9766_v44 = vrot.slane %v2828_v6, %v9256_v11  ;;  %v2712_v7 = vcombine.low %v9746_v1, %v9756_v63  ;;  %v1317_v14 = vcombine.high %v1260_v25, %v1276_v19  ;;  %v1332_v59 = vcombine.low %v1267_v41, %v1283_v4 }
 0x262   : > { %8077 = vmatmul.mubr.msk.bf16.vlgmr.msra.gmra.mrb[16].mxu1 %vm4332_vm1, %v1935_v55  ;;  %v1333_v5 = vcombine.high %v1267_v41, %v1283_v4  ;;  %v1180_v21 = vcombine.low %v1124_v2, %v1140_v15  ;;  %v1181_v32 = vcombine.high %v1124_v2, %v1140_v15  ;;  %v1324_v6 = vrot.slane %v1316_v52, %v9256_v11  ;;  %v9784_v41 = vpop.permute.xlu1 %2018 }
 0x263   : > { %v2848_v57 = vcombine.low %v9763_v49, %v9766_v44  ;;  %8082 = vmatprep.mubr.msk.bf16.mxu1 %vm8795_vm0, %v11353_v46  ;;  %v1331_v55 = vrot.slane %v1317_v14, %v9256_v11  ;;  %v1340_v10 = vrot.slane %v1332_v59, %v9256_v11  ;;  %v1196_v54 = vcombine.low %v1131_v35, %v1147_v47 }
 0x264   : > { %v1347_v19 = vrot.slane %v1333_v5, %v9256_v11  ;;  %v1188_v61 = vrot.slane %v1180_v21, %v9256_v11  ;;  %v1195_v53 = vrot.slane %v1181_v32, %v9256_v11  ;;  %v1197_v15 = vcombine.high %v1131_v35, %v1147_v47  ;;  %v9795_v21 = vpop.permute.xlu0 %2004 }
 0x265   : > { %v3128_v25 = vpack.c.bf16 %v2848_v57, %v2712_v7  ;;  %v7737_v2 = vcombine.low %v1324_v6, %v1331_v55  ;;  %v7739_v4 = vcombine.high %v1324_v6, %v1331_v55  ;;  %v1204_v0 = vrot.slane %v1196_v54, %v9256_v11 }
 0x266   : > { %v7741_v14 = vcombine.low %v1340_v10, %v1347_v19  ;;  %v7743_v12 = vcombine.high %v1340_v10, %v1347_v19  ;;  %v7729_v59 = vcombine.low %v1188_v61, %v1195_v53  ;;  %v1211_v32 = vrot.slane %v1197_v15, %v9256_v11 }
 0x267   : > { %v4525_v52 = vsel %vm4332_vm1, %v3128_v25, 0  ;;  %v9789_v7 = vrot.slane %v7737_v2, %v9250_v3  ;;  %v9792_v57 = vrot.slane %v7739_v4, %v9250_v3  ;;  %v7731_v5 = vcombine.high %v1188_v61, %v1195_v53 }
 0x268   : > { %8081 = vmatpush3.bf16.xpose.msra.mxu1 %v4525_v52  ;;  %v7775_v54 = vcombine.high %v9635_v17, %v9638_v23  ;;  %v7761_v35 = vcombine.low %v9667_v26, %v9670_v58  ;;  %v9802_v47 = vrot.slane %v7741_v14, %v9250_v3  ;;  %v9805_v6 = vrot.slane %v7743_v12, %v9250_v3 }
 0x269   : > { %8086 = vmatprep.subr.bf16.mxu1 %v11353_v46  ;;  %v7763_v55 = vcombine.high %v9667_v26, %v9670_v58  ;;  %v7765_v53 = vcombine.low %v9674_v60, %v9677_v20  ;;  %v7767_v61 = vcombine.high %v9674_v60, %v9677_v20  ;;  %v1476_v10 = vrot.slane %v1468_v38, %v9256_v11  ;;  %v9827_v58 = vpop.permute.xlu1 %2030 }
 0x26a   : > { %v9821_v25 = vrot.slane %v7729_v59, %v9250_v3  ;;  %v7733_v19 = vcombine.low %v1204_v0, %v1211_v32  ;;  %v1508_v26 = vrot.slane %v1500_v45, %v9256_v11  ;;  %v9834_v60 = vrot.slane %v7731_v5, %v9250_v3 }
 0x26b   : > { %v11411_v2 = vcombine.low %v9587_v37, %v9590_v39  ;;  %v7735_v15 = vcombine.high %v1204_v0, %v1211_v32  ;;  %v11412_v45 = vcombine.low %v9607_v36, %v9610_v13  ;;  %v2713_v14 = vcombine.high %v9746_v1, %v9756_v63  ;;  %v9860_v32 = vpop.permute.xlu0 %2016 }
 0x26c   : > { %v2849_v59 = vcombine.high %v9763_v49, %v9766_v44  ;;  %v9849_v5 = vrot.slane %v7761_v35, %v9250_v3  ;;  %v9852_v20 = vrot.slane %v7763_v55, %v9250_v3  ;;  %v9858_v0 = vrot.slane %v7767_v61, %v9250_v3 }
 0x26d   : > { %v1612_v4 = vrot.slane %v11411_v2, %v9256_v11  ;;  %v1644_v52 = vrot.slane %v11412_v45, %v9256_v11  ;;  %v9855_v2 = vrot.slane %v7765_v53, %v9250_v3  ;;  %v9863_v45 = vrot.slane %v7733_v19, %v9250_v3 }
 0x26e   : > { %v1520_v1 = vcombine.low %v1476_v10, %v1508_v26  ;;  %v3129_v49 = vpack.c.bf16 %v2849_v59, %v2713_v14  ;;  %v2916_v44 = vcombine.low %v9849_v5, %v9852_v20  ;;  %v11413_v55 = vcombine.low %v9621_v40, %v9624_v16 }
 0x26f   : > { %v1656_v63 = vcombine.low %v1612_v4, %v1644_v52  ;;  %v2948_v35 = vcombine.low %v9855_v2, %v9858_v0  ;;  %v11414_v61 = vcombine.high %v9621_v40, %v9624_v16  ;;  %v9882_v14 = vrot.slane %v7735_v15, %v9250_v3 }
 0x270   : > { %v9873_v53 = vrot.slane %v11413_v55, %v9250_v3  ;;  %v11415_v38 = vcombine.low %v9635_v17, %v9638_v23  ;;  %v9891_v46 = vrot.slane %v7775_v54, %v9250_v3  ;;  %v9893_v55 = vpop.permute.xlu1 %802  ;;  %v9896_v56 = vrot.slane %v2916_v44, %v9256_v11 }
 0x271   : > { %v9879_v19 = vrot.slane %v11414_v61, %v9250_v3  ;;  %v1936_v59 = vpack.c.bf16 %v1656_v63, %v1520_v1  ;;  %v9899_v40 = vrot.slane %v2948_v35, %v9256_v11  ;;  %v2476_v15 = vcombine.low %v9681_v28, %v9784_v41  ;;  %v2029_v35 = vpop.permute.xlu0 %2028 }
 0x272   : > { %v9888_v12 = vrot.slane %v11415_v38, %v9250_v3  ;;  %v4572_v17 = vsel %vm4332_vm1, %v3129_v49, 0  ;;  %v2477_v54 = vcombine.high %v9681_v28, %v9784_v41  ;;  %v2340_v38 = vcombine.low %v9772_v9, %v9860_v32 }
 0x273   : > { %v3052_v16 = vcombine.low %v9873_v53, %v9879_v19  ;;  %8083 = vmatmul.mubr.msk.bf16.vlgmr.msra.gmra.mrb[20].mxu1 %vm4332_vm1, %v1936_v59  ;;  %v2980_v1 = vcombine.low %v9896_v56, %v9899_v40  ;;  %v11416_v44 = vmov 0.0   ;;  %v2341_v49 = vcombine.high %v9772_v9, %v9860_v32 }
 0x274   : > { %v3084_v23 = vcombine.low %v9888_v12, %v9891_v46  ;;  %8087 = vmatpush3.bf16.xpose.msra.mxu1 %v4572_v17  ;;  %8088 = vmatprep.mubr.msk.bf16.mxu1 %vm8795_vm0, %v11416_v44  ;;  %v2484_v28 = vrot.slane %v2476_v15, %v9250_v3  ;;  %v2491_v41 = vrot.slane %v2477_v54, %v9250_v3 }
 0x275   : > { %v9916_v63 = vrot.slane %v3052_v16, %v9256_v11  ;;  %8092 = vmatprep.subr.bf16.mxu1 %v11416_v44  ;;  %v9929_v59 = vrot.slane %v2340_v38, %v9250_v3  ;;  %v1521_v16 = vcombine.high %v1476_v10, %v1508_v26  ;;  %v1657_v17 = vcombine.high %v1612_v4, %v1644_v52  ;;  %v9943_v10 = vpop.permute.xlu1 %814  ;;  %v9958_v38 = vpop.permute.xlu0 %800 }
 0x276   : > { %v9923_v61 = vrot.slane %v3084_v23, %v9256_v11  ;;  %v2661_v42 = vcombine.high %v9692_v24, %v9698_v34  ;;  %v2693_v9 = vcombine.high %v9704_v29, %v9712_v62  ;;  %v2797_v15 = vcombine.high %v9718_v27, %v9726_v50 }
 0x277   : > { %v2829_v23 = vcombine.high %v9732_v33, %v9738_v48  ;;  %v2492_v54 = vcombine.low %v9753_v51, %v9827_v58  ;;  %v1937_v26 = vpack.c.bf16 %v1657_v17, %v1521_v16  ;;  %v2493_v29 = vcombine.high %v9753_v51, %v9827_v58 }
 0x278   : > { %v3116_v32 = vcombine.low %v9916_v63, %v9923_v61  ;;  %v9946_v24 = vrot.slane %v2661_v42, %v9256_v11  ;;  %v2707_v34 = vrot.slane %v2693_v9, %v9256_v11  ;;  %v2811_v27 = vrot.slane %v2797_v15, %v9256_v11 }
 0x279   : > { %v2843_v50 = vrot.slane %v2829_v23, %v9256_v11  ;;  %v2500_v33 = vrot.slane %v2492_v54, %v9250_v3  ;;  %v2507_v4 = vrot.slane %v2493_v29, %v9250_v3  ;;  %v2356_v52 = vcombine.low %v9795_v21, %v2029_v35 }
 0x27a   : > { %v3132_v62 = vpack.c.bf16 %v3116_v32, %v2980_v1  ;;  %v2714_v48 = vcombine.low %v9946_v24, %v2707_v34  ;;  %v2357_v42 = vcombine.high %v9795_v21, %v2029_v35  ;;  %v827_v35 = vpop.permute.xlu1 %826 }
 0x27b   : > { %8089 = vmatmul.mubr.msk.bf16.vlgmr.msra.gmra.mrb[24].mxu1 %vm4332_vm1, %v1937_v26  ;;  %v2850_v51 = vcombine.low %v2811_v27, %v2843_v50  ;;  %v2540_v58 = vcombine.low %v2484_v28, %v2500_v33  ;;  %v2541_v1 = vcombine.high %v2484_v28, %v2500_v33  ;;  %v2556_v17 = vcombine.low %v2491_v41, %v2507_v4 }
 0x27c   : > { %v4713_v16 = vsel %vm4332_vm1, %v3132_v62, 0  ;;  %v2557_v9 = vcombine.high %v2491_v41, %v2507_v4  ;;  %v2364_v32 = vrot.slane %v2356_v52, %v9250_v3  ;;  %v2371_v15 = vrot.slane %v2357_v42, %v9250_v3  ;;  %8094 = vmatprep.mubr.msk.bf16.mxu1 %vm8795_vm0, %v11416_v44 }
 0x27d   : > { %8105 = vmatpush3.bf16.xpose.msra.mxu0 %v4713_v16  ;;  %v3130_v23 = vpack.c.bf16 %v2850_v51, %v2714_v48  ;;  %v9965_v54 = vrot.slane %v2540_v58, %v9256_v11  ;;  %v9968_v21 = vrot.slane %v2541_v1, %v9256_v11  ;;  %v1893_v28 = vcombine.high %v9802_v47, %v9805_v6  ;;  %v9995_v58 = vpop.permute.xlu0 %812 }
 0x27e   : > { %8116 = vmatprep.subr.bf16.mxu0 %v11416_v44  ;;  %v1724_v41 = vcombine.low %v9821_v25, %v9834_v60  ;;  %v1725_v26 = vcombine.high %v9821_v25, %v9834_v60  ;;  %v2404_v29 = vcombine.low %v9929_v59, %v2364_v32  ;;  %v1756_v62 = vcombine.low %v9863_v45, %v9882_v14 }
 0x27f   : > { %v2355_v33 = vrot.slane %v2341_v49, %v9250_v3  ;;  %v4619_v48 = vsel %vm4332_vm1, %v3130_v23, 0  ;;  %v2405_v4 = vcombine.high %v9929_v59, %v2364_v32  ;;  %v1757_v52 = vcombine.high %v9863_v45, %v9882_v14  ;;  %v10023_v23 = vpop.permute.xlu1 %838 }
 0x280   : > { %8093 = vmatpush3.bf16.xpose.msra.mxu1 %v4619_v48  ;;  %v9988_v42 = vrot.slane %v2556_v17, %v9256_v11  ;;  %v9991_v16 = vrot.slane %v2557_v9, %v9256_v11  ;;  %v11417_v59 = vcombine.high %v9559_v30, %v9567_v43  ;;  %v11418_v17 = vcombine.high %v9573_v31, %v9576_v22 }
 0x281   : > { %v2420_v49 = vcombine.low %v2355_v33, %v2371_v15  ;;  %v2421_v1 = vcombine.high %v2355_v33, %v2371_v15  ;;  %8098 = vmatprep.subr.bf16.mxu1 %v11416_v44  ;;  %v10009_v48 = vrot.slane %v2404_v29, %v9256_v11  ;;  %v11419_v15 = vcombine.high %v9587_v37, %v9590_v39 }
 0x282   : > { %v1483_v32 = vrot.slane %v11417_v59, %v9256_v11  ;;  %v1515_v9 = vrot.slane %v11418_v17, %v9256_v11  ;;  %v11420_v30 = vcombine.high %v9607_v36, %v9610_v13  ;;  %v10020_v59 = vrot.slane %v2405_v4, %v9256_v11 }
 0x283   : > { %v1619_v33 = vrot.slane %v11419_v15, %v9256_v11  ;;  %v2715_v22 = vcombine.high %v9946_v24, %v2707_v34  ;;  %v2851_v17 = vcombine.high %v2811_v27, %v2843_v50  ;;  %v10026_v51 = vrot.slane %v1724_v41, %v9256_v11  ;;  %v825_v15 = vpop.permute.xlu0 %824 }
 0x284   : > { %v1651_v43 = vrot.slane %v11420_v30, %v9256_v11  ;;  %v1522_v31 = vcombine.low %v1483_v32, %v1515_v9  ;;  %v10029_v37 = vrot.slane %v1756_v62, %v9256_v11  ;;  %v11421_v39 = vcombine.low %v9789_v7, %v9792_v57 }
 0x285   : > { %v10038_v13 = vrot.slane %v2420_v49, %v9256_v11  ;;  %v10041_v24 = vrot.slane %v2421_v1, %v9256_v11  ;;  %v3131_v34 = vpack.c.bf16 %v2851_v17, %v2715_v22  ;;  %v11422_v27 = vcombine.low %v9802_v47, %v9805_v6  ;;  %v10062_v17 = vpop.permute.xlu1 %3148 }
 0x286   : > { %v1658_v29 = vcombine.low %v1619_v33, %v1651_v43  ;;  %v10035_v36 = vrot.slane %v11421_v39, %v9256_v11  ;;  %v1788_v62 = vcombine.low %v10026_v51, %v10029_v37  ;;  %v2917_v4 = vcombine.high %v9849_v5, %v9852_v20 }
 0x287   : > { %v10047_v50 = vrot.slane %v11422_v27, %v9256_v11  ;;  %v2949_v49 = vcombine.high %v9855_v2, %v9858_v0  ;;  %v4666_v1 = vsel %vm4332_vm1, %v3131_v34, 0  ;;  %v3053_v22 = vcombine.high %v9873_v53, %v9879_v19 }
 0x288   : > { %v1938_v41 = vpack.c.bf16 %v1658_v29, %v1522_v31  ;;  %v3085_v31 = vcombine.high %v9888_v12, %v9891_v46  ;;  %v10066_v20 = vrot.slane %v2917_v4, %v9256_v11  ;;  %v1284_v2 = vcombine.low %v9893_v55, %v827_v35 }
 0x289   : > { %v1924_v30 = vcombine.low %v10035_v36, %v10047_v50  ;;  %v10069_v5 = vrot.slane %v2949_v49, %v9256_v11  ;;  %v1285_v0 = vcombine.high %v9893_v55, %v827_v35  ;;  %v10074_v53 = vrot.slane %v3053_v22, %v9256_v11 }
 0x28a   : > { %8095 = vmatmul.mubr.msk.bf16.vlgmr.msra.gmra.mrb[28].mxu1 %vm4332_vm1, %v1938_v41  ;;  %v10077_v46 = vrot.slane %v3085_v31, %v9256_v11  ;;  %v1292_v19 = vrot.slane %v1284_v2, %v9250_v3  ;;  %v1148_v55 = vcombine.low %v9958_v38, %v825_v15  ;;  %v1149_v34 = vcombine.high %v9958_v38, %v825_v15  ;;  %v837_v38 = vpop.permute.xlu0 %836 }
 0x28b   : > { %8099 = vmatpush3.bf16.xpose.msra.mxu1 %v4666_v1  ;;  %v1940_v29 = vpack.c.bf16 %v1924_v30, %v1788_v62  ;;  %8100 = vmatprep.mubr.msk.bf16.mxu1 %vm8795_vm0, %v11416_v44  ;;  %v2982_v12 = vcombine.low %v10066_v20, %v10069_v5  ;;  %v1299_v39 = vrot.slane %v1285_v0, %v9250_v3 }
 0x28c   : > { %8110 = vmatprep.subr.bf16.mxu1 %v11416_v44  ;;  %v3118_v35 = vcombine.low %v10074_v53, %v10077_v46  ;;  %v1523_v27 = vcombine.high %v1483_v32, %v1515_v9  ;;  %v1659_v41 = vcombine.high %v1619_v33, %v1651_v43  ;;  %v1156_v62 = vrot.slane %v1148_v55, %v9250_v3 }
 0x28d   : > { %8107 = vmatmul.mubr.msk.bf16.vlgmr.msra.gmra.mrb[8].mxu0 %vm4332_vm1, %v1940_v29  ;;  %v2981_v4 = vcombine.high %v9896_v56, %v9899_v40  ;;  %v3117_v49 = vcombine.high %v9916_v63, %v9923_v61  ;;  %v10102_v1 = vrot.slane %v1725_v26, %v9256_v11  ;;  %v1163_v9 = vrot.slane %v1149_v34, %v9250_v3  ;;  %v10111_v56 = vpop.permute.xlu1 %3160 }
 0x28e   : > { %8118 = vmatprep.mubr.msk.bf16.mxu0 %vm8795_vm0, %v11416_v44  ;;  %v3134_v32 = vpack.c.bf16 %v3118_v35, %v2982_v12  ;;  %v1939_v33 = vpack.c.bf16 %v1659_v41, %v1523_v27  ;;  %v10109_v43 = vrot.slane %v1757_v52, %v9256_v11  ;;  %v11423_v25 = vcombine.high %v9789_v7, %v9792_v57 }
 0x28f   : > { %v3133_v40 = vpack.c.bf16 %v3117_v49, %v2981_v4  ;;  %v10123_v63 = vrot.slane %v1893_v28, %v9256_v11  ;;  %v1300_v45 = vcombine.low %v9943_v10, %v10023_v23  ;;  %v1301_v26 = vcombine.high %v9943_v10, %v10023_v23  ;;  %v8586_v10 = vld [vmem:[%s11332_s4 + $0x2] ss:$0 sm:$0xff] }
 0x290   : > { %v10117_v60 = vrot.slane %v11423_v25, %v9256_v11  ;;  %v4807_v14 = vsel %vm4332_vm1, %v3134_v32, 0  ;;  %v1790_v61 = vcombine.low %v10102_v1, %v10109_v43  ;;  %v1164_v7 = vcombine.low %v9995_v58, %v837_v38 }
 0x291   : > { %8117 = vmatpush3.bf16.xpose.msra.mxu0 %v4807_v14  ;;  %v4760_v57 = vsel %vm4332_vm1, %v3133_v40, 0  ;;  %v1308_v6 = vrot.slane %v1300_v45, %v9250_v3  ;;  %v1165_v28 = vcombine.high %v9995_v58, %v837_v38  ;;  %v1315_v52 = vrot.slane %v1301_v26, %v9250_v3  ;;  %v10152_v55 = vpop.permute.xlu1 %3184 }
 0x292   : > { %8101 = vmatmul.mubr.msk.bf16.vlgmr.msra.gmra.mrb[32].mxu1 %vm4332_vm1, %v1939_v33  ;;  %v1926_v47 = vcombine.low %v10117_v60, %v10123_v63  ;;  %v1172_v15 = vrot.slane %v1164_v7, %v9250_v3  ;;  %v10145_v23 = vadd.f32 %v8586_v10, %v9316_v18  ;;  %8128 = vmatprep.subr.bf16.mxu0 %v11416_v44 }
 0x293   : > { %8111 = vmatpush3.bf16.xpose.msra.mxu1 %v4760_v57  ;;  %8112 = vmatprep.mubr.msk.bf16.mxu1 %vm8795_vm0, %v11416_v44  ;;  %v1348_v22 = vcombine.low %v1292_v19, %v1308_v6  ;;  %v1349_v31 = vcombine.high %v1292_v19, %v1308_v6  ;;  %v1179_v58 = vrot.slane %v1165_v28, %v9250_v3 }
 0x294   : > { %v1942_v30 = vpack.c.bf16 %v1926_v47, %v1790_v61  ;;  %8122 = vmatprep.subr.bf16.mxu1 %v11416_v44  ;;  %v1364_v2 = vcombine.low %v1299_v39, %v1315_v52  ;;  %v1365_v0 = vcombine.high %v1299_v39, %v1315_v52  ;;  %v1212_v29 = vcombine.low %v1156_v62, %v1172_v15 }
 0x295   : > { %v1213_v12 = vcombine.high %v1156_v62, %v1172_v15  ;;  %11424 = vst [vmem:[#allocation23_spill] sm:$0xff] %v10152_v55  ;;  %v1356_v18 = vrot.slane %v1348_v22, %v9256_v11  ;;  %v1363_v35 = vrot.slane %v1349_v31, %v9256_v11  ;;  %v1228_v34 = vcombine.low %v1163_v9, %v1179_v58 }
 0x296   : > { %v1229_v27 = vcombine.high %v1163_v9, %v1179_v58  ;;  %3158 = vrot.lane.b32.xlu1 %v10145_v23, %s8787_s18  ;;  %v1372_v19 = vrot.slane %v1364_v2, %v9256_v11  ;;  %v1379_v41 = vrot.slane %v1365_v0, %v9256_v11  ;;  %v1220_v39 = vrot.slane %v1212_v29, %v9256_v11 }
 0x297   : > { %v1227_v62 = vrot.slane %v1213_v12, %v9256_v11  ;;  %3146 = vrot.lane.b32.xlu0 %v10145_v23, %s8788_s20  ;;  %v7738_v4 = vcombine.low %v1356_v18, %v1363_v35  ;;  %v7740_v49 = vcombine.high %v1356_v18, %v1363_v35  ;;  %v1236_v38 = vrot.slane %v1228_v34, %v9256_v11  ;;  %v10240_v34 = vpop.permute.xlu0 %3172 }
 0x298   : > { %v1243_v32 = vrot.slane %v1229_v27, %v9256_v11  ;;  %8119 = vmatmul.mubr.msk.bf16.vlgmr.msra.gmra.mrb[12].mxu0 %vm4332_vm1, %v1942_v30  ;;  %v7742_v9 = vcombine.low %v1372_v19, %v1379_v41  ;;  %v7744_v33 = vcombine.high %v1372_v19, %v1379_v41  ;;  %v7774_v45 = vcombine.low %v9988_v42, %v9991_v16 }
 0x299   : > { %v7730_v40 = vcombine.low %v1220_v39, %v1227_v62  ;;  %v7732_v25 = vcombine.high %v1220_v39, %v1227_v62  ;;  %v7776_v14 = vcombine.high %v9988_v42, %v9991_v16  ;;  %v7762_v7 = vcombine.low %v10009_v48, %v10020_v59  ;;  %8130 = vmatprep.mubr.msk.bf16.mxu0 %vm8795_vm0, %v11416_v44  ;;  %v10185_v42 = vpop.permute.xlu1 %3196 }
 0x29a   : > { %v7734_v61 = vcombine.low %v1236_v38, %v1243_v32  ;;  %v7736_v26 = vcombine.high %v1236_v38, %v1243_v32  ;;  %3170 = vrot.lane.b32.xlu1 %v10145_v23, %s8789_s21  ;;  %v7764_v57 = vcombine.high %v10009_v48, %v10020_v59  ;;  %11425 = vst [vmem:[#allocation24_spill] sm:$0xff] %v10185_v42 }
 0x29b   : > { %v10178_v47 = vrot.slane %v7730_v40, %v9250_v3  ;;  %v10181_v6 = vrot.slane %v7732_v25, %v9250_v3  ;;  %v7766_v16 = vcombine.low %v10038_v13, %v10041_v24  ;;  %v7768_v28 = vcombine.high %v10038_v13, %v10041_v24  ;;  %3182 = vrot.lane.b32.xlu0 %v10145_v23, %s8790_s9 }
 0x29c   : > { %v10192_v52 = vrot.slane %v7734_v61, %v9250_v3  ;;  %v10195_v48 = vrot.slane %v7736_v26, %v9250_v3  ;;  %v10200_v59 = vrot.slane %v7738_v4, %v9250_v3  ;;  %v10203_v15 = vrot.slane %v7740_v49, %v9250_v3 }
 0x29d   : > { %v10206_v10 = vrot.slane %v7742_v9, %v9250_v3  ;;  %v10209_v13 = vrot.slane %v7744_v33, %v9250_v3  ;;  %v1740_v24 = vcombine.low %v10178_v47, %v10181_v6  ;;  %v1789_v22 = vcombine.high %v10026_v51, %v10029_v37 }
 0x29e   : > { %v1772_v30 = vcombine.low %v10192_v52, %v10195_v48  ;;  %v1925_v31 = vcombine.high %v10035_v36, %v10047_v50  ;;  %3194 = vrot.lane.b32.xlu1 %v10145_v23, %s8791_s7  ;;  %v2983_v58 = vcombine.high %v10066_v20, %v10069_v5  ;;  %v3119_v2 = vcombine.high %v10074_v53, %v10077_v46  ;;  %v10238_v46 = vpop.permute.xlu1 %3144 }
 0x29f   : > { %v2867_v0 = vrot.slane %v7762_v7, %v9250_v3  ;;  %v2883_v29 = vrot.slane %v7764_v57, %v9250_v3  ;;  %v2899_v18 = vrot.slane %v7766_v16, %v9250_v3  ;;  %v2915_v51 = vrot.slane %v7768_v28, %v9250_v3 }
 0x2a0   : > { %v1941_v12 = vpack.c.bf16 %v1925_v31, %v1789_v22  ;;  %v11426_v37 = vcombine.low %v9965_v54, %v9968_v21  ;;  %v3135_v50 = vpack.c.bf16 %v3119_v2, %v2983_v58  ;;  %v11427_v20 = vcombine.high %v9965_v54, %v9968_v21 }
 0x2a1   : > { %v2932_v35 = vcombine.low %v2867_v0, %v2883_v29  ;;  %v3035_v53 = vrot.slane %v7774_v45, %v9250_v3  ;;  %v1876_v27 = vcombine.low %v10200_v59, %v10203_v15  ;;  %v2964_v19 = vcombine.low %v2899_v18, %v2915_v51 }
 0x2a2   : > { %v3003_v36 = vrot.slane %v11426_v37, %v9250_v3  ;;  %v3019_v5 = vrot.slane %v11427_v20, %v9250_v3  ;;  %8113 = vmatmul.mubr.msk.bf16.vlgmr.msra.gmra.mrb[36].mxu1 %vm4332_vm1, %v1941_v12  ;;  %v3051_v41 = vrot.slane %v7776_v14, %v9250_v3  ;;  %v1908_v39 = vcombine.low %v10206_v10, %v10209_v13 }
 0x2a3   : > { %v4854_v54 = vsel %vm4332_vm1, %v3135_v50, 0  ;;  %v2940_v21 = vrot.slane %v2932_v35, %v9256_v11  ;;  %8124 = vmatprep.mubr.msk.bf16.mxu1 %vm8795_vm0, %v11416_v44  ;;  %3206 = vrot.lane.b32.xlu1 %v10145_v23, %s8792_s23  ;;  %v2972_v4 = vrot.slane %v2964_v19, %v9256_v11  ;;  %v1791_v38 = vcombine.high %v10102_v1, %v10109_v43 }
 0x2a4   : > { %v3068_v62 = vcombine.low %v3003_v36, %v3019_v5  ;;  %8123 = vmatpush3.bf16.xpose.msra.mxu1 %v4854_v54  ;;  %v3100_v49 = vcombine.low %v3035_v53, %v3051_v41  ;;  %v1927_v32 = vcombine.high %v10117_v60, %v10123_v63  ;;  %v1748_v33 = vrot.slane %v1740_v24, %v9256_v11  ;;  %v3157_v60 = vpop.permute.xlu1 %3156  ;;  %v10267_v63 = vpop.permute.xlu0 %3208 }
 0x2a5   : > { %8134 = vmatprep.subr.bf16.mxu1 %v11416_v44  ;;  %v1780_v40 = vrot.slane %v1772_v30, %v9256_v11  ;;  %v2933_v25 = vcombine.high %v2867_v0, %v2883_v29  ;;  %v2984_v45 = vcombine.low %v2940_v21, %v2972_v4  ;;  %v2985_v61 = vcombine.high %v2940_v21, %v2972_v4 }
 0x2a6   : > { %v3076_v9 = vrot.slane %v3068_v62, %v9256_v11  ;;  %v3108_v14 = vrot.slane %v3100_v49, %v9256_v11  ;;  %v1884_v26 = vrot.slane %v1876_v27, %v9256_v11  ;;  %v1916_v1 = vrot.slane %v1908_v39, %v9256_v11  ;;  %11428 = vst [vmem:[#allocation25_spill] sm:$0xff] %v10267_v63 }
 0x2a7   : > { %v2947_v43 = vrot.slane %v2933_v25, %v9256_v11  ;;  %3218 = vrot.lane.b32.xlu1 %v10145_v23, %s8794_s15  ;;  %v2965_v16 = vcombine.high %v2899_v18, %v2915_v51  ;;  %v3069_v28 = vcombine.high %v3003_v36, %v3019_v5  ;;  %v1741_v24 = vcombine.high %v10178_v47, %v10181_v6 }
 0x2a8   : > { %v3120_v7 = vcombine.low %v3076_v9, %v3108_v14  ;;  %v3121_v57 = vcombine.high %v3076_v9, %v3108_v14  ;;  %v1943_v30 = vpack.c.bf16 %v1927_v32, %v1791_v38  ;;  %v1792_v22 = vcombine.low %v1748_v33, %v1780_v40  ;;  %v3169_v27 = vpop.permute.xlu0 %3168 }
 0x2a9   : > { %v3101_v31 = vcombine.high %v3035_v53, %v3051_v41  ;;  %v2979_v0 = vrot.slane %v2965_v16, %v9256_v11  ;;  %v3083_v29 = vrot.slane %v3069_v28, %v9256_v11  ;;  %v1928_v12 = vcombine.low %v1884_v26, %v1916_v1  ;;  %v10283_v53 = vpop.permute.xlu1 %3180 }
 0x2aa   : > { %v3136_v58 = vpack.c.bf16 %v3120_v7, %v2984_v45  ;;  %v3137_v2 = vpack.c.bf16 %v3121_v57, %v2985_v61  ;;  %v1793_v37 = vcombine.high %v1748_v33, %v1780_v40  ;;  %v1929_v50 = vcombine.high %v1884_v26, %v1916_v1 }
 0x2ab   : > { %8125 = vmatmul.mubr.msk.bf16.vlgmr.msra.gmra.mrb[40].mxu1 %vm4332_vm1, %v1943_v30  ;;  %v3115_v18 = vrot.slane %v3101_v31, %v9256_v11  ;;  %v2986_v6 = vcombine.low %v2947_v43, %v2979_v0  ;;  %v2987_v36 = vcombine.high %v2947_v43, %v2979_v0  ;;  %v1773_v35 = vcombine.high %v10192_v52, %v10195_v48 }
 0x2ac   : > { %v4901_v51 = vsel %vm4332_vm1, %v3136_v58, 0  ;;  %v4948_v47 = vsel %vm4332_vm1, %v3137_v2, 0  ;;  %8136 = vmatprep.mubr.msk.bf16.mxu1 %vm8795_vm0, %v11416_v44  ;;  %v1877_v19 = vcombine.high %v10200_v59, %v10203_v15  ;;  %v1909_v41 = vcombine.high %v10206_v10, %v10209_v13  ;;  %v3205_v9 = vpop.permute.xlu0 %3204  ;;  %v11429_v58 = vld [vmem:[#allocation22_spill] sm:$0xff] }
 0x2ad   : > { %8129 = vmatpush3.bf16.xpose.msra.mxu0 %v4901_v51  ;;  %8135 = vmatpush3.bf16.xpose.msra.mxu1 %v4948_v47  ;;  %v3122_v20 = vcombine.low %v3083_v29, %v3115_v18  ;;  %v3123_v5 = vcombine.high %v3083_v29, %v3115_v18  ;;  %v1944_v39 = vpack.c.bf16 %v1928_v12, %v1792_v22  ;;  %v3193_v13 = vpop.permute.xlu1 %3192 }
 0x2ae   : > { %8140 = vmatprep.subr.bf16.mxu0 %v11416_v44  ;;  %8146 = vmatprep.subr.bf16.mxu1 %v11416_v44  ;;  %v1945_v54 = vpack.c.bf16 %v1929_v50, %v1793_v37  ;;  %v3228_v21 = vcombine.low %v9254_v8, %v3157_v60  ;;  %v1755_v62 = vrot.slane %v1741_v24, %v9256_v11 }
 0x2af   : > { %v3138_v52 = vpack.c.bf16 %v3122_v20, %v2986_v6  ;;  %v3139_v48 = vpack.c.bf16 %v3123_v5, %v2987_v36  ;;  %v1787_v4 = vrot.slane %v1773_v35, %v9256_v11  ;;  %v3229_v49 = vcombine.high %v9254_v8, %v3157_v60 }
 0x2b0   : > { %v1891_v59 = vrot.slane %v1877_v19, %v9256_v11  ;;  %v1923_v15 = vrot.slane %v1909_v41, %v9256_v11  ;;  %v3236_v10 = vrot.slane %v3228_v21, %v9250_v3  ;;  %v3244_v38 = vcombine.low %v10238_v46, %v3169_v27  ;;  %v3217_v28 = vpop.permute.xlu0 %3216 }
 0x2b1   : > { %v3245_v32 = vcombine.high %v10238_v46, %v3169_v27  ;;  %v4995_v33 = vsel %vm4332_vm1, %v3138_v52, 0  ;;  %v5042_v8 = vsel %vm4332_vm1, %v3139_v48, 0  ;;  %v1794_v40 = vcombine.low %v1755_v62, %v1787_v4  ;;  %v3163_v16 = vpop.permute.xlu1 %3162 }
 0x2b2   : > { %v3243_v25 = vrot.slane %v3229_v49, %v9250_v3  ;;  %v3252_v45 = vrot.slane %v3244_v38, %v9250_v3  ;;  %v1930_v46 = vcombine.low %v1891_v59, %v1923_v15  ;;  %v1795_v14 = vcombine.high %v1755_v62, %v1787_v4 }
 0x2b3   : > { %v1931_v61 = vcombine.high %v1891_v59, %v1923_v15  ;;  %v3259_v26 = vrot.slane %v3245_v32, %v9250_v3  ;;  %v3636_v2 = vcombine.low %v11429_v58, %v3163_v16  ;;  %v3637_v50 = vcombine.high %v11429_v58, %v3163_v16 }
 0x2b4   : > { %8131 = vmatmul.mubr.msk.bf16.vlgmr.msra.gmra.mrb[16].mxu0 %vm4332_vm1, %v1944_v39  ;;  %8137 = vmatmul.mubr.msk.bf16.vlgmr.msra.gmra.mrb[44].mxu1 %vm4332_vm1, %v1945_v54  ;;  %v3292_v1 = vcombine.low %v3236_v10, %v3252_v45  ;;  %v3293_v43 = vcombine.high %v3236_v10, %v3252_v45  ;;  %v1946_v24 = vpack.c.bf16 %v1930_v46, %v1794_v40  ;;  %v3151_v20 = vpop.permute.xlu0 %3150 }
 0x2b5   : > { %8141 = vmatpush3.bf16.xpose.msra.mxu0 %v4995_v33  ;;  %8147 = vmatpush3.bf16.xpose.msra.mxu1 %v5042_v8  ;;  %v3308_v57 = vcombine.low %v3243_v25, %v3259_v26  ;;  %v1947_v30 = vpack.c.bf16 %v1931_v61, %v1795_v14  ;;  %v3309_v22 = vcombine.high %v3243_v25, %v3259_v26  ;;  %v3175_v6 = vpop.permute.xlu1 %3174 }
 0x2b6   : > { %8142 = vmatprep.mubr.msk.bf16.mxu0 %vm8795_vm0, %v11416_v44  ;;  %8148 = vmatprep.mubr.msk.bf16.mxu1 %vm8795_vm0, %v11416_v44  ;;  %v3300_v60 = vrot.slane %v3292_v1, %v9256_v11  ;;  %v3307_v7 = vrot.slane %v3293_v43, %v9256_v11  ;;  %v3260_v18 = vcombine.low %v10283_v53, %v3205_v9 }
 0x2b7   : > { %8152 = vmatprep.subr.bf16.mxu0 %v11416_v44  ;;  %8158 = vmatprep.subr.bf16.mxu1 %v11416_v44  ;;  %v3316_v31 = vrot.slane %v3308_v57, %v9256_v11  ;;  %v3323_v0 = vrot.slane %v3309_v22, %v9256_v11  ;;  %v3644_v51 = vrot.slane %v3636_v2, %v9250_v3 }
 0x2b8   : > { %v7777_v29 = vcombine.low %v3300_v60, %v3307_v7  ;;  %v7779_v12 = vcombine.high %v3300_v60, %v3307_v7  ;;  %v3261_v47 = vcombine.high %v10283_v53, %v3205_v9  ;;  %v3276_v36 = vcombine.low %v3193_v13, %v3217_v28 }
 0x2b9   : > { %v7781_v37 = vcombine.low %v3316_v31, %v3323_v0  ;;  %v3277_v35 = vcombine.high %v3193_v13, %v3217_v28  ;;  %v7783_v27 = vcombine.high %v3316_v31, %v3323_v0  ;;  %v3268_v19 = vrot.slane %v3260_v18, %v9250_v3 }
 0x2ba   : > { %v10329_v5 = vrot.slane %v7777_v29, %v9250_v3  ;;  %v3652_v41 = vcombine.low %v3151_v20, %v3175_v6  ;;  %v3275_v39 = vrot.slane %v3261_v47, %v9250_v3  ;;  %v3284_v54 = vrot.slane %v3276_v36, %v9250_v3 }
 0x2bb   : > { %v3291_v52 = vrot.slane %v3277_v35, %v9250_v3  ;;  %v3653_v48 = vcombine.high %v3151_v20, %v3175_v6  ;;  %v10336_v53 = vrot.slane %v7779_v12, %v9250_v3  ;;  %v10339_v21 = vrot.slane %v7781_v37, %v9250_v3 }
 0x2bc   : > { %8143 = vmatmul.mubr.msk.bf16.vlgmr.msra.gmra.mrb[20].mxu0 %vm4332_vm1, %v1946_v24  ;;  %8149 = vmatmul.mubr.msk.bf16.vlgmr.msra.gmra.mrb[48].mxu1 %vm4332_vm1, %v1947_v30  ;;  %v3651_v62 = vrot.slane %v3637_v50, %v9250_v3  ;;  %v3660_v4 = vrot.slane %v3652_v41, %v9250_v3  ;;  %v3324_v49 = vcombine.low %v3268_v19, %v3284_v54 }
 0x2bd   : > { %8154 = vmatprep.mubr.msk.bf16.mxu0 %vm8795_vm0, %v11416_v44  ;;  %8160 = vmatprep.mubr.msk.bf16.mxu1 %vm8795_vm0, %v11416_v44  ;;  %v3325_v59 = vcombine.high %v3268_v19, %v3284_v54  ;;  %v3340_v15 = vcombine.low %v3275_v39, %v3291_v52  ;;  %v3341_v10 = vcombine.high %v3275_v39, %v3291_v52 }
 0x2be   : > { %v10344_v13 = vrot.slane %v7783_v27, %v9250_v3  ;;  %v3667_v38 = vrot.slane %v3653_v48, %v9250_v3  ;;  %v3700_v32 = vcombine.low %v3644_v51, %v3660_v4  ;;  %v3701_v9 = vcombine.high %v3644_v51, %v3660_v4  ;;  %v10411_v4 = vpop.permute.xlu0 %3186 }
 0x2bf   : > { %v10348_v33 = vrot.slane %v3324_v49, %v9256_v11  ;;  %v10351_v8 = vrot.slane %v3325_v59, %v9256_v11  ;;  %v10354_v40 = vrot.slane %v3340_v15, %v9256_v11  ;;  %v10357_v25 = vrot.slane %v3341_v10, %v9256_v11  ;;  %11431 = vst [vmem:[#allocation26_spill] sm:$0xff] %v10411_v4 }
 0x2c0   : > { %v3708_v45 = vrot.slane %v3700_v32, %v9256_v11  ;;  %v3715_v46 = vrot.slane %v3701_v9, %v9256_v11  ;;  %v3716_v14 = vcombine.low %v3651_v62, %v3667_v38  ;;  %v3717_v61 = vcombine.high %v3651_v62, %v3667_v38  ;;  %v10409_v62 = vpop.permute.xlu1 %3198 }
 0x2c1   : > { %v7778_v26 = vcombine.low %v10348_v33, %v10351_v8  ;;  %v7780_v1 = vcombine.high %v10348_v33, %v10351_v8  ;;  %v7782_v43 = vcombine.low %v10354_v40, %v10357_v25  ;;  %v7784_v60 = vcombine.high %v10354_v40, %v10357_v25  ;;  %11430 = vst [vmem:[#allocation22_spill] sm:$0xff] %v10409_v62 }
 0x2c2   : > { %v3724_v7 = vrot.slane %v3716_v14, %v9256_v11  ;;  %v3731_v57 = vrot.slane %v3717_v61, %v9256_v11  ;;  %v7801_v16 = vcombine.low %v3708_v45, %v3715_v46  ;;  %v7803_v28 = vcombine.high %v3708_v45, %v3715_v46 }
 0x2c3   : > { %v3837_v2 = vcombine.high %v10329_v5, %v10336_v53  ;;  %v3869_v0 = vcombine.high %v10339_v21, %v10344_v13 }
 0x2c4   : > { %v4188_v24 = vrot.slane %v7801_v16, %v9250_v3  ;;  %v4204_v30 = vrot.slane %v7803_v28, %v9250_v3  ;;  %v7805_v22 = vcombine.low %v3724_v7, %v3731_v57  ;;  %v7807_v31 = vcombine.high %v3724_v7, %v3731_v57 }
 0x2c5   : > { %v10380_v50 = vrot.slane %v3837_v2, %v9256_v11  ;;  %v10383_v18 = vrot.slane %v3869_v0, %v9256_v11  ;;  %v3836_v7 = vcombine.low %v10329_v5, %v10336_v53  ;;  %v3868_v57 = vcombine.low %v10339_v21, %v10344_v13 }
 0x2c6   : > { %v4220_v29 = vrot.slane %v7805_v22, %v9250_v3  ;;  %v4236_v12 = vrot.slane %v7807_v31, %v9250_v3  ;;  %v4244_v37 = vcombine.low %v4188_v24, %v4204_v30  ;;  %v4245_v20 = vcombine.high %v4188_v24, %v4204_v30 }
 0x2c7   : > { %v3902_v6 = vcombine.low %v10380_v50, %v10383_v18  ;;  %v3903_v36 = vcombine.high %v10380_v50, %v10383_v18  ;;  %v3876_v5 = vrot.slane %v3868_v57, %v9256_v11 }
 0x2c8   : > { %v10386_v51 = vrot.slane %v4244_v37, %v9256_v11  ;;  %v4276_v47 = vcombine.low %v4220_v29, %v4236_v12  ;;  %v4277_v27 = vcombine.high %v4220_v29, %v4236_v12  ;;  %v10400_v39 = vrot.slane %v4245_v20, %v9256_v11 }
 0x2c9   : > { %v3844_v12 = vrot.slane %v3836_v7, %v9256_v11 }
 0x2ca   : > { %v10393_v35 = vrot.slane %v4276_v47, %v9256_v11  ;;  %v10403_v54 = vrot.slane %v4277_v27, %v9256_v11 }
 0x308   : > { %v3159_v49 = vpop.permute.xlu1 %3158 }
 0x309   : > { %v3364_v59 = vcombine.low %v10145_v23, %v3159_v49  ;;  %v3365_v15 = vcombine.high %v10145_v23, %v3159_v49  ;;  %v3147_v10 = vpop.permute.xlu0 %3146 }
 0x30b   : > { %v3372_v32 = vrot.slane %v3364_v59, %v9250_v3  ;;  %v3379_v9 = vrot.slane %v3365_v15, %v9250_v3 }
 0x30c   : > { %v3171_v38 = vpop.permute.xlu1 %3170 }
 0x30d   : > { %v3380_v45 = vcombine.low %v3147_v10, %v3171_v38  ;;  %v3381_v46 = vcombine.high %v3147_v10, %v3171_v38  ;;  %v3183_v29 = vpop.permute.xlu0 %3182  ;;  %v3900_v38 = vcombine.low %v3844_v12, %v3876_v5 }
 0x30f   : > { %v3388_v14 = vrot.slane %v3380_v45, %v9250_v3  ;;  %v3395_v61 = vrot.slane %v3381_v46, %v9250_v3 }
 0x310   : > { %v3195_v16 = vpop.permute.xlu1 %3194 }
 0x311   : > { %v3428_v23 = vcombine.low %v3372_v32, %v3388_v14  ;;  %v3429_v28 = vcombine.high %v3372_v32, %v3388_v14  ;;  %v3444_v24 = vcombine.low %v3379_v9, %v3395_v61  ;;  %v3445_v30 = vcombine.high %v3379_v9, %v3395_v61 }
 0x312   : > { %v3901_v32 = vcombine.high %v3844_v12, %v3876_v5 }
 0x313   : > { %v3436_v22 = vrot.slane %v3428_v23, %v9256_v11  ;;  %v3443_v31 = vrot.slane %v3429_v28, %v9256_v11  ;;  %v3452_v2 = vrot.slane %v3444_v24, %v9256_v11  ;;  %v3459_v0 = vrot.slane %v3445_v30, %v9256_v11 }
 0x315   : > { %v7785_v53 = vcombine.low %v3436_v22, %v3443_v31  ;;  %v7787_v21 = vcombine.high %v3436_v22, %v3443_v31  ;;  %v7789_v13 = vcombine.low %v3452_v2, %v3459_v0  ;;  %v7791_v37 = vcombine.high %v3452_v2, %v3459_v0  ;;  %v3207_v47 = vpop.permute.xlu1 %3206  ;;  %v10434_v14 = vpop.f32.mrb[4].mxu1 }
 0x316   : > { %v3396_v20 = vcombine.low %v3183_v29, %v3207_v47  ;;  %v3397_v27 = vcombine.high %v3183_v29, %v3207_v47  ;;  %v8060_v23 = vpop.f32.mrb[5].mxu1  ;;  %v5085_v28 = vsel %vm4332_vm1, %v10434_v14, -inf }
 0x317   : > { %v3916_v49 = vrot.slane %v7785_v53, %v9250_v3  ;;  %v3932_v59 = vrot.slane %v7787_v21, %v9250_v3  ;;  %v3948_v15 = vrot.slane %v7789_v13, %v9250_v3  ;;  %v3964_v10 = vrot.slane %v7791_v37, %v9250_v3  ;;  %5086 = vmax.xlane.f32.xlu0 %v5085_v28  ;;  %v10441_v0 = vpop.f32.mrb[6].mxu1 }
 0x318   : > { %v3404_v9 = vrot.slane %v3396_v20, %v9250_v3  ;;  %v3411_v22 = vrot.slane %v3397_v27, %v9250_v3  ;;  %v8061_v5 = vpop.f32.mrb[7].mxu1 }
 0x319   : > { %v3972_v45 = vcombine.low %v3916_v49, %v3932_v59  ;;  %v4004_v46 = vcombine.low %v3948_v15, %v3964_v10  ;;  %v3219_v61 = vpop.permute.xlu1 %3218  ;;  %v3973_v7 = vcombine.high %v3916_v49, %v3932_v59  ;;  %v4005_v57 = vcombine.high %v3948_v15, %v3964_v10 }
 0x31a   : > { %v3412_v24 = vcombine.low %v3195_v16, %v3219_v61  ;;  %v3413_v30 = vcombine.high %v3195_v16, %v3219_v61  ;;  %v3835_v5 = vrot.slane %v7784_v60, %v9250_v3 }
 0x31b   : > { %v3980_v31 = vrot.slane %v3972_v45, %v9256_v11  ;;  %v4012_v2 = vrot.slane %v4004_v46, %v9256_v11  ;;  %v3987_v29 = vrot.slane %v3973_v7, %v9256_v11  ;;  %v4019_v12 = vrot.slane %v4005_v57, %v9256_v11 }
 0x31c   : > { %v3420_v53 = vrot.slane %v3412_v24, %v9250_v3  ;;  %v3427_v21 = vrot.slane %v3413_v30, %v9250_v3 }
 0x31d   : > { %v4036_v13 = vcombine.low %v3980_v31, %v4012_v2  ;;  %v4037_v16 = vcombine.high %v3980_v31, %v4012_v2  ;;  %v4038_v37 = vcombine.low %v3987_v29, %v4019_v12  ;;  %v4039_v47 = vcombine.high %v3987_v29, %v4019_v12 }
 0x31e   : > { %v3460_v20 = vcombine.low %v3404_v9, %v3420_v53  ;;  %v3461_v27 = vcombine.high %v3404_v9, %v3420_v53  ;;  %v3476_v49 = vcombine.low %v3411_v22, %v3427_v21  ;;  %v3477_v59 = vcombine.high %v3411_v22, %v3427_v21 }
 0x31f   : > { %v4316_v15 = vpack.c.bf16 %v4036_v13, %v3900_v38  ;;  %v4317_v10 = vpack.c.bf16 %v4037_v16, %v3901_v32  ;;  %v10450_v45 = vpack.c.bf16 %v4038_v37, %v3902_v6  ;;  %v10455_v46 = vpack.c.bf16 %v4039_v47, %v3903_v36  ;;  %v10461_v38 = vpop.f32.mrb[8].mxu1 }
 0x320   : > { %v3468_v61 = vrot.slane %v3460_v20, %v9256_v11  ;;  %v3475_v7 = vrot.slane %v3461_v27, %v9256_v11  ;;  %v3484_v9 = vrot.slane %v3476_v49, %v9256_v11  ;;  %v3491_v57 = vrot.slane %v3477_v59, %v9256_v11  ;;  %v8066_v32 = vpop.f32.mrb[9].mxu1 }
 0x321   : > { %8153 = vmatpush3.bf16.msra.mxu0 %v4316_v15  ;;  %8159 = vmatpush3.bf16.msra.mxu1 %v4317_v10  ;;  %v10465_v50 = vpop.f32.mrb[10].mxu1  ;;  %v3787_v2 = vrot.slane %v7778_v26, %v9250_v3  ;;  %v3803_v29 = vrot.slane %v7780_v1, %v9250_v3  ;;  %v3819_v12 = vrot.slane %v7782_v43, %v9250_v3 }
 0x322   : > { %v7786_v6 = vcombine.low %v3468_v61, %v3475_v7  ;;  %v7788_v23 = vcombine.high %v3468_v61, %v3475_v7  ;;  %v7790_v28 = vcombine.low %v3484_v9, %v3491_v57  ;;  %8164 = vmatprep.subr.bf16.mxu0 %v11416_v44  ;;  %8170 = vmatprep.subr.bf16.mxu1 %v11416_v44  ;;  %v8067_v36 = vpop.f32.mrb[11].mxu1 }
 0x323   : > { %v7792_v18 = vcombine.high %v3484_v9, %v3491_v57  ;;  %v3852_v16 = vcombine.low %v3787_v2, %v3803_v29  ;;  %v3884_v43 = vcombine.low %v3819_v12, %v3835_v5  ;;  %v3853_v40 = vcombine.high %v3787_v2, %v3803_v29 }
 0x324   : > { %v3923_v53 = vrot.slane %v7786_v6, %v9250_v3  ;;  %v3939_v21 = vrot.slane %v7788_v23, %v9250_v3  ;;  %v3955_v26 = vrot.slane %v7790_v28, %v9250_v3  ;;  %v3885_v25 = vcombine.high %v3819_v12, %v3835_v5 }
 0x325   : > { %v3971_v13 = vrot.slane %v7792_v18, %v9250_v3  ;;  %v3860_v27 = vrot.slane %v3852_v16, %v9256_v11  ;;  %v3892_v49 = vrot.slane %v3884_v43, %v9256_v11  ;;  %v3867_v10 = vrot.slane %v3853_v40, %v9256_v11 }
 0x326   : > { %v3988_v37 = vcombine.low %v3923_v53, %v3939_v21  ;;  %v3989_v60 = vcombine.high %v3923_v53, %v3939_v21  ;;  %v3899_v61 = vrot.slane %v3885_v25, %v9256_v11 }
 0x327   : > { %v4020_v47 = vcombine.low %v3955_v26, %v3971_v13  ;;  %v4021_v9 = vcombine.high %v3955_v26, %v3971_v13  ;;  %v3904_v57 = vcombine.low %v3860_v27, %v3892_v49  ;;  %v3905_v6 = vcombine.high %v3860_v27, %v3892_v49 }
 0x328   : > { %v3996_v59 = vrot.slane %v3988_v37, %v9256_v11  ;;  %v4003_v7 = vrot.slane %v3989_v60, %v9256_v11  ;;  %v3906_v28 = vcombine.low %v3867_v10, %v3899_v61  ;;  %v3907_v36 = vcombine.high %v3867_v10, %v3899_v61 }
 0x329   : > { %v4028_v15 = vrot.slane %v4020_v47, %v9256_v11  ;;  %v4035_v18 = vrot.slane %v4021_v9, %v9256_v11  ;;  %v5088_v61 = vsel %vm4332_vm1, %v10441_v0, -inf }
 0x32b   : > { %v4040_v32 = vcombine.low %v3996_v59, %v4028_v15  ;;  %v4041_v23 = vcombine.high %v3996_v59, %v4028_v15  ;;  %v4042_v2 = vcombine.low %v4003_v7, %v4035_v18  ;;  %v4043_v29 = vcombine.high %v4003_v7, %v4035_v18 }
 0x32d   : > { %v10467_v24 = vpop.f32.mrb[12].mxu1  ;;  %v10507_v12 = vpack.c.bf16 %v4042_v2, %v3906_v28  ;;  %v10509_v5 = vpack.c.bf16 %v4043_v29, %v3907_v36 }
 0x32e   : > { %v8072_v30 = vpop.f32.mrb[13].mxu1 }
 0x32f   : > { %v10469_v22 = vpop.f32.mrb[14].mxu1  ;;  %v10503_v30 = vpack.c.bf16 %v4040_v32, %v3904_v57  ;;  %v5091_v57 = vsel %vm4332_vm1, %v10461_v38, -inf }
 0x330   : > { %v8073_v31 = vpop.f32.mrb[15].mxu1 }
 0x331   : > { %v10505_v31 = vpack.c.bf16 %v4041_v23, %v3905_v6 }
 0x335   : > { %v10491_v33 = vpop.f32.mrb[16].mxu1 }
 0x336   : > { %v8078_v8 = vpop.f32.mrb[17].mxu1 }
 0x337   : > { %v10493_v1 = vpop.f32.mrb[18].mxu1 }
 0x338   : > { %v8079_v20 = vpop.f32.mrb[19].mxu1 }
 0x346   : > { %v10511_v53 = vpop.f32.mrb[20].mxu1 }
 0x347   : > { %v8084_v21 = vpop.f32.mrb[21].mxu1 }
 0x348   : > { %v10513_v26 = vpop.f32.mrb[22].mxu1  ;;  %v5094_v21 = vsel %vm4332_vm1, %v10465_v50, -inf }
 0x349   : > { %v8085_v13 = vpop.f32.mrb[23].mxu1 }
 0x34e   : > { %v10515_v8 = vpop.f32.mrb[24].mxu1 }
 0x34f   : > { %v8090_v16 = vpop.f32.mrb[25].mxu1 }
 0x350   : > { %v10517_v43 = vpop.f32.mrb[26].mxu1 }
 0x351   : > { %v8091_v37 = vpop.f32.mrb[27].mxu1 }
 0x35d   : > { %v10519_v47 = vpop.f32.mrb[28].mxu1 }
 0x35e   : > { %v8096_v20 = vpop.f32.mrb[29].mxu1 }
 0x35f   : > { %v10521_v40 = vpop.f32.mrb[30].mxu1 }
 0x360   : > { %v10523_v25 = vpop.f32.mrb[8].mxu0  ;;  %v8097_v60 = vpop.f32.mrb[31].mxu1 }
 0x361   : > { %v8108_v27 = vpop.f32.mrb[9].mxu0  ;;  %v5133_v49 = vsel %vm4332_vm1, %v10523_v25, -inf }
 0x362   : > { %5134 = vmax.xlane.f32.xlu1 %v5133_v49  ;;  %v10527_v59 = vpop.f32.mrb[10].mxu0 }
 0x363   : > { %v8109_v15 = vpop.f32.mrb[11].mxu0  ;;  %v5136_v10 = vsel %vm4332_vm1, %v10527_v59, -inf }
 0x364   : > { %5137 = vmax.xlane.f32.xlu0 %v5136_v10 }
 0x365   : > { %v10533_v7 = vpop.f32.mrb[32].mxu1 }
 0x366   : > { %5089 = vmax.xlane.f32.xlu1 %v5088_v61  ;;  %v8102_v9 = vpop.f32.mrb[33].mxu1 }
 0x367   : > { %v10537_v32 = vpop.f32.mrb[34].mxu1 }
 0x368   : > { %5092 = vmax.xlane.f32.xlu0 %v5091_v57  ;;  %v8103_v6 = vpop.f32.mrb[35].mxu1 }
 0x36b   : > { %v10539_v23 = vpop.f32.mrb[12].mxu0 }
 0x36c   : > { %v8120_v28 = vpop.f32.mrb[13].mxu0  ;;  %v5145_v18 = vsel %vm4332_vm1, %v10539_v23, -inf }
 0x36d   : > { %5146 = vmax.xlane.f32.xlu1 %v5145_v18  ;;  %v10543_v36 = vpop.f32.mrb[14].mxu0 }
 0x36e   : > { %v8121_v2 = vpop.f32.mrb[15].mxu0  ;;  %v5148_v29 = vsel %vm4332_vm1, %v10543_v36, -inf }
 0x36f   : > { %5149 = vmax.xlane.f32.xlu0 %v5148_v29 }
 0x373   : > { %5095 = vmax.xlane.f32.xlu0 %v5094_v21 }
 0x375   : > { %v10549_v13 = vpop.f32.mrb[36].mxu1 }
 0x376   : > { %v8114_v16 = vpop.f32.mrb[37].mxu1 }
 0x377   : > { %v10551_v37 = vpop.f32.mrb[38].mxu1  ;;  %v5097_v16 = vsel %vm4332_vm1, %v10467_v24, -inf }
 0x378   : > { %v8115_v20 = vpop.f32.mrb[39].mxu1 }
 0x379   : > { %v5100_v20 = vsel %vm4332_vm1, %v10469_v22, -inf }
 0x37e   : > { %v10553_v60 = vpop.f32.mrb[40].mxu1 }
 0x37f   : > { %v8126_v27 = vpop.f32.mrb[41].mxu1 }
 0x380   : > { %v10555_v49 = vpop.f32.mrb[42].mxu1 }
 0x381   : > { %v8127_v15 = vpop.f32.mrb[43].mxu1 }
 0x387   : > { %v10557_v10 = vpop.f32.mrb[16].mxu0  ;;  %v10559_v61 = vpop.f32.mrb[44].mxu1 }
 0x388   : > { %v8132_v9 = vpop.f32.mrb[17].mxu0  ;;  %v8138_v57 = vpop.f32.mrb[45].mxu1  ;;  %v5157_v6 = vsel %vm4332_vm1, %v10557_v10, -inf }
 0x389   : > { %v10563_v28 = vpop.f32.mrb[46].mxu1  ;;  %5158 = vmax.xlane.f32.xlu1 %v5157_v6  ;;  %v10565_v18 = vpop.f32.mrb[18].mxu0 }
 0x38a   : > { %v8133_v2 = vpop.f32.mrb[19].mxu0  ;;  %v8139_v29 = vpop.f32.mrb[47].mxu1  ;;  %v5160_v21 = vsel %vm4332_vm1, %v10565_v18, -inf }
 0x38b   : > { %5161 = vmax.xlane.f32.xlu0 %v5160_v21 }
 0x38d   : > { %5098 = vmax.xlane.f32.xlu1 %v5097_v16 }
 0x38f   : > { %v10573_v27 = vpop.f32.mrb[48].mxu1  ;;  %5101 = vmax.xlane.f32.xlu0 %v5100_v20  ;;  %v10575_v15 = vpop.f32.mrb[20].mxu0  ;;  %v5103_v20 = vsel %vm4332_vm1, %v10491_v33, -inf }
 0x390   : > { %v8144_v9 = vpop.f32.mrb[21].mxu0  ;;  %v8150_v57 = vpop.f32.mrb[49].mxu1  ;;  %v5169_v6 = vsel %vm4332_vm1, %v10575_v15, -inf }
 0x391   : > { %v10579_v2 = vpop.f32.mrb[50].mxu1  ;;  %5170 = vmax.xlane.f32.xlu1 %v5169_v6  ;;  %v10581_v29 = vpop.f32.mrb[22].mxu0  ;;  %v5106_v9 = vsel %vm4332_vm1, %v10493_v1, -inf  ;;  %v5109_v57 = vsel %vm4332_vm1, %v10511_v53, -inf  ;;  %v5112_v6 = vsel %vm4332_vm1, %v10513_v26, -inf }
 0x392   : > { %v8145_v21 = vpop.f32.mrb[23].mxu0  ;;  %v8151_v16 = vpop.f32.mrb[51].mxu1  ;;  %v5172_v48 = vsel %vm4332_vm1, %v10581_v29, -inf }
 0x393   : > { %5173 = vmax.xlane.f32.xlu0 %v5172_v48  ;;  %v5115_v21 = vsel %vm4332_vm1, %v10515_v8, -inf  ;;  %v5118_v48 = vsel %vm4332_vm1, %v10517_v43, -inf  ;;  %v5121_v16 = vsel %vm4332_vm1, %v10519_v47, -inf }
 0x395   : > { %5104 = vmax.xlane.f32.xlu1 %v5103_v20  ;;  %v5124_v20 = vsel %vm4332_vm1, %v10521_v40, -inf }
 0x397   : > { %5107 = vmax.xlane.f32.xlu0 %v5106_v9  ;;  %v5127_v9 = vsel %vm4332_vm1, %v10533_v7, -inf }
 0x399   : > { %5110 = vmax.xlane.f32.xlu1 %v5109_v57  ;;  %v5130_v57 = vsel %vm4332_vm1, %v10537_v32, -inf }
 0x39b   : > { %5113 = vmax.xlane.f32.xlu0 %v5112_v6  ;;  %v5139_v6 = vsel %vm4332_vm1, %v10549_v13, -inf }
 0x39d   : > { %5116 = vmax.xlane.f32.xlu1 %v5115_v21  ;;  %v5142_v21 = vsel %vm4332_vm1, %v10551_v37, -inf }
 0x39f   : > { %5119 = vmax.xlane.f32.xlu0 %v5118_v48  ;;  %v5154_v48 = vsel %vm4332_vm1, %v10555_v49, -inf }
 0x3a1   : > { %5122 = vmax.xlane.f32.xlu1 %v5121_v16  ;;  %v5166_v16 = vsel %vm4332_vm1, %v10563_v28, -inf }
 0x3a3   : > { %5125 = vmax.xlane.f32.xlu0 %v5124_v20  ;;  %v5178_v20 = vsel %vm4332_vm1, %v10579_v2, -inf }
 0x3a5   : > { %5128 = vmax.xlane.f32.xlu1 %v5127_v9  ;;  %v5151_v9 = vsel %vm4332_vm1, %v10553_v60, -inf }
 0x3a7   : > { %5131 = vmax.xlane.f32.xlu0 %v5130_v57  ;;  %v5163_v57 = vsel %vm4332_vm1, %v10559_v61, -inf }
 0x3a9   : > { %5140 = vmax.xlane.f32.xlu1 %v5139_v6  ;;  %v5175_v6 = vsel %vm4332_vm1, %v10573_v27, -inf }
 0x3ab   : > { %5143 = vmax.xlane.f32.xlu0 %v5142_v21  ;;  %v5087_v21 = vpop.xlane.xlu0 %5086 }
 0x3af   : > { %5155 = vmax.xlane.f32.xlu0 %v5154_v48  ;;  %v5181_v48 = vsub.f32 %v10434_v14, %v5087_v21 }
 0x3b1   : > { %v5213_v52 = vmul.f32 1.442695, %v5181_v48 }
 0x3b3   : > { %5167 = vmax.xlane.f32.xlu0 %v5166_v16 }
 0x3b7   : > { %5179 = vmax.xlane.f32.xlu0 %v5178_v20 }
 0x3ba   : > { %3210 = vrot.lane.b32.xlu1 %v11429_v58, %s8792_s23 }
 0x3de   : > { %5152 = vmax.xlane.f32.xlu1 %v5151_v9 }
 0x3e2   : > { %5164 = vmax.xlane.f32.xlu1 %v5163_v57 }
 0x3e6   : > { %5176 = vmax.xlane.f32.xlu1 %v5175_v6 }
 0x3ef   : > { %v5135_v16 = vpop.xlane.xlu1 %5134 }
 0x3f0   : > { %v5197_v20 = vsub.f32 %v10523_v25, %v5135_v16 }
 0x3f1   : > { %v5138_v41 = vpop.xlane.xlu0 %5137 }
 0x3f2   : > { %v5245_v19 = vmul.f32 1.442695, %v5197_v20  ;;  %v5198_v62 = vsub.f32 %v10527_v59, %v5138_v41 }
 0x3f3   : > { %v5090_v9 = vpop.xlane.xlu1 %5089 }
 0x3f4   : > { %8458 = vpow2.f32 %v5245_v19  ;;  %v5247_v4 = vmul.f32 1.442695, %v5198_v62  ;;  %v5182_v57 = vsub.f32 %v10441_v0, %v5090_v9 }
 0x3f5   : > { %8460 = vpow2.f32 %v5213_v52  ;;  %v5093_v55 = vpop.xlane.xlu0 %5092 }
 0x3f6   : > { %8462 = vpow2.f32 %v5247_v4  ;;  %v5215_v6 = vmul.f32 1.442695, %v5182_v57  ;;  %v5183_v63 = vsub.f32 %v10461_v38, %v5093_v55 }
 0x3f8   : > { %8464 = vpow2.f32 %v5215_v6  ;;  %v5217_v14 = vmul.f32 1.442695, %v5183_v63 }
 0x3fa   : > { %8466 = vpow2.f32 %v5217_v14  ;;  %v5147_v25 = vpop.xlane.xlu1 %5146 }
 0x3fb   : > { %v5201_v21 = vsub.f32 %v10539_v23, %v5147_v25 }
 0x3fc   : > { %v5150_v48 = vpop.xlane.xlu0 %5149 }
 0x3fd   : > { %v5253_v41 = vmul.f32 1.442695, %v5201_v21  ;;  %v5202_v19 = vsub.f32 %v10543_v36, %v5150_v48 }
 0x3fe   : > { %v10629_v16 = vpop.eup %8458 }
 0x3ff   : > { %v10632_v62 = vpop.eup %8460  ;;  %v5325_v52 = vsel %vm4332_vm1, %v10629_v16, 0.0  ;;  %8468 = vpow2.f32 %v5253_v41  ;;  %v5255_v55 = vmul.f32 1.442695, %v5202_v19 }
 0x400   : > { %v10636_v4 = vpop.eup %8462  ;;  %5326 = vadd.xlane.f32.xlu1 %v5325_v52  ;;  %v5096_v63 = vpop.xlane.xlu0 %5095  ;;  %v5277_v23 = vsel %vm4332_vm1, %v10632_v62, 0.0 }
 0x401   : > { %v5328_v0 = vsel %vm4332_vm1, %v10636_v4, 0.0  ;;  %8470 = vpow2.f32 %v5255_v55  ;;  %v5184_v59 = vsub.f32 %v10465_v50, %v5096_v63 }
 0x402   : > { %v10640_v38 = vpop.eup %8464  ;;  %5329 = vadd.xlane.f32.xlu0 %v5328_v0 }
 0x403   : > { %v5219_v20 = vmul.f32 1.442695, %v5184_v59  ;;  %v5280_v9 = vsel %vm4332_vm1, %v10640_v38, 0.0 }
 0x404   : > { %v10645_v36 = vpop.eup %8466  ;;  %5278 = vadd.xlane.f32.xlu1 %v5277_v23 }
 0x405   : > { %8472 = vpow2.f32 %v5219_v20  ;;  %v5283_v57 = vsel %vm4332_vm1, %v10645_v36, 0.0 }
 0x406   : > { %5281 = vadd.xlane.f32.xlu0 %v5280_v9 }
 0x408   : > { %5284 = vadd.xlane.f32.xlu1 %v5283_v57 }
 0x409   : > { %v10651_v6 = vpop.eup %8468 }
 0x40a   : > { %11432 = vst [vmem:[#allocation27_spill] sm:$0xff] %v10651_v6  ;;  %v5337_v50 = vsel %vm4332_vm1, %v10651_v6, 0.0 }
 0x40b   : > { %v10655_v14 = vpop.eup %8470  ;;  %5338 = vadd.xlane.f32.xlu0 %v5337_v50 }
 0x40c   : > { %v5340_v25 = vsel %vm4332_vm1, %v10655_v14, 0.0 }
 0x40d   : > { %5341 = vadd.xlane.f32.xlu1 %v5340_v25 }
 0x40f   : > { %v10659_v21 = vpop.eup %8472 }
 0x410   : > { %v5286_v48 = vsel %vm4332_vm1, %v10659_v21, 0.0 }
 0x411   : > { %5287 = vadd.xlane.f32.xlu0 %v5286_v48 }
 0x416   : > { %v5159_v41 = vpop.xlane.xlu1 %5158 }
 0x417   : > { %v5205_v19 = vsub.f32 %v10557_v10, %v5159_v41 }
 0x418   : > { %v5162_v52 = vpop.xlane.xlu0 %5161 }
 0x419   : > { %v5261_v55 = vmul.f32 1.442695, %v5205_v19  ;;  %v5206_v63 = vsub.f32 %v10565_v18, %v5162_v52 }
 0x41a   : > { %v5099_v0 = vpop.xlane.xlu1 %5098 }
 0x41b   : > { %8474 = vpow2.f32 %v5261_v55  ;;  %v5185_v59 = vsub.f32 %v10467_v24, %v5099_v0  ;;  %v5263_v23 = vmul.f32 1.442695, %v5206_v63 }
 0x41c   : > { %v5102_v20 = vpop.xlane.xlu0 %5101 }
 0x41d   : > { %v5221_v9 = vmul.f32 1.442695, %v5185_v59  ;;  %v5186_v57 = vsub.f32 %v10469_v22, %v5102_v20 }
 0x41e   : > { %v10667_v50 = vpop.xlane.xlu1 %5170 }
 0x41f   : > { %8476 = vpow2.f32 %v5221_v9  ;;  %v5223_v25 = vmul.f32 1.442695, %v5186_v57 }
 0x420   : > { %8478 = vpow2.f32 %v5263_v23  ;;  %v10671_v48 = vpop.xlane.xlu0 %5173 }
 0x421   : > { %8480 = vpow2.f32 %v5223_v25 }
 0x422   : > { %v5105_v24 = vpop.xlane.xlu1 %5104 }
 0x423   : > { %v5187_v41 = vsub.f32 %v10491_v33, %v5105_v24 }
 0x424   : > { %v5108_v19 = vpop.xlane.xlu0 %5107 }
 0x425   : > { %v10676_v52 = vpop.eup %8474  ;;  %v5225_v22 = vmul.f32 1.442695, %v5187_v41  ;;  %v5188_v55 = vsub.f32 %v10493_v1, %v5108_v19 }
 0x426   : > { %v5111_v63 = vpop.xlane.xlu1 %5110  ;;  %v5349_v0 = vsel %vm4332_vm1, %v10676_v52, 0.0 }
 0x427   : > { %8482 = vpow2.f32 %v5225_v22  ;;  %v5227_v59 = vmul.f32 1.442695, %v5188_v55  ;;  %v5189_v23 = vsub.f32 %v10511_v53, %v5111_v63  ;;  %5350 = vadd.xlane.f32.xlu1 %v5349_v0 }
 0x428   : > { %v5114_v20 = vpop.xlane.xlu0 %5113 }
 0x429   : > { %v10682_v9 = vpop.eup %8476  ;;  %8484 = vpow2.f32 %v5227_v59  ;;  %v5229_v33 = vmul.f32 1.442695, %v5189_v23  ;;  %v5190_v57 = vsub.f32 %v10513_v26, %v5114_v20 }
 0x42a   : > { %v10685_v25 = vpop.eup %8478  ;;  %v5117_v24 = vpop.xlane.xlu1 %5116  ;;  %v5289_v1 = vsel %vm4332_vm1, %v10682_v9, 0.0 }
 0x42b   : > { %v10689_v41 = vpop.eup %8480  ;;  %8486 = vpow2.f32 %v5229_v33  ;;  %v5231_v19 = vmul.f32 1.442695, %v5190_v57  ;;  %v5191_v53 = vsub.f32 %v10515_v8, %v5117_v24  ;;  %5290 = vadd.xlane.f32.xlu0 %v5289_v1  ;;  %v5352_v59 = vsel %vm4332_vm1, %v10685_v25, 0.0 }
 0x42c   : > { %v5120_v22 = vpop.xlane.xlu0 %5119  ;;  %v5292_v55 = vsel %vm4332_vm1, %v10689_v41, 0.0 }
 0x42d   : > { %8488 = vpow2.f32 %v5231_v19  ;;  %v5233_v63 = vmul.f32 1.442695, %v5191_v53  ;;  %v5192_v26 = vsub.f32 %v10517_v43, %v5120_v22  ;;  %5293 = vadd.xlane.f32.xlu1 %v5292_v55 }
 0x42e   : > { %v5123_v0 = vpop.xlane.xlu1 %5122 }
 0x42f   : > { %8490 = vpow2.f32 %v5233_v63  ;;  %v5235_v23 = vmul.f32 1.442695, %v5192_v26  ;;  %v5193_v20 = vsub.f32 %v10519_v47, %v5123_v0  ;;  %5353 = vadd.xlane.f32.xlu0 %v5352_v59 }
 0x430   : > { %v5126_v8 = vpop.xlane.xlu0 %5125 }
 0x431   : > { %v10698_v33 = vpop.eup %8482  ;;  %8492 = vpow2.f32 %v5235_v23  ;;  %v5237_v57 = vmul.f32 1.442695, %v5193_v20  ;;  %v5194_v24 = vsub.f32 %v10521_v40, %v5126_v8 }
 0x432   : > { %v5129_v1 = vpop.xlane.xlu1 %5128  ;;  %v5295_v43 = vsel %vm4332_vm1, %v10698_v33, 0.0 }
 0x433   : > { %v10703_v19 = vpop.eup %8484  ;;  %v5239_v53 = vmul.f32 1.442695, %v5194_v24  ;;  %v5195_v22 = vsub.f32 %v10533_v7, %v5129_v1  ;;  %5296 = vadd.xlane.f32.xlu0 %v5295_v43  ;;  %8494 = vpow2.f32 %v5237_v57 }
 0x434   : > { %v5132_v47 = vpop.xlane.xlu0 %5131  ;;  %v5298_v59 = vsel %vm4332_vm1, %v10703_v19, 0.0 }
 0x435   : > { %v10706_v55 = vpop.eup %8486  ;;  %8496 = vpow2.f32 %v5239_v53  ;;  %v5241_v63 = vmul.f32 1.442695, %v5195_v22  ;;  %v5196_v26 = vsub.f32 %v10537_v32, %v5132_v47 }
 0x436   : > { %v5141_v0 = vpop.xlane.xlu1 %5140  ;;  %v5301_v40 = vsel %vm4332_vm1, %v10706_v55, 0.0 }
 0x437   : > { %v10713_v23 = vpop.eup %8488  ;;  %v5199_v7 = vsub.f32 %v10549_v13, %v5141_v0  ;;  %5302 = vadd.xlane.f32.xlu1 %v5301_v40  ;;  %5299 = vadd.xlane.f32.xlu0 %v5298_v59  ;;  %8498 = vpow2.f32 %v5241_v63  ;;  %v5243_v8 = vmul.f32 1.442695, %v5196_v26 }
 0x438   : > { %v5304_v24 = vsel %vm4332_vm1, %v10713_v23, 0.0 }
 0x439   : > { %v10716_v20 = vpop.eup %8490  ;;  %v5249_v57 = vmul.f32 1.442695, %v5199_v7 }
 0x43a   : > { %v5307_v32 = vsel %vm4332_vm1, %v10716_v20, 0.0 }
 0x43b   : > { %v10722_v1 = vpop.eup %8492  ;;  %8500 = vpow2.f32 %v5249_v57  ;;  %5308 = vadd.xlane.f32.xlu1 %v5307_v32  ;;  %5305 = vadd.xlane.f32.xlu0 %v5304_v24  ;;  %v5144_v57 = vpop.xlane.xlu0 %5143 }
 0x43c   : > { %8502 = vpow2.f32 %v5243_v8  ;;  %v5310_v43 = vsel %vm4332_vm1, %v10722_v1, 0.0  ;;  %v11434_v8 = vld [vmem:[#allocation21_spill] sm:$0xff]  ;;  %v10748_v32 = vpop.permute.xlu1 %3210  ;;  %v5200_v24 = vsub.f32 %v10551_v37, %v5144_v57  ;;  %v11435_v37 = vsub.f32 %v10575_v15, %v10667_v50 }
 0x43d   : > { %v10724_v13 = vpop.eup %8494 }
 0x43e   : > { %v5313_v47 = vsel %vm4332_vm1, %v10724_v13, 0.0  ;;  %v5269_v57 = vmul.f32 1.442695, %v11435_v37 }
 0x43f   : > { %v10728_v53 = vpop.eup %8496  ;;  %5311 = vadd.xlane.f32.xlu0 %v5310_v43  ;;  %v5156_v18 = vpop.xlane.xlu0 %5155 }
 0x440   : > { %v5316_v22 = vsel %vm4332_vm1, %v10728_v53, 0.0 }
 0x441   : > { %5317 = vadd.xlane.f32.xlu1 %v5316_v22  ;;  %v10734_v63 = vpop.eup %8498  ;;  %v5251_v22 = vmul.f32 1.442695, %v5200_v24 }
 0x442   : > { %v5319_v0 = vsel %vm4332_vm1, %v10734_v63, 0.0 }
 0x443   : > { %5314 = vadd.xlane.f32.xlu0 %v5313_v47  ;;  %8504 = vpow2.f32 %v5251_v22  ;;  %v5168_v6 = vpop.xlane.xlu0 %5167 }
 0x445   : > { %v10736_v26 = vpop.eup %8500 }
 0x446   : > { %11433 = vst [vmem:[#allocation28_spill] sm:$0xff] %v10736_v26  ;;  %v5331_v40 = vsel %vm4332_vm1, %v10736_v26, 0.0  ;;  %v10742_v59 = vpop.eup %8502 }
 0x447   : > { %5320 = vadd.xlane.f32.xlu0 %v5319_v0  ;;  %5332 = vadd.xlane.f32.xlu1 %v5331_v40  ;;  %v5322_v7 = vsel %vm4332_vm1, %v10742_v59, 0.0  ;;  %v5204_v40 = vsub.f32 %v10555_v49, %v5156_v18  ;;  %v5180_v18 = vpop.xlane.xlu0 %5179 }
 0x449   : > { %v5259_v42 = vmul.f32 1.442695, %v5204_v40 }
 0x44b   : > { %5323 = vadd.xlane.f32.xlu0 %v5322_v7 }
 0x461   : > { %3220 = vrot.lane.b32.xlu0 %v11434_v8, %s8794_s15 }
 0x46b   : > { %v5153_v43 = vpop.xlane.xlu1 %5152 }
 0x46c   : > { %v5203_v47 = vsub.f32 %v10553_v60, %v5153_v43  ;;  %v5208_v60 = vsub.f32 %v10563_v28, %v5168_v6  ;;  %v10758_v43 = vpop.eup %8504 }
 0x46d   : > { %v5334_v15 = vsel %vm4332_vm1, %v10758_v43, 0.0 }
 0x46e   : > { %v5257_v7 = vmul.f32 1.442695, %v5203_v47  ;;  %v5267_v49 = vmul.f32 1.442695, %v5208_v60 }
 0x46f   : > { %v5165_v10 = vpop.xlane.xlu1 %5164 }
 0x470   : > { %v5207_v0 = vsub.f32 %v10559_v61, %v5165_v10 }
 0x472   : > { %v5265_v26 = vmul.f32 1.442695, %v5207_v0 }
 0x473   : > { %v5177_v24 = vpop.xlane.xlu1 %5176 }
 0x474   : > { %8506 = vpow2.f32 %v5265_v26  ;;  %v5211_v10 = vsub.f32 %v10573_v27, %v5177_v24 }
 0x475   : > { %8508 = vpow2.f32 %v5257_v7 }
 0x476   : > { %8510 = vpow2.f32 %v5259_v42  ;;  %v5212_v42 = vsub.f32 %v10579_v2, %v5180_v18  ;;  %v5273_v28 = vmul.f32 1.442695, %v5211_v10 }
 0x477   : > { %8512 = vpow2.f32 %v5269_v57 }
 0x478   : > { %8514 = vpow2.f32 %v5267_v49  ;;  %v5275_v27 = vmul.f32 1.442695, %v5212_v42 }
 0x479   : > { %8516 = vpow2.f32 %v5273_v28 }
 0x47a   : > { %8518 = vpow2.f32 %v5275_v27 }
 0x47e   : > { %v10760_v61 = vpop.eup %8506 }
 0x47f   : > { %v5355_v26 = vsel %vm4332_vm1, %v10760_v61, 0.0  ;;  %v10767_v50 = vpop.eup %8508 }
 0x480   : > { %5356 = vadd.xlane.f32.xlu1 %v5355_v26  ;;  %5335 = vadd.xlane.f32.xlu0 %v5334_v15  ;;  %v5343_v6 = vsel %vm4332_vm1, %v10767_v50, 0.0  ;;  %v10772_v22 = vpop.eup %8510 }
 0x481   : > { %v5346_v47 = vsel %vm4332_vm1, %v10772_v22, 0.0  ;;  %v10776_v0 = vpop.eup %8512 }
 0x482   : > { %v5361_v40 = vsel %vm4332_vm1, %v10776_v0, 0.0  ;;  %v10780_v2 = vpop.eup %8514 }
 0x483   : > { %v5358_v37 = vsel %vm4332_vm1, %v10780_v2, 0.0  ;;  %v10784_v60 = vpop.eup %8516 }
 0x484   : > { %5344 = vadd.xlane.f32.xlu0 %v5343_v6  ;;  %v5367_v49 = vsel %vm4332_vm1, %v10784_v60, 0.0  ;;  %v10790_v18 = vpop.eup %8518 }
 0x485   : > { %v5370_v26 = vsel %vm4332_vm1, %v10790_v18, 0.0 }
 0x488   : > { %5347 = vadd.xlane.f32.xlu0 %v5346_v47 }
 0x48c   : > { %5362 = vadd.xlane.f32.xlu0 %v5361_v40 }
 0x48d   : > { %v5327_v7 = vpop.xlane.xlu1 %5326 }
 0x48e   : > { %8520 = vrcp.f32 %v5327_v7 }
 0x48f   : > { %v5330_v57 = vpop.xlane.xlu0 %5329 }
 0x490   : > { %5359 = vadd.xlane.f32.xlu0 %v5358_v37  ;;  %8522 = vrcp.f32 %v5330_v57 }
 0x491   : > { %3222 = vrot.lane.b32.xlu1 %v11429_v58, %s8794_s15  ;;  %v5279_v24 = vpop.xlane.xlu1 %5278 }
 0x492   : > { %8524 = vrcp.f32 %v5279_v24 }
 0x493   : > { %v5282_v10 = vpop.xlane.xlu0 %5281 }
 0x494   : > { %5368 = vadd.xlane.f32.xlu0 %v5367_v49  ;;  %8526 = vrcp.f32 %v5282_v10 }
 0x495   : > { %v5285_v27 = vpop.xlane.xlu1 %5284 }
 0x496   : > { %8528 = vrcp.f32 %v5285_v27  ;;  %v3501_v27 = vcombine.high %v11434_v8, %v10111_v56 }
 0x498   : > { %v8521_v15 = vpop.eup %8520  ;;  %5371 = vadd.xlane.f32.xlu0 %v5370_v26  ;;  %v10794_v42 = vpop.xlane.xlu0 %5338 }
 0x499   : > { %v10797_v58 = vmul.f32 %v8521_v15, %v10629_v16  ;;  %v11436_v16 = vsub.f32 %v10581_v29, %v10671_v48 }
 0x49a   : > { %v8523_v28 = vpop.eup %8522  ;;  %v10823_v29 = vpop.xlane.xlu1 %5341 }
 0x49b   : > { %v10800_v6 = vmul.f32 %v8523_v28, %v10636_v4  ;;  %v5271_v10 = vmul.f32 1.442695, %v11436_v16  ;;  %v3500_v28 = vcombine.low %v11434_v8, %v10111_v56 }
 0x49c   : > { %v8525_v47 = vpop.eup %8524 }
 0x49d   : > { %v5445_v40 = vpack.c.bf16 %v10800_v6, %v10797_v58  ;;  %v5405_v37 = vmul.f32 %v8525_v47, %v10632_v62  ;;  %v3516_v47 = vcombine.low %v10062_v17, %v10240_v34 }
 0x49e   : > { %v8527_v7 = vpop.eup %8526  ;;  %v5288_v24 = vpop.xlane.xlu0 %5287 }
 0x49f   : > { %v5406_v57 = vmul.f32 %v8527_v7, %v10640_v38  ;;  %8530 = vrcp.f32 %v5288_v24  ;;  %v3517_v7 = vcombine.high %v10062_v17, %v10240_v34  ;;  %v3515_v24 = vrot.slane %v3501_v27, %v9250_v3 }
 0x4a0   : > { %8532 = vpow2.f32 %v5271_v10  ;;  %v8529_v62 = vpop.eup %8528 }
 0x4a1   : > { %v5437_v49 = vpack.c.bf16 %v5406_v57, %v5405_v37  ;;  %v5407_v38 = vmul.f32 %v8529_v62, %v10645_v36  ;;  %v3508_v57 = vrot.slane %v3500_v28, %v9250_v3  ;;  %v3531_v16 = vrot.slane %v3517_v7, %v9250_v3 }
 0x4a3   : > { %8155 = vmatmul.mubr.msk.bf16.vlgmr.msra.gmra.mrb[24].mxu0 %vm4332_vm1, %v5437_v49  ;;  %v3524_v49 = vrot.slane %v3516_v47, %v9250_v3 }
 0x4a4   : > { %8165 = vmatpush3.bf16.msra.mxu0 %v10450_v45  ;;  %8166 = vmatprep.mubr.msk.bf16.mxu0 %vm8795_vm0, %v11416_v44 }
 0x4a5   : > { %8176 = vmatprep.subr.bf16.mxu0 %v11416_v44  ;;  %v3564_v56 = vcombine.low %v3508_v57, %v3524_v49  ;;  %v3565_v8 = vcombine.high %v3508_v57, %v3524_v49 }
 0x4a7   : > { %v3572_v28 = vrot.slane %v3564_v56, %v9256_v11 }
 0x4a9   : > { %v8531_v4 = vpop.eup %8530 }
 0x4aa   : > { %v5408_v26 = vmul.f32 %v8531_v4, %v10659_v21  ;;  %v10820_v45 = vpop.eup %8532  ;;  %v3580_v4 = vcombine.low %v3515_v24, %v3531_v16 }
 0x4ab   : > { %v5364_v48 = vsel %vm4332_vm1, %v10820_v45, 0.0 }
 0x4ac   : > { %v5438_v15 = vpack.c.bf16 %v5408_v26, %v5407_v38  ;;  %v3581_v38 = vcombine.high %v3515_v24, %v3531_v16  ;;  %v3588_v27 = vrot.slane %v3580_v4, %v9256_v11 }
 0x4ae   : > { %8161 = vmatmul.mubr.msk.bf16.vlgmr.msra.gmra.mrb[52].mxu1 %vm4332_vm1, %v5438_v15  ;;  %v3595_v47 = vrot.slane %v3581_v38, %v9256_v11 }
 0x4af   : > { %8171 = vmatpush3.bf16.msra.mxu1 %v10455_v46  ;;  %8172 = vmatprep.mubr.msk.bf16.mxu1 %vm8795_vm0, %v11416_v44 }
 0x4b0   : > { %8182 = vmatprep.subr.bf16.mxu1 %v11416_v44  ;;  %v7799_v16 = vcombine.high %v3588_v27, %v3595_v47 }
 0x4b4   : > { %v5351_v36 = vpop.xlane.xlu1 %5350 }
 0x4b5   : > { %5365 = vadd.xlane.f32.xlu1 %v5364_v48 }
 0x4b8   : > { %v5291_v21 = vpop.xlane.xlu0 %5290 }
 0x4b9   : > { %8534 = vrcp.f32 %v5291_v21 }
 0x4ba   : > { %8536 = vrcp.f32 %v5351_v36  ;;  %v5294_v46 = vpop.xlane.xlu1 %5293 }
 0x4bb   : > { %8538 = vrcp.f32 %v5294_v46  ;;  %v3579_v46 = vrot.slane %v3565_v8, %v9256_v11 }
 0x4bc   : > { %v5354_v37 = vpop.xlane.xlu0 %5353 }
 0x4bd   : > { %8540 = vrcp.f32 %v5354_v37  ;;  %v7795_v49 = vcombine.high %v3572_v28, %v3579_v46 }
 0x4bf   : > { %v4068_v38 = vrot.slane %v7795_v49, %v9250_v3 }
 0x4c0   : > { %v5297_v10 = vpop.xlane.xlu0 %5296 }
 0x4c1   : > { %8542 = vrcp.f32 %v5297_v10 }
 0x4c3   : > { %v8535_v62 = vpop.eup %8534 }
 0x4c4   : > { %v8537_v26 = vpop.eup %8536  ;;  %v5303_v17 = vpop.xlane.xlu1 %5302  ;;  %v5409_v48 = vmul.f32 %v8535_v62, %v10682_v9 }
 0x4c5   : > { %v5300_v34 = vpop.xlane.xlu0 %5299  ;;  %v8539_v15 = vpop.eup %8538  ;;  %v10846_v7 = vmul.f32 %v8537_v26, %v10676_v52  ;;  %v7793_v52 = vcombine.low %v3572_v28, %v3579_v46  ;;  %v4100_v26 = vrot.slane %v7799_v16, %v9250_v3 }
 0x4c6   : > { %v5410_v36 = vmul.f32 %v8539_v15, %v10689_v41  ;;  %8544 = vrcp.f32 %v5300_v34 }
 0x4c7   : > { %v8541_v21 = vpop.eup %8540  ;;  %8546 = vrcp.f32 %v5303_v17  ;;  %v4052_v4 = vrot.slane %v7793_v52, %v9250_v3 }
 0x4c8   : > { %v10849_v37 = vmul.f32 %v8541_v21, %v10685_v25  ;;  %v5309_v9 = vpop.xlane.xlu1 %5308  ;;  %v5439_v41 = vpack.c.bf16 %v5410_v36, %v5409_v48  ;;  %v7797_v25 = vcombine.low %v3588_v27, %v3595_v47 }
 0x4c9   : > { %v5306_v57 = vpop.xlane.xlu0 %5305  ;;  %v4108_v46 = vcombine.low %v4052_v4, %v4068_v38 }
 0x4ca   : > { %8548 = vrcp.f32 %v5306_v57  ;;  %8167 = vmatmul.mubr.msk.bf16.vlgmr.msra.gmra.mrb[28].mxu0 %vm4332_vm1, %v5439_v41  ;;  %v5449_v24 = vpack.c.bf16 %v10849_v37, %v10846_v7 }
 0x4cb   : > { %8550 = vrcp.f32 %v5309_v9  ;;  %8177 = vmatpush3.bf16.msra.mxu0 %v10503_v30  ;;  %8178 = vmatprep.mubr.msk.bf16.mxu0 %vm8795_vm0, %v11416_v44  ;;  %v8543_v62 = vpop.eup %8542  ;;  %v4084_v30 = vrot.slane %v7797_v25, %v9250_v3 }
 0x4cc   : > { %8188 = vmatprep.subr.bf16.mxu0 %v11416_v44  ;;  %v5411_v34 = vmul.f32 %v8543_v62, %v10698_v33 }
 0x4cd   : > { %v5312_v10 = vpop.xlane.xlu0 %5311  ;;  %v4140_v27 = vcombine.low %v4084_v30, %v4100_v26 }
 0x4ce   : > { %8552 = vrcp.f32 %v5312_v10  ;;  %v5318_v56 = vpop.xlane.xlu1 %5317 }
 0x4cf   : > { %8554 = vrcp.f32 %v5318_v56  ;;  %v4141_v56 = vcombine.high %v4084_v30, %v4100_v26 }
 0x4d0   : > { %v8545_v8 = vpop.eup %8544 }
 0x4d1   : > { %v5315_v17 = vpop.xlane.xlu0 %5314  ;;  %v5412_v15 = vmul.f32 %v8545_v8, %v10703_v19  ;;  %v8547_v48 = vpop.eup %8546 }
 0x4d2   : > { %8556 = vrcp.f32 %v5315_v17  ;;  %v5413_v9 = vmul.f32 %v8547_v48, %v10706_v55  ;;  %v4116_v55 = vrot.slane %v4108_v46, %v9256_v11  ;;  %v11442_v46 = vld [vmem:[#allocation25_spill] sm:$0xff] }
 0x4d3   : > { %v5440_v36 = vpack.c.bf16 %v5412_v15, %v5411_v34  ;;  %v11438_v34 = vcombine.high %v10386_v51, %v10393_v35 }
 0x4d4   : > { %v8549_v21 = vpop.eup %8548 }
 0x4d5   : > { %v5321_v28 = vpop.xlane.xlu0 %5320  ;;  %v8551_v47 = vpop.eup %8550  ;;  %v5414_v57 = vmul.f32 %v8549_v21, %v10713_v23  ;;  %8173 = vmatmul.mubr.msk.bf16.vlgmr.msra.gmra.mrb[56].mxu1 %vm4332_vm1, %v5440_v36  ;;  %v4148_v23 = vrot.slane %v4140_v27, %v9256_v11  ;;  %v11439_v36 = vcombine.low %v10400_v39, %v10403_v54 }
 0x4d6   : > { %8183 = vmatpush3.bf16.msra.mxu1 %v10505_v31  ;;  %8184 = vmatprep.mubr.msk.bf16.mxu1 %vm8795_vm0, %v11416_v44  ;;  %8558 = vrcp.f32 %v5321_v28  ;;  %v5415_v41 = vmul.f32 %v8551_v47, %v10716_v20  ;;  %v4109_v20 = vcombine.high %v4052_v4, %v4068_v38  ;;  %v10896_v4 = vrot.slane %v4141_v56, %v9256_v11  ;;  %v11444_v56 = vld [vmem:[#allocation26_spill] sm:$0xff] }
 0x4d7   : > { %v5441_v19 = vpack.c.bf16 %v5414_v57, %v5413_v9  ;;  %8194 = vmatprep.subr.bf16.mxu1 %v11416_v44  ;;  %v4172_v62 = vcombine.low %v4116_v55, %v4148_v23 }
 0x4d8   : > { %v8553_v33 = vpop.eup %8552  ;;  %v10893_v8 = vrot.slane %v4109_v20, %v9256_v11 }
 0x4d9   : > { %v5416_v52 = vmul.f32 %v8553_v33, %v10722_v1  ;;  %v5324_v49 = vpop.xlane.xlu0 %5323  ;;  %v8555_v25 = vpop.eup %8554  ;;  %8179 = vmatmul.mubr.msk.bf16.vlgmr.msra.gmra.mrb[32].mxu0 %vm4332_vm1, %v5441_v19 }
 0x4da   : > { %8560 = vrcp.f32 %v5324_v49  ;;  %8189 = vmatpush3.bf16.msra.mxu0 %v10507_v12  ;;  %8190 = vmatprep.mubr.msk.bf16.mxu0 %vm8795_vm0, %v11416_v44  ;;  %v5418_v1 = vmul.f32 %v8555_v25, %v10728_v53  ;;  %v11437_v53 = vcombine.low %v10386_v51, %v10393_v35  ;;  %v4174_v26 = vcombine.low %v10893_v8, %v10896_v4  ;;  %v11440_v35 = vld [vmem:[#allocation27_spill] sm:$0xff] }
 0x4db   : > { %v5442_v31 = vpack.c.bf16 %v5416_v52, %v5415_v41  ;;  %8200 = vmatprep.subr.bf16.mxu0 %v11416_v44  ;;  %8562 = vrcp.f32 %v10823_v29  ;;  %v5333_v52 = vpop.xlane.xlu1 %5332 }
 0x4dc   : > { %v8557_v16 = vpop.eup %8556  ;;  %8564 = vrcp.f32 %v10794_v42  ;;  %v4173_v42 = vcombine.high %v4116_v55, %v4148_v23  ;;  %v4326_v21 = vpack.c.bf16 %v11439_v36, %v4174_v26 }
 0x4dd   : > { %v5417_v10 = vmul.f32 %v8557_v16, %v10724_v13  ;;  %8185 = vmatmul.mubr.msk.bf16.vlgmr.msra.gmra.mrb[60].mxu1 %vm4332_vm1, %v5442_v31  ;;  %v4324_v13 = vpack.c.bf16 %v11437_v53, %v4172_v62  ;;  %v3221_v6 = vpop.permute.xlu0 %3220  ;;  %8566 = vrcp.f32 %v5333_v52  ;;  %v3669_v53 = vcombine.high %v11444_v56, %v10748_v32 }
 0x4de   : > { %8195 = vmatpush3.bf16.msra.mxu1 %v10509_v5  ;;  %8196 = vmatprep.mubr.msk.bf16.mxu1 %vm8795_vm0, %v11416_v44  ;;  %v4325_v15 = vpack.c.bf16 %v11438_v34, %v4173_v42  ;;  %v4175_v52 = vcombine.high %v10893_v8, %v10896_v4  ;;  %v11447_v8 = vcombine.high %v10400_v39, %v10403_v54 }
 0x4df   : > { %v5443_v12 = vpack.c.bf16 %v5418_v1, %v5417_v10  ;;  %8206 = vmatprep.subr.bf16.mxu1 %v11416_v44 }
 0x4e0   : > { %v8559_v29 = vpop.eup %8558  ;;  %v4327_v4 = vpack.c.bf16 %v11447_v8, %v4175_v52 }
 0x4e1   : > { %8191 = vmatmul.mubr.msk.bf16.vlgmr.msra.gmra.mrb[36].mxu0 %vm4332_vm1, %v5443_v12  ;;  %v5419_v38 = vmul.f32 %v8559_v29, %v10734_v63  ;;  %v3668_v12 = vcombine.low %v11444_v56, %v10748_v32 }
 0x4e2   : > { %8201 = vmatpush3.bf16.msra.mxu0 %v4324_v13  ;;  %8202 = vmatprep.mubr.msk.bf16.mxu0 %vm8795_vm0, %v11416_v44 }
 0x4e3   : > { %8212 = vmatprep.subr.bf16.mxu0 %v11416_v44 }
 0x4e4   : > { %v8561_v5 = vpop.eup %8560 }
 0x4e5   : > { %v5420_v30 = vmul.f32 %v8561_v5, %v10742_v59  ;;  %v8563_v48 = vpop.eup %8562 }
 0x4e6   : > { %v8565_v63 = vpop.eup %8564  ;;  %v5426_v51 = vmul.f32 %v8563_v48, %v10655_v14  ;;  %v11443_v14 = vld [vmem:[#allocation23_spill] sm:$0xff]  ;;  %v3683_v48 = vrot.slane %v3669_v53, %v9250_v3 }
 0x4e7   : > { %v5444_v17 = vpack.c.bf16 %v5420_v30, %v5419_v38  ;;  %v5425_v59 = vmul.f32 %v8565_v63, %v11440_v35  ;;  %v3532_v27 = vcombine.low %v11443_v14, %v11442_v46  ;;  %v3533_v9 = vcombine.high %v11443_v14, %v11442_v46  ;;  %v11445_v38 = vld [vmem:[#allocation22_spill] sm:$0xff]  ;;  %v8567_v35 = vpop.eup %8566 }
 0x4e9   : > { %8197 = vmatmul.mubr.msk.bf16.vlgmr.msra.gmra.mrb[64].mxu1 %vm4332_vm1, %v5444_v17  ;;  %8203 = vmatmul.mubr.msk.bf16.vlgmr.msra.gmra.mrb[40].mxu0 %vm4332_vm1, %v5445_v40  ;;  %v5447_v58 = vpack.c.bf16 %v5426_v51, %v5425_v59  ;;  %v11441_v40 = vld [vmem:[#allocation24_spill] sm:$0xff]  ;;  %v3540_v33 = vrot.slane %v3532_v27, %v9250_v3  ;;  %v3547_v41 = vrot.slane %v3533_v9, %v9250_v3 }
 0x4ea   : > { %8207 = vmatpush3.bf16.msra.mxu1 %v4325_v15  ;;  %8213 = vmatpush3.bf16.msra.mxu0 %v4326_v21  ;;  %v3548_v28 = vcombine.low %v11441_v40, %v3221_v6  ;;  %v3549_v47 = vcombine.high %v11441_v40, %v3221_v6  ;;  %v3676_v15 = vrot.slane %v3668_v12, %v9250_v3 }
 0x4eb   : > { %8214 = vmatprep.mubr.msk.bf16.mxu0 %vm8795_vm0, %v11416_v44  ;;  %8208 = vmatprep.mubr.msk.bf16.mxu1 %vm8795_vm0, %v11416_v44 }
 0x4ec   : > { %8218 = vmatprep.subr.bf16.mxu1 %v11416_v44  ;;  %8224 = vmatprep.subr.bf16.mxu0 %v11416_v44  ;;  %v3556_v57 = vrot.slane %v3548_v28, %v9250_v3  ;;  %v3563_v19 = vrot.slane %v3549_v47, %v9250_v3 }
 0x4ee   : > { %v3596_v49 = vcombine.low %v3540_v33, %v3556_v57  ;;  %v3597_v55 = vcombine.high %v3540_v33, %v3556_v57  ;;  %v3612_v23 = vcombine.low %v3547_v41, %v3563_v19  ;;  %v3613_v25 = vcombine.high %v3547_v41, %v3563_v19  ;;  %v11446_v33 = vld [vmem:[#allocation28_spill] sm:$0xff] }
 0x4ef   : > { %v5423_v19 = vmul.f32 %v8567_v35, %v11446_v33 }
 0x4f0   : > { %v3604_v31 = vrot.slane %v3596_v49, %v9256_v11  ;;  %v3611_v16 = vrot.slane %v3597_v55, %v9256_v11  ;;  %v3620_v10 = vrot.slane %v3612_v23, %v9256_v11  ;;  %v3627_v62 = vrot.slane %v3613_v25, %v9256_v11 }
 0x4f1   : > { %8215 = vmatmul.mubr.msk.bf16.vlgmr.msra.gmra.mrb[44].mxu0 %vm4332_vm1, %v5447_v58 }
 0x4f2   : > { %8226 = vmatprep.mubr.msk.bf16.mxu0 %vm8795_vm0, %v11416_v44  ;;  %v7794_v13 = vcombine.low %v3604_v31, %v3611_v16  ;;  %v7796_v29 = vcombine.high %v3604_v31, %v3611_v16  ;;  %v7798_v17 = vcombine.low %v3620_v10, %v3627_v62  ;;  %v7800_v34 = vcombine.high %v3620_v10, %v3627_v62 }
 0x4f4   : > { %v4059_v32 = vrot.slane %v7794_v13, %v9250_v3  ;;  %v4075_v63 = vrot.slane %v7796_v29, %v9250_v3  ;;  %v4091_v28 = vrot.slane %v7798_v17, %v9250_v3  ;;  %v4107_v46 = vrot.slane %v7800_v34, %v9250_v3 }
 0x4f6   : > { %v4124_v49 = vcombine.low %v4059_v32, %v4075_v63  ;;  %v4125_v13 = vcombine.high %v4059_v32, %v4075_v63  ;;  %v4157_v29 = vcombine.high %v4091_v28, %v4107_v46 }
 0x4f8   : > { %v4139_v63 = vrot.slane %v4125_v13, %v9256_v11 }
 0x50d   : > { %v5357_v20 = vpop.xlane.xlu1 %5356  ;;  %v5336_v1 = vpop.xlane.xlu0 %5335 }
 0x50e   : > { %8568 = vrcp.f32 %v5336_v1  ;;  %v4156_v1 = vcombine.low %v4091_v28, %v4107_v46 }
 0x511   : > { %v3223_v5 = vpop.permute.xlu1 %3222  ;;  %v5345_v42 = vpop.xlane.xlu0 %5344 }
 0x512   : > { %v3684_v30 = vcombine.low %v11445_v38, %v3223_v5  ;;  %v3685_v26 = vcombine.high %v11445_v38, %v3223_v5  ;;  %8570 = vrcp.f32 %v5345_v42 }
 0x514   : > { %v3692_v36 = vrot.slane %v3684_v30, %v9250_v3  ;;  %v3699_v21 = vrot.slane %v3685_v26, %v9250_v3  ;;  %v4164_v30 = vrot.slane %v4156_v1, %v9256_v11 }
 0x515   : > { %v5348_v51 = vpop.xlane.xlu0 %5347 }
 0x516   : > { %v3732_v59 = vcombine.low %v3676_v15, %v3692_v36  ;;  %v3733_v58 = vcombine.high %v3676_v15, %v3692_v36  ;;  %v3748_v6 = vcombine.low %v3683_v48, %v3699_v21  ;;  %v3749_v40 = vcombine.high %v3683_v48, %v3699_v21 }
 0x517   : > { %8572 = vrcp.f32 %v5348_v51  ;;  %v4171_v51 = vrot.slane %v4157_v29, %v9256_v11 }
 0x518   : > { %v3740_v14 = vrot.slane %v3732_v59, %v9256_v11  ;;  %v3747_v27 = vrot.slane %v3733_v58, %v9256_v11  ;;  %v3756_v47 = vrot.slane %v3748_v6, %v9256_v11  ;;  %v3763_v9 = vrot.slane %v3749_v40, %v9256_v11  ;;  %v8569_v57 = vpop.eup %8568 }
 0x519   : > { %v10961_v41 = vpop.xlane.xlu0 %5362  ;;  %v5424_v55 = vmul.f32 %v8569_v57, %v10758_v43  ;;  %8574 = vrcp.f32 %v5357_v20  ;;  %v4132_v20 = vrot.slane %v4124_v49, %v9256_v11  ;;  %v4179_v49 = vcombine.high %v4139_v63, %v4171_v51 }
 0x51a   : > { %v7802_v23 = vcombine.low %v3740_v14, %v3747_v27  ;;  %v7804_v25 = vcombine.high %v3740_v14, %v3747_v27  ;;  %v7806_v31 = vcombine.low %v3756_v47, %v3763_v9  ;;  %v7808_v16 = vcombine.high %v3756_v47, %v3763_v9 }
 0x51b   : > { %v5446_v12 = vpack.c.bf16 %v5424_v55, %v5423_v19  ;;  %v4176_v35 = vcombine.low %v4132_v20, %v4164_v30  ;;  %v4177_v58 = vcombine.high %v4132_v20, %v4164_v30 }
 0x51c   : > { %v4195_v10 = vrot.slane %v7802_v23, %v9250_v3  ;;  %v4211_v62 = vrot.slane %v7804_v25, %v9250_v3  ;;  %v4227_v56 = vrot.slane %v7806_v31, %v9250_v3  ;;  %v4243_v53 = vrot.slane %v7808_v16, %v9250_v3  ;;  %v8571_v38 = vpop.eup %8570 }
 0x51d   : > { %v5360_v43 = vpop.xlane.xlu0 %5359  ;;  %8209 = vmatmul.mubr.msk.bf16.vlgmr.msra.gmra.mrb[68].mxu1 %vm4332_vm1, %v5446_v12  ;;  %v5427_v21 = vmul.f32 %v8571_v38, %v10767_v50  ;;  %v4178_v50 = vcombine.low %v4139_v63, %v4171_v51 }
 0x51e   : > { %8576 = vrcp.f32 %v5360_v43  ;;  %v4260_v5 = vcombine.low %v4195_v10, %v4211_v62  ;;  %v4261_v42 = vcombine.high %v4195_v10, %v4211_v62  ;;  %8219 = vmatpush3.bf16.msra.mxu1 %v4327_v4  ;;  %8220 = vmatprep.mubr.msk.bf16.mxu1 %vm8795_vm0, %v11416_v44  ;;  %v4292_v26 = vcombine.low %v4227_v56, %v4243_v53 }
 0x51f   : > { %v4293_v39 = vcombine.high %v4227_v56, %v4243_v53  ;;  %8230 = vmatprep.subr.bf16.mxu1 %v11416_v44 }
 0x520   : > { %v4268_v54 = vrot.slane %v4260_v5, %v9256_v11  ;;  %v4300_v15 = vrot.slane %v4292_v26, %v9256_v11  ;;  %v4275_v48 = vrot.slane %v4261_v42, %v9256_v11 }
 0x521   : > { %v8573_v17 = vpop.eup %8572  ;;  %v5369_v34 = vpop.xlane.xlu0 %5368  ;;  %v4307_v36 = vrot.slane %v4293_v39, %v9256_v11 }
 0x522   : > { %v5428_v32 = vmul.f32 %v8573_v17, %v10772_v22  ;;  %v4312_v59 = vcombine.low %v4268_v54, %v4300_v15  ;;  %v4313_v6 = vcombine.high %v4268_v54, %v4300_v15  ;;  %8578 = vrcp.f32 %v5369_v34 }
 0x523   : > { %v8575_v28 = vpop.eup %8574  ;;  %v4314_v47 = vcombine.low %v4275_v48, %v4307_v36  ;;  %v4315_v19 = vcombine.high %v4275_v48, %v4307_v36 }
 0x524   : > { %v5448_v40 = vpack.c.bf16 %v5428_v32, %v5427_v21  ;;  %v4328_v14 = vpack.c.bf16 %v4312_v59, %v4176_v35  ;;  %v4329_v27 = vpack.c.bf16 %v4313_v6, %v4177_v58  ;;  %v5431_v9 = vmul.f32 %v8575_v28, %v10760_v61 }
 0x525   : > { %v5372_v46 = vpop.xlane.xlu0 %5371  ;;  %v4330_v33 = vpack.c.bf16 %v4314_v47, %v4178_v50  ;;  %v4331_v55 = vpack.c.bf16 %v4315_v19, %v4179_v49 }
 0x526   : > { %8221 = vmatmul.mubr.msk.bf16.vlgmr.msra.gmra.mrb[72].mxu1 %vm4332_vm1, %v5448_v40  ;;  %8580 = vrcp.f32 %v5372_v46  ;;  %8225 = vmatpush3.bf16.msra.mxu0 %v4328_v14 }
 0x527   : > { %8231 = vmatpush3.bf16.msra.mxu1 %v4329_v27  ;;  %8236 = vmatprep.subr.bf16.mxu0 %v11416_v44  ;;  %8582 = vrcp.f32 %v10961_v41 }
 0x528   : > { %v8577_v22 = vpop.eup %8576  ;;  %8232 = vmatprep.mubr.msk.bf16.mxu1 %vm8795_vm0, %v11416_v44  ;;  %8242 = vmatprep.subr.bf16.mxu1 %v11416_v44 }
 0x529   : > { %v5432_v57 = vmul.f32 %v8577_v22, %v10780_v2  ;;  %8227 = vmatmul.mubr.msk.bf16.vlgmr.msra.gmra.mrb[48].mxu0 %vm4332_vm1, %v5449_v24 }
 0x52a   : > { %8237 = vmatpush3.bf16.msra.mxu0 %v4330_v33  ;;  %8238 = vmatprep.mubr.msk.bf16.mxu0 %vm8795_vm0, %v11416_v44 }
 0x52b   : > { %v5450_v52 = vpack.c.bf16 %v5432_v57, %v5431_v9 }
 0x52c   : > { %v8579_v23 = vpop.eup %8578 }
 0x52d   : > { %v5435_v2 = vmul.f32 %v8579_v23, %v10784_v60 }
 0x52e   : > { %8233 = vmatmul.mubr.msk.bf16.vlgmr.msra.gmra.mrb[76].mxu1 %vm4332_vm1, %v5450_v52 }
 0x52f   : > { %8243 = vmatpush3.bf16.msra.mxu1 %v4331_v55  ;;  %8244 = vmatprep.mubr.msk.bf16.mxu1 %vm8795_vm0, %v11416_v44 }
 0x530   : > { %v8581_v61 = vpop.eup %8580 }
 0x531   : > { %v5436_v7 = vmul.f32 %v8581_v61, %v10790_v18  ;;  %v8583_v25 = vpop.eup %8582 }
 0x532   : > { %v5433_v16 = vmul.f32 %v8583_v25, %v10776_v0 }
 0x533   : > { %v5452_v37 = vpack.c.bf16 %v5436_v7, %v5435_v2 }
 0x536   : > { %8245 = vmatmul.mubr.msk.bf16.vlgmr.msra.gmra.mrb[80].mxu1 %vm4332_vm1, %v5452_v37 }
 0x542   : > { %v5366_v24 = vpop.xlane.xlu1 %5365 }
 0x543   : > { %8584 = vrcp.f32 %v5366_v24 }
 0x54d   : > { %v8585_v31 = vpop.eup %8584 }
 0x54e   : > { %v5434_v1 = vmul.f32 %v8585_v31, %v10820_v45 }
 0x550   : > { %v5451_v10 = vpack.c.bf16 %v5434_v1, %v5433_v16 }
 0x552   : > { %8239 = vmatmul.mubr.msk.bf16.vlgmr.msra.gmra.mrb[52].mxu0 %vm4332_vm1, %v5451_v10 }
 0x576   : > { %v5490_v44 = vpop.f32.mrb[24].mxu0 }
 0x577   : > { %v8156_v60 = vpop.f32.mrb[25].mxu0 }
 0x578   : > { %v5493_v62 = vpop.f32.mrb[26].mxu0 }
 0x579   : > { %v8157_v18 = vpop.f32.mrb[27].mxu0 }
 0x581   : > { %v5534_v56 = vpop.f32.mrb[52].mxu1 }
 0x582   : > { %v8162_v12 = vpop.f32.mrb[53].mxu1 }
 0x583   : > { %v5537_v53 = vpop.f32.mrb[54].mxu1 }
 0x584   : > { %v8163_v8 = vpop.f32.mrb[55].mxu1 }
 0x59d   : > { %v5578_v41 = vpop.f32.mrb[28].mxu0 }
 0x59e   : > { %v6157_v4 = vcombine.low %v5490_v44, %v5578_v41  ;;  %v6158_v43 = vcombine.high %v5490_v44, %v5578_v41  ;;  %v8168_v13 = vpop.f32.mrb[29].mxu0 }
 0x59f   : > { %v5581_v29 = vpop.f32.mrb[30].mxu0 }
 0x5a0   : > { %v6293_v20 = vcombine.low %v5493_v62, %v5581_v29  ;;  %v6294_v0 = vcombine.high %v5493_v62, %v5581_v29  ;;  %v8169_v5 = vpop.f32.mrb[31].mxu0  ;;  %v6165_v26 = vrot.slane %v6157_v4, %v9250_v3  ;;  %v6172_v39 = vrot.slane %v6158_v43, %v9250_v3 }
 0x5a2   : > { %v6301_v58 = vrot.slane %v6293_v20, %v9250_v3  ;;  %v6308_v6 = vrot.slane %v6294_v0, %v9250_v3 }
 0x5a8   : > { %v5622_v45 = vpop.f32.mrb[56].mxu1 }
 0x5a9   : > { %v6173_v42 = vcombine.low %v5534_v56, %v5622_v45  ;;  %v6174_v38 = vcombine.high %v5534_v56, %v5622_v45  ;;  %v8174_v30 = vpop.f32.mrb[57].mxu1 }
 0x5aa   : > { %v5625_v54 = vpop.f32.mrb[58].mxu1 }
 0x5ab   : > { %v6181_v17 = vrot.slane %v6173_v42, %v9250_v3  ;;  %v6188_v34 = vrot.slane %v6174_v38, %v9250_v3  ;;  %v6309_v15 = vcombine.low %v5537_v53, %v5625_v54  ;;  %v6310_v48 = vcombine.high %v5537_v53, %v5625_v54  ;;  %v8175_v36 = vpop.f32.mrb[59].mxu1 }
 0x5ac   : > { %v5666_v21 = vpop.f32.mrb[32].mxu0 }
 0x5ad   : > { %v6221_v32 = vcombine.low %v6165_v26, %v6181_v17  ;;  %v6222_v63 = vcombine.high %v6165_v26, %v6181_v17  ;;  %v6237_v51 = vcombine.low %v6172_v39, %v6188_v34  ;;  %v6238_v35 = vcombine.high %v6172_v39, %v6188_v34  ;;  %v8180_v59 = vpop.f32.mrb[33].mxu0 }
 0x5ae   : > { %v6317_v40 = vrot.slane %v6309_v15, %v9250_v3  ;;  %v6324_v28 = vrot.slane %v6310_v48, %v9250_v3  ;;  %v11018_v46 = vpop.f32.mrb[34].mxu0 }
 0x5af   : > { %v6229_v14 = vrot.slane %v6221_v32, %v9256_v11  ;;  %v6236_v27 = vrot.slane %v6222_v63, %v9256_v11  ;;  %v6245_v47 = vrot.slane %v6237_v51, %v9256_v11  ;;  %v6252_v50 = vrot.slane %v6238_v35, %v9256_v11  ;;  %v8181_v22 = vpop.f32.mrb[35].mxu0 }
 0x5b0   : > { %v6357_v9 = vcombine.low %v6301_v58, %v6317_v40  ;;  %v6358_v57 = vcombine.high %v6301_v58, %v6317_v40  ;;  %v6373_v33 = vcombine.low %v6308_v6, %v6324_v28  ;;  %v6374_v19 = vcombine.high %v6308_v6, %v6324_v28  ;;  %v11024_v52 = vpop.f32.mrb[60].mxu1 }
 0x5b1   : > { %v7841_v49 = vcombine.low %v6229_v14, %v6236_v27  ;;  %v7843_v55 = vcombine.high %v6229_v14, %v6236_v27  ;;  %v7845_v23 = vcombine.low %v6245_v47, %v6252_v50  ;;  %v7847_v61 = vcombine.high %v6245_v47, %v6252_v50  ;;  %v8186_v2 = vpop.f32.mrb[61].mxu1 }
 0x5b2   : > { %v6365_v7 = vrot.slane %v6357_v9, %v9256_v11  ;;  %v6372_v37 = vrot.slane %v6358_v57, %v9256_v11  ;;  %v6381_v24 = vrot.slane %v6373_v33, %v9256_v11  ;;  %v6388_v25 = vrot.slane %v6374_v19, %v9256_v11  ;;  %v11030_v31 = vpop.f32.mrb[62].mxu1 }
 0x5b3   : > { %v6709_v16 = vrot.slane %v7841_v49, %v9250_v3  ;;  %v6725_v1 = vrot.slane %v7843_v55, %v9250_v3  ;;  %v6741_v10 = vrot.slane %v7845_v23, %v9250_v3  ;;  %v6757_v44 = vrot.slane %v7847_v61, %v9250_v3  ;;  %v8187_v60 = vpop.f32.mrb[63].mxu1 }
 0x5b4   : > { %v7849_v62 = vcombine.low %v6365_v7, %v6372_v37  ;;  %v7851_v18 = vcombine.high %v6365_v7, %v6372_v37  ;;  %v7853_v56 = vcombine.low %v6381_v24, %v6388_v25  ;;  %v7855_v12 = vcombine.high %v6381_v24, %v6388_v25  ;;  %v5754_v53 = vpop.f32.mrb[36].mxu0 }
 0x5b5   : > { %v6189_v8 = vcombine.low %v5666_v21, %v5754_v53  ;;  %v6190_v41 = vcombine.high %v5666_v21, %v5754_v53  ;;  %v8192_v4 = vpop.f32.mrb[37].mxu0  ;;  %v6766_v43 = vcombine.high %v6709_v16, %v6725_v1  ;;  %v6798_v13 = vcombine.high %v6741_v10, %v6757_v44 }
 0x5b6   : > { %v6845_v29 = vrot.slane %v7849_v62, %v9250_v3  ;;  %v6861_v20 = vrot.slane %v7851_v18, %v9250_v3  ;;  %v6877_v0 = vrot.slane %v7853_v56, %v9250_v3  ;;  %v6893_v5 = vrot.slane %v7855_v12, %v9250_v3  ;;  %v5757_v45 = vpop.f32.mrb[38].mxu0 }
 0x5b7   : > { %v6197_v42 = vrot.slane %v6189_v8, %v9250_v3  ;;  %v6325_v38 = vcombine.low %v11018_v46, %v5757_v45  ;;  %v6326_v30 = vcombine.high %v11018_v46, %v5757_v45  ;;  %v8193_v26 = vpop.f32.mrb[39].mxu0  ;;  %v6780_v39 = vrot.slane %v6766_v43, %v9256_v11 }
 0x5b8   : > { %v6812_v54 = vrot.slane %v6798_v13, %v9256_v11  ;;  %v6902_v17 = vcombine.high %v6845_v29, %v6861_v20  ;;  %v6934_v34 = vcombine.high %v6877_v0, %v6893_v5  ;;  %v6204_v15 = vrot.slane %v6190_v41, %v9250_v3 }
 0x5b9   : > { %v6333_v48 = vrot.slane %v6325_v38, %v9250_v3  ;;  %v6765_v36 = vcombine.low %v6709_v16, %v6725_v1  ;;  %v6797_v21 = vcombine.low %v6741_v10, %v6757_v44  ;;  %v6901_v35 = vcombine.low %v6845_v29, %v6861_v20 }
 0x5ba   : > { %v6832_v32 = vcombine.high %v6780_v39, %v6812_v54  ;;  %v6916_v63 = vrot.slane %v6902_v17, %v9256_v11  ;;  %v6948_v51 = vrot.slane %v6934_v34, %v9256_v11  ;;  %v6933_v40 = vcombine.low %v6877_v0, %v6893_v5 }
 0x5bb   : > { %v11050_v58 = vrot.slane %v6765_v36, %v9256_v11  ;;  %v11053_v6 = vrot.slane %v6797_v21, %v9256_v11  ;;  %v6831_v28 = vcombine.low %v6780_v39, %v6812_v54  ;;  %v11060_v22 = vrot.slane %v6901_v35, %v9256_v11 }
 0x5bc   : > { %v5798_v59 = vpop.f32.mrb[64].mxu1  ;;  %v11057_v27 = vpop.f32.mrb[40].mxu0  ;;  %v6968_v50 = vcombine.high %v6916_v63, %v6948_v51  ;;  %v11065_v19 = vrot.slane %v6933_v40, %v9256_v11  ;;  %v6967_v49 = vcombine.low %v6916_v63, %v6948_v51  ;;  %v6340_v56 = vrot.slane %v6326_v30, %v9250_v3 }
 0x5bd   : > { %v6205_v46 = vcombine.low %v11024_v52, %v5798_v59  ;;  %v6206_v14 = vcombine.high %v11024_v52, %v5798_v59  ;;  %v8198_v47 = vpop.f32.mrb[65].mxu1  ;;  %v8204_v9 = vpop.f32.mrb[41].mxu0  ;;  %v6830_v33 = vcombine.high %v11050_v58, %v11053_v6  ;;  %v6829_v55 = vcombine.low %v11050_v58, %v11053_v6 }
 0x5be   : > { %v5801_v57 = vpop.f32.mrb[66].mxu1  ;;  %v11073_v7 = vpop.f32.mrb[42].mxu0  ;;  %v8360_v24 = vpack.i.bf16 %v6968_v50, %v6832_v32  ;;  %v6966_v25 = vcombine.high %v11060_v22, %v11065_v19  ;;  %v8355_v1 = vpack.i.bf16 %v6967_v49, %v6831_v28  ;;  %v6965_v10 = vcombine.low %v11060_v22, %v11065_v19 }
 0x5bf   : > { %v6213_v52 = vrot.slane %v6205_v46, %v9250_v3  ;;  %v6220_v23 = vrot.slane %v6206_v14, %v9250_v3  ;;  %v6341_v61 = vcombine.low %v11030_v31, %v5801_v57  ;;  %v6342_v2 = vcombine.high %v11030_v31, %v5801_v57  ;;  %v8199_v37 = vpop.f32.mrb[67].mxu1  ;;  %v8205_v16 = vpop.f32.mrb[43].mxu0 }
 0x5c0   : > { %8361 = vrot.lane.b32.xlu0 %v8360_v24, %s8791_s7  ;;  %v8350_v53 = vpack.i.bf16 %v6966_v25, %v6830_v33 }
 0x5c1   : > { %v6253_v44 = vcombine.low %v6197_v42, %v6213_v52  ;;  %v6254_v60 = vcombine.high %v6197_v42, %v6213_v52  ;;  %v6269_v62 = vcombine.low %v6204_v15, %v6220_v23  ;;  %v6270_v18 = vcombine.high %v6204_v15, %v6220_v23 }
 0x5c2   : > { %v6349_v31 = vrot.slane %v6341_v61, %v9250_v3  ;;  %v6356_v12 = vrot.slane %v6342_v2, %v9250_v3  ;;  %8351 = vrot.lane.b32.xlu1 %v8350_v53, %s8794_s15 }
 0x5c3   : > { %v6261_v8 = vrot.slane %v6253_v44, %v9256_v11  ;;  %v6268_v41 = vrot.slane %v6254_v60, %v9256_v11  ;;  %v6277_v4 = vrot.slane %v6269_v62, %v9256_v11  ;;  %v6284_v43 = vrot.slane %v6270_v18, %v9256_v11 }
 0x5c4   : > { %v6389_v13 = vcombine.low %v6333_v48, %v6349_v31  ;;  %v6390_v29 = vcombine.high %v6333_v48, %v6349_v31  ;;  %v6405_v20 = vcombine.low %v6340_v56, %v6356_v12  ;;  %v6406_v0 = vcombine.high %v6340_v56, %v6356_v12  ;;  %v11088_v30 = vpop.f32.mrb[44].mxu0 }
 0x5c5   : > { %v7842_v5 = vcombine.low %v6261_v8, %v6268_v41  ;;  %v7844_v45 = vcombine.high %v6261_v8, %v6268_v41  ;;  %v7846_v42 = vcombine.low %v6277_v4, %v6284_v43  ;;  %v7848_v38 = vcombine.high %v6277_v4, %v6284_v43  ;;  %v8216_v34 = vpop.f32.mrb[45].mxu0 }
 0x5c6   : > { %v6397_v26 = vrot.slane %v6389_v13, %v9256_v11  ;;  %v6404_v39 = vrot.slane %v6390_v29, %v9256_v11  ;;  %v6413_v54 = vrot.slane %v6405_v20, %v9256_v11  ;;  %v6420_v17 = vrot.slane %v6406_v0, %v9256_v11  ;;  %v11098_v32 = vpop.f32.mrb[46].mxu0  ;;  %8356 = vrot.lane.b32.xlu1 %v8355_v1, %s8792_s23 }
 0x5c7   : > { %v6716_v15 = vrot.slane %v7842_v5, %v9250_v3  ;;  %v6732_v48 = vrot.slane %v7844_v45, %v9250_v3  ;;  %v6748_v36 = vrot.slane %v7846_v42, %v9250_v3  ;;  %v6764_v21 = vrot.slane %v7848_v38, %v9250_v3  ;;  %v8217_v40 = vpop.f32.mrb[47].mxu0 }
 0x5c8   : > { %v7850_v63 = vcombine.low %v6397_v26, %v6404_v39  ;;  %v7852_v51 = vcombine.high %v6397_v26, %v6404_v39  ;;  %v7854_v35 = vcombine.low %v6413_v54, %v6420_v17  ;;  %v7856_v59 = vcombine.high %v6413_v54, %v6420_v17 }
 0x5c9   : > { %v6429_v28 = vcombine.low %v11057_v27, %v11088_v30  ;;  %v6430_v46 = vcombine.high %v11057_v27, %v11088_v30  ;;  %v6565_v14 = vcombine.low %v11073_v7, %v11098_v32  ;;  %v6566_v47 = vcombine.high %v11073_v7, %v11098_v32 }
 0x5ca   : > { %v6852_v50 = vrot.slane %v7850_v63, %v9250_v3  ;;  %v6868_v9 = vrot.slane %v7852_v51, %v9250_v3  ;;  %v6884_v57 = vrot.slane %v7854_v35, %v9250_v3  ;;  %v6900_v33 = vrot.slane %v7856_v59, %v9250_v3 }
 0x5cb   : > { %v6781_v49 = vcombine.low %v6716_v15, %v6732_v48  ;;  %v6813_v52 = vcombine.low %v6748_v36, %v6764_v21  ;;  %v6782_v2 = vcombine.high %v6716_v15, %v6732_v48  ;;  %v6814_v27 = vcombine.high %v6748_v36, %v6764_v21 }
 0x5cc   : > { %v6917_v23 = vcombine.low %v6852_v50, %v6868_v9  ;;  %v6949_v61 = vcombine.low %v6884_v57, %v6900_v33  ;;  %v6918_v37 = vcombine.high %v6852_v50, %v6868_v9  ;;  %v6950_v24 = vcombine.high %v6884_v57, %v6900_v33 }
 0x5cd   : > { %v6789_v25 = vrot.slane %v6781_v49, %v9256_v11  ;;  %v6821_v7 = vrot.slane %v6813_v52, %v9256_v11  ;;  %v6796_v44 = vrot.slane %v6782_v2, %v9256_v11  ;;  %v6828_v60 = vrot.slane %v6814_v27, %v9256_v11 }
 0x5ce   : > { %v6925_v16 = vrot.slane %v6917_v23, %v9256_v11  ;;  %v6957_v1 = vrot.slane %v6949_v61, %v9256_v11  ;;  %v6932_v62 = vrot.slane %v6918_v37, %v9256_v11  ;;  %v6964_v18 = vrot.slane %v6950_v24, %v9256_v11 }
 0x5cf   : > { %v6833_v56 = vcombine.low %v6789_v25, %v6821_v7  ;;  %v6834_v12 = vcombine.high %v6789_v25, %v6821_v7  ;;  %v6835_v8 = vcombine.low %v6796_v44, %v6828_v60  ;;  %v6836_v4 = vcombine.high %v6796_v44, %v6828_v60 }
 0x5d0   : > { %v6969_v31 = vcombine.low %v6925_v16, %v6957_v1  ;;  %v6970_v53 = vcombine.high %v6925_v16, %v6957_v1  ;;  %v6971_v41 = vcombine.low %v6932_v62, %v6964_v18  ;;  %v6972_v43 = vcombine.high %v6932_v62, %v6964_v18 }
 0x5d1   : > { %v6437_v17 = vrot.slane %v6429_v28, %v9250_v3  ;;  %v6444_v34 = vrot.slane %v6430_v46, %v9250_v3  ;;  %v6573_v57 = vrot.slane %v6565_v14, %v9250_v3  ;;  %v6580_v28 = vrot.slane %v6566_v47, %v9250_v3 }
 0x5d2   : > { %v8365_v13 = vpack.i.bf16 %v6969_v31, %v6833_v56  ;;  %v8370_v29 = vpack.i.bf16 %v6970_v53, %v6834_v12  ;;  %v11121_v20 = vpack.i.bf16 %v6971_v41, %v6835_v8  ;;  %v11123_v0 = vpack.i.bf16 %v6972_v43, %v6836_v4 }
 0x5d4   : > { %8366 = vrot.lane.b32.xlu0 %v8365_v13, %s8790_s9 }
 0x5d8   : > { %8371 = vrot.lane.b32.xlu0 %v8370_v29, %s8789_s21 }
 0x5f0   : > { %v5886_v5 = vpop.f32.mrb[68].mxu1 }
 0x5f1   : > { %v8210_v45 = vpop.f32.mrb[69].mxu1 }
 0x5f2   : > { %v5889_v42 = vpop.f32.mrb[70].mxu1 }
 0x5f3   : > { %v8211_v38 = vpop.f32.mrb[71].mxu1 }
 0x5f9   : > { %v5974_v30 = vpop.f32.mrb[72].mxu1 }
 0x5fa   : > { %v6445_v26 = vcombine.low %v5886_v5, %v5974_v30  ;;  %v6446_v39 = vcombine.high %v5886_v5, %v5974_v30  ;;  %v8222_v54 = vpop.f32.mrb[73].mxu1 }
 0x5fb   : > { %v5977_v15 = vpop.f32.mrb[74].mxu1 }
 0x5fc   : > { %v6453_v48 = vrot.slane %v6445_v26, %v9250_v3  ;;  %v6460_v36 = vrot.slane %v6446_v39, %v9250_v3  ;;  %v6581_v21 = vcombine.low %v5889_v42, %v5977_v15  ;;  %v6582_v32 = vcombine.high %v5889_v42, %v5977_v15  ;;  %v8223_v63 = vpop.f32.mrb[75].mxu1  ;;  %v11131_v51 = vpop.f32.mrb[48].mxu0 }
 0x5fd   : > { %v8228_v9 = vpop.f32.mrb[49].mxu0 }
 0x5fe   : > { %v6493_v35 = vcombine.low %v6437_v17, %v6453_v48  ;;  %v6494_v59 = vcombine.high %v6437_v17, %v6453_v48  ;;  %v6509_v40 = vcombine.low %v6444_v34, %v6460_v36  ;;  %v6510_v50 = vcombine.high %v6444_v34, %v6460_v36  ;;  %v11137_v49 = vpop.f32.mrb[50].mxu0 }
 0x5ff   : > { %v6589_v46 = vrot.slane %v6581_v21, %v9250_v3  ;;  %v6596_v33 = vrot.slane %v6582_v32, %v9250_v3  ;;  %v8229_v27 = vpop.f32.mrb[51].mxu0 }
 0x600   : > { %v6501_v52 = vrot.slane %v6493_v35, %v9256_v11  ;;  %v6508_v23 = vrot.slane %v6494_v59, %v9256_v11  ;;  %v6517_v61 = vrot.slane %v6509_v40, %v9256_v11  ;;  %v6524_v2 = vrot.slane %v6510_v50, %v9256_v11 }
 0x601   : > { %v6629_v37 = vcombine.low %v6573_v57, %v6589_v46  ;;  %v6630_v24 = vcombine.high %v6573_v57, %v6589_v46  ;;  %v6645_v14 = vcombine.low %v6580_v28, %v6596_v33  ;;  %v6646_v25 = vcombine.high %v6580_v28, %v6596_v33  ;;  %v11143_v47 = vpop.f32.mrb[76].mxu1 }
 0x602   : > { %v7857_v7 = vcombine.low %v6501_v52, %v6508_v23  ;;  %v7859_v16 = vcombine.high %v6501_v52, %v6508_v23  ;;  %v7861_v1 = vcombine.low %v6517_v61, %v6524_v2  ;;  %v7863_v44 = vcombine.high %v6517_v61, %v6524_v2  ;;  %v8234_v60 = vpop.f32.mrb[77].mxu1 }
 0x603   : > { %v6637_v62 = vrot.slane %v6629_v37, %v9256_v11  ;;  %v6644_v18 = vrot.slane %v6630_v24, %v9256_v11  ;;  %v6653_v56 = vrot.slane %v6645_v14, %v9256_v11  ;;  %v6660_v31 = vrot.slane %v6646_v25, %v9256_v11  ;;  %v11149_v12 = vpop.f32.mrb[78].mxu1 }
 0x604   : > { %v6981_v53 = vrot.slane %v7857_v7, %v9250_v3  ;;  %v6997_v8 = vrot.slane %v7859_v16, %v9250_v3  ;;  %v7013_v41 = vrot.slane %v7861_v1, %v9250_v3  ;;  %v7029_v4 = vrot.slane %v7863_v44, %v9250_v3  ;;  %v8235_v43 = vpop.f32.mrb[79].mxu1 }
 0x605   : > { %v7865_v13 = vcombine.low %v6637_v62, %v6644_v18  ;;  %v7867_v29 = vcombine.high %v6637_v62, %v6644_v18  ;;  %v7869_v5 = vcombine.low %v6653_v56, %v6660_v31  ;;  %v7871_v45 = vcombine.high %v6653_v56, %v6660_v31  ;;  %v8450_v18 = vld [vmem:[#allocation8 + $0xc0] sm:$0xff]   ;;  %v8451_v56 = vld [vmem:[#allocation8 + $0xc8] sm:$0xff]   ;;  %v8452_v31 = vld [vmem:[#allocation8 + $0xd0] sm:$0xff]  }
 0x606   : > { %v7038_v42 = vcombine.high %v6981_v53, %v6997_v8  ;;  %v7070_v38 = vcombine.high %v7013_v41, %v7029_v4  ;;  %v7037_v30 = vcombine.low %v6981_v53, %v6997_v8  ;;  %v7069_v26 = vcombine.low %v7013_v41, %v7029_v4  ;;  %8248 = vmatprep.subr.bf16.mxu0 %v8450_v18 }
 0x607   : > { %v7117_v39 = vrot.slane %v7865_v13, %v9250_v3  ;;  %v7133_v54 = vrot.slane %v7867_v29, %v9250_v3  ;;  %v7149_v17 = vrot.slane %v7869_v5, %v9250_v3  ;;  %v7165_v34 = vrot.slane %v7871_v45, %v9250_v3  ;;  %8249 = vmatpush3.bf16.msra.mxu0 %v8450_v18 }
 0x608   : > { %v7052_v15 = vrot.slane %v7038_v42, %v9256_v11  ;;  %v7084_v48 = vrot.slane %v7070_v38, %v9256_v11  ;;  %v11162_v36 = vrot.slane %v7037_v30, %v9256_v11  ;;  %v11165_v21 = vrot.slane %v7069_v26, %v9256_v11  ;;  %8250 = vmatprep.subr.bf16.mxu0 %v8451_v56 }
 0x609   : > { %v6150_v32 = vpop.f32.mrb[80].mxu1  ;;  %v7174_v63 = vcombine.high %v7117_v39, %v7133_v54  ;;  %v7206_v35 = vcombine.high %v7149_v17, %v7165_v34  ;;  %v7173_v59 = vcombine.low %v7117_v39, %v7133_v54  ;;  %v7205_v40 = vcombine.low %v7149_v17, %v7165_v34 }
 0x60a   : > { %v6477_v50 = vcombine.low %v11143_v47, %v6150_v32  ;;  %v6478_v9 = vcombine.high %v11143_v47, %v6150_v32  ;;  %v8246_v57 = vpop.f32.mrb[81].mxu1  ;;  %v7103_v28 = vcombine.low %v7052_v15, %v7084_v48  ;;  %v7102_v46 = vcombine.high %v11162_v36, %v11165_v21 }
 0x60b   : > { %v6153_v33 = vpop.f32.mrb[82].mxu1  ;;  %v7188_v52 = vrot.slane %v7174_v63, %v9256_v11  ;;  %v7220_v23 = vrot.slane %v7206_v35, %v9256_v11  ;;  %v11174_v61 = vrot.slane %v7173_v59, %v9256_v11  ;;  %v11177_v2 = vrot.slane %v7205_v40, %v9256_v11  ;;  %8251 = vmatpush3.bf16.msra.mxu0 %v8451_v56 }
 0x60c   : > { %v6613_v27 = vcombine.low %v11149_v12, %v6153_v33  ;;  %v6614_v37 = vcombine.high %v11149_v12, %v6153_v33  ;;  %v8247_v24 = vpop.f32.mrb[83].mxu1  ;;  %v7104_v47 = vcombine.high %v7052_v15, %v7084_v48  ;;  %v7101_v16 = vcombine.low %v11162_v36, %v11165_v21  ;;  %8252 = vmatprep.subr.bf16.mxu0 %v8452_v31  ;;  %v8453_v12 = vld [vmem:[#allocation8 + $0xd8] sm:$0xff]  }
 0x60d   : > { %v7239_v14 = vcombine.low %v7188_v52, %v7220_v23  ;;  %v7238_v25 = vcombine.high %v11174_v61, %v11177_v2  ;;  %v7240_v7 = vcombine.high %v7188_v52, %v7220_v23  ;;  %v7237_v1 = vcombine.low %v11174_v61, %v11177_v2 }
 0x60e   : > { %v6485_v43 = vrot.slane %v6477_v50, %v9250_v3  ;;  %v6628_v54 = vrot.slane %v6614_v37, %v9250_v3 }
 0x60f   : > { %v8385_v44 = vpack.i.bf16 %v7239_v14, %v7103_v28  ;;  %v8375_v60 = vpack.i.bf16 %v7238_v25, %v7102_v46  ;;  %v8390_v62 = vpack.i.bf16 %v7240_v7, %v7104_v47  ;;  %8253 = vmatpush3.bf16.msra.mxu0 %v8452_v31  ;;  %v8454_v31 = vld [vmem:[#allocation8 + $0xe0] sm:$0xff]  }
 0x610   : > { %8254 = vmatprep.subr.bf16.mxu0 %v8453_v12 }
 0x611   : > { %8386 = vrot.lane.b32.xlu1 %v8385_v44, %s8792_s23  ;;  %8376 = vrot.lane.b32.xlu0 %v8375_v60, %s8794_s15 }
 0x613   : > { %8255 = vmatpush3.bf16.msra.mxu0 %v8453_v12 }
 0x614   : > { %8256 = vmatprep.subr.bf16.mxu0 %v8454_v31 }
 0x615   : > { %8391 = vrot.lane.b32.xlu1 %v8390_v62, %s8791_s7  ;;  %8381 = vrot.lane.b32.xlu0 %v11121_v20, %s8787_s18  ;;  %v6492_v20 = vrot.slane %v6478_v9, %v9250_v3 }
 0x617   : > { %8257 = vmatpush3.bf16.msra.mxu0 %v8454_v31 }
 0x619   : > { %8411 = vrot.lane.b32.xlu0 %v11123_v0, %s8788_s20 }
 0x625   : > { %v6106_v53 = vpop.f32.mrb[52].mxu0 }
 0x626   : > { %v6461_v8 = vcombine.low %v11131_v51, %v6106_v53  ;;  %v6462_v41 = vcombine.high %v11131_v51, %v6106_v53  ;;  %v8240_v4 = vpop.f32.mrb[53].mxu0  ;;  %v6621_v51 = vrot.slane %v6613_v27, %v9250_v3 }
 0x627   : > { %v6109_v13 = vpop.f32.mrb[54].mxu0 }
 0x628   : > { %v6469_v29 = vrot.slane %v6461_v8, %v9250_v3  ;;  %v6476_v0 = vrot.slane %v6462_v41, %v9250_v3  ;;  %v6597_v5 = vcombine.low %v11137_v49, %v6109_v13  ;;  %v6598_v45 = vcombine.high %v11137_v49, %v6109_v13  ;;  %v8241_v42 = vpop.f32.mrb[55].mxu0 }
 0x629   : > { %v8455_v42 = vld [vmem:[#allocation8 + $0xe8] sm:$0xff]  }
 0x62a   : > { %v6525_v38 = vcombine.low %v6469_v29, %v6485_v43  ;;  %v6526_v30 = vcombine.high %v6469_v29, %v6485_v43  ;;  %v6541_v26 = vcombine.low %v6476_v0, %v6492_v20  ;;  %v6542_v39 = vcombine.high %v6476_v0, %v6492_v20  ;;  %8258 = vmatprep.subr.bf16.mxu0 %v8455_v42 }
 0x62b   : > { %v6605_v17 = vrot.slane %v6597_v5, %v9250_v3  ;;  %v6612_v34 = vrot.slane %v6598_v45, %v9250_v3  ;;  %8259 = vmatpush3.bf16.msra.mxu0 %v8455_v42 }
 0x62c   : > { %v6533_v15 = vrot.slane %v6525_v38, %v9256_v11  ;;  %v6540_v48 = vrot.slane %v6526_v30, %v9256_v11  ;;  %v6549_v32 = vrot.slane %v6541_v26, %v9256_v11  ;;  %v6556_v49 = vrot.slane %v6542_v39, %v9256_v11 }
 0x62d   : > { %v6661_v63 = vcombine.low %v6605_v17, %v6621_v51  ;;  %v6662_v35 = vcombine.high %v6605_v17, %v6621_v51  ;;  %v6677_v59 = vcombine.low %v6612_v34, %v6628_v54  ;;  %v6678_v40 = vcombine.high %v6612_v34, %v6628_v54 }
 0x62e   : > { %v7858_v50 = vcombine.low %v6533_v15, %v6540_v48  ;;  %v7860_v9 = vcombine.high %v6533_v15, %v6540_v48  ;;  %v7862_v57 = vcombine.low %v6549_v32, %v6556_v49  ;;  %v7864_v28 = vcombine.high %v6549_v32, %v6556_v49  ;;  %v8456_v48 = vld [vmem:[#allocation8 + $0xf0] sm:$0xff]  }
 0x62f   : > { %v6669_v46 = vrot.slane %v6661_v63, %v9256_v11  ;;  %v6676_v33 = vrot.slane %v6662_v35, %v9256_v11  ;;  %v6685_v52 = vrot.slane %v6677_v59, %v9256_v11  ;;  %v6692_v23 = vrot.slane %v6678_v40, %v9256_v11  ;;  %8260 = vmatprep.subr.bf16.mxu0 %v8456_v48 }
 0x630   : > { %v6988_v27 = vrot.slane %v7858_v50, %v9250_v3  ;;  %v7004_v37 = vrot.slane %v7860_v9, %v9250_v3  ;;  %v7020_v24 = vrot.slane %v7862_v57, %v9250_v3  ;;  %v7036_v14 = vrot.slane %v7864_v28, %v9250_v3  ;;  %8261 = vmatpush3.bf16.msra.mxu0 %v8456_v48  ;;  %v8457_v50 = vld [vmem:[#allocation8 + $0xf8] sm:$0xff]  }
 0x631   : > { %v7866_v25 = vcombine.low %v6669_v46, %v6676_v33  ;;  %v7868_v47 = vcombine.high %v6669_v46, %v6676_v33  ;;  %v7870_v7 = vcombine.low %v6685_v52, %v6692_v23  ;;  %v7872_v44 = vcombine.high %v6685_v52, %v6692_v23  ;;  %8262 = vmatprep.subr.bf16.mxu0 %v8457_v50 }
 0x632   : > { %v7053_v60 = vcombine.low %v6988_v27, %v7004_v37  ;;  %v7085_v62 = vcombine.low %v7020_v24, %v7036_v14  ;;  %v7054_v18 = vcombine.high %v6988_v27, %v7004_v37  ;;  %v7086_v56 = vcombine.high %v7020_v24, %v7036_v14 }
 0x633   : > { %v7124_v12 = vrot.slane %v7866_v25, %v9250_v3  ;;  %v7140_v53 = vrot.slane %v7868_v47, %v9250_v3  ;;  %v7156_v8 = vrot.slane %v7870_v7, %v9250_v3  ;;  %v7172_v41 = vrot.slane %v7872_v44, %v9250_v3 }
 0x634   : > { %v7061_v4 = vrot.slane %v7053_v60, %v9256_v11  ;;  %v7093_v43 = vrot.slane %v7085_v62, %v9256_v11  ;;  %v7068_v29 = vrot.slane %v7054_v18, %v9256_v11  ;;  %v7100_v0 = vrot.slane %v7086_v56, %v9256_v11  ;;  %8263 = vmatpush3.bf16.msra.mxu0 %v8457_v50  ;;  %v8352_v57 = vpop.permute.xlu1 %8351 }
 0x635   : > { %v7189_v20 = vcombine.low %v7124_v12, %v7140_v53  ;;  %v7221_v13 = vcombine.low %v7156_v8, %v7172_v41  ;;  %v7190_v26 = vcombine.high %v7124_v12, %v7140_v53  ;;  %v7222_v39 = vcombine.high %v7156_v8, %v7172_v41 }
 0x636   : > { %v7105_v5 = vcombine.low %v7061_v4, %v7093_v43  ;;  %v7106_v45 = vcombine.high %v7061_v4, %v7093_v43  ;;  %v7107_v3 = vcombine.low %v7068_v29, %v7100_v0  ;;  %v7108_v51 = vcombine.high %v7068_v29, %v7100_v0 }
 0x637   : > { %v7197_v38 = vrot.slane %v7189_v20, %v9256_v11  ;;  %v7229_v30 = vrot.slane %v7221_v13, %v9256_v11  ;;  %v7204_v34 = vrot.slane %v7190_v26, %v9256_v11  ;;  %v7236_v15 = vrot.slane %v7222_v39, %v9256_v11  ;;  %v8362_v11 = vpop.permute.xlu0 %8361 }
 0x638   : > { %v8357_v46 = vpop.permute.xlu1 %8356  ;;  %v8354_v33 = vunpack.i.h.bf16 %v8352_v57  ;;  %v8353_v52 = vunpack.i.l.bf16 %v8352_v57  ;;  %v8364_v62 = vunpack.i.h.bf16 %v8362_v11  ;;  %v8363_v18 = vunpack.i.l.bf16 %v8362_v11 }
 0x639   : > { %v7241_v54 = vcombine.low %v7197_v38, %v7229_v30  ;;  %v7242_v17 = vcombine.high %v7197_v38, %v7229_v30  ;;  %v7243_v63 = vcombine.low %v7204_v34, %v7236_v15  ;;  %v7244_v35 = vcombine.high %v7204_v34, %v7236_v15 }
 0x63a   : > { %v8359_v23 = vunpack.i.h.bf16 %v8357_v46  ;;  %v8358_v27 = vunpack.i.l.bf16 %v8357_v46  ;;  %v7357_v24 = vsel %vm4332_vm1, %v6829_v55, %v8353_v52  ;;  %v7358_v14 = vsel %vm4332_vm1, %v6965_v10, %v8354_v33 }
 0x63b   : > { %v8395_v32 = vpack.i.bf16 %v7241_v54, %v7105_v5  ;;  %v8400_v49 = vpack.i.bf16 %v7242_v17, %v7106_v45  ;;  %v8405_v59 = vpack.i.bf16 %v7243_v63, %v7107_v3  ;;  %v8415_v40 = vpack.i.bf16 %v7244_v35, %v7108_v51 }
 0x63c   : > { %v7362_v25 = vsel %vm7361_vm2, %v7357_v24, %v8358_v27  ;;  %v7363_v47 = vsel %vm7361_vm2, %v7358_v14, %v8359_v23  ;;  %v7874_v27 = vld [vmem:[%s11332_s4 + $0x3] ss:$0 sm:$0xff] }
 0x63d   : > { %8396 = vrot.lane.b32.xlu1 %v8395_v32, %s8790_s9  ;;  %v7367_v22 = vsel %vm7366_vm3, %v7362_v25, %v8363_v18  ;;  %v7368_v19 = vsel %vm7366_vm3, %v7363_v47, %v8364_v62 }
 0x641   : > { %8401 = vrot.lane.b32.xlu1 %v8400_v49, %s8789_s21 }
 0x645   : > { %8406 = vrot.lane.b32.xlu1 %v8405_v59, %s8787_s18  ;;  %s8798_s18 = smov [#allocation10]  }
 0x646   : > { %v8367_v9 = vpop.permute.xlu0 %8366 }
 0x647   : > { %v8369_v7 = vunpack.i.h.bf16 %v8367_v9  ;;  %v8368_v44 = vunpack.i.l.bf16 %v8367_v9 }
 0x649   : > { %8416 = vrot.lane.b32.xlu1 %v8415_v40, %s8788_s20  ;;  %v7372_v10 = vsel %vm7371_vm4, %v7367_v22, %v8368_v44  ;;  %v7373_v31 = vsel %vm7371_vm4, %v7368_v19, %v8369_v7  ;;  %s8709_s20 = sshll.u32 %s8798_s18, 4  ;;  %s8710_s20 = int_to_ptr.vmem [resolvable:$false] %s8709_s20 }
 0x64a   : > { %v8372_v28 = vpop.permute.xlu0 %8371  ;;  %s8711_s21 = scalar_lea.vmem %s8710_s20, 1024  ;;  %p8712_p3 = scmp.lt.s32.totalorder %s11279_s0, %s8710_s20 }
 0x64b   : > { %v8374_v56 = vunpack.i.h.bf16 %v8372_v28  ;;  %v8373_v58 = vunpack.i.l.bf16 %v8372_v28  ;;  %p8713_p9 = scmp.lt.s32.totalorder %s8711_s21, %s8705_s25 }
 0x64d   : > { %v7377_v53 = vsel %vm7376_vm5, %v7372_v10, %v8373_v58  ;;  %v7378_v8 = vsel %vm7376_vm5, %v7373_v31, %v8374_v56  ;;  %p8714_p6 = por %p8713_p9, %p8712_p3 }
 0x64f   : > { %p8715_p4 = pnand %p8714_p6, %p8708_p13 }
 0x683   : > { %v8377_v37 = vpop.permute.xlu0 %8376  ;;  %v8387_v5 = vpop.permute.xlu1 %8386 }
 0x684   : > { %v8379_v38 = vunpack.i.h.bf16 %v8377_v37  ;;  %v8378_v30 = vunpack.i.l.bf16 %v8377_v37  ;;  %v8389_v26 = vunpack.i.h.bf16 %v8387_v5  ;;  %v8388_v39 = vunpack.i.l.bf16 %v8387_v5 }
 0x686   : > { %v7360_v51 = vsel %vm4332_vm1, %v7237_v1, %v8379_v38  ;;  %v7359_v54 = vsel %vm4332_vm1, %v7101_v16, %v8378_v30 }
 0x687   : > { %v8382_v60 = vpop.permute.xlu0 %8381  ;;  %v8392_v45 = vpop.permute.xlu1 %8391  ;;  %v7364_v35 = vsel %vm7361_vm2, %v7359_v54, %v8388_v39  ;;  %v7365_v59 = vsel %vm7361_vm2, %v7360_v51, %v8389_v26 }
 0x688   : > { %v8384_v6 = vunpack.i.h.bf16 %v8382_v60  ;;  %v8383_v55 = vunpack.i.l.bf16 %v8382_v60  ;;  %v8394_v17 = vunpack.i.h.bf16 %v8392_v45  ;;  %v8393_v34 = vunpack.i.l.bf16 %v8392_v45 }
 0x68a   : > { %v7382_v43 = vsel %vm7381_vm6, %v7377_v53, %v8383_v55  ;;  %v7383_v20 = vsel %vm7381_vm6, %v7378_v8, %v8384_v6  ;;  %v7369_v2 = vsel %vm7366_vm3, %v7364_v35, %v8393_v34  ;;  %v7370_v36 = vsel %vm7366_vm3, %v7365_v59, %v8394_v17 }
 0x68b   : > { %v8412_v12 = vpop.permute.xlu0 %8411 }
 0x68c   : > { %v8414_v41 = vunpack.i.h.bf16 %v8412_v12  ;;  %v8413_v4 = vunpack.i.l.bf16 %v8412_v12 }
 0x68e   : > { %v7387_v13 = vsel %vm7386_vm7, %v7382_v43, %v8413_v4  ;;  %v7388_v29 = vsel %vm7386_vm7, %v7383_v20, %v8414_v41 }
 0x68f   : > { %v7391_v0 = vpack.c.bf16 %v7388_v29, %v7387_v13 }
 0x691   : > { %8264 = vmatprep.mubr.bf16.mxu0 %v7391_v0 }
 0x6af   : > { %v8397_v42 = vpop.permute.xlu1 %8396 }
 0x6b0   : > { %v8399_v15 = vunpack.i.h.bf16 %v8397_v42  ;;  %v8398_v48 = vunpack.i.l.bf16 %v8397_v42 }
 0x6b2   : > { %v7374_v21 = vsel %vm7371_vm4, %v7369_v2, %v8398_v48  ;;  %v7375_v16 = vsel %vm7371_vm4, %v7370_v36, %v8399_v15 }
 0x6b3   : > { %v8402_v3 = vpop.permute.xlu1 %8401 }
 0x6b4   : > { %v8404_v49 = vunpack.i.h.bf16 %v8402_v3  ;;  %v8403_v63 = vunpack.i.l.bf16 %v8402_v3 }
 0x6b6   : > { %v7379_v50 = vsel %vm7376_vm5, %v7374_v21, %v8403_v63  ;;  %v7380_v11 = vsel %vm7376_vm5, %v7375_v16, %v8404_v49 }
 0x6b7   : > { %v8407_v32 = vpop.permute.xlu1 %8406 }
 0x6b8   : > { %v8409_v40 = vunpack.i.h.bf16 %v8407_v32  ;;  %v8408_v61 = vunpack.i.l.bf16 %v8407_v32 }
 0x6ba   : > { %v7384_v28 = vsel %vm7381_vm6, %v7379_v50, %v8408_v61  ;;  %v7385_v46 = vsel %vm7381_vm6, %v7380_v11, %v8409_v40 }
 0x6bb   : > { %v8417_v1 = vpop.permute.xlu1 %8416 }
 0x6bc   : > { %v8419_v9 = vunpack.i.h.bf16 %v8417_v1  ;;  %v8418_v57 = vunpack.i.l.bf16 %v8417_v1 }
 0x6be   : > { %v7389_v33 = vsel %vm7386_vm7, %v7384_v28, %v8418_v57  ;;  %v7390_v52 = vsel %vm7386_vm7, %v7385_v46, %v8419_v9 }
 0x6bf   : > { %v7392_v23 = vpack.c.bf16 %v7390_v52, %v7389_v33 }
 0x6c1   : > { %8265 = vmatmul.mubr.bf16.vlgmr.msra.gmra.mrb[56].mxu0 %v7392_v23 }
 0x794   : > { %v8266_v37 = vpop.f32.mrb[56].mxu0 }
 0x795   : > { %v7509_v24 = vadd.f32 %v8266_v37, %v7874_v27  ;;  %v7500_v14 = vpop.f32.mrb[57].mxu0 }
 0x796   : > { %v7501_v25 = vadd.f32 %v7874_v27, %v7500_v14  ;;  %v8267_v47 = vpop.f32.mrb[58].mxu0 }
 0x797   : > { %7517 = vst [vmem:[%s334_s28 + $0x10] sm:$0xff] %v7509_v24  ;;  %v7512_v7 = vadd.f32 %v8267_v47, %v7874_v27  ;;  %v7503_v44 = vpop.f32.mrb[59].mxu0 }
 0x798   : > { %7515 = vst [vmem:[%s334_s28] sm:$0xff] %v7501_v25  ;;  %v7504_v60 = vadd.f32 %v7874_v27, %v7503_v44 }
 0x799   : > { %7518 = vst [vmem:[%s334_s28 + $0x18] sm:$0xff] %v7512_v7 }
 0x79a   : > { %7516 = vst [vmem:[%s334_s28 + $0x8] sm:$0xff] %v7504_v60 }
 0x79b   : > { %8718 = shalt.err (!%p8715_p4)
}
 0x79c   : > { %s8719_s9 = scalar_lea.hbm %s11284_s16, 512  ;;  %s8723_s7 = scalar_lea.hbm %s11333_s5, 1024 }
 0x79d   : > { %p8720_p7 = scmp.ne.s32.totalorder %s11284_s16, %s8719_s9  ;;  %p8724_p11 = scmp.lt.u32.totalorder %s11284_s16, %s11333_s5 }
 0x79e   : > { %p8725_p0 = scmp.lt.u32.totalorder %s8723_s7, %s8719_s9  ;;  %p8727_p2 = scmp.lt.u32.totalorder %s8719_s9, %s11284_s16 }
 0x79f   : > { %p8721_p5 = pnand %p8720_p7, %p11448_p12 }
 0x7a0   : > { %p8726_p1 = por %p8725_p0, %p8724_p11 }
 0x7a1   : > { %p8722_p8 = pneg %p8721_p5 }
 0x7a2   : > { %p8728_p10 = por %p8727_p2, %p8726_p1 }
 0x7a4   : > { %p8729_p13 = pnand %p8728_p10, %p8722_p8 }
 0x7a6   : > { %8732 = shalt.err (!%p8729_p13)
}
 0x7a7   : > { %s8799_s30 = smov 128   ;;  %s8800_s27 = smov 8  }
 0x7a8   : > { %8278 = dma.vmem_to_hbm [thread:$0]  (%p11448_p12), %s11279_s0, 512, %s11284_s16, %s7520_s14, %s8799_s30, %s8799_s30, %s8800_s27  }
 0x7a9 PF: > { %s11449_s24 = sld [smem:[#allocation15_spill]]  ;;  %s11450_s26 = sld [smem:[#allocation20_spill]] }
 0x7aa   : > { %s11451_s6 = sld [smem:[#allocation17_spill]] }
 0x7af   : > { %s7548_s22 = sand.u32 1, %s11449_s24   ;;  %p11452_p3 = scmp.ne.s32.totalorder %s11450_s26, 0 }
 0x7b0   : > { %p11453_p9 = scmp.ge.s32.totalorder %s11451_s6, 2  ;;  %s7549_s29 = scalar_lea.sflag [#allocation4], %s7548_s22 }
 0x7b2   : > { %p8295_p6 = pnand %p11453_p9, %p11452_p3 }
 0x7b4   : > { %8762 = dma.done.wait (!%p8295_p6), %s7549_s29, 512  }
 0x7b5   : > { %8764 = vsyncadd (!%p8295_p6), %s7549_s29, 4294966784  ;;  %s11454_s21 = sld [smem:[#allocation18_spill]]  ;;  %s11455_s28 = sld [smem:[#allocation16_spill]] }
 0x7b6   : > { %s11456_s20 = sld [smem:[#allocation19_spill]]  ;;  %s11457_s18 = smov %s8771_s19 }
 0x7bb   : > { %p22_p4 = scmp.ge.s32.totalorder %s11454_s21, 4   ;;  %s11458_s19 = smov %s11455_s28 }
 0x7bd   :  { %24 = sbr.rel (!%p22_p4) target bundleno = 11 (0xb), region = 119 }
 0x7c4   :  { %7554 = vsyncpa [#allocation3], 1 }
 0x7c5   :  { %7556 = vsyncpa [#allocation3 + $0x1], 1 }
 0x7c6   :  { %7557 = vsyncpa [#allocation6], 1 }
 0x7c7   :  { %7559 = vsyncpa [#allocation6 + $0x1], 1 }
 0x7c8   :  { %7560 = vsyncpa [#allocation9], 1 }
 0x7c9   :  { %7561 = vsyncpa [#allocation4], 1 }
 0x7ca   :  { %7563 = vsyncpa [#allocation4 + $0x1], 1 }

// kernel: tpu_custom_call.1
= control target key start
LH: loop header
LB: loop body
LE: loop exit
PB: predicated region body
PF: predicated region fallthrough
CT: control target
= control target key end

     0   :  { %s11328_s0 = inlined_call_operand.hbm [shape: bf16[64,128], index: 0, kind: input, shape index: {}]   ;;  %s11329_s1 = inlined_call_operand.hbm [shape: bf16[64,128], index: 1, kind: input, shape index: {}]   ;;  %s11330_s2 = inlined_call_operand.hbm [shape: bf16[64,128], index: 2, kind: input, shape index: {}]   ;;  %s11331_s3 = inlined_call_operand.hbm [shape: bf16[4,128,128], index: 3, kind: input, shape index: {}]   ;;  %s11332_s4 = inlined_call_operand.vmem [shape: f32[4,1,128], index: 4, kind: input, shape index: {}]   ;;  %s11333_s5 = inlined_call_operand.hbm [shape: f32[64,128], index: 5, kind: output, shape index: {}]  }
   0x1   :  { %11366 = sst [smem:[#allocation29_spill]] %s11328_s0 }
   0x2   :  { %11367 = sst [smem:[#allocation30_spill]] %s11329_s1 }
   0x3   :  { %10 = vsyncpa [#allocation3], 0 }
   0x4   :  { %12 = vsyncpa [#allocation3 + $0x1], 0 }
   0x5   :  { %13 = vsyncpa [#allocation6], 0 }
   0x6   :  { %15 = vsyncpa [#allocation6 + $0x1], 0 }
   0x7   :  { %16 = vsyncpa [#allocation9], 0 }
   0x8   :  { %17 = vsyncpa [#allocation4], 0 }
   0x9   :  { %19 = vsyncpa [#allocation4 + $0x1], 0  ;;  %s8831_s18 = smov 0   ;;  %s8833_s19 = smov 0  }
   0xa   :  { %s8835_s20 = smov 0   ;;  %s8837_s21 = smov 0  }
   0xb LB: > { %11368 = sst [smem:[#allocation15_spill]] %s8767_s18  ;;  %s8852_s22 = sadd.s32 1, %s8779_s21   ;;  %s8779_s21 = sphi %s8837_s21, %s11454_s21   ;;  %s8775_s20 = sphi %s8835_s20, %s11456_s20   ;;  %s8771_s19 = sphi %s8833_s19, %s11458_s19   ;;  %s8767_s18 = sphi %s8831_s18, %s11457_s18  }
   0xc   : > { %11369 = sst [smem:[#allocation16_spill]] %s8775_s20  ;;  %s32_s23 = sadd.s32 1, %s8775_s20 }
   0xd   : > { %11370 = sst [smem:[#allocation17_spill]] %s8779_s21  ;;  %s29_s24 = ssub.s32 %s8779_s21, %s8852_s22 }
   0xe   : > { %11371 = sst [smem:[#allocation18_spill]] %s8852_s22  ;;  %p11334_p0 = scmp.ne.s32.totalorder %s8775_s20, %s8771_s19 }
   0xf   : > { %p30_p1 = scmp.eq.s32.totalorder %s29_s24, 0  ;;  %p40_p2 = scmp.eq.s32.totalorder %s8779_s21, 0 }
  0x10   : > { %p8299_p5 = scmp.lt.s32.totalorder %s8779_s21, 2  ;;  %s205_s26 = sand.u32 1, %s8775_s20  }
  0x11   : > { %s8861_s25 = scalar_select %p30_p1, %s8775_s20, %s32_s23  }
  0x12   : > { %p41_p3 = por %p40_p2, %p11334_p0  ;;  %s8871_s27 = sshll.u32 %s205_s26, 4 }
  0x13   : > { %11372 = sst [smem:[#allocation19_spill]] %s8861_s25  ;;  %s8874_s28 = sshll.u32 %s8779_s21, 8 }
  0x14   : > { %p8876_p6 = pnand %p8299_p5, %p41_p3  ;;  %s226_s30 = sand.u32 1, %s8779_s21  }
  0x15   : > { %s11374_s1 = sld [smem:[#allocation30_spill]]  ;;  %s230_s9 = scalar_lea.vmem [#allocation5], %s8871_s27 }
  0x16   : > { %s11373_s29 = scalar_select %p8876_p6, 1, 0 }
  0x17   : > { %s237_s10 = sshll.u32 %s230_s9, 4  ;;  %s8890_s11 = scalar_lea.sflag [#allocation6], %s226_s30  ;;  %s8888_s10 = int_to_ptr.vmem [resolvable:$true] %s237_s10 }
  0x18   : > { %p8896_p8 = pneg %p8876_p6 }
  0x1a   : > { %s11375_s13 = scalar_select %p8896_p8, 1, 0 }
  0x1b   : > { %s8885_s8 = scalar_lea.hbm %s11374_s1, %s8874_s28  ;;  %s8592_s16 = scalar_lea.hbm %s11374_s1, 512 }
  0x1c   : > { %s8587_s12 = scalar_lea.hbm %s8885_s8, 256  ;;  %p8593_p11 = scmp.lt.u32.totalorder %s8885_s8, %s11374_s1 }
  0x1d   : > { %p8588_p7 = scmp.ne.s32.totalorder %s8885_s8, %s8587_s12  ;;  %p8594_p12 = scmp.lt.u32.totalorder %s8592_s16, %s8587_s12 }
  0x1e   : > { %p8596_p1 = scmp.lt.u32.totalorder %s8587_s12, %s8885_s8 }
  0x1f   : > { %p8590_p9 = pnand %p8896_p8, %p8588_p7  ;;  %p8595_p13 = por %p8594_p12, %p8593_p11 }
  0x21   : > { %p8591_p10 = pneg %p8590_p9  ;;  %p8597_p2 = por %p8596_p1, %p8595_p13 }
  0x23   : > { %p8598_p3 = pnand %p8597_p2, %p8591_p10 }
  0x25   : > { %8601 = shalt.err (!%p8598_p3)
}
  0x26   : > { %s8602_s24 = scalar_lea.vmem %s8888_s10, 256  ;;  %s8781_s30 = smov [#allocation5]  }
  0x27   : > { %p8603_p5 = scmp.ne.s32.totalorder %s8888_s10, %s8602_s24  ;;  %s8607_s6 = sshll.u32 %s8781_s30, 4  ;;  %s8608_s6 = int_to_ptr.vmem [resolvable:$false] %s8607_s6 }
  0x28   : > { %s8609_s7 = scalar_lea.vmem %s8608_s6, 512  ;;  %p8610_p4 = scmp.lt.s32.totalorder %s8888_s10, %s8608_s6 }
  0x29   : > { %p8605_p7 = pnand %p8603_p5, %p8896_p8  ;;  %p8611_p0 = scmp.lt.s32.totalorder %s8609_s7, %s8602_s24 }
  0x2b   : > { %p8606_p9 = pneg %p8605_p7  ;;  %p8612_p11 = por %p8611_p0, %p8610_p4 }
  0x2d   : > { %p8613_p12 = pnand %p8612_p11, %p8606_p9 }
  0x2f   : > { %8616 = shalt.err (!%p8613_p12)
}
  0x30   : > { %s11335_s9 = smov 64   ;;  %s11337_s12 = smov 4  }
  0x31   : > { %8290 = dma.hbm_to_vmem [thread:$0]  (!%p8876_p6), %s8885_s8, 256, %s8888_s10, %s8890_s11, %s11335_s9, %s11335_s9, %s11337_s12  }
  0x32   : > { %s8924_s14 = sadd.s32 4294967295, %s8779_s21   ;;  %s7659_s15 = sadd.s32 4294967294, %s8779_s21  }
  0x33   : > { %p45_p0 = scmp.ne.s32.totalorder %s8771_s19, %s8767_s18  ;;  %p11341_p4 = scmp.eq.s32.totalorder %s8924_s14, 0 }
  0x34   : > { %p163_p10 = scmp.eq.s32.totalorder %s8924_s14, 1  ;;  %p169_p13 = scmp.eq.s32.totalorder %s7659_s15, 1 }
  0x35   : > { %p8933_p1 = por %p11341_p4, %p45_p0  ;;  %p7660_p2 = scmp.ge.s32.totalorder %s8779_s21, 1 }
  0x36   : > { %p11377_p3 = scmp.ne.s32.totalorder %s8775_s20, %s8771_s19  ;;  %p8945_p7 = por %p169_p13, %p45_p0 }
  0x37   : > { %s11376_s16 = scalar_select %p8933_p1, 1, 0 }
  0x38   : > { %p8941_p5 = por %p163_p10, %p11377_p3  ;;  %p176_p9 = scmp.lt.s32.totalorder %s8779_s21, 3 }
  0x39   : > { %s11379_s10 = scalar_select %p8945_p7, 1, 0 }
  0x3a   : > { %s11378_s8 = scalar_select %p8941_p5, 1, 0 }
  0x3b   : > { %11380 = sst [smem:[#allocation20_spill]] %s11379_s10  ;;  %p8950_p11 = pnand %p7660_p2, %p176_p9 }
  0x3c   : > { %s8784_s23 = smov [#allocation8]   ;;  %s11382_s0 = sld [smem:[#allocation29_spill]] }
  0x3d   : > { %s11381_s17 = scalar_select %p8950_p11, 1, 0 }
  0x3e   : > { %s188_s24 = sshll.u32 %s8784_s23, 4  ;;  %p8280_p12 = pneg %p8950_p11  ;;  %s8954_s24 = int_to_ptr.vmem [resolvable:$true] %s188_s24 }
  0x3f   : > { %s209_s15 = scalar_lea.vmem [#allocation2], %s8871_s27  ;;  %s8975_s23 = scalar_lea.sflag [#allocation3], %s205_s26 }
  0x40   : > { %s216_s9 = sshll.u32 %s209_s15, 4  ;;  %p8967_p0 = pnand %p8280_p12, %p11341_p4  ;;  %s8971_s9 = int_to_ptr.vmem [resolvable:$true] %s216_s9 }
  0x42   : > { %s8962_s7 = scalar_lea.hbm %s11382_s0, %s8874_s28  ;;  %s8622_s25 = scalar_lea.hbm %s11382_s0, 512 }
  0x43   : > { %s11383_s12 = scalar_select %p8967_p0, 1, 0 }
  0x44   : > { %s8617_s1 = scalar_lea.hbm %s8962_s7, 256  ;;  %p8623_p3 = scmp.lt.u32.totalorder %s8962_s7, %s11382_s0 }
  0x45   : > { %p8618_p10 = scmp.ne.s32.totalorder %s8962_s7, %s8617_s1  ;;  %p8624_p9 = scmp.lt.u32.totalorder %s8622_s25, %s8617_s1 }
  0x46   : > { %p8626_p4 = scmp.lt.u32.totalorder %s8617_s1, %s8962_s7 }
  0x47   : > { %p8620_p13 = pnand %p8618_p10, %p8896_p8  ;;  %p8625_p12 = por %p8624_p9, %p8623_p3 }
  0x49   : > { %p8621_p2 = pneg %p8620_p13  ;;  %p8627_p7 = por %p8626_p4, %p8625_p12 }
  0x4b   : > { %p8628_p5 = pnand %p8627_p7, %p8621_p2 }
  0x4d   : > { %8631 = shalt.err (!%p8628_p5)
}
  0x4e   : > { %s8632_s26 = scalar_lea.vmem %s8971_s9, 256  ;;  %s8785_s30 = smov [#allocation2]  }
  0x4f   : > { %p8633_p10 = scmp.ne.s32.totalorder %s8971_s9, %s8632_s26  ;;  %s8637_s6 = sshll.u32 %s8785_s30, 4  ;;  %s8638_s6 = int_to_ptr.vmem [resolvable:$false] %s8637_s6 }
  0x50   : > { %s8639_s22 = scalar_lea.vmem %s8638_s6, 512  ;;  %p8640_p11 = scmp.lt.s32.totalorder %s8971_s9, %s8638_s6 }
  0x51   : > { %p8635_p13 = pnand %p8633_p10, %p8896_p8  ;;  %p8641_p0 = scmp.lt.s32.totalorder %s8639_s22, %s8632_s26 }
  0x53   : > { %p8636_p1 = pneg %p8635_p13  ;;  %p8642_p3 = por %p8641_p0, %p8640_p11 }
  0x55   : > { %p8643_p9 = pnand %p8642_p3, %p8636_p1 }
  0x57   : > { %8646 = shalt.err (!%p8643_p9)
}
  0x58   : > { %s11384_s1 = smov 4   ;;  %s11385_s25 = smov 64  }
  0x59   : > { %8287 = dma.hbm_to_vmem [thread:$0]  (!%p8876_p6), %s8962_s7, 256, %s8971_s9, %s8975_s23, %s11385_s25, %s11385_s25, %s11384_s1  }
  0x5a   : > { %s9006_s0 = scalar_lea.hbm %s11330_s2, %s8874_s28  ;;  %s8647_s22 = scalar_lea.hbm %s11331_s3, 4096 }
  0x5b   : > { %p8648_p4 = scmp.ne.s32.totalorder %s11331_s3, %s8647_s22  ;;  %p11386_p1 = scmp.ne.s32.totalorder %s11383_s12, 0 }
  0x5c   : > { %p8654_p0 = scmp.lt.u32.totalorder %s8647_s22, %s11331_s3 }
  0x5d   : > { %p8649_p5 = pneg %p11386_p1 }
  0x5f   : > { %p8650_p7 = pnand %p8649_p5, %p8648_p4 }
  0x61   : > { %p8651_p11 = pneg %p8650_p7 }
  0x63   : > { %p8656_p2 = pnand %p8654_p0, %p8651_p11 }
  0x65   : > { %8659 = shalt.err (!%p8656_p2)
}
  0x66   : > { %s8660_s28 = scalar_lea.vmem %s8954_s24, 4096  ;;  %p8668_p3 = scmp.lt.s32.totalorder %s8954_s24, %s8954_s24 }
  0x67   : > { %p8661_p12 = scmp.ne.s32.totalorder %s8954_s24, %s8660_s28  ;;  %p8669_p9 = scmp.lt.s32.totalorder %s8660_s28, %s8660_s28 }
  0x69   : > { %p8663_p10 = pnand %p8661_p12, %p8649_p5  ;;  %p8670_p6 = por %p8669_p9, %p8668_p3 }
  0x6b   : > { %p8664_p13 = pneg %p8663_p10 }
  0x6d   : > { %p8671_p8 = pnand %p8670_p6, %p8664_p13 }
  0x6f   : > { %8674 = shalt.err (!%p8671_p8)
}
  0x70   : > { %8283 = dma.hbm_to_vmem [thread:$0]  (!%p11386_p1), %s11331_s3, 4096, %s8954_s24, [#allocation9], %s11385_s25, %s11385_s25, %s11384_s1  }
  0x71   : > { %s251_s21 = scalar_lea.vmem [#allocation7], %s8871_s27  ;;  %s8675_s10 = scalar_lea.hbm %s9006_s0, 256 }
  0x72   : > { %s258_s9 = sshll.u32 %s251_s21, 4  ;;  %p8676_p6 = scmp.ne.s32.totalorder %s9006_s0, %s8675_s10  ;;  %s9033_s9 = int_to_ptr.vmem [resolvable:$true] %s258_s9 }
  0x73   : > { %p11387_p8 = scmp.ne.s32.totalorder %s11375_s13, 0  ;;  %s8680_s23 = scalar_lea.hbm %s11330_s2, 512 }
  0x74   : > { %p8681_p7 = scmp.lt.u32.totalorder %s9006_s0, %s11330_s2  ;;  %p8682_p11 = scmp.lt.u32.totalorder %s8680_s23, %s8675_s10 }
  0x75   : > { %p8678_p4 = pnand %p8676_p6, %p11387_p8  ;;  %p8684_p1 = scmp.lt.u32.totalorder %s8675_s10, %s9006_s0 }
  0x76   : > { %p8683_p0 = por %p8682_p11, %p8681_p7 }
  0x77   : > { %p8679_p5 = pneg %p8678_p4 }
  0x78   : > { %p8685_p2 = por %p8684_p1, %p8683_p0 }
  0x7a   : > { %p8686_p12 = pnand %p8685_p2, %p8679_p5 }
  0x7c   : > { %8689 = shalt.err (!%p8686_p12)
}
  0x7d   : > { %s8690_s27 = scalar_lea.vmem %s9033_s9, 256  ;;  %s8786_s24 = smov [#allocation7]  }
  0x7e   : > { %p8691_p10 = scmp.ne.s32.totalorder %s9033_s9, %s8690_s27  ;;  %s8695_s26 = sshll.u32 %s8786_s24, 4  ;;  %s8696_s26 = int_to_ptr.vmem [resolvable:$false] %s8695_s26 }
  0x7f   : > { %s8697_s6 = scalar_lea.vmem %s8696_s26, 512  ;;  %p8698_p9 = scmp.lt.s32.totalorder %s9033_s9, %s8696_s26 }
  0x80   : > { %p8693_p13 = pnand %p8691_p10, %p11387_p8  ;;  %p8699_p6 = scmp.lt.s32.totalorder %s8697_s6, %s8690_s27 }
  0x82   : > { %p8694_p3 = pneg %p8693_p13  ;;  %p8700_p4 = por %p8699_p6, %p8698_p9 }
  0x84   : > { %p8701_p7 = pnand %p8700_p4, %p8694_p3 }
  0x86   : > { %8704 = shalt.err (!%p8701_p7)
}
  0x87   : > { %p11388_p5 = scmp.ne.s32.totalorder %s11373_s29, 0  ;;  %p11389_p8 = scmp.ne.s32.totalorder %s11381_s17, 0 }
  0x89   : > { %8293 = dma.hbm_to_vmem [thread:$0]  (!%p11388_p5), %s9006_s0, 256, %s9033_s9, %s8890_s11, %s11385_s25, %s11385_s25, %s11384_s1  }
  0x8a   : > { %270 = sbr.rel (%p11389_p8) target bundleno = 1961 (0x7a9), region = 40 }
  0x91   : > { %s9063_s13 = sand.u32 1, %s8771_s19   ;;  %p11390_p11 = scmp.ne.s32.totalorder %s11376_s16, 0 }
  0x92   : > { %s9066_s22 = sshll.u32 %s9063_s13, 4  ;;  %s273_s29 = scalar_lea.sflag [#allocation3], %s9063_s13 }
  0x93   : > { %s276_s28 = scalar_lea.vmem [#allocation2], %s9066_s22 }
  0x94   : > { %8750 = dma.done.wait (%p11390_p11), %s273_s29, 256  }
  0x95   : > { %8752 = vsyncadd (%p11390_p11), %s273_s29, 4294967040  ;;  %s281_s0 = sand.u32 1, %s8924_s14   ;;  %s285_s17 = scalar_lea.vmem [#allocation5], %s9066_s22 }
  0x96   : > { %s282_s11 = scalar_lea.sflag [#allocation6], %s281_s0 }
  0x97   : > { %8754 = dma.done.wait (%p11390_p11), %s282_s11, 512  }
  0x98   : > { %8756 = vsyncadd (%p11390_p11), %s282_s11, 4294966784  ;;  %s294_s1 = scalar_lea.vmem [#allocation7], %s9066_s22  ;;  %p11391_p0 = scmp.eq.s32.totalorder %s8924_s14, 0 }
  0x9a   : > { %8758 = dma.done.wait (%p11391_p0), [#allocation9], 4096   ;;  %p11392_p1 = pmov %p11391_p0 }
  0x9b   : > { %v8420_v0 = vld [vmem:[#allocation8 + $0x40] sm:$0xff]   ;;  %v8421_v1 = vld [vmem:[#allocation8 + $0x48] sm:$0xff]   ;;  %v8422_v2 = vld [vmem:[#allocation8 + $0x50] sm:$0xff]   ;;  %s8787_s18 = smov 96   ;;  %s8788_s20 = smov 112   ;;  %v11353_v46 = vmov 0.0   ;;  %v849_v59 = vlaneseq }
  0x9c   : > { %8760 = vsyncadd (%p11392_p1), [#allocation9], 4294963200  ;;  %8016 = vmatprep.subr.bf16.mxu1 %v8420_v0  ;;  %v8424_v3 = vld [vmem:[#allocation8] sm:$0xff]   ;;  %v8426_v4 = vld [vmem:[#allocation8 + $0x8] sm:$0xff]   ;;  %s8789_s21 = smov 80   ;;  %s8790_s9 = smov 64  }
  0x9d   : > { %8017 = vmatpush3.bf16.msra.mxu1 %v8420_v0  ;;  %7996 = vmatprep.subr.bf16.mxu0 %v8424_v3  ;;  %v8423_v5 = vld [vmem:[#allocation8 + $0x58] sm:$0xff]   ;;  %v8428_v6 = vld [vmem:[#allocation8 + $0x10] sm:$0xff]   ;;  %v8425_v7 = vld [vmem:[#allocation8 + $0x60] sm:$0xff]   ;;  %s8791_s7 = smov 48   ;;  %s8792_s23 = smov 32   ;;  %vm8795_vm0 = vmmov 0  }
  0x9e   : > { %8018 = vmatprep.subr.bf16.mxu1 %v8421_v1  ;;  %7997 = vmatpush3.bf16.msra.mxu0 %v8424_v3  ;;  %v8430_v8 = vld [vmem:[#allocation8 + $0x18] sm:$0xff]   ;;  %v8433_v9 = vld [vmem:[%s285_s17] sm:$0xff]   ;;  %v8427_v10 = vld [vmem:[#allocation8 + $0x68] sm:$0xff]   ;;  %s8794_s15 = smov 16   ;;  %v8796_v57 = vmov 1983009808  }
  0x9f   : > { %7998 = vmatprep.subr.bf16.mxu0 %v8426_v4  ;;  %v8432_v11 = vld [vmem:[#allocation8 + $0x20] sm:$0xff]   ;;  %8032 = vmatprep.mubr.bf16.mxu1 %v8433_v9  ;;  %v8429_v13 = vld [vmem:[#allocation8 + $0x70] sm:$0xff]   ;;  %v8435_v14 = vld [vmem:[#allocation8 + $0x28] sm:$0xff]   ;;  %v847_v58 = vunpack.c.l.s4 %v8796_v57  ;;  %v8797_v60 = vmov 1934713408   ;;  %v850_v63 = vshrl.u32 %v849_v59, 7 }
  0xa0   : > { %v8438_v12 = vld [vmem:[%s276_s28] sm:$0xff]   ;;  %v8431_v15 = vld [vmem:[#allocation8 + $0x78] sm:$0xff]   ;;  %v8441_v22 = vld [vmem:[#allocation8 + $0x88] sm:$0xff]   ;;  %v911_v61 = vunpack.c.l.s4 %v8797_v60  ;;  %vm4332_vm1 = vcmask 130048   ;;  %vm7361_vm2 = vcmask 261120   ;;  %vm7366_vm3 = vcmask 392192  }
  0xa1   : > { %8019 = vmatpush3.bf16.msra.mxu1 %v8421_v1  ;;  %8012 = vmatprep.mubr.bf16.mxu0 %v8438_v12  ;;  %v8436_v16 = vld [vmem:[#allocation8 + $0x30] sm:$0xff]   ;;  %v8437_v17 = vld [vmem:[#allocation8 + $0x38] sm:$0xff]   ;;  %v8440_v19 = vld [vmem:[#allocation8 + $0x80] sm:$0xff]   ;;  %v848_v62 = vunpack.c.0.s8 %v847_v58  ;;  %vm7371_vm4 = vcmask 523264   ;;  %vm7376_vm5 = vcmask 654336   ;;  %vm7381_vm6 = vcmask 785408  }
  0xa2   : > { %8020 = vmatprep.subr.bf16.mxu1 %v8422_v2  ;;  %7999 = vmatpush3.bf16.msra.mxu0 %v8426_v4  ;;  %v8434_v18 = vld [vmem:[%s285_s17 + $0x8] sm:$0xff]   ;;  %v8448_v21 = vld [vmem:[%s294_s1] sm:$0xff]   ;;  %vm7386_vm7 = vcmask 916480   ;;  %s7677_s6 = sshll.u32 %s9063_s13, 5  ;;  %s7891_s11 = sshll.u32 %s8924_s14, 9 }
  0xa3   : > { %8000 = vmatprep.subr.bf16.mxu0 %v8428_v6  ;;  %v8439_v20 = vld [vmem:[%s276_s28 + $0x8] sm:$0xff]   ;;  %v8442_v23 = vld [vmem:[#allocation8 + $0x90] sm:$0xff]   ;;  %v8444_v25 = vld [vmem:[#allocation8 + $0xa0] sm:$0xff]   ;;  %v9250_v3 = vsub.s32 %v848_v62, %v850_v63  ;;  %s334_s28 = scalar_lea.vmem [#allocation10], %s7677_s6  ;;  %s11284_s16 = scalar_lea.hbm %s11333_s5, %s7891_s11 }
  0xa4   : > { %v8443_v24 = vld [vmem:[#allocation8 + $0x98] sm:$0xff]   ;;  %v8445_v26 = vld [vmem:[#allocation8 + $0xa8] sm:$0xff]   ;;  %v8446_v27 = vld [vmem:[#allocation8 + $0xb0] sm:$0xff]   ;;  %s7533_s0 = sshll.u32 %s334_s28, 4  ;;  %s7520_s14 = scalar_lea.sflag [#allocation4], %s9063_s13  ;;  %s11279_s0 = int_to_ptr.vmem [resolvable:$true] %s7533_s0 }
  0xa5   : > { %8021 = vmatpush3.bf16.msra.mxu1 %v8422_v2  ;;  %v8447_v28 = vld [vmem:[#allocation8 + $0xb8] sm:$0xff]   ;;  %v7690_v30 = vld [vmem:[%s11332_s4 + $0x1] ss:$0 sm:$0xff]  ;;  %v7678_v41 = vld [vmem:[%s11332_s4] ss:$0 sm:$0xff]  ;;  %v912_v2 = vunpack.c.0.s8 %v911_v61  ;;  %s8705_s25 = scalar_lea.vmem %s11279_s0, 512 }
  0xa6   : > { %8022 = vmatprep.subr.bf16.mxu1 %v8423_v5  ;;  %8001 = vmatpush3.bf16.msra.mxu0 %v8428_v6  ;;  %v8449_v29 = vld [vmem:[%s294_s1 + $0x8] sm:$0xff]   ;;  %v7702_v55 = vld [vmem:[%s11332_s4 + $0x2] ss:$0 sm:$0xff]  ;;  %p8706_p2 = scmp.ne.s32.totalorder %s11279_s0, %s8705_s25  ;;  %p11448_p12 = scmp.ne.s32.totalorder %s11378_s8, 0 }
  0xa7   : > { %8002 = vmatprep.subr.bf16.mxu0 %v8430_v8 }
  0xa8   : > { %p8707_p10 = pnand %p8706_p2, %p11448_p12 }
  0xa9   : > { %8023 = vmatpush3.bf16.msra.mxu1 %v8423_v5 }
  0xaa   : > { %8024 = vmatprep.subr.bf16.mxu1 %v8425_v7  ;;  %8003 = vmatpush3.bf16.msra.mxu0 %v8430_v8  ;;  %p8708_p13 = pneg %p8707_p10 }
  0xab   : > { %8004 = vmatprep.subr.bf16.mxu0 %v8432_v11 }
  0xad   : > { %8025 = vmatpush3.bf16.msra.mxu1 %v8425_v7 }
  0xae   : > { %8026 = vmatprep.subr.bf16.mxu1 %v8427_v10  ;;  %8005 = vmatpush3.bf16.msra.mxu0 %v8432_v11  ;;  %v9256_v11 = vsub.s32 %v912_v2, %v850_v63 }
  0xaf   : > { %8006 = vmatprep.subr.bf16.mxu0 %v8435_v14 }
  0xb1   : > { %8027 = vmatpush3.bf16.msra.mxu1 %v8427_v10 }
  0xb2   : > { %8028 = vmatprep.subr.bf16.mxu1 %v8429_v13  ;;  %8007 = vmatpush3.bf16.msra.mxu0 %v8435_v14 }
  0xb3   : > { %8008 = vmatprep.subr.bf16.mxu0 %v8436_v16 }
  0xb5   : > { %8029 = vmatpush3.bf16.msra.mxu1 %v8429_v13 }
  0xb6   : > { %8030 = vmatprep.subr.bf16.mxu1 %v8431_v15  ;;  %8009 = vmatpush3.bf16.msra.mxu0 %v8436_v16 }
  0xb7   : > { %8010 = vmatprep.subr.bf16.mxu0 %v8437_v17 }
  0xb9   : > { %8031 = vmatpush3.bf16.msra.mxu1 %v8431_v15 }
  0xba   : > { %8011 = vmatpush3.bf16.msra.mxu0 %v8437_v17  ;;  %8056 = vmatprep.subr.bf16.mxu1 %v11353_v46 }
  0xbb   : > { %8036 = vmatprep.subr.bf16.mxu0 %v8440_v19 }
  0xbc   : > { %8033 = vmatmul.mubr.bf16.vlgmr.msra.gmra.mrb[0].mxu1 %v8434_v18 }
  0xbd   : > { %8013 = vmatmul.mubr.bf16.vlgmr.msra.gmra.mrb[0].mxu0 %v8439_v20  ;;  %8058 = vmatprep.mubr.msk.bf16.mxu1 %vm8795_vm0, %v11353_v46 }
  0xbe   : > { %8037 = vmatpush3.bf16.msra.mxu0 %v8440_v19  ;;  %8052 = vmatprep.mubr.bf16.mxu0 %v8448_v21 }
  0xbf   : > { %8038 = vmatprep.subr.bf16.mxu0 %v8441_v22 }
  0xc2   : > { %8039 = vmatpush3.bf16.msra.mxu0 %v8441_v22 }
  0xc3   : > { %8040 = vmatprep.subr.bf16.mxu0 %v8442_v23 }
  0xc6   : > { %8041 = vmatpush3.bf16.msra.mxu0 %v8442_v23 }
  0xc7   : > { %8042 = vmatprep.subr.bf16.mxu0 %v8443_v24 }
  0xca   : > { %8043 = vmatpush3.bf16.msra.mxu0 %v8443_v24 }
  0xcb   : > { %8044 = vmatprep.subr.bf16.mxu0 %v8444_v25 }
  0xce   : > { %8045 = vmatpush3.bf16.msra.mxu0 %v8444_v25 }
  0xcf   : > { %8046 = vmatprep.subr.bf16.mxu0 %v8445_v26 }
  0xd2   : > { %8047 = vmatpush3.bf16.msra.mxu0 %v8445_v26 }
  0xd3   : > { %8048 = vmatprep.subr.bf16.mxu0 %v8446_v27 }
  0xd6   : > { %8049 = vmatpush3.bf16.msra.mxu0 %v8446_v27 }
  0xd7   : > { %8050 = vmatprep.subr.bf16.mxu0 %v8447_v28 }
  0xda   : > { %8051 = vmatpush3.bf16.msra.mxu0 %v8447_v28 }
  0xdb   : > { %8104 = vmatprep.subr.bf16.mxu0 %v11353_v46 }
  0xdd   : > { %8053 = vmatmul.mubr.bf16.vlgmr.msra.gmra.mrb[4].mxu0 %v8449_v29 }
  0xde   : > { %8106 = vmatprep.mubr.msk.bf16.mxu0 %vm8795_vm0, %v11353_v46 }
 0x18f   : > { %v8034_v31 = vpop.f32.mrb[0].mxu1 }
 0x190   : > { %v603_v32 = vpop.f32.mrb[1].mxu1  ;;  %v8014_v36 = vpop.f32.mrb[0].mxu0  ;;  %v9175_v48 = vadd.f32 %v8034_v31, %v7690_v30 }
 0x191   : > { %v9100_v33 = vadd.f32 %v7690_v30, %v603_v32  ;;  %v8035_v34 = vpop.f32.mrb[2].mxu1  ;;  %v461_v37 = vpop.f32.mrb[1].mxu0  ;;  %v470_v49 = vadd.f32 %v8014_v36, %v7678_v41 }
 0x192   : > { %v606_v35 = vpop.f32.mrb[3].mxu1  ;;  %v8015_v39 = vpop.f32.mrb[2].mxu0  ;;  %v462_v42 = vadd.f32 %v7678_v41, %v461_v37  ;;  %v9153_v47 = vadd.f32 %v8035_v34, %v7690_v30 }
 0x193   : > { %1964 = vrot.lane.b32.xlu1 %v9100_v33, %s8787_s18  ;;  %1952 = vrot.lane.b32.xlu0 %v9100_v33, %s8788_s20  ;;  %v9106_v38 = vadd.f32 %v7690_v30, %v606_v35  ;;  %v464_v40 = vpop.f32.mrb[3].mxu0  ;;  %v473_v50 = vadd.f32 %v8015_v39, %v7678_v41  ;;  %v9189_v51 = vmul.f32 0.25, %v470_v49 }
 0x194   : > { %v465_v43 = vadd.f32 %v7678_v41, %v464_v40  ;;  %v9127_v44 = vmul.f32 0.25, %v462_v42 }
 0x195   : > { %v9191_v52 = vmul.f32 0.25, %v473_v50 }
 0x196   : > { %v9129_v45 = vmul.f32 0.25, %v465_v43 }
 0x197   : > { %1966 = vrot.lane.b32.xlu1 %v9106_v38, %s8787_s18  ;;  %1976 = vrot.lane.b32.xlu0 %v9100_v33, %s8789_s21 }
 0x19b   : > { %1978 = vrot.lane.b32.xlu1 %v9106_v38, %s8789_s21  ;;  %1988 = vrot.lane.b32.xlu0 %v9100_v33, %s8790_s9 }
 0x19f   : > { %1990 = vrot.lane.b32.xlu1 %v9106_v38, %s8790_s9  ;;  %2000 = vrot.lane.b32.xlu0 %v9100_v33, %s8791_s7 }
 0x1a3   : > { %2002 = vrot.lane.b32.xlu1 %v9106_v38, %s8791_s7  ;;  %1954 = vrot.lane.b32.xlu0 %v9106_v38, %s8788_s20 }
 0x1a7   : > { %762 = vrot.lane.b32.xlu1 %v9129_v45, %s8788_s20  ;;  %760 = vrot.lane.b32.xlu0 %v9127_v44, %s8788_s20 }
 0x1ab   : > { %774 = vrot.lane.b32.xlu1 %v9129_v45, %s8787_s18  ;;  %772 = vrot.lane.b32.xlu0 %v9127_v44, %s8787_s18 }
 0x1af   : > { %786 = vrot.lane.b32.xlu1 %v9129_v45, %s8789_s21  ;;  %784 = vrot.lane.b32.xlu0 %v9127_v44, %s8789_s21 }
 0x1b0   : > { %v8054_v53 = vpop.f32.mrb[4].mxu0 }
 0x1b1   : > { %v741_v54 = vpop.f32.mrb[5].mxu0  ;;  %v9240_v56 = vadd.f32 %v8054_v53, %v7702_v55 }
 0x1b2   : > { %v9254_v8 = vadd.f32 %v7702_v55, %v741_v54  ;;  %v8055_v32 = vpop.f32.mrb[6].mxu0 }
 0x1b3   : > { %2014 = vrot.lane.b32.xlu1 %v9106_v38, %s8792_s23  ;;  %2012 = vrot.lane.b32.xlu0 %v9100_v33, %s8792_s23  ;;  %11393 = vst [vmem:[#allocation21_spill] sm:$0xff] %v9240_v56  ;;  %v9292_v42 = vadd.f32 %v8055_v32, %v7702_v55 }
 0x1b5   : > { %11394 = vst [vmem:[#allocation22_spill] sm:$0xff] %v9292_v42 }
 0x1b7   : > { %2026 = vrot.lane.b32.xlu1 %v9106_v38, %s8794_s15  ;;  %2024 = vrot.lane.b32.xlu0 %v9100_v33, %s8794_s15 }
 0x1bb   : > { %1958 = vrot.lane.b32.xlu1 %v9153_v47, %s8788_s20  ;;  %796 = vrot.lane.b32.xlu0 %v9127_v44, %s8790_s9 }
 0x1bf   : > { %1970 = vrot.lane.b32.xlu1 %v9153_v47, %s8787_s18  ;;  %808 = vrot.lane.b32.xlu0 %v9127_v44, %s8791_s7 }
 0x1c3   : > { %798 = vrot.lane.b32.xlu1 %v9129_v45, %s8790_s9  ;;  %820 = vrot.lane.b32.xlu0 %v9127_v44, %s8792_s23 }
 0x1c7   : > { %810 = vrot.lane.b32.xlu1 %v9129_v45, %s8791_s7  ;;  %832 = vrot.lane.b32.xlu0 %v9127_v44, %s8794_s15 }
 0x1cb   : > { %822 = vrot.lane.b32.xlu1 %v9129_v45, %s8792_s23  ;;  %1956 = vrot.lane.b32.xlu0 %v9175_v48, %s8788_s20 }
 0x1cf   : > { %834 = vrot.lane.b32.xlu1 %v9129_v45, %s8794_s15  ;;  %1968 = vrot.lane.b32.xlu0 %v9175_v48, %s8787_s18 }
 0x1d3   : > { %1982 = vrot.lane.b32.xlu1 %v9153_v47, %s8789_s21  ;;  %1980 = vrot.lane.b32.xlu0 %v9175_v48, %s8789_s21 }
 0x1d7   : > { %766 = vrot.lane.b32.xlu1 %v9191_v52, %s8788_s20  ;;  %764 = vrot.lane.b32.xlu0 %v9189_v51, %s8788_s20 }
 0x1db   : > { %778 = vrot.lane.b32.xlu1 %v9191_v52, %s8787_s18  ;;  %776 = vrot.lane.b32.xlu0 %v9189_v51, %s8787_s18 }
 0x1df   : > { %790 = vrot.lane.b32.xlu1 %v9191_v52, %s8789_s21  ;;  %788 = vrot.lane.b32.xlu0 %v9189_v51, %s8789_s21 }
 0x1e3   : > { %1994 = vrot.lane.b32.xlu1 %v9153_v47, %s8790_s9  ;;  %1992 = vrot.lane.b32.xlu0 %v9175_v48, %s8790_s9 }
 0x1e7   : > { %2006 = vrot.lane.b32.xlu1 %v9153_v47, %s8791_s7  ;;  %2004 = vrot.lane.b32.xlu0 %v9175_v48, %s8791_s7 }
 0x1eb   : > { %2018 = vrot.lane.b32.xlu1 %v9153_v47, %s8792_s23  ;;  %2016 = vrot.lane.b32.xlu0 %v9175_v48, %s8792_s23 }
 0x1ef   : > { %2030 = vrot.lane.b32.xlu1 %v9153_v47, %s8794_s15  ;;  %2028 = vrot.lane.b32.xlu0 %v9175_v48, %s8794_s15 }
 0x1f3   : > { %802 = vrot.lane.b32.xlu1 %v9191_v52, %s8790_s9  ;;  %800 = vrot.lane.b32.xlu0 %v9189_v51, %s8790_s9 }
 0x1f7   : > { %814 = vrot.lane.b32.xlu1 %v9191_v52, %s8791_s7  ;;  %812 = vrot.lane.b32.xlu0 %v9189_v51, %s8791_s7 }
 0x1fb   : > { %826 = vrot.lane.b32.xlu1 %v9191_v52, %s8792_s23  ;;  %824 = vrot.lane.b32.xlu0 %v9189_v51, %s8792_s23 }
 0x1ff   : > { %838 = vrot.lane.b32.xlu1 %v9191_v52, %s8794_s15  ;;  %836 = vrot.lane.b32.xlu0 %v9189_v51, %s8794_s15 }
 0x203   : > { %3148 = vrot.lane.b32.xlu1 %v9240_v56, %s8788_s20  ;;  %3172 = vrot.lane.b32.xlu0 %v9240_v56, %s8789_s21 }
 0x205   : > { %v1965_v0 = vpop.permute.xlu1 %1964  ;;  %v1953_v1 = vpop.permute.xlu0 %1952 }
 0x206   : > { %v2036_v4 = vcombine.low %v9100_v33, %v1965_v0  ;;  %v2037_v5 = vcombine.high %v9100_v33, %v1965_v0 }
 0x207   : > { %3160 = vrot.lane.b32.xlu1 %v9240_v56, %s8787_s18  ;;  %3208 = vrot.lane.b32.xlu0 %v9240_v56, %s8792_s23 }
 0x208   : > { %v2044_v12 = vrot.slane %v2036_v4, %v9250_v3  ;;  %v2051_v13 = vrot.slane %v2037_v5, %v9250_v3 }
 0x209   : > { %v1967_v6 = vpop.permute.xlu1 %1966  ;;  %v1977_v7 = vpop.permute.xlu0 %1976 }
 0x20a   : > { %v2052_v9 = vcombine.low %v1953_v1, %v1977_v7  ;;  %v2053_v10 = vcombine.high %v1953_v1, %v1977_v7  ;;  %v2172_v33 = vcombine.low %v9106_v38, %v1967_v6  ;;  %v2173_v34 = vcombine.high %v9106_v38, %v1967_v6 }
 0x20b   : > { %3184 = vrot.lane.b32.xlu1 %v9240_v56, %s8790_s9  ;;  %3168 = vrot.lane.b32.xlu0 %v9254_v8, %s8789_s21 }
 0x20c   : > { %v2060_v14 = vrot.slane %v2052_v9, %v9250_v3  ;;  %v2067_v15 = vrot.slane %v2053_v10, %v9250_v3  ;;  %v2180_v53 = vrot.slane %v2172_v33, %v9250_v3  ;;  %v2187_v54 = vrot.slane %v2173_v34, %v9250_v3 }
 0x20d   : > { %v1979_v16 = vpop.permute.xlu1 %1978  ;;  %v9266_v17 = vpop.permute.xlu0 %1988 }
 0x20e   : > { %v2100_v18 = vcombine.low %v2044_v12, %v2060_v14  ;;  %v2101_v19 = vcombine.high %v2044_v12, %v2060_v14  ;;  %v2116_v20 = vcombine.low %v2051_v13, %v2067_v15  ;;  %v2117_v21 = vcombine.high %v2051_v13, %v2067_v15 }
 0x20f   : > { %3196 = vrot.lane.b32.xlu1 %v9240_v56, %s8791_s7  ;;  %3204 = vrot.lane.b32.xlu0 %v9254_v8, %s8792_s23 }
 0x210   : > { %v2108_v22 = vrot.slane %v2100_v18, %v9256_v11  ;;  %v2115_v23 = vrot.slane %v2101_v19, %v9256_v11  ;;  %v2124_v24 = vrot.slane %v2116_v20, %v9256_v11  ;;  %v2131_v25 = vrot.slane %v2117_v21, %v9256_v11  ;;  %v9316_v18 = vpop.f32.mrb[7].mxu0 }
 0x211   : > { %v9276_v26 = vpop.permute.xlu1 %1990  ;;  %v9278_v27 = vpop.permute.xlu0 %2000 }
 0x212   : > { %v7745_v28 = vcombine.low %v2108_v22, %v2115_v23  ;;  %v7747_v29 = vcombine.high %v2108_v22, %v2115_v23  ;;  %v7749_v30 = vcombine.low %v2124_v24, %v2131_v25  ;;  %v7751_v31 = vcombine.high %v2124_v24, %v2131_v25 }
 0x213   : > { %3144 = vrot.lane.b32.xlu1 %v9254_v8, %s8788_s20  ;;  %3216 = vrot.lane.b32.xlu0 %v9254_v8, %s8794_s15 }
 0x214   : > { %v2588_v35 = vrot.slane %v7745_v28, %v9250_v3  ;;  %v2604_v36 = vrot.slane %v7747_v29, %v9250_v3  ;;  %v2620_v37 = vrot.slane %v7749_v30, %v9250_v3  ;;  %v2636_v39 = vrot.slane %v7751_v31, %v9250_v3 }
 0x215   : > { %v9290_v40 = vpop.permute.xlu1 %2002  ;;  %v1955_v41 = vpop.permute.xlu0 %1954 }
 0x216   : > { %v2188_v38 = vcombine.low %v1955_v41, %v1979_v16  ;;  %v2189_v43 = vcombine.high %v1955_v41, %v1979_v16  ;;  %v2644_v49 = vcombine.low %v2588_v35, %v2604_v36  ;;  %v2676_v50 = vcombine.low %v2620_v37, %v2636_v39 }
 0x217   : > { %3156 = vrot.lane.b32.xlu1 %v9254_v8, %s8787_s18  ;;  %3150 = vrot.lane.b32.xlu0 %v9292_v42, %s8788_s20  ;;  %v2645_v2 = vcombine.high %v2588_v35, %v2604_v36  ;;  %v2677_v4 = vcombine.high %v2620_v37, %v2636_v39 }
 0x218   : > { %v2196_v57 = vrot.slane %v2188_v38, %v9250_v3  ;;  %v2203_v58 = vrot.slane %v2189_v43, %v9250_v3  ;;  %v9303_v0 = vrot.slane %v2644_v49, %v9256_v11  ;;  %v9306_v1 = vrot.slane %v2676_v50, %v9256_v11 }
 0x219   : > { %v763_v55 = vpop.permute.xlu1 %762  ;;  %v761_v59 = vpop.permute.xlu0 %760  ;;  %v9329_v25 = vrot.slane %v2645_v2, %v9256_v11  ;;  %v9332_v28 = vrot.slane %v2677_v4, %v9256_v11 }
 0x21a   : > { %v2236_v60 = vcombine.low %v2180_v53, %v2196_v57  ;;  %v2237_v61 = vcombine.high %v2180_v53, %v2196_v57  ;;  %v2252_v62 = vcombine.low %v2187_v54, %v2203_v58  ;;  %v2253_v63 = vcombine.high %v2187_v54, %v2203_v58 }
 0x21b   : > { %3180 = vrot.lane.b32.xlu1 %v9254_v8, %s8790_s9  ;;  %3186 = vrot.lane.b32.xlu0 %v9292_v42, %s8790_s9  ;;  %v2708_v23 = vcombine.low %v9303_v0, %v9306_v1  ;;  %v2709_v24 = vcombine.high %v9303_v0, %v9306_v1 }
 0x21c   : > { %v2244_v5 = vrot.slane %v2236_v60, %v9256_v11  ;;  %v2251_v6 = vrot.slane %v2237_v61, %v9256_v11  ;;  %v2260_v7 = vrot.slane %v2252_v62, %v9256_v11  ;;  %v2267_v9 = vrot.slane %v2253_v63, %v9256_v11 }
 0x21d   : > { %v775_v10 = vpop.permute.xlu1 %774  ;;  %v773_v12 = vpop.permute.xlu0 %772 }
 0x21e   : > { %v7753_v13 = vcombine.low %v2244_v5, %v2251_v6  ;;  %v7755_v14 = vcombine.high %v2244_v5, %v2251_v6  ;;  %v7757_v15 = vcombine.low %v2260_v7, %v2267_v9  ;;  %v7759_v16 = vcombine.high %v2260_v7, %v2267_v9 }
 0x21f   : > { %v980_v19 = vcombine.low %v9129_v45, %v775_v10  ;;  %v981_v20 = vcombine.high %v9129_v45, %v775_v10  ;;  %v844_v21 = vcombine.low %v9127_v44, %v773_v12  ;;  %v845_v22 = vcombine.high %v9127_v44, %v773_v12  ;;  %3192 = vrot.lane.b32.xlu1 %v9254_v8, %s8791_s7 }
 0x220   : > { %v2724_v30 = vrot.slane %v7753_v13, %v9250_v3  ;;  %v2740_v44 = vrot.slane %v7755_v14, %v9250_v3  ;;  %v2756_v31 = vrot.slane %v7757_v15, %v9250_v3  ;;  %v2772_v32 = vrot.slane %v7759_v16, %v9250_v3 }
 0x221   : > { %v787_v45 = vpop.permute.xlu1 %786  ;;  %v785_v29 = vpop.permute.xlu0 %784  ;;  %v988_v37 = vrot.slane %v980_v19, %v9250_v3  ;;  %v995_v39 = vrot.slane %v981_v20, %v9250_v3  ;;  %v852_v41 = vrot.slane %v844_v21, %v9250_v3  ;;  %v859_v38 = vrot.slane %v845_v22, %v9250_v3 }
 0x222   : > { %v996_v33 = vcombine.low %v763_v55, %v787_v45  ;;  %v997_v34 = vcombine.high %v763_v55, %v787_v45  ;;  %v860_v35 = vcombine.low %v761_v59, %v785_v29  ;;  %v861_v36 = vcombine.high %v761_v59, %v785_v29 }
 0x223   : > { %3162 = vrot.lane.b32.xlu1 %v9292_v42, %s8787_s18  ;;  %v2780_v58 = vcombine.low %v2724_v30, %v2740_v44  ;;  %v2812_v55 = vcombine.low %v2756_v31, %v2772_v32  ;;  %v2781_v59 = vcombine.high %v2724_v30, %v2740_v44  ;;  %v2813_v60 = vcombine.high %v2756_v31, %v2772_v32 }
 0x224   : > { %v1004_v43 = vrot.slane %v996_v33, %v9250_v3  ;;  %v1011_v49 = vrot.slane %v997_v34, %v9250_v3  ;;  %v868_v50 = vrot.slane %v860_v35, %v9250_v3  ;;  %v875_v53 = vrot.slane %v861_v36, %v9250_v3 }
 0x225   : > { %v9348_v54 = vpop.permute.xlu1 %2014  ;;  %v9350_v57 = vpop.permute.xlu0 %2012 }
 0x226   : > { %v1044_v61 = vcombine.low %v988_v37, %v1004_v43  ;;  %v1045_v62 = vcombine.high %v988_v37, %v1004_v43  ;;  %v1060_v63 = vcombine.low %v995_v39, %v1011_v49  ;;  %v1061_v2 = vcombine.high %v995_v39, %v1011_v49 }
 0x227   : > { %v908_v4 = vcombine.low %v852_v41, %v868_v50  ;;  %v909_v5 = vcombine.high %v852_v41, %v868_v50  ;;  %v924_v6 = vcombine.low %v859_v38, %v875_v53  ;;  %v925_v7 = vcombine.high %v859_v38, %v875_v53  ;;  %3174 = vrot.lane.b32.xlu1 %v9292_v42, %s8789_s21 }
 0x228   : > { %v1052_v9 = vrot.slane %v1044_v61, %v9256_v11  ;;  %v1059_v10 = vrot.slane %v1045_v62, %v9256_v11  ;;  %v1068_v12 = vrot.slane %v1060_v63, %v9256_v11  ;;  %v1075_v13 = vrot.slane %v1061_v2, %v9256_v11 }
 0x229   : > { %v916_v14 = vrot.slane %v908_v4, %v9256_v11  ;;  %v923_v15 = vrot.slane %v909_v5, %v9256_v11  ;;  %v932_v16 = vrot.slane %v924_v6, %v9256_v11  ;;  %v939_v19 = vrot.slane %v925_v7, %v9256_v11  ;;  %v2027_v20 = vpop.permute.xlu1 %2026  ;;  %v2025_v21 = vpop.permute.xlu0 %2024 }
 0x22a   : > { %v7721_v22 = vcombine.low %v1052_v9, %v1059_v10  ;;  %v7723_v45 = vcombine.high %v1052_v9, %v1059_v10  ;;  %v7725_v29 = vcombine.low %v1068_v12, %v1075_v13  ;;  %v7727_v30 = vcombine.high %v1068_v12, %v1075_v13 }
 0x22b   : > { %v7713_v44 = vcombine.low %v916_v14, %v923_v15  ;;  %v7715_v31 = vcombine.high %v916_v14, %v923_v15  ;;  %v7717_v32 = vcombine.low %v932_v16, %v939_v19  ;;  %v7719_v33 = vcombine.high %v932_v16, %v939_v19  ;;  %3198 = vrot.lane.b32.xlu1 %v9292_v42, %s8791_s7 }
 0x22c   : > { %v9365_v34 = vrot.slane %v7721_v22, %v9250_v3  ;;  %v9368_v35 = vrot.slane %v7723_v45, %v9250_v3  ;;  %v9375_v39 = vrot.slane %v2780_v58, %v9256_v11  ;;  %v9378_v41 = vrot.slane %v2812_v55, %v9256_v11 }
 0x22d   : > { %v9380_v38 = vpop.permute.xlu1 %1958  ;;  %v9382_v43 = vpop.permute.xlu0 %796  ;;  %v9385_v49 = vrot.slane %v2781_v59, %v9256_v11  ;;  %v9388_v50 = vrot.slane %v2813_v60, %v9256_v11  ;;  %v9391_v53 = vrot.slane %v7725_v29, %v9250_v3  ;;  %v9394_v61 = vrot.slane %v7727_v30, %v9250_v3 }
 0x22e   : > { %v9397_v58 = vrot.slane %v7713_v44, %v9250_v3  ;;  %v9400_v55 = vrot.slane %v7715_v31, %v9250_v3  ;;  %v1588_v62 = vcombine.low %v9365_v34, %v9368_v35  ;;  %v9407_v60 = vrot.slane %v7717_v32, %v9250_v3 }
 0x22f   : > { %v9410_v63 = vrot.slane %v7719_v33, %v9250_v3  ;;  %v2204_v2 = vcombine.low %v9276_v26, %v9348_v54  ;;  %v2205_v4 = vcombine.high %v9276_v26, %v9348_v54  ;;  %v2068_v5 = vcombine.low %v9266_v17, %v9350_v57 }
 0x230   : > { %v2069_v6 = vcombine.high %v9266_v17, %v9350_v57  ;;  %v2220_v7 = vcombine.low %v9290_v40, %v2027_v20  ;;  %v2221_v9 = vcombine.high %v9290_v40, %v2027_v20  ;;  %v2084_v10 = vcombine.low %v9278_v27, %v2025_v21 }
 0x231   : > { %v2085_v12 = vcombine.high %v9278_v27, %v2025_v21  ;;  %v9424_v13 = vpop.permute.xlu1 %1970  ;;  %v9426_v14 = vpop.permute.xlu0 %808  ;;  %v1620_v26 = vcombine.low %v9391_v53, %v9394_v61  ;;  %v2212_v17 = vrot.slane %v2204_v2, %v9250_v3  ;;  %v2219_v57 = vrot.slane %v2205_v4, %v9250_v3 }
 0x232   : > { %v2228_v40 = vrot.slane %v2220_v7, %v9250_v3  ;;  %v2235_v15 = vrot.slane %v2221_v9, %v9250_v3  ;;  %v2092_v27 = vrot.slane %v2084_v10, %v9250_v3  ;;  %v1452_v19 = vcombine.low %v9397_v58, %v9400_v55 }
 0x233   : > { %v2099_v16 = vrot.slane %v2085_v12, %v9250_v3  ;;  %v2076_v20 = vrot.slane %v2068_v5, %v9250_v3  ;;  %v2083_v21 = vrot.slane %v2069_v6, %v9250_v3  ;;  %v2844_v22 = vcombine.low %v9375_v39, %v9378_v41 }
 0x234   : > { %v2268_v45 = vcombine.low %v2212_v17, %v2228_v40  ;;  %v2269_v29 = vcombine.high %v2212_v17, %v2228_v40  ;;  %v2284_v30 = vcombine.low %v2219_v57, %v2235_v15  ;;  %v2285_v44 = vcombine.high %v2219_v57, %v2235_v15 }
 0x235   : > { %v9444_v31 = vpop.permute.xlu1 %798  ;;  %v821_v32 = vpop.permute.xlu0 %820  ;;  %v2132_v33 = vcombine.low %v2076_v20, %v2092_v27  ;;  %v2133_v2 = vcombine.high %v2076_v20, %v2092_v27  ;;  %v2148_v4 = vcombine.low %v2083_v21, %v2099_v16  ;;  %v2149_v7 = vcombine.high %v2083_v21, %v2099_v16 }
 0x236   : > { %v9447_v9 = vrot.slane %v2268_v45, %v9256_v11  ;;  %v9450_v5 = vrot.slane %v2269_v29, %v9256_v11  ;;  %v9453_v6 = vrot.slane %v2284_v30, %v9256_v11  ;;  %v9456_v10 = vrot.slane %v2285_v44, %v9256_v11 }
 0x237   : > { %v1484_v17 = vcombine.low %v9407_v60, %v9410_v63  ;;  %v9467_v15 = vrot.slane %v2132_v33, %v9256_v11  ;;  %v9470_v27 = vrot.slane %v2133_v2, %v9256_v11  ;;  %v9475_v20 = vrot.slane %v1452_v19, %v9256_v11 }
 0x238   : > { %v9484_v44 = vrot.slane %v2148_v4, %v9256_v11  ;;  %v9487_v33 = vrot.slane %v2149_v7, %v9256_v11  ;;  %v3124_v37 = vpack.c.bf16 %v2844_v22, %v2708_v23  ;;  %v876_v29 = vcombine.low %v9382_v43, %v821_v32 }
 0x239   : > { %v9477_v21 = vpop.permute.xlu1 %810  ;;  %v833_v45 = vpop.permute.xlu0 %832  ;;  %v877_v30 = vcombine.high %v9382_v43, %v821_v32  ;;  %v1492_v4 = vrot.slane %v1484_v17, %v9256_v11  ;;  %v1596_v54 = vrot.slane %v1588_v62, %v9256_v11  ;;  %v1628_v7 = vrot.slane %v1620_v26, %v9256_v11 }
 0x23a   : > { %v4337_v59 = vsel %vm4332_vm1, %v3124_v37, 0  ;;  %v2845_v19 = vcombine.high %v9375_v39, %v9378_v41  ;;  %v892_v23 = vcombine.low %v9426_v14, %v833_v45  ;;  %v893_v26 = vcombine.high %v9426_v14, %v833_v45 }
 0x23b   : > { %8057 = vmatpush3.bf16.xpose.msra.mxu1 %v4337_v59  ;;  %v1516_v32 = vcombine.low %v9475_v20, %v1492_v4  ;;  %v1652_v62 = vcombine.low %v1596_v54, %v1628_v7  ;;  %v884_v41 = vrot.slane %v876_v29, %v9250_v3  ;;  %v891_v59 = vrot.slane %v877_v30, %v9250_v3 }
 0x23c   : > { %8062 = vmatprep.subr.bf16.mxu1 %v11353_v46  ;;  %v900_v43 = vrot.slane %v892_v23, %v9250_v3  ;;  %v3125_v14 = vpack.c.bf16 %v2845_v19, %v2709_v24  ;;  %v907_v45 = vrot.slane %v893_v26, %v9250_v3  ;;  %v1517_v23 = vcombine.high %v9475_v20, %v1492_v4 }
 0x23d   : > { %v823_v22 = vpop.permute.xlu1 %822  ;;  %v9511_v17 = vpop.permute.xlu0 %1956  ;;  %v1932_v37 = vpack.c.bf16 %v1652_v62, %v1516_v32  ;;  %v1653_v36 = vcombine.high %v1596_v54, %v1628_v7  ;;  %v2846_v1 = vcombine.low %v9385_v49, %v9388_v50 }
 0x23e   : > { %v1012_v2 = vcombine.low %v9444_v31, %v823_v22  ;;  %v940_v57 = vcombine.low %v884_v41, %v900_v43  ;;  %v941_v12 = vcombine.high %v884_v41, %v900_v43  ;;  %v1013_v39 = vcombine.high %v9444_v31, %v823_v22 }
 0x23f   : > { %v956_v40 = vcombine.low %v891_v59, %v907_v45  ;;  %v957_v29 = vcombine.high %v891_v59, %v907_v45  ;;  %v4384_v19 = vsel %vm4332_vm1, %v3125_v14, 0  ;;  %v11397_v41 = vcombine.high %v9153_v47, %v9424_v13 }
 0x240   : > { %v948_v30 = vrot.slane %v940_v57, %v9256_v11  ;;  %v955_v0 = vrot.slane %v941_v12, %v9256_v11  ;;  %v1020_v12 = vrot.slane %v1012_v2, %v9250_v3  ;;  %v1027_v57 = vrot.slane %v1013_v39, %v9250_v3 }
 0x241   : > { %v835_v16 = vpop.permute.xlu1 %834  ;;  %v964_v43 = vrot.slane %v956_v40, %v9256_v11  ;;  %v971_v31 = vrot.slane %v957_v29, %v9256_v11  ;;  %v9537_v32 = vpop.permute.xlu0 %1968  ;;  %v11395_v40 = vcombine.low %v9329_v25, %v9332_v28  ;;  %v11396_v2 = vcombine.low %v9153_v47, %v9424_v13 }
 0x242   : > { %v1028_v24 = vcombine.low %v9477_v21, %v835_v16  ;;  %v1029_v22 = vcombine.high %v9477_v21, %v835_v16  ;;  %8059 = vmatmul.mubr.msk.bf16.vlgmr.msra.gmra.mrb[4].mxu1 %vm4332_vm1, %v1932_v37  ;;  %v7714_v54 = vcombine.low %v948_v30, %v955_v0  ;;  %v7716_v7 = vcombine.high %v948_v30, %v955_v0 }
 0x243   : > { %8063 = vmatpush3.bf16.xpose.msra.mxu1 %v4384_v19  ;;  %8064 = vmatprep.mubr.msk.bf16.mxu1 %vm8795_vm0, %v11353_v46  ;;  %v3126_v16 = vpack.c.bf16 %v2846_v1, %v11395_v40  ;;  %v2452_v62 = vrot.slane %v11396_v2, %v9250_v3  ;;  %v7718_v26 = vcombine.low %v964_v43, %v971_v31 }
 0x244   : > { %v1036_v20 = vrot.slane %v1028_v24, %v9250_v3  ;;  %v1043_v21 = vrot.slane %v1029_v22, %v9250_v3  ;;  %v7720_v37 = vcombine.high %v964_v43, %v971_v31  ;;  %8068 = vmatprep.subr.bf16.mxu1 %v11353_v46  ;;  %v2459_v59 = vrot.slane %v11397_v41, %v9250_v3 }
 0x245   : > { %v1983_v4 = vpop.permute.xlu1 %1982  ;;  %v1933_v14 = vpack.c.bf16 %v1653_v36, %v1517_v23  ;;  %v9559_v30 = vrot.slane %v7714_v54, %v9250_v3  ;;  %v2308_v24 = vcombine.low %v9175_v48, %v9537_v32  ;;  %v9567_v43 = vrot.slane %v7716_v7, %v9250_v3  ;;  %v1981_v23 = vpop.permute.xlu0 %1980 }
 0x246   : > { %v1076_v39 = vcombine.low %v1020_v12, %v1036_v20  ;;  %v1077_v45 = vcombine.high %v1020_v12, %v1036_v20  ;;  %v1092_v29 = vcombine.low %v1027_v57, %v1043_v21  ;;  %v1093_v1 = vcombine.high %v1027_v57, %v1043_v21 }
 0x247   : > { %v4431_v47 = vsel %vm4332_vm1, %v3126_v16, 0  ;;  %v9573_v31 = vrot.slane %v7718_v26, %v9250_v3  ;;  %v9576_v22 = vrot.slane %v7720_v37, %v9250_v3  ;;  %v2460_v12 = vcombine.low %v9380_v38, %v1983_v4 }
 0x248   : > { %v1084_v0 = vrot.slane %v1076_v39, %v9256_v11  ;;  %v1091_v36 = vrot.slane %v1077_v45, %v9256_v11  ;;  %v1100_v13 = vrot.slane %v1092_v29, %v9256_v11  ;;  %v1107_v54 = vrot.slane %v1093_v1, %v9256_v11 }
 0x249   : > { %v9564_v19 = vpop.permute.xlu1 %766  ;;  %v2309_v7 = vcombine.high %v9175_v48, %v9537_v32  ;;  %v2461_v40 = vcombine.high %v9380_v38, %v1983_v4  ;;  %v2468_v2 = vrot.slane %v2460_v12, %v9250_v3  ;;  %v2324_v26 = vcombine.low %v9511_v17, %v1981_v23 }
 0x24a   : > { %v7722_v57 = vcombine.low %v1084_v0, %v1091_v36  ;;  %v7724_v20 = vcombine.high %v1084_v0, %v1091_v36  ;;  %8065 = vmatmul.mubr.msk.bf16.vlgmr.msra.gmra.mrb[8].mxu1 %vm4332_vm1, %v1933_v14  ;;  %v7726_v16 = vcombine.low %v1100_v13, %v1107_v54  ;;  %v7728_v21 = vcombine.high %v1100_v13, %v1107_v54 }
 0x24b   : > { %8069 = vmatpush3.bf16.xpose.msra.mxu1 %v4431_v47  ;;  %v2475_v41 = vrot.slane %v2461_v40, %v9250_v3  ;;  %8070 = vmatprep.mubr.msk.bf16.mxu1 %vm8795_vm0, %v11353_v46  ;;  %v1468_v38 = vcombine.low %v9559_v30, %v9567_v43  ;;  %v2508_v4 = vcombine.low %v2452_v62, %v2468_v2  ;;  %v9604_v47 = vpop.permute.xlu0 %764 }
 0x24c   : > { %v9587_v37 = vrot.slane %v7722_v57, %v9250_v3  ;;  %v9590_v39 = vrot.slane %v7724_v20, %v9250_v3  ;;  %v2509_v14 = vcombine.high %v2452_v62, %v2468_v2  ;;  %8074 = vmatprep.subr.bf16.mxu1 %v11353_v46  ;;  %v1500_v45 = vcombine.low %v9573_v31, %v9576_v22 }
 0x24d   : > { %v779_v48 = vpop.permute.xlu1 %778  ;;  %v2524_v0 = vcombine.low %v2459_v59, %v2475_v41  ;;  %v2525_v1 = vcombine.high %v2459_v59, %v2475_v41  ;;  %v9607_v36 = vrot.slane %v7726_v16, %v9250_v3  ;;  %v9610_v13 = vrot.slane %v7728_v21, %v9250_v3 }
 0x24e   : > { %v2316_v62 = vrot.slane %v2308_v24, %v9250_v3  ;;  %v2323_v54 = vrot.slane %v2309_v7, %v9250_v3  ;;  %v2325_v59 = vcombine.high %v9511_v17, %v1981_v23  ;;  %v2332_v20 = vrot.slane %v2324_v26, %v9250_v3 }
 0x24f   : > { %v9621_v40 = vrot.slane %v2508_v4, %v9256_v11  ;;  %v9624_v16 = vrot.slane %v2509_v14, %v9256_v11  ;;  %v11398_v24 = vcombine.high %v9397_v58, %v9400_v55  ;;  %v11399_v21 = vcombine.high %v9407_v60, %v9410_v63 }
 0x250   : > { %v9635_v17 = vrot.slane %v2524_v0, %v9256_v11  ;;  %v9638_v23 = vrot.slane %v2525_v1, %v9256_v11  ;;  %v2339_v26 = vrot.slane %v2325_v59, %v9250_v3  ;;  %v2372_v41 = vcombine.low %v2316_v62, %v2332_v20 }
 0x251   : > { %v1467_v7 = vrot.slane %v11398_v24, %v9256_v11  ;;  %v1499_v2 = vrot.slane %v11399_v21, %v9256_v11  ;;  %v791_v4 = vpop.permute.xlu1 %790  ;;  %v2373_v14 = vcombine.high %v2316_v62, %v2332_v20  ;;  %v11400_v58 = vcombine.high %v9365_v34, %v9368_v35  ;;  %v777_v62 = vpop.permute.xlu0 %776 }
 0x252   : > { %v11401_v60 = vcombine.high %v9391_v53, %v9394_v61  ;;  %v2388_v1 = vcombine.low %v2323_v54, %v2339_v26  ;;  %v2389_v24 = vcombine.high %v2323_v54, %v2339_v26  ;;  %v2847_v59 = vcombine.high %v9385_v49, %v9388_v50 }
 0x253   : > { %v1518_v57 = vcombine.low %v1467_v7, %v1499_v2  ;;  %v1603_v55 = vrot.slane %v11400_v58, %v9256_v11  ;;  %v1252_v34 = vcombine.low %v9191_v52, %v779_v48  ;;  %v1253_v35 = vcombine.high %v9191_v52, %v779_v48 }
 0x254   : > { %v1635_v63 = vrot.slane %v11401_v60, %v9256_v11  ;;  %v11402_v49 = vcombine.high %v9329_v25, %v9332_v28  ;;  %v9667_v26 = vrot.slane %v2372_v41, %v9256_v11  ;;  %v9670_v58 = vrot.slane %v2373_v14, %v9256_v11 }
 0x255   : > { %v1116_v48 = vcombine.low %v9189_v51, %v777_v62  ;;  %v9674_v60 = vrot.slane %v2388_v1, %v9256_v11  ;;  %v9677_v20 = vrot.slane %v2389_v24, %v9256_v11  ;;  %v1260_v25 = vrot.slane %v1252_v34, %v9250_v3  ;;  %v9681_v28 = vpop.permute.xlu1 %1994 }
 0x256   : > { %v1654_v21 = vcombine.low %v1603_v55, %v1635_v63  ;;  %v3127_v50 = vpack.c.bf16 %v2847_v59, %v11402_v49  ;;  %v1267_v41 = vrot.slane %v1253_v35, %v9250_v3  ;;  %v1519_v14 = vcombine.high %v1467_v7, %v1499_v2  ;;  %v789_v7 = vpop.permute.xlu0 %788 }
 0x257   : > { %v1655_v59 = vcombine.high %v1603_v55, %v1635_v63  ;;  %v11403_v1 = vcombine.low %v9467_v15, %v9470_v27  ;;  %v1124_v2 = vrot.slane %v1116_v48, %v9250_v3  ;;  %v11406_v63 = vcombine.high %v9484_v44, %v9487_v33 }
 0x258   : > { %v1934_v52 = vpack.c.bf16 %v1654_v21, %v1518_v57  ;;  %v4478_v29 = vsel %vm4332_vm1, %v3127_v50, 0  ;;  %v1117_v57 = vcombine.high %v9189_v51, %v777_v62  ;;  %v11404_v21 = vcombine.high %v9467_v15, %v9470_v27 }
 0x259   : > { %v9692_v24 = vrot.slane %v11403_v1, %v9250_v3  ;;  %v11405_v51 = vcombine.low %v9484_v44, %v9487_v33  ;;  %v1935_v55 = vpack.c.bf16 %v1655_v59, %v1519_v14  ;;  %v9712_v62 = vrot.slane %v11406_v63, %v9250_v3 }
 0x25a   : > { %8071 = vmatmul.mubr.msk.bf16.vlgmr.msra.gmra.mrb[12].mxu1 %vm4332_vm1, %v1934_v52  ;;  %v9698_v34 = vrot.slane %v11404_v21, %v9250_v3  ;;  %v11407_v15 = vcombine.low %v9447_v9, %v9450_v5  ;;  %v11408_v49 = vcombine.high %v9447_v9, %v9450_v5  ;;  %v11409_v44 = vcombine.low %v9453_v6, %v9456_v10 }
 0x25b   : > { %8075 = vmatpush3.bf16.xpose.msra.mxu1 %v4478_v29  ;;  %8076 = vmatprep.mubr.msk.bf16.mxu1 %vm8795_vm0, %v11353_v46  ;;  %v9704_v29 = vrot.slane %v11405_v51, %v9250_v3  ;;  %v11410_v52 = vcombine.high %v9453_v6, %v9456_v10  ;;  %v1268_v59 = vcombine.low %v9564_v19, %v791_v4  ;;  %v9753_v51 = vpop.permute.xlu1 %2006 }
 0x25c   : > { %8080 = vmatprep.subr.bf16.mxu1 %v11353_v46  ;;  %v9718_v27 = vrot.slane %v11407_v15, %v9250_v3  ;;  %v2660_v35 = vcombine.low %v9692_v24, %v9698_v34  ;;  %v9726_v50 = vrot.slane %v11408_v49, %v9250_v3  ;;  %v9732_v33 = vrot.slane %v11409_v44, %v9250_v3 }
 0x25d   : > { %v9738_v48 = vrot.slane %v11410_v52, %v9250_v3  ;;  %v2692_v14 = vcombine.low %v9704_v29, %v9712_v62  ;;  %v1269_v9 = vcombine.high %v9564_v19, %v791_v4  ;;  %v1132_v5 = vcombine.low %v9604_v47, %v789_v7 }
 0x25e   : > { %v9746_v1 = vrot.slane %v2660_v35, %v9256_v11  ;;  %v2796_v21 = vcombine.low %v9718_v27, %v9726_v50  ;;  %v1133_v10 = vcombine.high %v9604_v47, %v789_v7  ;;  %v1276_v19 = vrot.slane %v1268_v59, %v9250_v3 }
 0x25f   : > { %v2828_v6 = vcombine.low %v9732_v33, %v9738_v48  ;;  %v9756_v63 = vrot.slane %v2692_v14, %v9256_v11  ;;  %v1283_v4 = vrot.slane %v1269_v9, %v9250_v3  ;;  %v1140_v15 = vrot.slane %v1132_v5, %v9250_v3  ;;  %v9772_v9 = vpop.permute.xlu0 %1992 }
 0x260   : > { %v1131_v35 = vrot.slane %v1117_v57, %v9250_v3  ;;  %v9763_v49 = vrot.slane %v2796_v21, %v9256_v11  ;;  %v1147_v47 = vrot.slane %v1133_v10, %v9250_v3  ;;  %v1316_v52 = vcombine.low %v1260_v25, %v1276_v19 }
 0x261   : > { %v9766_v44 = vrot.slane %v2828_v6, %v9256_v11  ;;  %v2712_v7 = vcombine.low %v9746_v1, %v9756_v63  ;;  %v1317_v14 = vcombine.high %v1260_v25, %v1276_v19  ;;  %v1332_v59 = vcombine.low %v1267_v41, %v1283_v4 }
 0x262   : > { %8077 = vmatmul.mubr.msk.bf16.vlgmr.msra.gmra.mrb[16].mxu1 %vm4332_vm1, %v1935_v55  ;;  %v1333_v5 = vcombine.high %v1267_v41, %v1283_v4  ;;  %v1180_v21 = vcombine.low %v1124_v2, %v1140_v15  ;;  %v1181_v32 = vcombine.high %v1124_v2, %v1140_v15  ;;  %v1324_v6 = vrot.slane %v1316_v52, %v9256_v11  ;;  %v9784_v41 = vpop.permute.xlu1 %2018 }
 0x263   : > { %v2848_v57 = vcombine.low %v9763_v49, %v9766_v44  ;;  %8082 = vmatprep.mubr.msk.bf16.mxu1 %vm8795_vm0, %v11353_v46  ;;  %v1331_v55 = vrot.slane %v1317_v14, %v9256_v11  ;;  %v1340_v10 = vrot.slane %v1332_v59, %v9256_v11  ;;  %v1196_v54 = vcombine.low %v1131_v35, %v1147_v47 }
 0x264   : > { %v1347_v19 = vrot.slane %v1333_v5, %v9256_v11  ;;  %v1188_v61 = vrot.slane %v1180_v21, %v9256_v11  ;;  %v1195_v53 = vrot.slane %v1181_v32, %v9256_v11  ;;  %v1197_v15 = vcombine.high %v1131_v35, %v1147_v47  ;;  %v9795_v21 = vpop.permute.xlu0 %2004 }
 0x265   : > { %v3128_v25 = vpack.c.bf16 %v2848_v57, %v2712_v7  ;;  %v7737_v2 = vcombine.low %v1324_v6, %v1331_v55  ;;  %v7739_v4 = vcombine.high %v1324_v6, %v1331_v55  ;;  %v1204_v0 = vrot.slane %v1196_v54, %v9256_v11 }
 0x266   : > { %v7741_v14 = vcombine.low %v1340_v10, %v1347_v19  ;;  %v7743_v12 = vcombine.high %v1340_v10, %v1347_v19  ;;  %v7729_v59 = vcombine.low %v1188_v61, %v1195_v53  ;;  %v1211_v32 = vrot.slane %v1197_v15, %v9256_v11 }
 0x267   : > { %v4525_v52 = vsel %vm4332_vm1, %v3128_v25, 0  ;;  %v9789_v7 = vrot.slane %v7737_v2, %v9250_v3  ;;  %v9792_v57 = vrot.slane %v7739_v4, %v9250_v3  ;;  %v7731_v5 = vcombine.high %v1188_v61, %v1195_v53 }
 0x268   : > { %8081 = vmatpush3.bf16.xpose.msra.mxu1 %v4525_v52  ;;  %v7775_v54 = vcombine.high %v9635_v17, %v9638_v23  ;;  %v7761_v35 = vcombine.low %v9667_v26, %v9670_v58  ;;  %v9802_v47 = vrot.slane %v7741_v14, %v9250_v3  ;;  %v9805_v6 = vrot.slane %v7743_v12, %v9250_v3 }
 0x269   : > { %8086 = vmatprep.subr.bf16.mxu1 %v11353_v46  ;;  %v7763_v55 = vcombine.high %v9667_v26, %v9670_v58  ;;  %v7765_v53 = vcombine.low %v9674_v60, %v9677_v20  ;;  %v7767_v61 = vcombine.high %v9674_v60, %v9677_v20  ;;  %v1476_v10 = vrot.slane %v1468_v38, %v9256_v11  ;;  %v9827_v58 = vpop.permute.xlu1 %2030 }
 0x26a   : > { %v9821_v25 = vrot.slane %v7729_v59, %v9250_v3  ;;  %v7733_v19 = vcombine.low %v1204_v0, %v1211_v32  ;;  %v1508_v26 = vrot.slane %v1500_v45, %v9256_v11  ;;  %v9834_v60 = vrot.slane %v7731_v5, %v9250_v3 }
 0x26b   : > { %v11411_v2 = vcombine.low %v9587_v37, %v9590_v39  ;;  %v7735_v15 = vcombine.high %v1204_v0, %v1211_v32  ;;  %v11412_v45 = vcombine.low %v9607_v36, %v9610_v13  ;;  %v2713_v14 = vcombine.high %v9746_v1, %v9756_v63  ;;  %v9860_v32 = vpop.permute.xlu0 %2016 }
 0x26c   : > { %v2849_v59 = vcombine.high %v9763_v49, %v9766_v44  ;;  %v9849_v5 = vrot.slane %v7761_v35, %v9250_v3  ;;  %v9852_v20 = vrot.slane %v7763_v55, %v9250_v3  ;;  %v9858_v0 = vrot.slane %v7767_v61, %v9250_v3 }
 0x26d   : > { %v1612_v4 = vrot.slane %v11411_v2, %v9256_v11  ;;  %v1644_v52 = vrot.slane %v11412_v45, %v9256_v11  ;;  %v9855_v2 = vrot.slane %v7765_v53, %v9250_v3  ;;  %v9863_v45 = vrot.slane %v7733_v19, %v9250_v3 }
 0x26e   : > { %v1520_v1 = vcombine.low %v1476_v10, %v1508_v26  ;;  %v3129_v49 = vpack.c.bf16 %v2849_v59, %v2713_v14  ;;  %v2916_v44 = vcombine.low %v9849_v5, %v9852_v20  ;;  %v11413_v55 = vcombine.low %v9621_v40, %v9624_v16 }
 0x26f   : > { %v1656_v63 = vcombine.low %v1612_v4, %v1644_v52  ;;  %v2948_v35 = vcombine.low %v9855_v2, %v9858_v0  ;;  %v11414_v61 = vcombine.high %v9621_v40, %v9624_v16  ;;  %v9882_v14 = vrot.slane %v7735_v15, %v9250_v3 }
 0x270   : > { %v9873_v53 = vrot.slane %v11413_v55, %v9250_v3  ;;  %v11415_v38 = vcombine.low %v9635_v17, %v9638_v23  ;;  %v9891_v46 = vrot.slane %v7775_v54, %v9250_v3  ;;  %v9893_v55 = vpop.permute.xlu1 %802  ;;  %v9896_v56 = vrot.slane %v2916_v44, %v9256_v11 }
 0x271   : > { %v9879_v19 = vrot.slane %v11414_v61, %v9250_v3  ;;  %v1936_v59 = vpack.c.bf16 %v1656_v63, %v1520_v1  ;;  %v9899_v40 = vrot.slane %v2948_v35, %v9256_v11  ;;  %v2476_v15 = vcombine.low %v9681_v28, %v9784_v41  ;;  %v2029_v35 = vpop.permute.xlu0 %2028 }
 0x272   : > { %v9888_v12 = vrot.slane %v11415_v38, %v9250_v3  ;;  %v4572_v17 = vsel %vm4332_vm1, %v3129_v49, 0  ;;  %v2477_v54 = vcombine.high %v9681_v28, %v9784_v41  ;;  %v2340_v38 = vcombine.low %v9772_v9, %v9860_v32 }
 0x273   : > { %v3052_v16 = vcombine.low %v9873_v53, %v9879_v19  ;;  %8083 = vmatmul.mubr.msk.bf16.vlgmr.msra.gmra.mrb[20].mxu1 %vm4332_vm1, %v1936_v59  ;;  %v2980_v1 = vcombine.low %v9896_v56, %v9899_v40  ;;  %v11416_v44 = vmov 0.0   ;;  %v2341_v49 = vcombine.high %v9772_v9, %v9860_v32 }
 0x274   : > { %v3084_v23 = vcombine.low %v9888_v12, %v9891_v46  ;;  %8087 = vmatpush3.bf16.xpose.msra.mxu1 %v4572_v17  ;;  %8088 = vmatprep.mubr.msk.bf16.mxu1 %vm8795_vm0, %v11416_v44  ;;  %v2484_v28 = vrot.slane %v2476_v15, %v9250_v3  ;;  %v2491_v41 = vrot.slane %v2477_v54, %v9250_v3 }
 0x275   : > { %v9916_v63 = vrot.slane %v3052_v16, %v9256_v11  ;;  %8092 = vmatprep.subr.bf16.mxu1 %v11416_v44  ;;  %v9929_v59 = vrot.slane %v2340_v38, %v9250_v3  ;;  %v1521_v16 = vcombine.high %v1476_v10, %v1508_v26  ;;  %v1657_v17 = vcombine.high %v1612_v4, %v1644_v52  ;;  %v9943_v10 = vpop.permute.xlu1 %814  ;;  %v9958_v38 = vpop.permute.xlu0 %800 }
 0x276   : > { %v9923_v61 = vrot.slane %v3084_v23, %v9256_v11  ;;  %v2661_v42 = vcombine.high %v9692_v24, %v9698_v34  ;;  %v2693_v9 = vcombine.high %v9704_v29, %v9712_v62  ;;  %v2797_v15 = vcombine.high %v9718_v27, %v9726_v50 }
 0x277   : > { %v2829_v23 = vcombine.high %v9732_v33, %v9738_v48  ;;  %v2492_v54 = vcombine.low %v9753_v51, %v9827_v58  ;;  %v1937_v26 = vpack.c.bf16 %v1657_v17, %v1521_v16  ;;  %v2493_v29 = vcombine.high %v9753_v51, %v9827_v58 }
 0x278   : > { %v3116_v32 = vcombine.low %v9916_v63, %v9923_v61  ;;  %v9946_v24 = vrot.slane %v2661_v42, %v9256_v11  ;;  %v2707_v34 = vrot.slane %v2693_v9, %v9256_v11  ;;  %v2811_v27 = vrot.slane %v2797_v15, %v9256_v11 }
 0x279   : > { %v2843_v50 = vrot.slane %v2829_v23, %v9256_v11  ;;  %v2500_v33 = vrot.slane %v2492_v54, %v9250_v3  ;;  %v2507_v4 = vrot.slane %v2493_v29, %v9250_v3  ;;  %v2356_v52 = vcombine.low %v9795_v21, %v2029_v35 }
 0x27a   : > { %v3132_v62 = vpack.c.bf16 %v3116_v32, %v2980_v1  ;;  %v2714_v48 = vcombine.low %v9946_v24, %v2707_v34  ;;  %v2357_v42 = vcombine.high %v9795_v21, %v2029_v35  ;;  %v827_v35 = vpop.permute.xlu1 %826 }
 0x27b   : > { %8089 = vmatmul.mubr.msk.bf16.vlgmr.msra.gmra.mrb[24].mxu1 %vm4332_vm1, %v1937_v26  ;;  %v2850_v51 = vcombine.low %v2811_v27, %v2843_v50  ;;  %v2540_v58 = vcombine.low %v2484_v28, %v2500_v33  ;;  %v2541_v1 = vcombine.high %v2484_v28, %v2500_v33  ;;  %v2556_v17 = vcombine.low %v2491_v41, %v2507_v4 }
 0x27c   : > { %v4713_v16 = vsel %vm4332_vm1, %v3132_v62, 0  ;;  %v2557_v9 = vcombine.high %v2491_v41, %v2507_v4  ;;  %v2364_v32 = vrot.slane %v2356_v52, %v9250_v3  ;;  %v2371_v15 = vrot.slane %v2357_v42, %v9250_v3  ;;  %8094 = vmatprep.mubr.msk.bf16.mxu1 %vm8795_vm0, %v11416_v44 }
 0x27d   : > { %8105 = vmatpush3.bf16.xpose.msra.mxu0 %v4713_v16  ;;  %v3130_v23 = vpack.c.bf16 %v2850_v51, %v2714_v48  ;;  %v9965_v54 = vrot.slane %v2540_v58, %v9256_v11  ;;  %v9968_v21 = vrot.slane %v2541_v1, %v9256_v11  ;;  %v1893_v28 = vcombine.high %v9802_v47, %v9805_v6  ;;  %v9995_v58 = vpop.permute.xlu0 %812 }
 0x27e   : > { %8116 = vmatprep.subr.bf16.mxu0 %v11416_v44  ;;  %v1724_v41 = vcombine.low %v9821_v25, %v9834_v60  ;;  %v1725_v26 = vcombine.high %v9821_v25, %v9834_v60  ;;  %v2404_v29 = vcombine.low %v9929_v59, %v2364_v32  ;;  %v1756_v62 = vcombine.low %v9863_v45, %v9882_v14 }
 0x27f   : > { %v2355_v33 = vrot.slane %v2341_v49, %v9250_v3  ;;  %v4619_v48 = vsel %vm4332_vm1, %v3130_v23, 0  ;;  %v2405_v4 = vcombine.high %v9929_v59, %v2364_v32  ;;  %v1757_v52 = vcombine.high %v9863_v45, %v9882_v14  ;;  %v10023_v23 = vpop.permute.xlu1 %838 }
 0x280   : > { %8093 = vmatpush3.bf16.xpose.msra.mxu1 %v4619_v48  ;;  %v9988_v42 = vrot.slane %v2556_v17, %v9256_v11  ;;  %v9991_v16 = vrot.slane %v2557_v9, %v9256_v11  ;;  %v11417_v59 = vcombine.high %v9559_v30, %v9567_v43  ;;  %v11418_v17 = vcombine.high %v9573_v31, %v9576_v22 }
 0x281   : > { %v2420_v49 = vcombine.low %v2355_v33, %v2371_v15  ;;  %v2421_v1 = vcombine.high %v2355_v33, %v2371_v15  ;;  %8098 = vmatprep.subr.bf16.mxu1 %v11416_v44  ;;  %v10009_v48 = vrot.slane %v2404_v29, %v9256_v11  ;;  %v11419_v15 = vcombine.high %v9587_v37, %v9590_v39 }
 0x282   : > { %v1483_v32 = vrot.slane %v11417_v59, %v9256_v11  ;;  %v1515_v9 = vrot.slane %v11418_v17, %v9256_v11  ;;  %v11420_v30 = vcombine.high %v9607_v36, %v9610_v13  ;;  %v10020_v59 = vrot.slane %v2405_v4, %v9256_v11 }
 0x283   : > { %v1619_v33 = vrot.slane %v11419_v15, %v9256_v11  ;;  %v2715_v22 = vcombine.high %v9946_v24, %v2707_v34  ;;  %v2851_v17 = vcombine.high %v2811_v27, %v2843_v50  ;;  %v10026_v51 = vrot.slane %v1724_v41, %v9256_v11  ;;  %v825_v15 = vpop.permute.xlu0 %824 }
 0x284   : > { %v1651_v43 = vrot.slane %v11420_v30, %v9256_v11  ;;  %v1522_v31 = vcombine.low %v1483_v32, %v1515_v9  ;;  %v10029_v37 = vrot.slane %v1756_v62, %v9256_v11  ;;  %v11421_v39 = vcombine.low %v9789_v7, %v9792_v57 }
 0x285   : > { %v10038_v13 = vrot.slane %v2420_v49, %v9256_v11  ;;  %v10041_v24 = vrot.slane %v2421_v1, %v9256_v11  ;;  %v3131_v34 = vpack.c.bf16 %v2851_v17, %v2715_v22  ;;  %v11422_v27 = vcombine.low %v9802_v47, %v9805_v6  ;;  %v10062_v17 = vpop.permute.xlu1 %3148 }
 0x286   : > { %v1658_v29 = vcombine.low %v1619_v33, %v1651_v43  ;;  %v10035_v36 = vrot.slane %v11421_v39, %v9256_v11  ;;  %v1788_v62 = vcombine.low %v10026_v51, %v10029_v37  ;;  %v2917_v4 = vcombine.high %v9849_v5, %v9852_v20 }
 0x287   : > { %v10047_v50 = vrot.slane %v11422_v27, %v9256_v11  ;;  %v2949_v49 = vcombine.high %v9855_v2, %v9858_v0  ;;  %v4666_v1 = vsel %vm4332_vm1, %v3131_v34, 0  ;;  %v3053_v22 = vcombine.high %v9873_v53, %v9879_v19 }
 0x288   : > { %v1938_v41 = vpack.c.bf16 %v1658_v29, %v1522_v31  ;;  %v3085_v31 = vcombine.high %v9888_v12, %v9891_v46  ;;  %v10066_v20 = vrot.slane %v2917_v4, %v9256_v11  ;;  %v1284_v2 = vcombine.low %v9893_v55, %v827_v35 }
 0x289   : > { %v1924_v30 = vcombine.low %v10035_v36, %v10047_v50  ;;  %v10069_v5 = vrot.slane %v2949_v49, %v9256_v11  ;;  %v1285_v0 = vcombine.high %v9893_v55, %v827_v35  ;;  %v10074_v53 = vrot.slane %v3053_v22, %v9256_v11 }
 0x28a   : > { %8095 = vmatmul.mubr.msk.bf16.vlgmr.msra.gmra.mrb[28].mxu1 %vm4332_vm1, %v1938_v41  ;;  %v10077_v46 = vrot.slane %v3085_v31, %v9256_v11  ;;  %v1292_v19 = vrot.slane %v1284_v2, %v9250_v3  ;;  %v1148_v55 = vcombine.low %v9958_v38, %v825_v15  ;;  %v1149_v34 = vcombine.high %v9958_v38, %v825_v15  ;;  %v837_v38 = vpop.permute.xlu0 %836 }
 0x28b   : > { %8099 = vmatpush3.bf16.xpose.msra.mxu1 %v4666_v1  ;;  %v1940_v29 = vpack.c.bf16 %v1924_v30, %v1788_v62  ;;  %8100 = vmatprep.mubr.msk.bf16.mxu1 %vm8795_vm0, %v11416_v44  ;;  %v2982_v12 = vcombine.low %v10066_v20, %v10069_v5  ;;  %v1299_v39 = vrot.slane %v1285_v0, %v9250_v3 }
 0x28c   : > { %8110 = vmatprep.subr.bf16.mxu1 %v11416_v44  ;;  %v3118_v35 = vcombine.low %v10074_v53, %v10077_v46  ;;  %v1523_v27 = vcombine.high %v1483_v32, %v1515_v9  ;;  %v1659_v41 = vcombine.high %v1619_v33, %v1651_v43  ;;  %v1156_v62 = vrot.slane %v1148_v55, %v9250_v3 }
 0x28d   : > { %8107 = vmatmul.mubr.msk.bf16.vlgmr.msra.gmra.mrb[8].mxu0 %vm4332_vm1, %v1940_v29  ;;  %v2981_v4 = vcombine.high %v9896_v56, %v9899_v40  ;;  %v3117_v49 = vcombine.high %v9916_v63, %v9923_v61  ;;  %v10102_v1 = vrot.slane %v1725_v26, %v9256_v11  ;;  %v1163_v9 = vrot.slane %v1149_v34, %v9250_v3  ;;  %v10111_v56 = vpop.permute.xlu1 %3160 }
 0x28e   : > { %8118 = vmatprep.mubr.msk.bf16.mxu0 %vm8795_vm0, %v11416_v44  ;;  %v3134_v32 = vpack.c.bf16 %v3118_v35, %v2982_v12  ;;  %v1939_v33 = vpack.c.bf16 %v1659_v41, %v1523_v27  ;;  %v10109_v43 = vrot.slane %v1757_v52, %v9256_v11  ;;  %v11423_v25 = vcombine.high %v9789_v7, %v9792_v57 }
 0x28f   : > { %v3133_v40 = vpack.c.bf16 %v3117_v49, %v2981_v4  ;;  %v10123_v63 = vrot.slane %v1893_v28, %v9256_v11  ;;  %v1300_v45 = vcombine.low %v9943_v10, %v10023_v23  ;;  %v1301_v26 = vcombine.high %v9943_v10, %v10023_v23  ;;  %v8586_v10 = vld [vmem:[%s11332_s4 + $0x2] ss:$0 sm:$0xff] }
 0x290   : > { %v10117_v60 = vrot.slane %v11423_v25, %v9256_v11  ;;  %v4807_v14 = vsel %vm4332_vm1, %v3134_v32, 0  ;;  %v1790_v61 = vcombine.low %v10102_v1, %v10109_v43  ;;  %v1164_v7 = vcombine.low %v9995_v58, %v837_v38 }
 0x291   : > { %8117 = vmatpush3.bf16.xpose.msra.mxu0 %v4807_v14  ;;  %v4760_v57 = vsel %vm4332_vm1, %v3133_v40, 0  ;;  %v1308_v6 = vrot.slane %v1300_v45, %v9250_v3  ;;  %v1165_v28 = vcombine.high %v9995_v58, %v837_v38  ;;  %v1315_v52 = vrot.slane %v1301_v26, %v9250_v3  ;;  %v10152_v55 = vpop.permute.xlu1 %3184 }
 0x292   : > { %8101 = vmatmul.mubr.msk.bf16.vlgmr.msra.gmra.mrb[32].mxu1 %vm4332_vm1, %v1939_v33  ;;  %v1926_v47 = vcombine.low %v10117_v60, %v10123_v63  ;;  %v1172_v15 = vrot.slane %v1164_v7, %v9250_v3  ;;  %v10145_v23 = vadd.f32 %v8586_v10, %v9316_v18  ;;  %8128 = vmatprep.subr.bf16.mxu0 %v11416_v44 }
 0x293   : > { %8111 = vmatpush3.bf16.xpose.msra.mxu1 %v4760_v57  ;;  %8112 = vmatprep.mubr.msk.bf16.mxu1 %vm8795_vm0, %v11416_v44  ;;  %v1348_v22 = vcombine.low %v1292_v19, %v1308_v6  ;;  %v1349_v31 = vcombine.high %v1292_v19, %v1308_v6  ;;  %v1179_v58 = vrot.slane %v1165_v28, %v9250_v3 }
 0x294   : > { %v1942_v30 = vpack.c.bf16 %v1926_v47, %v1790_v61  ;;  %8122 = vmatprep.subr.bf16.mxu1 %v11416_v44  ;;  %v1364_v2 = vcombine.low %v1299_v39, %v1315_v52  ;;  %v1365_v0 = vcombine.high %v1299_v39, %v1315_v52  ;;  %v1212_v29 = vcombine.low %v1156_v62, %v1172_v15 }
 0x295   : > { %v1213_v12 = vcombine.high %v1156_v62, %v1172_v15  ;;  %11424 = vst [vmem:[#allocation23_spill] sm:$0xff] %v10152_v55  ;;  %v1356_v18 = vrot.slane %v1348_v22, %v9256_v11  ;;  %v1363_v35 = vrot.slane %v1349_v31, %v9256_v11  ;;  %v1228_v34 = vcombine.low %v1163_v9, %v1179_v58 }
 0x296   : > { %v1229_v27 = vcombine.high %v1163_v9, %v1179_v58  ;;  %3158 = vrot.lane.b32.xlu1 %v10145_v23, %s8787_s18  ;;  %v1372_v19 = vrot.slane %v1364_v2, %v9256_v11  ;;  %v1379_v41 = vrot.slane %v1365_v0, %v9256_v11  ;;  %v1220_v39 = vrot.slane %v1212_v29, %v9256_v11 }
 0x297   : > { %v1227_v62 = vrot.slane %v1213_v12, %v9256_v11  ;;  %3146 = vrot.lane.b32.xlu0 %v10145_v23, %s8788_s20  ;;  %v7738_v4 = vcombine.low %v1356_v18, %v1363_v35  ;;  %v7740_v49 = vcombine.high %v1356_v18, %v1363_v35  ;;  %v1236_v38 = vrot.slane %v1228_v34, %v9256_v11  ;;  %v10240_v34 = vpop.permute.xlu0 %3172 }
 0x298   : > { %v1243_v32 = vrot.slane %v1229_v27, %v9256_v11  ;;  %8119 = vmatmul.mubr.msk.bf16.vlgmr.msra.gmra.mrb[12].mxu0 %vm4332_vm1, %v1942_v30  ;;  %v7742_v9 = vcombine.low %v1372_v19, %v1379_v41  ;;  %v7744_v33 = vcombine.high %v1372_v19, %v1379_v41  ;;  %v7774_v45 = vcombine.low %v9988_v42, %v9991_v16 }
 0x299   : > { %v7730_v40 = vcombine.low %v1220_v39, %v1227_v62  ;;  %v7732_v25 = vcombine.high %v1220_v39, %v1227_v62  ;;  %v7776_v14 = vcombine.high %v9988_v42, %v9991_v16  ;;  %v7762_v7 = vcombine.low %v10009_v48, %v10020_v59  ;;  %8130 = vmatprep.mubr.msk.bf16.mxu0 %vm8795_vm0, %v11416_v44  ;;  %v10185_v42 = vpop.permute.xlu1 %3196 }
 0x29a   : > { %v7734_v61 = vcombine.low %v1236_v38, %v1243_v32  ;;  %v7736_v26 = vcombine.high %v1236_v38, %v1243_v32  ;;  %3170 = vrot.lane.b32.xlu1 %v10145_v23, %s8789_s21  ;;  %v7764_v57 = vcombine.high %v10009_v48, %v10020_v59  ;;  %11425 = vst [vmem:[#allocation24_spill] sm:$0xff] %v10185_v42 }
 0x29b   : > { %v10178_v47 = vrot.slane %v7730_v40, %v9250_v3  ;;  %v10181_v6 = vrot.slane %v7732_v25, %v9250_v3  ;;  %v7766_v16 = vcombine.low %v10038_v13, %v10041_v24  ;;  %v7768_v28 = vcombine.high %v10038_v13, %v10041_v24  ;;  %3182 = vrot.lane.b32.xlu0 %v10145_v23, %s8790_s9 }
 0x29c   : > { %v10192_v52 = vrot.slane %v7734_v61, %v9250_v3  ;;  %v10195_v48 = vrot.slane %v7736_v26, %v9250_v3  ;;  %v10200_v59 = vrot.slane %v7738_v4, %v9250_v3  ;;  %v10203_v15 = vrot.slane %v7740_v49, %v9250_v3 }
 0x29d   : > { %v10206_v10 = vrot.slane %v7742_v9, %v9250_v3  ;;  %v10209_v13 = vrot.slane %v7744_v33, %v9250_v3  ;;  %v1740_v24 = vcombine.low %v10178_v47, %v10181_v6  ;;  %v1789_v22 = vcombine.high %v10026_v51, %v10029_v37 }
 0x29e   : > { %v1772_v30 = vcombine.low %v10192_v52, %v10195_v48  ;;  %v1925_v31 = vcombine.high %v10035_v36, %v10047_v50  ;;  %3194 = vrot.lane.b32.xlu1 %v10145_v23, %s8791_s7  ;;  %v2983_v58 = vcombine.high %v10066_v20, %v10069_v5  ;;  %v3119_v2 = vcombine.high %v10074_v53, %v10077_v46  ;;  %v10238_v46 = vpop.permute.xlu1 %3144 }
 0x29f   : > { %v2867_v0 = vrot.slane %v7762_v7, %v9250_v3  ;;  %v2883_v29 = vrot.slane %v7764_v57, %v9250_v3  ;;  %v2899_v18 = vrot.slane %v7766_v16, %v9250_v3  ;;  %v2915_v51 = vrot.slane %v7768_v28, %v9250_v3 }
 0x2a0   : > { %v1941_v12 = vpack.c.bf16 %v1925_v31, %v1789_v22  ;;  %v11426_v37 = vcombine.low %v9965_v54, %v9968_v21  ;;  %v3135_v50 = vpack.c.bf16 %v3119_v2, %v2983_v58  ;;  %v11427_v20 = vcombine.high %v9965_v54, %v9968_v21 }
 0x2a1   : > { %v2932_v35 = vcombine.low %v2867_v0, %v2883_v29  ;;  %v3035_v53 = vrot.slane %v7774_v45, %v9250_v3  ;;  %v1876_v27 = vcombine.low %v10200_v59, %v10203_v15  ;;  %v2964_v19 = vcombine.low %v2899_v18, %v2915_v51 }
 0x2a2   : > { %v3003_v36 = vrot.slane %v11426_v37, %v9250_v3  ;;  %v3019_v5 = vrot.slane %v11427_v20, %v9250_v3  ;;  %8113 = vmatmul.mubr.msk.bf16.vlgmr.msra.gmra.mrb[36].mxu1 %vm4332_vm1, %v1941_v12  ;;  %v3051_v41 = vrot.slane %v7776_v14, %v9250_v3  ;;  %v1908_v39 = vcombine.low %v10206_v10, %v10209_v13 }
 0x2a3   : > { %v4854_v54 = vsel %vm4332_vm1, %v3135_v50, 0  ;;  %v2940_v21 = vrot.slane %v2932_v35, %v9256_v11  ;;  %8124 = vmatprep.mubr.msk.bf16.mxu1 %vm8795_vm0, %v11416_v44  ;;  %3206 = vrot.lane.b32.xlu1 %v10145_v23, %s8792_s23  ;;  %v2972_v4 = vrot.slane %v2964_v19, %v9256_v11  ;;  %v1791_v38 = vcombine.high %v10102_v1, %v10109_v43 }
 0x2a4   : > { %v3068_v62 = vcombine.low %v3003_v36, %v3019_v5  ;;  %8123 = vmatpush3.bf16.xpose.msra.mxu1 %v4854_v54  ;;  %v3100_v49 = vcombine.low %v3035_v53, %v3051_v41  ;;  %v1927_v32 = vcombine.high %v10117_v60, %v10123_v63  ;;  %v1748_v33 = vrot.slane %v1740_v24, %v9256_v11  ;;  %v3157_v60 = vpop.permute.xlu1 %3156  ;;  %v10267_v63 = vpop.permute.xlu0 %3208 }
 0x2a5   : > { %8134 = vmatprep.subr.bf16.mxu1 %v11416_v44  ;;  %v1780_v40 = vrot.slane %v1772_v30, %v9256_v11  ;;  %v2933_v25 = vcombine.high %v2867_v0, %v2883_v29  ;;  %v2984_v45 = vcombine.low %v2940_v21, %v2972_v4  ;;  %v2985_v61 = vcombine.high %v2940_v21, %v2972_v4 }
 0x2a6   : > { %v3076_v9 = vrot.slane %v3068_v62, %v9256_v11  ;;  %v3108_v14 = vrot.slane %v3100_v49, %v9256_v11  ;;  %v1884_v26 = vrot.slane %v1876_v27, %v9256_v11  ;;  %v1916_v1 = vrot.slane %v1908_v39, %v9256_v11  ;;  %11428 = vst [vmem:[#allocation25_spill] sm:$0xff] %v10267_v63 }
 0x2a7   : > { %v2947_v43 = vrot.slane %v2933_v25, %v9256_v11  ;;  %3218 = vrot.lane.b32.xlu1 %v10145_v23, %s8794_s15  ;;  %v2965_v16 = vcombine.high %v2899_v18, %v2915_v51  ;;  %v3069_v28 = vcombine.high %v3003_v36, %v3019_v5  ;;  %v1741_v24 = vcombine.high %v10178_v47, %v10181_v6 }
 0x2a8   : > { %v3120_v7 = vcombine.low %v3076_v9, %v3108_v14  ;;  %v3121_v57 = vcombine.high %v3076_v9, %v3108_v14  ;;  %v1943_v30 = vpack.c.bf16 %v1927_v32, %v1791_v38  ;;  %v1792_v22 = vcombine.low %v1748_v33, %v1780_v40  ;;  %v3169_v27 = vpop.permute.xlu0 %3168 }
 0x2a9   : > { %v3101_v31 = vcombine.high %v3035_v53, %v3051_v41  ;;  %v2979_v0 = vrot.slane %v2965_v16, %v9256_v11  ;;  %v3083_v29 = vrot.slane %v3069_v28, %v9256_v11  ;;  %v1928_v12 = vcombine.low %v1884_v26, %v1916_v1  ;;  %v10283_v53 = vpop.permute.xlu1 %3180 }
 0x2aa   : > { %v3136_v58 = vpack.c.bf16 %v3120_v7, %v2984_v45  ;;  %v3137_v2 = vpack.c.bf16 %v3121_v57, %v2985_v61  ;;  %v1793_v37 = vcombine.high %v1748_v33, %v1780_v40  ;;  %v1929_v50 = vcombine.high %v1884_v26, %v1916_v1 }
 0x2ab   : > { %8125 = vmatmul.mubr.msk.bf16.vlgmr.msra.gmra.mrb[40].mxu1 %vm4332_vm1, %v1943_v30  ;;  %v3115_v18 = vrot.slane %v3101_v31, %v9256_v11  ;;  %v2986_v6 = vcombine.low %v2947_v43, %v2979_v0  ;;  %v2987_v36 = vcombine.high %v2947_v43, %v2979_v0  ;;  %v1773_v35 = vcombine.high %v10192_v52, %v10195_v48 }
 0x2ac   : > { %v4901_v51 = vsel %vm4332_vm1, %v3136_v58, 0  ;;  %v4948_v47 = vsel %vm4332_vm1, %v3137_v2, 0  ;;  %8136 = vmatprep.mubr.msk.bf16.mxu1 %vm8795_vm0, %v11416_v44  ;;  %v1877_v19 = vcombine.high %v10200_v59, %v10203_v15  ;;  %v1909_v41 = vcombine.high %v10206_v10, %v10209_v13  ;;  %v3205_v9 = vpop.permute.xlu0 %3204  ;;  %v11429_v58 = vld [vmem:[#allocation22_spill] sm:$0xff] }
 0x2ad   : > { %8129 = vmatpush3.bf16.xpose.msra.mxu0 %v4901_v51  ;;  %8135 = vmatpush3.bf16.xpose.msra.mxu1 %v4948_v47  ;;  %v3122_v20 = vcombine.low %v3083_v29, %v3115_v18  ;;  %v3123_v5 = vcombine.high %v3083_v29, %v3115_v18  ;;  %v1944_v39 = vpack.c.bf16 %v1928_v12, %v1792_v22  ;;  %v3193_v13 = vpop.permute.xlu1 %3192 }
 0x2ae   : > { %8140 = vmatprep.subr.bf16.mxu0 %v11416_v44  ;;  %8146 = vmatprep.subr.bf16.mxu1 %v11416_v44  ;;  %v1945_v54 = vpack.c.bf16 %v1929_v50, %v1793_v37  ;;  %v3228_v21 = vcombine.low %v9254_v8, %v3157_v60  ;;  %v1755_v62 = vrot.slane %v1741_v24, %v9256_v11 }
 0x2af   : > { %v3138_v52 = vpack.c.bf16 %v3122_v20, %v2986_v6  ;;  %v3139_v48 = vpack.c.bf16 %v3123_v5, %v2987_v36  ;;  %v1787_v4 = vrot.slane %v1773_v35, %v9256_v11  ;;  %v3229_v49 = vcombine.high %v9254_v8, %v3157_v60 }
 0x2b0   : > { %v1891_v59 = vrot.slane %v1877_v19, %v9256_v11  ;;  %v1923_v15 = vrot.slane %v1909_v41, %v9256_v11  ;;  %v3236_v10 = vrot.slane %v3228_v21, %v9250_v3  ;;  %v3244_v38 = vcombine.low %v10238_v46, %v3169_v27  ;;  %v3217_v28 = vpop.permute.xlu0 %3216 }
 0x2b1   : > { %v3245_v32 = vcombine.high %v10238_v46, %v3169_v27  ;;  %v4995_v33 = vsel %vm4332_vm1, %v3138_v52, 0  ;;  %v5042_v8 = vsel %vm4332_vm1, %v3139_v48, 0  ;;  %v1794_v40 = vcombine.low %v1755_v62, %v1787_v4  ;;  %v3163_v16 = vpop.permute.xlu1 %3162 }
 0x2b2   : > { %v3243_v25 = vrot.slane %v3229_v49, %v9250_v3  ;;  %v3252_v45 = vrot.slane %v3244_v38, %v9250_v3  ;;  %v1930_v46 = vcombine.low %v1891_v59, %v1923_v15  ;;  %v1795_v14 = vcombine.high %v1755_v62, %v1787_v4 }
 0x2b3   : > { %v1931_v61 = vcombine.high %v1891_v59, %v1923_v15  ;;  %v3259_v26 = vrot.slane %v3245_v32, %v9250_v3  ;;  %v3636_v2 = vcombine.low %v11429_v58, %v3163_v16  ;;  %v3637_v50 = vcombine.high %v11429_v58, %v3163_v16 }
 0x2b4   : > { %8131 = vmatmul.mubr.msk.bf16.vlgmr.msra.gmra.mrb[16].mxu0 %vm4332_vm1, %v1944_v39  ;;  %8137 = vmatmul.mubr.msk.bf16.vlgmr.msra.gmra.mrb[44].mxu1 %vm4332_vm1, %v1945_v54  ;;  %v3292_v1 = vcombine.low %v3236_v10, %v3252_v45  ;;  %v3293_v43 = vcombine.high %v3236_v10, %v3252_v45  ;;  %v1946_v24 = vpack.c.bf16 %v1930_v46, %v1794_v40  ;;  %v3151_v20 = vpop.permute.xlu0 %3150 }
 0x2b5   : > { %8141 = vmatpush3.bf16.xpose.msra.mxu0 %v4995_v33  ;;  %8147 = vmatpush3.bf16.xpose.msra.mxu1 %v5042_v8  ;;  %v3308_v57 = vcombine.low %v3243_v25, %v3259_v26  ;;  %v1947_v30 = vpack.c.bf16 %v1931_v61, %v1795_v14  ;;  %v3309_v22 = vcombine.high %v3243_v25, %v3259_v26  ;;  %v3175_v6 = vpop.permute.xlu1 %3174 }
 0x2b6   : > { %8142 = vmatprep.mubr.msk.bf16.mxu0 %vm8795_vm0, %v11416_v44  ;;  %8148 = vmatprep.mubr.msk.bf16.mxu1 %vm8795_vm0, %v11416_v44  ;;  %v3300_v60 = vrot.slane %v3292_v1, %v9256_v11  ;;  %v3307_v7 = vrot.slane %v3293_v43, %v9256_v11  ;;  %v3260_v18 = vcombine.low %v10283_v53, %v3205_v9 }
 0x2b7   : > { %8152 = vmatprep.subr.bf16.mxu0 %v11416_v44  ;;  %8158 = vmatprep.subr.bf16.mxu1 %v11416_v44  ;;  %v3316_v31 = vrot.slane %v3308_v57, %v9256_v11  ;;  %v3323_v0 = vrot.slane %v3309_v22, %v9256_v11  ;;  %v3644_v51 = vrot.slane %v3636_v2, %v9250_v3 }
 0x2b8   : > { %v7777_v29 = vcombine.low %v3300_v60, %v3307_v7  ;;  %v7779_v12 = vcombine.high %v3300_v60, %v3307_v7  ;;  %v3261_v47 = vcombine.high %v10283_v53, %v3205_v9  ;;  %v3276_v36 = vcombine.low %v3193_v13, %v3217_v28 }
 0x2b9   : > { %v7781_v37 = vcombine.low %v3316_v31, %v3323_v0  ;;  %v3277_v35 = vcombine.high %v3193_v13, %v3217_v28  ;;  %v7783_v27 = vcombine.high %v3316_v31, %v3323_v0  ;;  %v3268_v19 = vrot.slane %v3260_v18, %v9250_v3 }
 0x2ba   : > { %v10329_v5 = vrot.slane %v7777_v29, %v9250_v3  ;;  %v3652_v41 = vcombine.low %v3151_v20, %v3175_v6  ;;  %v3275_v39 = vrot.slane %v3261_v47, %v9250_v3  ;;  %v3284_v54 = vrot.slane %v3276_v36, %v9250_v3 }
 0x2bb   : > { %v3291_v52 = vrot.slane %v3277_v35, %v9250_v3  ;;  %v3653_v48 = vcombine.high %v3151_v20, %v3175_v6  ;;  %v10336_v53 = vrot.slane %v7779_v12, %v9250_v3  ;;  %v10339_v21 = vrot.slane %v7781_v37, %v9250_v3 }
 0x2bc   : > { %8143 = vmatmul.mubr.msk.bf16.vlgmr.msra.gmra.mrb[20].mxu0 %vm4332_vm1, %v1946_v24  ;;  %8149 = vmatmul.mubr.msk.bf16.vlgmr.msra.gmra.mrb[48].mxu1 %vm4332_vm1, %v1947_v30  ;;  %v3651_v62 = vrot.slane %v3637_v50, %v9250_v3  ;;  %v3660_v4 = vrot.slane %v3652_v41, %v9250_v3  ;;  %v3324_v49 = vcombine.low %v3268_v19, %v3284_v54 }
 0x2bd   : > { %8154 = vmatprep.mubr.msk.bf16.mxu0 %vm8795_vm0, %v11416_v44  ;;  %8160 = vmatprep.mubr.msk.bf16.mxu1 %vm8795_vm0, %v11416_v44  ;;  %v3325_v59 = vcombine.high %v3268_v19, %v3284_v54  ;;  %v3340_v15 = vcombine.low %v3275_v39, %v3291_v52  ;;  %v3341_v10 = vcombine.high %v3275_v39, %v3291_v52 }
 0x2be   : > { %v10344_v13 = vrot.slane %v7783_v27, %v9250_v3  ;;  %v3667_v38 = vrot.slane %v3653_v48, %v9250_v3  ;;  %v3700_v32 = vcombine.low %v3644_v51, %v3660_v4  ;;  %v3701_v9 = vcombine.high %v3644_v51, %v3660_v4  ;;  %v10411_v4 = vpop.permute.xlu0 %3186 }
 0x2bf   : > { %v10348_v33 = vrot.slane %v3324_v49, %v9256_v11  ;;  %v10351_v8 = vrot.slane %v3325_v59, %v9256_v11  ;;  %v10354_v40 = vrot.slane %v3340_v15, %v9256_v11  ;;  %v10357_v25 = vrot.slane %v3341_v10, %v9256_v11  ;;  %11431 = vst [vmem:[#allocation26_spill] sm:$0xff] %v10411_v4 }
 0x2c0   : > { %v3708_v45 = vrot.slane %v3700_v32, %v9256_v11  ;;  %v3715_v46 = vrot.slane %v3701_v9, %v9256_v11  ;;  %v3716_v14 = vcombine.low %v3651_v62, %v3667_v38  ;;  %v3717_v61 = vcombine.high %v3651_v62, %v3667_v38  ;;  %v10409_v62 = vpop.permute.xlu1 %3198 }
 0x2c1   : > { %v7778_v26 = vcombine.low %v10348_v33, %v10351_v8  ;;  %v7780_v1 = vcombine.high %v10348_v33, %v10351_v8  ;;  %v7782_v43 = vcombine.low %v10354_v40, %v10357_v25  ;;  %v7784_v60 = vcombine.high %v10354_v40, %v10357_v25  ;;  %11430 = vst [vmem:[#allocation22_spill] sm:$0xff] %v10409_v62 }
 0x2c2   : > { %v3724_v7 = vrot.slane %v3716_v14, %v9256_v11  ;;  %v3731_v57 = vrot.slane %v3717_v61, %v9256_v11  ;;  %v7801_v16 = vcombine.low %v3708_v45, %v3715_v46  ;;  %v7803_v28 = vcombine.high %v3708_v45, %v3715_v46 }
 0x2c3   : > { %v3837_v2 = vcombine.high %v10329_v5, %v10336_v53  ;;  %v3869_v0 = vcombine.high %v10339_v21, %v10344_v13 }
 0x2c4   : > { %v4188_v24 = vrot.slane %v7801_v16, %v9250_v3  ;;  %v4204_v30 = vrot.slane %v7803_v28, %v9250_v3  ;;  %v7805_v22 = vcombine.low %v3724_v7, %v3731_v57  ;;  %v7807_v31 = vcombine.high %v3724_v7, %v3731_v57 }
 0x2c5   : > { %v10380_v50 = vrot.slane %v3837_v2, %v9256_v11  ;;  %v10383_v18 = vrot.slane %v3869_v0, %v9256_v11  ;;  %v3836_v7 = vcombine.low %v10329_v5, %v10336_v53  ;;  %v3868_v57 = vcombine.low %v10339_v21, %v10344_v13 }
 0x2c6   : > { %v4220_v29 = vrot.slane %v7805_v22, %v9250_v3  ;;  %v4236_v12 = vrot.slane %v7807_v31, %v9250_v3  ;;  %v4244_v37 = vcombine.low %v4188_v24, %v4204_v30  ;;  %v4245_v20 = vcombine.high %v4188_v24, %v4204_v30 }
 0x2c7   : > { %v3902_v6 = vcombine.low %v10380_v50, %v10383_v18  ;;  %v3903_v36 = vcombine.high %v10380_v50, %v10383_v18  ;;  %v3876_v5 = vrot.slane %v3868_v57, %v9256_v11 }
 0x2c8   : > { %v10386_v51 = vrot.slane %v4244_v37, %v9256_v11  ;;  %v4276_v47 = vcombine.low %v4220_v29, %v4236_v12  ;;  %v4277_v27 = vcombine.high %v4220_v29, %v4236_v12  ;;  %v10400_v39 = vrot.slane %v4245_v20, %v9256_v11 }
 0x2c9   : > { %v3844_v12 = vrot.slane %v3836_v7, %v9256_v11 }
 0x2ca   : > { %v10393_v35 = vrot.slane %v4276_v47, %v9256_v11  ;;  %v10403_v54 = vrot.slane %v4277_v27, %v9256_v11 }
 0x308   : > { %v3159_v49 = vpop.permute.xlu1 %3158 }
 0x309   : > { %v3364_v59 = vcombine.low %v10145_v23, %v3159_v49  ;;  %v3365_v15 = vcombine.high %v10145_v23, %v3159_v49  ;;  %v3147_v10 = vpop.permute.xlu0 %3146 }
 0x30b   : > { %v3372_v32 = vrot.slane %v3364_v59, %v9250_v3  ;;  %v3379_v9 = vrot.slane %v3365_v15, %v9250_v3 }
 0x30c   : > { %v3171_v38 = vpop.permute.xlu1 %3170 }
 0x30d   : > { %v3380_v45 = vcombine.low %v3147_v10, %v3171_v38  ;;  %v3381_v46 = vcombine.high %v3147_v10, %v3171_v38  ;;  %v3183_v29 = vpop.permute.xlu0 %3182  ;;  %v3900_v38 = vcombine.low %v3844_v12, %v3876_v5 }
 0x30f   : > { %v3388_v14 = vrot.slane %v3380_v45, %v9250_v3  ;;  %v3395_v61 = vrot.slane %v3381_v46, %v9250_v3 }
 0x310   : > { %v3195_v16 = vpop.permute.xlu1 %3194 }
 0x311   : > { %v3428_v23 = vcombine.low %v3372_v32, %v3388_v14  ;;  %v3429_v28 = vcombine.high %v3372_v32, %v3388_v14  ;;  %v3444_v24 = vcombine.low %v3379_v9, %v3395_v61  ;;  %v3445_v30 = vcombine.high %v3379_v9, %v3395_v61 }
 0x312   : > { %v3901_v32 = vcombine.high %v3844_v12, %v3876_v5 }
 0x313   : > { %v3436_v22 = vrot.slane %v3428_v23, %v9256_v11  ;;  %v3443_v31 = vrot.slane %v3429_v28, %v9256_v11  ;;  %v3452_v2 = vrot.slane %v3444_v24, %v9256_v11  ;;  %v3459_v0 = vrot.slane %v3445_v30, %v9256_v11 }
 0x315   : > { %v7785_v53 = vcombine.low %v3436_v22, %v3443_v31  ;;  %v7787_v21 = vcombine.high %v3436_v22, %v3443_v31  ;;  %v7789_v13 = vcombine.low %v3452_v2, %v3459_v0  ;;  %v7791_v37 = vcombine.high %v3452_v2, %v3459_v0  ;;  %v3207_v47 = vpop.permute.xlu1 %3206  ;;  %v10434_v14 = vpop.f32.mrb[4].mxu1 }
 0x316   : > { %v3396_v20 = vcombine.low %v3183_v29, %v3207_v47  ;;  %v3397_v27 = vcombine.high %v3183_v29, %v3207_v47  ;;  %v8060_v23 = vpop.f32.mrb[5].mxu1  ;;  %v5085_v28 = vsel %vm4332_vm1, %v10434_v14, -inf }
 0x317   : > { %v3916_v49 = vrot.slane %v7785_v53, %v9250_v3  ;;  %v3932_v59 = vrot.slane %v7787_v21, %v9250_v3  ;;  %v3948_v15 = vrot.slane %v7789_v13, %v9250_v3  ;;  %v3964_v10 = vrot.slane %v7791_v37, %v9250_v3  ;;  %5086 = vmax.xlane.f32.xlu0 %v5085_v28  ;;  %v10441_v0 = vpop.f32.mrb[6].mxu1 }
 0x318   : > { %v3404_v9 = vrot.slane %v3396_v20, %v9250_v3  ;;  %v3411_v22 = vrot.slane %v3397_v27, %v9250_v3  ;;  %v8061_v5 = vpop.f32.mrb[7].mxu1 }
 0x319   : > { %v3972_v45 = vcombine.low %v3916_v49, %v3932_v59  ;;  %v4004_v46 = vcombine.low %v3948_v15, %v3964_v10  ;;  %v3219_v61 = vpop.permute.xlu1 %3218  ;;  %v3973_v7 = vcombine.high %v3916_v49, %v3932_v59  ;;  %v4005_v57 = vcombine.high %v3948_v15, %v3964_v10 }
 0x31a   : > { %v3412_v24 = vcombine.low %v3195_v16, %v3219_v61  ;;  %v3413_v30 = vcombine.high %v3195_v16, %v3219_v61  ;;  %v3835_v5 = vrot.slane %v7784_v60, %v9250_v3 }
 0x31b   : > { %v3980_v31 = vrot.slane %v3972_v45, %v9256_v11  ;;  %v4012_v2 = vrot.slane %v4004_v46, %v9256_v11  ;;  %v3987_v29 = vrot.slane %v3973_v7, %v9256_v11  ;;  %v4019_v12 = vrot.slane %v4005_v57, %v9256_v11 }
 0x31c   : > { %v3420_v53 = vrot.slane %v3412_v24, %v9250_v3  ;;  %v3427_v21 = vrot.slane %v3413_v30, %v9250_v3 }
 0x31d   : > { %v4036_v13 = vcombine.low %v3980_v31, %v4012_v2  ;;  %v4037_v16 = vcombine.high %v3980_v31, %v4012_v2  ;;  %v4038_v37 = vcombine.low %v3987_v29, %v4019_v12  ;;  %v4039_v47 = vcombine.high %v3987_v29, %v4019_v12 }
 0x31e   : > { %v3460_v20 = vcombine.low %v3404_v9, %v3420_v53  ;;  %v3461_v27 = vcombine.high %v3404_v9, %v3420_v53  ;;  %v3476_v49 = vcombine.low %v3411_v22, %v3427_v21  ;;  %v3477_v59 = vcombine.high %v3411_v22, %v3427_v21 }
 0x31f   : > { %v4316_v15 = vpack.c.bf16 %v4036_v13, %v3900_v38  ;;  %v4317_v10 = vpack.c.bf16 %v4037_v16, %v3901_v32  ;;  %v10450_v45 = vpack.c.bf16 %v4038_v37, %v3902_v6  ;;  %v10455_v46 = vpack.c.bf16 %v4039_v47, %v3903_v36  ;;  %v10461_v38 = vpop.f32.mrb[8].mxu1 }
 0x320   : > { %v3468_v61 = vrot.slane %v3460_v20, %v9256_v11  ;;  %v3475_v7 = vrot.slane %v3461_v27, %v9256_v11  ;;  %v3484_v9 = vrot.slane %v3476_v49, %v9256_v11  ;;  %v3491_v57 = vrot.slane %v3477_v59, %v9256_v11  ;;  %v8066_v32 = vpop.f32.mrb[9].mxu1 }
 0x321   : > { %8153 = vmatpush3.bf16.msra.mxu0 %v4316_v15  ;;  %8159 = vmatpush3.bf16.msra.mxu1 %v4317_v10  ;;  %v10465_v50 = vpop.f32.mrb[10].mxu1  ;;  %v3787_v2 = vrot.slane %v7778_v26, %v9250_v3  ;;  %v3803_v29 = vrot.slane %v7780_v1, %v9250_v3  ;;  %v3819_v12 = vrot.slane %v7782_v43, %v9250_v3 }
 0x322   : > { %v7786_v6 = vcombine.low %v3468_v61, %v3475_v7  ;;  %v7788_v23 = vcombine.high %v3468_v61, %v3475_v7  ;;  %v7790_v28 = vcombine.low %v3484_v9, %v3491_v57  ;;  %8164 = vmatprep.subr.bf16.mxu0 %v11416_v44  ;;  %8170 = vmatprep.subr.bf16.mxu1 %v11416_v44  ;;  %v8067_v36 = vpop.f32.mrb[11].mxu1 }
 0x323   : > { %v7792_v18 = vcombine.high %v3484_v9, %v3491_v57  ;;  %v3852_v16 = vcombine.low %v3787_v2, %v3803_v29  ;;  %v3884_v43 = vcombine.low %v3819_v12, %v3835_v5  ;;  %v3853_v40 = vcombine.high %v3787_v2, %v3803_v29 }
 0x324   : > { %v3923_v53 = vrot.slane %v7786_v6, %v9250_v3  ;;  %v3939_v21 = vrot.slane %v7788_v23, %v9250_v3  ;;  %v3955_v26 = vrot.slane %v7790_v28, %v9250_v3  ;;  %v3885_v25 = vcombine.high %v3819_v12, %v3835_v5 }
 0x325   : > { %v3971_v13 = vrot.slane %v7792_v18, %v9250_v3  ;;  %v3860_v27 = vrot.slane %v3852_v16, %v9256_v11  ;;  %v3892_v49 = vrot.slane %v3884_v43, %v9256_v11  ;;  %v3867_v10 = vrot.slane %v3853_v40, %v9256_v11 }
 0x326   : > { %v3988_v37 = vcombine.low %v3923_v53, %v3939_v21  ;;  %v3989_v60 = vcombine.high %v3923_v53, %v3939_v21  ;;  %v3899_v61 = vrot.slane %v3885_v25, %v9256_v11 }
 0x327   : > { %v4020_v47 = vcombine.low %v3955_v26, %v3971_v13  ;;  %v4021_v9 = vcombine.high %v3955_v26, %v3971_v13  ;;  %v3904_v57 = vcombine.low %v3860_v27, %v3892_v49  ;;  %v3905_v6 = vcombine.high %v3860_v27, %v3892_v49 }
 0x328   : > { %v3996_v59 = vrot.slane %v3988_v37, %v9256_v11  ;;  %v4003_v7 = vrot.slane %v3989_v60, %v9256_v11  ;;  %v3906_v28 = vcombine.low %v3867_v10, %v3899_v61  ;;  %v3907_v36 = vcombine.high %v3867_v10, %v3899_v61 }
 0x329   : > { %v4028_v15 = vrot.slane %v4020_v47, %v9256_v11  ;;  %v4035_v18 = vrot.slane %v4021_v9, %v9256_v11  ;;  %v5088_v61 = vsel %vm4332_vm1, %v10441_v0, -inf }
 0x32b   : > { %v4040_v32 = vcombine.low %v3996_v59, %v4028_v15  ;;  %v4041_v23 = vcombine.high %v3996_v59, %v4028_v15  ;;  %v4042_v2 = vcombine.low %v4003_v7, %v4035_v18  ;;  %v4043_v29 = vcombine.high %v4003_v7, %v4035_v18 }
 0x32d   : > { %v10467_v24 = vpop.f32.mrb[12].mxu1  ;;  %v10507_v12 = vpack.c.bf16 %v4042_v2, %v3906_v28  ;;  %v10509_v5 = vpack.c.bf16 %v4043_v29, %v3907_v36 }
 0x32e   : > { %v8072_v30 = vpop.f32.mrb[13].mxu1 }
 0x32f   : > { %v10469_v22 = vpop.f32.mrb[14].mxu1  ;;  %v10503_v30 = vpack.c.bf16 %v4040_v32, %v3904_v57  ;;  %v5091_v57 = vsel %vm4332_vm1, %v10461_v38, -inf }
 0x330   : > { %v8073_v31 = vpop.f32.mrb[15].mxu1 }
 0x331   : > { %v10505_v31 = vpack.c.bf16 %v4041_v23, %v3905_v6 }
 0x335   : > { %v10491_v33 = vpop.f32.mrb[16].mxu1 }
 0x336   : > { %v8078_v8 = vpop.f32.mrb[17].mxu1 }
 0x337   : > { %v10493_v1 = vpop.f32.mrb[18].mxu1 }
 0x338   : > { %v8079_v20 = vpop.f32.mrb[19].mxu1 }
 0x346   : > { %v10511_v53 = vpop.f32.mrb[20].mxu1 }
 0x347   : > { %v8084_v21 = vpop.f32.mrb[21].mxu1 }
 0x348   : > { %v10513_v26 = vpop.f32.mrb[22].mxu1  ;;  %v5094_v21 = vsel %vm4332_vm1, %v10465_v50, -inf }
 0x349   : > { %v8085_v13 = vpop.f32.mrb[23].mxu1 }
 0x34e   : > { %v10515_v8 = vpop.f32.mrb[24].mxu1 }
 0x34f   : > { %v8090_v16 = vpop.f32.mrb[25].mxu1 }
 0x350   : > { %v10517_v43 = vpop.f32.mrb[26].mxu1 }
 0x351   : > { %v8091_v37 = vpop.f32.mrb[27].mxu1 }
 0x35d   : > { %v10519_v47 = vpop.f32.mrb[28].mxu1 }
 0x35e   : > { %v8096_v20 = vpop.f32.mrb[29].mxu1 }
 0x35f   : > { %v10521_v40 = vpop.f32.mrb[30].mxu1 }
 0x360   : > { %v10523_v25 = vpop.f32.mrb[8].mxu0  ;;  %v8097_v60 = vpop.f32.mrb[31].mxu1 }
 0x361   : > { %v8108_v27 = vpop.f32.mrb[9].mxu0  ;;  %v5133_v49 = vsel %vm4332_vm1, %v10523_v25, -inf }
 0x362   : > { %5134 = vmax.xlane.f32.xlu1 %v5133_v49  ;;  %v10527_v59 = vpop.f32.mrb[10].mxu0 }
 0x363   : > { %v8109_v15 = vpop.f32.mrb[11].mxu0  ;;  %v5136_v10 = vsel %vm4332_vm1, %v10527_v59, -inf }
 0x364   : > { %5137 = vmax.xlane.f32.xlu0 %v5136_v10 }
 0x365   : > { %v10533_v7 = vpop.f32.mrb[32].mxu1 }
 0x366   : > { %5089 = vmax.xlane.f32.xlu1 %v5088_v61  ;;  %v8102_v9 = vpop.f32.mrb[33].mxu1 }
 0x367   : > { %v10537_v32 = vpop.f32.mrb[34].mxu1 }
 0x368   : > { %5092 = vmax.xlane.f32.xlu0 %v5091_v57  ;;  %v8103_v6 = vpop.f32.mrb[35].mxu1 }
 0x36b   : > { %v10539_v23 = vpop.f32.mrb[12].mxu0 }
 0x36c   : > { %v8120_v28 = vpop.f32.mrb[13].mxu0  ;;  %v5145_v18 = vsel %vm4332_vm1, %v10539_v23, -inf }
 0x36d   : > { %5146 = vmax.xlane.f32.xlu1 %v5145_v18  ;;  %v10543_v36 = vpop.f32.mrb[14].mxu0 }
 0x36e   : > { %v8121_v2 = vpop.f32.mrb[15].mxu0  ;;  %v5148_v29 = vsel %vm4332_vm1, %v10543_v36, -inf }
 0x36f   : > { %5149 = vmax.xlane.f32.xlu0 %v5148_v29 }
 0x373   : > { %5095 = vmax.xlane.f32.xlu0 %v5094_v21 }
 0x375   : > { %v10549_v13 = vpop.f32.mrb[36].mxu1 }
 0x376   : > { %v8114_v16 = vpop.f32.mrb[37].mxu1 }
 0x377   : > { %v10551_v37 = vpop.f32.mrb[38].mxu1  ;;  %v5097_v16 = vsel %vm4332_vm1, %v10467_v24, -inf }
 0x378   : > { %v8115_v20 = vpop.f32.mrb[39].mxu1 }
 0x379   : > { %v5100_v20 = vsel %vm4332_vm1, %v10469_v22, -inf }
 0x37e   : > { %v10553_v60 = vpop.f32.mrb[40].mxu1 }
 0x37f   : > { %v8126_v27 = vpop.f32.mrb[41].mxu1 }
 0x380   : > { %v10555_v49 = vpop.f32.mrb[42].mxu1 }
 0x381   : > { %v8127_v15 = vpop.f32.mrb[43].mxu1 }
 0x387   : > { %v10557_v10 = vpop.f32.mrb[16].mxu0  ;;  %v10559_v61 = vpop.f32.mrb[44].mxu1 }
 0x388   : > { %v8132_v9 = vpop.f32.mrb[17].mxu0  ;;  %v8138_v57 = vpop.f32.mrb[45].mxu1  ;;  %v5157_v6 = vsel %vm4332_vm1, %v10557_v10, -inf }
 0x389   : > { %v10563_v28 = vpop.f32.mrb[46].mxu1  ;;  %5158 = vmax.xlane.f32.xlu1 %v5157_v6  ;;  %v10565_v18 = vpop.f32.mrb[18].mxu0 }
 0x38a   : > { %v8133_v2 = vpop.f32.mrb[19].mxu0  ;;  %v8139_v29 = vpop.f32.mrb[47].mxu1  ;;  %v5160_v21 = vsel %vm4332_vm1, %v10565_v18, -inf }
 0x38b   : > { %5161 = vmax.xlane.f32.xlu0 %v5160_v21 }
 0x38d   : > { %5098 = vmax.xlane.f32.xlu1 %v5097_v16 }
 0x38f   : > { %v10573_v27 = vpop.f32.mrb[48].mxu1  ;;  %5101 = vmax.xlane.f32.xlu0 %v5100_v20  ;;  %v10575_v15 = vpop.f32.mrb[20].mxu0  ;;  %v5103_v20 = vsel %vm4332_vm1, %v10491_v33, -inf }
 0x390   : > { %v8144_v9 = vpop.f32.mrb[21].mxu0  ;;  %v8150_v57 = vpop.f32.mrb[49].mxu1  ;;  %v5169_v6 = vsel %vm4332_vm1, %v10575_v15, -inf }
 0x391   : > { %v10579_v2 = vpop.f32.mrb[50].mxu1  ;;  %5170 = vmax.xlane.f32.xlu1 %v5169_v6  ;;  %v10581_v29 = vpop.f32.mrb[22].mxu0  ;;  %v5106_v9 = vsel %vm4332_vm1, %v10493_v1, -inf  ;;  %v5109_v57 = vsel %vm4332_vm1, %v10511_v53, -inf  ;;  %v5112_v6 = vsel %vm4332_vm1, %v10513_v26, -inf }
 0x392   : > { %v8145_v21 = vpop.f32.mrb[23].mxu0  ;;  %v8151_v16 = vpop.f32.mrb[51].mxu1  ;;  %v5172_v48 = vsel %vm4332_vm1, %v10581_v29, -inf }
 0x393   : > { %5173 = vmax.xlane.f32.xlu0 %v5172_v48  ;;  %v5115_v21 = vsel %vm4332_vm1, %v10515_v8, -inf  ;;  %v5118_v48 = vsel %vm4332_vm1, %v10517_v43, -inf  ;;  %v5121_v16 = vsel %vm4332_vm1, %v10519_v47, -inf }
 0x395   : > { %5104 = vmax.xlane.f32.xlu1 %v5103_v20  ;;  %v5124_v20 = vsel %vm4332_vm1, %v10521_v40, -inf }
 0x397   : > { %5107 = vmax.xlane.f32.xlu0 %v5106_v9  ;;  %v5127_v9 = vsel %vm4332_vm1, %v10533_v7, -inf }
 0x399   : > { %5110 = vmax.xlane.f32.xlu1 %v5109_v57  ;;  %v5130_v57 = vsel %vm4332_vm1, %v10537_v32, -inf }
 0x39b   : > { %5113 = vmax.xlane.f32.xlu0 %v5112_v6  ;;  %v5139_v6 = vsel %vm4332_vm1, %v10549_v13, -inf }
 0x39d   : > { %5116 = vmax.xlane.f32.xlu1 %v5115_v21  ;;  %v5142_v21 = vsel %vm4332_vm1, %v10551_v37, -inf }
 0x39f   : > { %5119 = vmax.xlane.f32.xlu0 %v5118_v48  ;;  %v5154_v48 = vsel %vm4332_vm1, %v10555_v49, -inf }
 0x3a1   : > { %5122 = vmax.xlane.f32.xlu1 %v5121_v16  ;;  %v5166_v16 = vsel %vm4332_vm1, %v10563_v28, -inf }
 0x3a3   : > { %5125 = vmax.xlane.f32.xlu0 %v5124_v20  ;;  %v5178_v20 = vsel %vm4332_vm1, %v10579_v2, -inf }
 0x3a5   : > { %5128 = vmax.xlane.f32.xlu1 %v5127_v9  ;;  %v5151_v9 = vsel %vm4332_vm1, %v10553_v60, -inf }
 0x3a7   : > { %5131 = vmax.xlane.f32.xlu0 %v5130_v57  ;;  %v5163_v57 = vsel %vm4332_vm1, %v10559_v61, -inf }
 0x3a9   : > { %5140 = vmax.xlane.f32.xlu1 %v5139_v6  ;;  %v5175_v6 = vsel %vm4332_vm1, %v10573_v27, -inf }
 0x3ab   : > { %5143 = vmax.xlane.f32.xlu0 %v5142_v21  ;;  %v5087_v21 = vpop.xlane.xlu0 %5086 }
 0x3af   : > { %5155 = vmax.xlane.f32.xlu0 %v5154_v48  ;;  %v5181_v48 = vsub.f32 %v10434_v14, %v5087_v21 }
 0x3b1   : > { %v5213_v52 = vmul.f32 1.442695, %v5181_v48 }
 0x3b3   : > { %5167 = vmax.xlane.f32.xlu0 %v5166_v16 }
 0x3b7   : > { %5179 = vmax.xlane.f32.xlu0 %v5178_v20 }
 0x3ba   : > { %3210 = vrot.lane.b32.xlu1 %v11429_v58, %s8792_s23 }
 0x3de   : > { %5152 = vmax.xlane.f32.xlu1 %v5151_v9 }
 0x3e2   : > { %5164 = vmax.xlane.f32.xlu1 %v5163_v57 }
 0x3e6   : > { %5176 = vmax.xlane.f32.xlu1 %v5175_v6 }
 0x3ef   : > { %v5135_v16 = vpop.xlane.xlu1 %5134 }
 0x3f0   : > { %v5197_v20 = vsub.f32 %v10523_v25, %v5135_v16 }
 0x3f1   : > { %v5138_v41 = vpop.xlane.xlu0 %5137 }
 0x3f2   : > { %v5245_v19 = vmul.f32 1.442695, %v5197_v20  ;;  %v5198_v62 = vsub.f32 %v10527_v59, %v5138_v41 }
 0x3f3   : > { %v5090_v9 = vpop.xlane.xlu1 %5089 }
 0x3f4   : > { %8458 = vpow2.f32 %v5245_v19  ;;  %v5247_v4 = vmul.f32 1.442695, %v5198_v62  ;;  %v5182_v57 = vsub.f32 %v10441_v0, %v5090_v9 }
 0x3f5   : > { %8460 = vpow2.f32 %v5213_v52  ;;  %v5093_v55 = vpop.xlane.xlu0 %5092 }
 0x3f6   : > { %8462 = vpow2.f32 %v5247_v4  ;;  %v5215_v6 = vmul.f32 1.442695, %v5182_v57  ;;  %v5183_v63 = vsub.f32 %v10461_v38, %v5093_v55 }
 0x3f8   : > { %8464 = vpow2.f32 %v5215_v6  ;;  %v5217_v14 = vmul.f32 1.442695, %v5183_v63 }
 0x3fa   : > { %8466 = vpow2.f32 %v5217_v14  ;;  %v5147_v25 = vpop.xlane.xlu1 %5146 }
 0x3fb   : > { %v5201_v21 = vsub.f32 %v10539_v23, %v5147_v25 }
 0x3fc   : > { %v5150_v48 = vpop.xlane.xlu0 %5149 }
 0x3fd   : > { %v5253_v41 = vmul.f32 1.442695, %v5201_v21  ;;  %v5202_v19 = vsub.f32 %v10543_v36, %v5150_v48 }
 0x3fe   : > { %v10629_v16 = vpop.eup %8458 }
 0x3ff   : > { %v10632_v62 = vpop.eup %8460  ;;  %v5325_v52 = vsel %vm4332_vm1, %v10629_v16, 0.0  ;;  %8468 = vpow2.f32 %v5253_v41  ;;  %v5255_v55 = vmul.f32 1.442695, %v5202_v19 }
 0x400   : > { %v10636_v4 = vpop.eup %8462  ;;  %5326 = vadd.xlane.f32.xlu1 %v5325_v52  ;;  %v5096_v63 = vpop.xlane.xlu0 %5095  ;;  %v5277_v23 = vsel %vm4332_vm1, %v10632_v62, 0.0 }
 0x401   : > { %v5328_v0 = vsel %vm4332_vm1, %v10636_v4, 0.0  ;;  %8470 = vpow2.f32 %v5255_v55  ;;  %v5184_v59 = vsub.f32 %v10465_v50, %v5096_v63 }
 0x402   : > { %v10640_v38 = vpop.eup %8464  ;;  %5329 = vadd.xlane.f32.xlu0 %v5328_v0 }
 0x403   : > { %v5219_v20 = vmul.f32 1.442695, %v5184_v59  ;;  %v5280_v9 = vsel %vm4332_vm1, %v10640_v38, 0.0 }
 0x404   : > { %v10645_v36 = vpop.eup %8466  ;;  %5278 = vadd.xlane.f32.xlu1 %v5277_v23 }
 0x405   : > { %8472 = vpow2.f32 %v5219_v20  ;;  %v5283_v57 = vsel %vm4332_vm1, %v10645_v36, 0.0 }
 0x406   : > { %5281 = vadd.xlane.f32.xlu0 %v5280_v9 }
 0x408   : > { %5284 = vadd.xlane.f32.xlu1 %v5283_v57 }
 0x409   : > { %v10651_v6 = vpop.eup %8468 }
 0x40a   : > { %11432 = vst [vmem:[#allocation27_spill] sm:$0xff] %v10651_v6  ;;  %v5337_v50 = vsel %vm4332_vm1, %v10651_v6, 0.0 }
 0x40b   : > { %v10655_v14 = vpop.eup %8470  ;;  %5338 = vadd.xlane.f32.xlu0 %v5337_v50 }
 0x40c   : > { %v5340_v25 = vsel %vm4332_vm1, %v10655_v14, 0.0 }
 0x40d   : > { %5341 = vadd.xlane.f32.xlu1 %v5340_v25 }
 0x40f   : > { %v10659_v21 = vpop.eup %8472 }
 0x410   : > { %v5286_v48 = vsel %vm4332_vm1, %v10659_v21, 0.0 }
 0x411   : > { %5287 = vadd.xlane.f32.xlu0 %v5286_v48 }
 0x416   : > { %v5159_v41 = vpop.xlane.xlu1 %5158 }
 0x417   : > { %v5205_v19 = vsub.f32 %v10557_v10, %v5159_v41 }
 0x418   : > { %v5162_v52 = vpop.xlane.xlu0 %5161 }
 0x419   : > { %v5261_v55 = vmul.f32 1.442695, %v5205_v19  ;;  %v5206_v63 = vsub.f32 %v10565_v18, %v5162_v52 }
 0x41a   : > { %v5099_v0 = vpop.xlane.xlu1 %5098 }
 0x41b   : > { %8474 = vpow2.f32 %v5261_v55  ;;  %v5185_v59 = vsub.f32 %v10467_v24, %v5099_v0  ;;  %v5263_v23 = vmul.f32 1.442695, %v5206_v63 }
 0x41c   : > { %v5102_v20 = vpop.xlane.xlu0 %5101 }
 0x41d   : > { %v5221_v9 = vmul.f32 1.442695, %v5185_v59  ;;  %v5186_v57 = vsub.f32 %v10469_v22, %v5102_v20 }
 0x41e   : > { %v10667_v50 = vpop.xlane.xlu1 %5170 }
 0x41f   : > { %8476 = vpow2.f32 %v5221_v9  ;;  %v5223_v25 = vmul.f32 1.442695, %v5186_v57 }
 0x420   : > { %8478 = vpow2.f32 %v5263_v23  ;;  %v10671_v48 = vpop.xlane.xlu0 %5173 }
 0x421   : > { %8480 = vpow2.f32 %v5223_v25 }
 0x422   : > { %v5105_v24 = vpop.xlane.xlu1 %5104 }
 0x423   : > { %v5187_v41 = vsub.f32 %v10491_v33, %v5105_v24 }
 0x424   : > { %v5108_v19 = vpop.xlane.xlu0 %5107 }
 0x425   : > { %v10676_v52 = vpop.eup %8474  ;;  %v5225_v22 = vmul.f32 1.442695, %v5187_v41  ;;  %v5188_v55 = vsub.f32 %v10493_v1, %v5108_v19 }
 0x426   : > { %v5111_v63 = vpop.xlane.xlu1 %5110  ;;  %v5349_v0 = vsel %vm4332_vm1, %v10676_v52, 0.0 }
 0x427   : > { %8482 = vpow2.f32 %v5225_v22  ;;  %v5227_v59 = vmul.f32 1.442695, %v5188_v55  ;;  %v5189_v23 = vsub.f32 %v10511_v53, %v5111_v63  ;;  %5350 = vadd.xlane.f32.xlu1 %v5349_v0 }
 0x428   : > { %v5114_v20 = vpop.xlane.xlu0 %5113 }
 0x429   : > { %v10682_v9 = vpop.eup %8476  ;;  %8484 = vpow2.f32 %v5227_v59  ;;  %v5229_v33 = vmul.f32 1.442695, %v5189_v23  ;;  %v5190_v57 = vsub.f32 %v10513_v26, %v5114_v20 }
 0x42a   : > { %v10685_v25 = vpop.eup %8478  ;;  %v5117_v24 = vpop.xlane.xlu1 %5116  ;;  %v5289_v1 = vsel %vm4332_vm1, %v10682_v9, 0.0 }
 0x42b   : > { %v10689_v41 = vpop.eup %8480  ;;  %8486 = vpow2.f32 %v5229_v33  ;;  %v5231_v19 = vmul.f32 1.442695, %v5190_v57  ;;  %v5191_v53 = vsub.f32 %v10515_v8, %v5117_v24  ;;  %5290 = vadd.xlane.f32.xlu0 %v5289_v1  ;;  %v5352_v59 = vsel %vm4332_vm1, %v10685_v25, 0.0 }
 0x42c   : > { %v5120_v22 = vpop.xlane.xlu0 %5119  ;;  %v5292_v55 = vsel %vm4332_vm1, %v10689_v41, 0.0 }
 0x42d   : > { %8488 = vpow2.f32 %v5231_v19  ;;  %v5233_v63 = vmul.f32 1.442695, %v5191_v53  ;;  %v5192_v26 = vsub.f32 %v10517_v43, %v5120_v22  ;;  %5293 = vadd.xlane.f32.xlu1 %v5292_v55 }
 0x42e   : > { %v5123_v0 = vpop.xlane.xlu1 %5122 }
 0x42f   : > { %8490 = vpow2.f32 %v5233_v63  ;;  %v5235_v23 = vmul.f32 1.442695, %v5192_v26  ;;  %v5193_v20 = vsub.f32 %v10519_v47, %v5123_v0  ;;  %5353 = vadd.xlane.f32.xlu0 %v5352_v59 }
 0x430   : > { %v5126_v8 = vpop.xlane.xlu0 %5125 }
 0x431   : > { %v10698_v33 = vpop.eup %8482  ;;  %8492 = vpow2.f32 %v5235_v23  ;;  %v5237_v57 = vmul.f32 1.442695, %v5193_v20  ;;  %v5194_v24 = vsub.f32 %v10521_v40, %v5126_v8 }
 0x432   : > { %v5129_v1 = vpop.xlane.xlu1 %5128  ;;  %v5295_v43 = vsel %vm4332_vm1, %v10698_v33, 0.0 }
 0x433   : > { %v10703_v19 = vpop.eup %8484  ;;  %v5239_v53 = vmul.f32 1.442695, %v5194_v24  ;;  %v5195_v22 = vsub.f32 %v10533_v7, %v5129_v1  ;;  %5296 = vadd.xlane.f32.xlu0 %v5295_v43  ;;  %8494 = vpow2.f32 %v5237_v57 }
 0x434   : > { %v5132_v47 = vpop.xlane.xlu0 %5131  ;;  %v5298_v59 = vsel %vm4332_vm1, %v10703_v19, 0.0 }
 0x435   : > { %v10706_v55 = vpop.eup %8486  ;;  %8496 = vpow2.f32 %v5239_v53  ;;  %v5241_v63 = vmul.f32 1.442695, %v5195_v22  ;;  %v5196_v26 = vsub.f32 %v10537_v32, %v5132_v47 }
 0x436   : > { %v5141_v0 = vpop.xlane.xlu1 %5140  ;;  %v5301_v40 = vsel %vm4332_vm1, %v10706_v55, 0.0 }
 0x437   : > { %v10713_v23 = vpop.eup %8488  ;;  %v5199_v7 = vsub.f32 %v10549_v13, %v5141_v0  ;;  %5302 = vadd.xlane.f32.xlu1 %v5301_v40  ;;  %5299 = vadd.xlane.f32.xlu0 %v5298_v59  ;;  %8498 = vpow2.f32 %v5241_v63  ;;  %v5243_v8 = vmul.f32 1.442695, %v5196_v26 }
 0x438   : > { %v5304_v24 = vsel %vm4332_vm1, %v10713_v23, 0.0 }
 0x439   : > { %v10716_v20 = vpop.eup %8490  ;;  %v5249_v57 = vmul.f32 1.442695, %v5199_v7 }
 0x43a   : > { %v5307_v32 = vsel %vm4332_vm1, %v10716_v20, 0.0 }
 0x43b   : > { %v10722_v1 = vpop.eup %8492  ;;  %8500 = vpow2.f32 %v5249_v57  ;;  %5308 = vadd.xlane.f32.xlu1 %v5307_v32  ;;  %5305 = vadd.xlane.f32.xlu0 %v5304_v24  ;;  %v5144_v57 = vpop.xlane.xlu0 %5143 }
 0x43c   : > { %8502 = vpow2.f32 %v5243_v8  ;;  %v5310_v43 = vsel %vm4332_vm1, %v10722_v1, 0.0  ;;  %v11434_v8 = vld [vmem:[#allocation21_spill] sm:$0xff]  ;;  %v10748_v32 = vpop.permute.xlu1 %3210  ;;  %v5200_v24 = vsub.f32 %v10551_v37, %v5144_v57  ;;  %v11435_v37 = vsub.f32 %v10575_v15, %v10667_v50 }
 0x43d   : > { %v10724_v13 = vpop.eup %8494 }
 0x43e   : > { %v5313_v47 = vsel %vm4332_vm1, %v10724_v13, 0.0  ;;  %v5269_v57 = vmul.f32 1.442695, %v11435_v37 }
 0x43f   : > { %v10728_v53 = vpop.eup %8496  ;;  %5311 = vadd.xlane.f32.xlu0 %v5310_v43  ;;  %v5156_v18 = vpop.xlane.xlu0 %5155 }
 0x440   : > { %v5316_v22 = vsel %vm4332_vm1, %v10728_v53, 0.0 }
 0x441   : > { %5317 = vadd.xlane.f32.xlu1 %v5316_v22  ;;  %v10734_v63 = vpop.eup %8498  ;;  %v5251_v22 = vmul.f32 1.442695, %v5200_v24 }
 0x442   : > { %v5319_v0 = vsel %vm4332_vm1, %v10734_v63, 0.0 }
 0x443   : > { %5314 = vadd.xlane.f32.xlu0 %v5313_v47  ;;  %8504 = vpow2.f32 %v5251_v22  ;;  %v5168_v6 = vpop.xlane.xlu0 %5167 }
 0x445   : > { %v10736_v26 = vpop.eup %8500 }
 0x446   : > { %11433 = vst [vmem:[#allocation28_spill] sm:$0xff] %v10736_v26  ;;  %v5331_v40 = vsel %vm4332_vm1, %v10736_v26, 0.0  ;;  %v10742_v59 = vpop.eup %8502 }
 0x447   : > { %5320 = vadd.xlane.f32.xlu0 %v5319_v0  ;;  %5332 = vadd.xlane.f32.xlu1 %v5331_v40  ;;  %v5322_v7 = vsel %vm4332_vm1, %v10742_v59, 0.0  ;;  %v5204_v40 = vsub.f32 %v10555_v49, %v5156_v18  ;;  %v5180_v18 = vpop.xlane.xlu0 %5179 }
 0x449   : > { %v5259_v42 = vmul.f32 1.442695, %v5204_v40 }
 0x44b   : > { %5323 = vadd.xlane.f32.xlu0 %v5322_v7 }
 0x461   : > { %3220 = vrot.lane.b32.xlu0 %v11434_v8, %s8794_s15 }
 0x46b   : > { %v5153_v43 = vpop.xlane.xlu1 %5152 }
 0x46c   : > { %v5203_v47 = vsub.f32 %v10553_v60, %v5153_v43  ;;  %v5208_v60 = vsub.f32 %v10563_v28, %v5168_v6  ;;  %v10758_v43 = vpop.eup %8504 }
 0x46d   : > { %v5334_v15 = vsel %vm4332_vm1, %v10758_v43, 0.0 }
 0x46e   : > { %v5257_v7 = vmul.f32 1.442695, %v5203_v47  ;;  %v5267_v49 = vmul.f32 1.442695, %v5208_v60 }
 0x46f   : > { %v5165_v10 = vpop.xlane.xlu1 %5164 }
 0x470   : > { %v5207_v0 = vsub.f32 %v10559_v61, %v5165_v10 }
 0x472   : > { %v5265_v26 = vmul.f32 1.442695, %v5207_v0 }
 0x473   : > { %v5177_v24 = vpop.xlane.xlu1 %5176 }
 0x474   : > { %8506 = vpow2.f32 %v5265_v26  ;;  %v5211_v10 = vsub.f32 %v10573_v27, %v5177_v24 }
 0x475   : > { %8508 = vpow2.f32 %v5257_v7 }
 0x476   : > { %8510 = vpow2.f32 %v5259_v42  ;;  %v5212_v42 = vsub.f32 %v10579_v2, %v5180_v18  ;;  %v5273_v28 = vmul.f32 1.442695, %v5211_v10 }
 0x477   : > { %8512 = vpow2.f32 %v5269_v57 }
 0x478   : > { %8514 = vpow2.f32 %v5267_v49  ;;  %v5275_v27 = vmul.f32 1.442695, %v5212_v42 }
 0x479   : > { %8516 = vpow2.f32 %v5273_v28 }
 0x47a   : > { %8518 = vpow2.f32 %v5275_v27 }
 0x47e   : > { %v10760_v61 = vpop.eup %8506 }
 0x47f   : > { %v5355_v26 = vsel %vm4332_vm1, %v10760_v61, 0.0  ;;  %v10767_v50 = vpop.eup %8508 }
 0x480   : > { %5356 = vadd.xlane.f32.xlu1 %v5355_v26  ;;  %5335 = vadd.xlane.f32.xlu0 %v5334_v15  ;;  %v5343_v6 = vsel %vm4332_vm1, %v10767_v50, 0.0  ;;  %v10772_v22 = vpop.eup %8510 }
 0x481   : > { %v5346_v47 = vsel %vm4332_vm1, %v10772_v22, 0.0  ;;  %v10776_v0 = vpop.eup %8512 }
 0x482   : > { %v5361_v40 = vsel %vm4332_vm1, %v10776_v0, 0.0  ;;  %v10780_v2 = vpop.eup %8514 }
 0x483   : > { %v5358_v37 = vsel %vm4332_vm1, %v10780_v2, 0.0  ;;  %v10784_v60 = vpop.eup %8516 }
 0x484   : > { %5344 = vadd.xlane.f32.xlu0 %v5343_v6  ;;  %v5367_v49 = vsel %vm4332_vm1, %v10784_v60, 0.0  ;;  %v10790_v18 = vpop.eup %8518 }
 0x485   : > { %v5370_v26 = vsel %vm4332_vm1, %v10790_v18, 0.0 }
 0x488   : > { %5347 = vadd.xlane.f32.xlu0 %v5346_v47 }
 0x48c   : > { %5362 = vadd.xlane.f32.xlu0 %v5361_v40 }
 0x48d   : > { %v5327_v7 = vpop.xlane.xlu1 %5326 }
 0x48e   : > { %8520 = vrcp.f32 %v5327_v7 }
 0x48f   : > { %v5330_v57 = vpop.xlane.xlu0 %5329 }
 0x490   : > { %5359 = vadd.xlane.f32.xlu0 %v5358_v37  ;;  %8522 = vrcp.f32 %v5330_v57 }
 0x491   : > { %3222 = vrot.lane.b32.xlu1 %v11429_v58, %s8794_s15  ;;  %v5279_v24 = vpop.xlane.xlu1 %5278 }
 0x492   : > { %8524 = vrcp.f32 %v5279_v24 }
 0x493   : > { %v5282_v10 = vpop.xlane.xlu0 %5281 }
 0x494   : > { %5368 = vadd.xlane.f32.xlu0 %v5367_v49  ;;  %8526 = vrcp.f32 %v5282_v10 }
 0x495   : > { %v5285_v27 = vpop.xlane.xlu1 %5284 }
 0x496   : > { %8528 = vrcp.f32 %v5285_v27  ;;  %v3501_v27 = vcombine.high %v11434_v8, %v10111_v56 }
 0x498   : > { %v8521_v15 = vpop.eup %8520  ;;  %5371 = vadd.xlane.f32.xlu0 %v5370_v26  ;;  %v10794_v42 = vpop.xlane.xlu0 %5338 }
 0x499   : > { %v10797_v58 = vmul.f32 %v8521_v15, %v10629_v16  ;;  %v11436_v16 = vsub.f32 %v10581_v29, %v10671_v48 }
 0x49a   : > { %v8523_v28 = vpop.eup %8522  ;;  %v10823_v29 = vpop.xlane.xlu1 %5341 }
 0x49b   : > { %v10800_v6 = vmul.f32 %v8523_v28, %v10636_v4  ;;  %v5271_v10 = vmul.f32 1.442695, %v11436_v16  ;;  %v3500_v28 = vcombine.low %v11434_v8, %v10111_v56 }
 0x49c   : > { %v8525_v47 = vpop.eup %8524 }
 0x49d   : > { %v5445_v40 = vpack.c.bf16 %v10800_v6, %v10797_v58  ;;  %v5405_v37 = vmul.f32 %v8525_v47, %v10632_v62  ;;  %v3516_v47 = vcombine.low %v10062_v17, %v10240_v34 }
 0x49e   : > { %v8527_v7 = vpop.eup %8526  ;;  %v5288_v24 = vpop.xlane.xlu0 %5287 }
 0x49f   : > { %v5406_v57 = vmul.f32 %v8527_v7, %v10640_v38  ;;  %8530 = vrcp.f32 %v5288_v24  ;;  %v3517_v7 = vcombine.high %v10062_v17, %v10240_v34  ;;  %v3515_v24 = vrot.slane %v3501_v27, %v9250_v3 }
 0x4a0   : > { %8532 = vpow2.f32 %v5271_v10  ;;  %v8529_v62 = vpop.eup %8528 }
 0x4a1   : > { %v5437_v49 = vpack.c.bf16 %v5406_v57, %v5405_v37  ;;  %v5407_v38 = vmul.f32 %v8529_v62, %v10645_v36  ;;  %v3508_v57 = vrot.slane %v3500_v28, %v9250_v3  ;;  %v3531_v16 = vrot.slane %v3517_v7, %v9250_v3 }
 0x4a3   : > { %8155 = vmatmul.mubr.msk.bf16.vlgmr.msra.gmra.mrb[24].mxu0 %vm4332_vm1, %v5437_v49  ;;  %v3524_v49 = vrot.slane %v3516_v47, %v9250_v3 }
 0x4a4   : > { %8165 = vmatpush3.bf16.msra.mxu0 %v10450_v45  ;;  %8166 = vmatprep.mubr.msk.bf16.mxu0 %vm8795_vm0, %v11416_v44 }
 0x4a5   : > { %8176 = vmatprep.subr.bf16.mxu0 %v11416_v44  ;;  %v3564_v56 = vcombine.low %v3508_v57, %v3524_v49  ;;  %v3565_v8 = vcombine.high %v3508_v57, %v3524_v49 }
 0x4a7   : > { %v3572_v28 = vrot.slane %v3564_v56, %v9256_v11 }
 0x4a9   : > { %v8531_v4 = vpop.eup %8530 }
 0x4aa   : > { %v5408_v26 = vmul.f32 %v8531_v4, %v10659_v21  ;;  %v10820_v45 = vpop.eup %8532  ;;  %v3580_v4 = vcombine.low %v3515_v24, %v3531_v16 }
 0x4ab   : > { %v5364_v48 = vsel %vm4332_vm1, %v10820_v45, 0.0 }
 0x4ac   : > { %v5438_v15 = vpack.c.bf16 %v5408_v26, %v5407_v38  ;;  %v3581_v38 = vcombine.high %v3515_v24, %v3531_v16  ;;  %v3588_v27 = vrot.slane %v3580_v4, %v9256_v11 }
 0x4ae   : > { %8161 = vmatmul.mubr.msk.bf16.vlgmr.msra.gmra.mrb[52].mxu1 %vm4332_vm1, %v5438_v15  ;;  %v3595_v47 = vrot.slane %v3581_v38, %v9256_v11 }
 0x4af   : > { %8171 = vmatpush3.bf16.msra.mxu1 %v10455_v46  ;;  %8172 = vmatprep.mubr.msk.bf16.mxu1 %vm8795_vm0, %v11416_v44 }
 0x4b0   : > { %8182 = vmatprep.subr.bf16.mxu1 %v11416_v44  ;;  %v7799_v16 = vcombine.high %v3588_v27, %v3595_v47 }
 0x4b4   : > { %v5351_v36 = vpop.xlane.xlu1 %5350 }
 0x4b5   : > { %5365 = vadd.xlane.f32.xlu1 %v5364_v48 }
 0x4b8   : > { %v5291_v21 = vpop.xlane.xlu0 %5290 }
 0x4b9   : > { %8534 = vrcp.f32 %v5291_v21 }
 0x4ba   : > { %8536 = vrcp.f32 %v5351_v36  ;;  %v5294_v46 = vpop.xlane.xlu1 %5293 }
 0x4bb   : > { %8538 = vrcp.f32 %v5294_v46  ;;  %v3579_v46 = vrot.slane %v3565_v8, %v9256_v11 }
 0x4bc   : > { %v5354_v37 = vpop.xlane.xlu0 %5353 }
 0x4bd   : > { %8540 = vrcp.f32 %v5354_v37  ;;  %v7795_v49 = vcombine.high %v3572_v28, %v3579_v46 }
 0x4bf   : > { %v4068_v38 = vrot.slane %v7795_v49, %v9250_v3 }
 0x4c0   : > { %v5297_v10 = vpop.xlane.xlu0 %5296 }
 0x4c1   : > { %8542 = vrcp.f32 %v5297_v10 }
 0x4c3   : > { %v8535_v62 = vpop.eup %8534 }
 0x4c4   : > { %v8537_v26 = vpop.eup %8536  ;;  %v5303_v17 = vpop.xlane.xlu1 %5302  ;;  %v5409_v48 = vmul.f32 %v8535_v62, %v10682_v9 }
 0x4c5   : > { %v5300_v34 = vpop.xlane.xlu0 %5299  ;;  %v8539_v15 = vpop.eup %8538  ;;  %v10846_v7 = vmul.f32 %v8537_v26, %v10676_v52  ;;  %v7793_v52 = vcombine.low %v3572_v28, %v3579_v46  ;;  %v4100_v26 = vrot.slane %v7799_v16, %v9250_v3 }
 0x4c6   : > { %v5410_v36 = vmul.f32 %v8539_v15, %v10689_v41  ;;  %8544 = vrcp.f32 %v5300_v34 }
 0x4c7   : > { %v8541_v21 = vpop.eup %8540  ;;  %8546 = vrcp.f32 %v5303_v17  ;;  %v4052_v4 = vrot.slane %v7793_v52, %v9250_v3 }
 0x4c8   : > { %v10849_v37 = vmul.f32 %v8541_v21, %v10685_v25  ;;  %v5309_v9 = vpop.xlane.xlu1 %5308  ;;  %v5439_v41 = vpack.c.bf16 %v5410_v36, %v5409_v48  ;;  %v7797_v25 = vcombine.low %v3588_v27, %v3595_v47 }
 0x4c9   : > { %v5306_v57 = vpop.xlane.xlu0 %5305  ;;  %v4108_v46 = vcombine.low %v4052_v4, %v4068_v38 }
 0x4ca   : > { %8548 = vrcp.f32 %v5306_v57  ;;  %8167 = vmatmul.mubr.msk.bf16.vlgmr.msra.gmra.mrb[28].mxu0 %vm4332_vm1, %v5439_v41  ;;  %v5449_v24 = vpack.c.bf16 %v10849_v37, %v10846_v7 }
 0x4cb   : > { %8550 = vrcp.f32 %v5309_v9  ;;  %8177 = vmatpush3.bf16.msra.mxu0 %v10503_v30  ;;  %8178 = vmatprep.mubr.msk.bf16.mxu0 %vm8795_vm0, %v11416_v44  ;;  %v8543_v62 = vpop.eup %8542  ;;  %v4084_v30 = vrot.slane %v7797_v25, %v9250_v3 }
 0x4cc   : > { %8188 = vmatprep.subr.bf16.mxu0 %v11416_v44  ;;  %v5411_v34 = vmul.f32 %v8543_v62, %v10698_v33 }
 0x4cd   : > { %v5312_v10 = vpop.xlane.xlu0 %5311  ;;  %v4140_v27 = vcombine.low %v4084_v30, %v4100_v26 }
 0x4ce   : > { %8552 = vrcp.f32 %v5312_v10  ;;  %v5318_v56 = vpop.xlane.xlu1 %5317 }
 0x4cf   : > { %8554 = vrcp.f32 %v5318_v56  ;;  %v4141_v56 = vcombine.high %v4084_v30, %v4100_v26 }
 0x4d0   : > { %v8545_v8 = vpop.eup %8544 }
 0x4d1   : > { %v5315_v17 = vpop.xlane.xlu0 %5314  ;;  %v5412_v15 = vmul.f32 %v8545_v8, %v10703_v19  ;;  %v8547_v48 = vpop.eup %8546 }
 0x4d2   : > { %8556 = vrcp.f32 %v5315_v17  ;;  %v5413_v9 = vmul.f32 %v8547_v48, %v10706_v55  ;;  %v4116_v55 = vrot.slane %v4108_v46, %v9256_v11  ;;  %v11442_v46 = vld [vmem:[#allocation25_spill] sm:$0xff] }
 0x4d3   : > { %v5440_v36 = vpack.c.bf16 %v5412_v15, %v5411_v34  ;;  %v11438_v34 = vcombine.high %v10386_v51, %v10393_v35 }
 0x4d4   : > { %v8549_v21 = vpop.eup %8548 }
 0x4d5   : > { %v5321_v28 = vpop.xlane.xlu0 %5320  ;;  %v8551_v47 = vpop.eup %8550  ;;  %v5414_v57 = vmul.f32 %v8549_v21, %v10713_v23  ;;  %8173 = vmatmul.mubr.msk.bf16.vlgmr.msra.gmra.mrb[56].mxu1 %vm4332_vm1, %v5440_v36  ;;  %v4148_v23 = vrot.slane %v4140_v27, %v9256_v11  ;;  %v11439_v36 = vcombine.low %v10400_v39, %v10403_v54 }
 0x4d6   : > { %8183 = vmatpush3.bf16.msra.mxu1 %v10505_v31  ;;  %8184 = vmatprep.mubr.msk.bf16.mxu1 %vm8795_vm0, %v11416_v44  ;;  %8558 = vrcp.f32 %v5321_v28  ;;  %v5415_v41 = vmul.f32 %v8551_v47, %v10716_v20  ;;  %v4109_v20 = vcombine.high %v4052_v4, %v4068_v38  ;;  %v10896_v4 = vrot.slane %v4141_v56, %v9256_v11  ;;  %v11444_v56 = vld [vmem:[#allocation26_spill] sm:$0xff] }
 0x4d7   : > { %v5441_v19 = vpack.c.bf16 %v5414_v57, %v5413_v9  ;;  %8194 = vmatprep.subr.bf16.mxu1 %v11416_v44  ;;  %v4172_v62 = vcombine.low %v4116_v55, %v4148_v23 }
 0x4d8   : > { %v8553_v33 = vpop.eup %8552  ;;  %v10893_v8 = vrot.slane %v4109_v20, %v9256_v11 }
 0x4d9   : > { %v5416_v52 = vmul.f32 %v8553_v33, %v10722_v1  ;;  %v5324_v49 = vpop.xlane.xlu0 %5323  ;;  %v8555_v25 = vpop.eup %8554  ;;  %8179 = vmatmul.mubr.msk.bf16.vlgmr.msra.gmra.mrb[32].mxu0 %vm4332_vm1, %v5441_v19 }
 0x4da   : > { %8560 = vrcp.f32 %v5324_v49  ;;  %8189 = vmatpush3.bf16.msra.mxu0 %v10507_v12  ;;  %8190 = vmatprep.mubr.msk.bf16.mxu0 %vm8795_vm0, %v11416_v44  ;;  %v5418_v1 = vmul.f32 %v8555_v25, %v10728_v53  ;;  %v11437_v53 = vcombine.low %v10386_v51, %v10393_v35  ;;  %v4174_v26 = vcombine.low %v10893_v8, %v10896_v4  ;;  %v11440_v35 = vld [vmem:[#allocation27_spill] sm:$0xff] }
 0x4db   : > { %v5442_v31 = vpack.c.bf16 %v5416_v52, %v5415_v41  ;;  %8200 = vmatprep.subr.bf16.mxu0 %v11416_v44  ;;  %8562 = vrcp.f32 %v10823_v29  ;;  %v5333_v52 = vpop.xlane.xlu1 %5332 }
 0x4dc   : > { %v8557_v16 = vpop.eup %8556  ;;  %8564 = vrcp.f32 %v10794_v42  ;;  %v4173_v42 = vcombine.high %v4116_v55, %v4148_v23  ;;  %v4326_v21 = vpack.c.bf16 %v11439_v36, %v4174_v26 }
 0x4dd   : > { %v5417_v10 = vmul.f32 %v8557_v16, %v10724_v13  ;;  %8185 = vmatmul.mubr.msk.bf16.vlgmr.msra.gmra.mrb[60].mxu1 %vm4332_vm1, %v5442_v31  ;;  %v4324_v13 = vpack.c.bf16 %v11437_v53, %v4172_v62  ;;  %v3221_v6 = vpop.permute.xlu0 %3220  ;;  %8566 = vrcp.f32 %v5333_v52  ;;  %v3669_v53 = vcombine.high %v11444_v56, %v10748_v32 }
 0x4de   : > { %8195 = vmatpush3.bf16.msra.mxu1 %v10509_v5  ;;  %8196 = vmatprep.mubr.msk.bf16.mxu1 %vm8795_vm0, %v11416_v44  ;;  %v4325_v15 = vpack.c.bf16 %v11438_v34, %v4173_v42  ;;  %v4175_v52 = vcombine.high %v10893_v8, %v10896_v4  ;;  %v11447_v8 = vcombine.high %v10400_v39, %v10403_v54 }
 0x4df   : > { %v5443_v12 = vpack.c.bf16 %v5418_v1, %v5417_v10  ;;  %8206 = vmatprep.subr.bf16.mxu1 %v11416_v44 }
 0x4e0   : > { %v8559_v29 = vpop.eup %8558  ;;  %v4327_v4 = vpack.c.bf16 %v11447_v8, %v4175_v52 }
 0x4e1   : > { %8191 = vmatmul.mubr.msk.bf16.vlgmr.msra.gmra.mrb[36].mxu0 %vm4332_vm1, %v5443_v12  ;;  %v5419_v38 = vmul.f32 %v8559_v29, %v10734_v63  ;;  %v3668_v12 = vcombine.low %v11444_v56, %v10748_v32 }
 0x4e2   : > { %8201 = vmatpush3.bf16.msra.mxu0 %v4324_v13  ;;  %8202 = vmatprep.mubr.msk.bf16.mxu0 %vm8795_vm0, %v11416_v44 }
 0x4e3   : > { %8212 = vmatprep.subr.bf16.mxu0 %v11416_v44 }
 0x4e4   : > { %v8561_v5 = vpop.eup %8560 }
 0x4e5   : > { %v5420_v30 = vmul.f32 %v8561_v5, %v10742_v59  ;;  %v8563_v48 = vpop.eup %8562 }
 0x4e6   : > { %v8565_v63 = vpop.eup %8564  ;;  %v5426_v51 = vmul.f32 %v8563_v48, %v10655_v14  ;;  %v11443_v14 = vld [vmem:[#allocation23_spill] sm:$0xff]  ;;  %v3683_v48 = vrot.slane %v3669_v53, %v9250_v3 }
 0x4e7   : > { %v5444_v17 = vpack.c.bf16 %v5420_v30, %v5419_v38  ;;  %v5425_v59 = vmul.f32 %v8565_v63, %v11440_v35  ;;  %v3532_v27 = vcombine.low %v11443_v14, %v11442_v46  ;;  %v3533_v9 = vcombine.high %v11443_v14, %v11442_v46  ;;  %v11445_v38 = vld [vmem:[#allocation22_spill] sm:$0xff]  ;;  %v8567_v35 = vpop.eup %8566 }
 0x4e9   : > { %8197 = vmatmul.mubr.msk.bf16.vlgmr.msra.gmra.mrb[64].mxu1 %vm4332_vm1, %v5444_v17  ;;  %8203 = vmatmul.mubr.msk.bf16.vlgmr.msra.gmra.mrb[40].mxu0 %vm4332_vm1, %v5445_v40  ;;  %v5447_v58 = vpack.c.bf16 %v5426_v51, %v5425_v59  ;;  %v11441_v40 = vld [vmem:[#allocation24_spill] sm:$0xff]  ;;  %v3540_v33 = vrot.slane %v3532_v27, %v9250_v3  ;;  %v3547_v41 = vrot.slane %v3533_v9, %v9250_v3 }
 0x4ea   : > { %8207 = vmatpush3.bf16.msra.mxu1 %v4325_v15  ;;  %8213 = vmatpush3.bf16.msra.mxu0 %v4326_v21  ;;  %v3548_v28 = vcombine.low %v11441_v40, %v3221_v6  ;;  %v3549_v47 = vcombine.high %v11441_v40, %v3221_v6  ;;  %v3676_v15 = vrot.slane %v3668_v12, %v9250_v3 }
 0x4eb   : > { %8214 = vmatprep.mubr.msk.bf16.mxu0 %vm8795_vm0, %v11416_v44  ;;  %8208 = vmatprep.mubr.msk.bf16.mxu1 %vm8795_vm0, %v11416_v44 }
 0x4ec   : > { %8218 = vmatprep.subr.bf16.mxu1 %v11416_v44  ;;  %8224 = vmatprep.subr.bf16.mxu0 %v11416_v44  ;;  %v3556_v57 = vrot.slane %v3548_v28, %v9250_v3  ;;  %v3563_v19 = vrot.slane %v3549_v47, %v9250_v3 }
 0x4ee   : > { %v3596_v49 = vcombine.low %v3540_v33, %v3556_v57  ;;  %v3597_v55 = vcombine.high %v3540_v33, %v3556_v57  ;;  %v3612_v23 = vcombine.low %v3547_v41, %v3563_v19  ;;  %v3613_v25 = vcombine.high %v3547_v41, %v3563_v19  ;;  %v11446_v33 = vld [vmem:[#allocation28_spill] sm:$0xff] }
 0x4ef   : > { %v5423_v19 = vmul.f32 %v8567_v35, %v11446_v33 }
 0x4f0   : > { %v3604_v31 = vrot.slane %v3596_v49, %v9256_v11  ;;  %v3611_v16 = vrot.slane %v3597_v55, %v9256_v11  ;;  %v3620_v10 = vrot.slane %v3612_v23, %v9256_v11  ;;  %v3627_v62 = vrot.slane %v3613_v25, %v9256_v11 }
 0x4f1   : > { %8215 = vmatmul.mubr.msk.bf16.vlgmr.msra.gmra.mrb[44].mxu0 %vm4332_vm1, %v5447_v58 }
 0x4f2   : > { %8226 = vmatprep.mubr.msk.bf16.mxu0 %vm8795_vm0, %v11416_v44  ;;  %v7794_v13 = vcombine.low %v3604_v31, %v3611_v16  ;;  %v7796_v29 = vcombine.high %v3604_v31, %v3611_v16  ;;  %v7798_v17 = vcombine.low %v3620_v10, %v3627_v62  ;;  %v7800_v34 = vcombine.high %v3620_v10, %v3627_v62 }
 0x4f4   : > { %v4059_v32 = vrot.slane %v7794_v13, %v9250_v3  ;;  %v4075_v63 = vrot.slane %v7796_v29, %v9250_v3  ;;  %v4091_v28 = vrot.slane %v7798_v17, %v9250_v3  ;;  %v4107_v46 = vrot.slane %v7800_v34, %v9250_v3 }
 0x4f6   : > { %v4124_v49 = vcombine.low %v4059_v32, %v4075_v63  ;;  %v4125_v13 = vcombine.high %v4059_v32, %v4075_v63  ;;  %v4157_v29 = vcombine.high %v4091_v28, %v4107_v46 }
 0x4f8   : > { %v4139_v63 = vrot.slane %v4125_v13, %v9256_v11 }
 0x50d   : > { %v5357_v20 = vpop.xlane.xlu1 %5356  ;;  %v5336_v1 = vpop.xlane.xlu0 %5335 }
 0x50e   : > { %8568 = vrcp.f32 %v5336_v1  ;;  %v4156_v1 = vcombine.low %v4091_v28, %v4107_v46 }
 0x511   : > { %v3223_v5 = vpop.permute.xlu1 %3222  ;;  %v5345_v42 = vpop.xlane.xlu0 %5344 }
 0x512   : > { %v3684_v30 = vcombine.low %v11445_v38, %v3223_v5  ;;  %v3685_v26 = vcombine.high %v11445_v38, %v3223_v5  ;;  %8570 = vrcp.f32 %v5345_v42 }
 0x514   : > { %v3692_v36 = vrot.slane %v3684_v30, %v9250_v3  ;;  %v3699_v21 = vrot.slane %v3685_v26, %v9250_v3  ;;  %v4164_v30 = vrot.slane %v4156_v1, %v9256_v11 }
 0x515   : > { %v5348_v51 = vpop.xlane.xlu0 %5347 }
 0x516   : > { %v3732_v59 = vcombine.low %v3676_v15, %v3692_v36  ;;  %v3733_v58 = vcombine.high %v3676_v15, %v3692_v36  ;;  %v3748_v6 = vcombine.low %v3683_v48, %v3699_v21  ;;  %v3749_v40 = vcombine.high %v3683_v48, %v3699_v21 }
 0x517   : > { %8572 = vrcp.f32 %v5348_v51  ;;  %v4171_v51 = vrot.slane %v4157_v29, %v9256_v11 }
 0x518   : > { %v3740_v14 = vrot.slane %v3732_v59, %v9256_v11  ;;  %v3747_v27 = vrot.slane %v3733_v58, %v9256_v11  ;;  %v3756_v47 = vrot.slane %v3748_v6, %v9256_v11  ;;  %v3763_v9 = vrot.slane %v3749_v40, %v9256_v11  ;;  %v8569_v57 = vpop.eup %8568 }
 0x519   : > { %v10961_v41 = vpop.xlane.xlu0 %5362  ;;  %v5424_v55 = vmul.f32 %v8569_v57, %v10758_v43  ;;  %8574 = vrcp.f32 %v5357_v20  ;;  %v4132_v20 = vrot.slane %v4124_v49, %v9256_v11  ;;  %v4179_v49 = vcombine.high %v4139_v63, %v4171_v51 }
 0x51a   : > { %v7802_v23 = vcombine.low %v3740_v14, %v3747_v27  ;;  %v7804_v25 = vcombine.high %v3740_v14, %v3747_v27  ;;  %v7806_v31 = vcombine.low %v3756_v47, %v3763_v9  ;;  %v7808_v16 = vcombine.high %v3756_v47, %v3763_v9 }
 0x51b   : > { %v5446_v12 = vpack.c.bf16 %v5424_v55, %v5423_v19  ;;  %v4176_v35 = vcombine.low %v4132_v20, %v4164_v30  ;;  %v4177_v58 = vcombine.high %v4132_v20, %v4164_v30 }
 0x51c   : > { %v4195_v10 = vrot.slane %v7802_v23, %v9250_v3  ;;  %v4211_v62 = vrot.slane %v7804_v25, %v9250_v3  ;;  %v4227_v56 = vrot.slane %v7806_v31, %v9250_v3  ;;  %v4243_v53 = vrot.slane %v7808_v16, %v9250_v3  ;;  %v8571_v38 = vpop.eup %8570 }
 0x51d   : > { %v5360_v43 = vpop.xlane.xlu0 %5359  ;;  %8209 = vmatmul.mubr.msk.bf16.vlgmr.msra.gmra.mrb[68].mxu1 %vm4332_vm1, %v5446_v12  ;;  %v5427_v21 = vmul.f32 %v8571_v38, %v10767_v50  ;;  %v4178_v50 = vcombine.low %v4139_v63, %v4171_v51 }
 0x51e   : > { %8576 = vrcp.f32 %v5360_v43  ;;  %v4260_v5 = vcombine.low %v4195_v10, %v4211_v62  ;;  %v4261_v42 = vcombine.high %v4195_v10, %v4211_v62  ;;  %8219 = vmatpush3.bf16.msra.mxu1 %v4327_v4  ;;  %8220 = vmatprep.mubr.msk.bf16.mxu1 %vm8795_vm0, %v11416_v44  ;;  %v4292_v26 = vcombine.low %v4227_v56, %v4243_v53 }
 0x51f   : > { %v4293_v39 = vcombine.high %v4227_v56, %v4243_v53  ;;  %8230 = vmatprep.subr.bf16.mxu1 %v11416_v44 }
 0x520   : > { %v4268_v54 = vrot.slane %v4260_v5, %v9256_v11  ;;  %v4300_v15 = vrot.slane %v4292_v26, %v9256_v11  ;;  %v4275_v48 = vrot.slane %v4261_v42, %v9256_v11 }
 0x521   : > { %v8573_v17 = vpop.eup %8572  ;;  %v5369_v34 = vpop.xlane.xlu0 %5368  ;;  %v4307_v36 = vrot.slane %v4293_v39, %v9256_v11 }
 0x522   : > { %v5428_v32 = vmul.f32 %v8573_v17, %v10772_v22  ;;  %v4312_v59 = vcombine.low %v4268_v54, %v4300_v15  ;;  %v4313_v6 = vcombine.high %v4268_v54, %v4300_v15  ;;  %8578 = vrcp.f32 %v5369_v34 }
 0x523   : > { %v8575_v28 = vpop.eup %8574  ;;  %v4314_v47 = vcombine.low %v4275_v48, %v4307_v36  ;;  %v4315_v19 = vcombine.high %v4275_v48, %v4307_v36 }
 0x524   : > { %v5448_v40 = vpack.c.bf16 %v5428_v32, %v5427_v21  ;;  %v4328_v14 = vpack.c.bf16 %v4312_v59, %v4176_v35  ;;  %v4329_v27 = vpack.c.bf16 %v4313_v6, %v4177_v58  ;;  %v5431_v9 = vmul.f32 %v8575_v28, %v10760_v61 }
 0x525   : > { %v5372_v46 = vpop.xlane.xlu0 %5371  ;;  %v4330_v33 = vpack.c.bf16 %v4314_v47, %v4178_v50  ;;  %v4331_v55 = vpack.c.bf16 %v4315_v19, %v4179_v49 }
 0x526   : > { %8221 = vmatmul.mubr.msk.bf16.vlgmr.msra.gmra.mrb[72].mxu1 %vm4332_vm1, %v5448_v40  ;;  %8580 = vrcp.f32 %v5372_v46  ;;  %8225 = vmatpush3.bf16.msra.mxu0 %v4328_v14 }
 0x527   : > { %8231 = vmatpush3.bf16.msra.mxu1 %v4329_v27  ;;  %8236 = vmatprep.subr.bf16.mxu0 %v11416_v44  ;;  %8582 = vrcp.f32 %v10961_v41 }
 0x528   : > { %v8577_v22 = vpop.eup %8576  ;;  %8232 = vmatprep.mubr.msk.bf16.mxu1 %vm8795_vm0, %v11416_v44  ;;  %8242 = vmatprep.subr.bf16.mxu1 %v11416_v44 }
 0x529   : > { %v5432_v57 = vmul.f32 %v8577_v22, %v10780_v2  ;;  %8227 = vmatmul.mubr.msk.bf16.vlgmr.msra.gmra.mrb[48].mxu0 %vm4332_vm1, %v5449_v24 }
 0x52a   : > { %8237 = vmatpush3.bf16.msra.mxu0 %v4330_v33  ;;  %8238 = vmatprep.mubr.msk.bf16.mxu0 %vm8795_vm0, %v11416_v44 }
 0x52b   : > { %v5450_v52 = vpack.c.bf16 %v5432_v57, %v5431_v9 }
 0x52c   : > { %v8579_v23 = vpop.eup %8578 }
 0x52d   : > { %v5435_v2 = vmul.f32 %v8579_v23, %v10784_v60 }
 0x52e   : > { %8233 = vmatmul.mubr.msk.bf16.vlgmr.msra.gmra.mrb[76].mxu1 %vm4332_vm1, %v5450_v52 }
 0x52f   : > { %8243 = vmatpush3.bf16.msra.mxu1 %v4331_v55  ;;  %8244 = vmatprep.mubr.msk.bf16.mxu1 %vm8795_vm0, %v11416_v44 }
 0x530   : > { %v8581_v61 = vpop.eup %8580 }
 0x531   : > { %v5436_v7 = vmul.f32 %v8581_v61, %v10790_v18  ;;  %v8583_v25 = vpop.eup %8582 }
 0x532   : > { %v5433_v16 = vmul.f32 %v8583_v25, %v10776_v0 }
 0x533   : > { %v5452_v37 = vpack.c.bf16 %v5436_v7, %v5435_v2 }
 0x536   : > { %8245 = vmatmul.mubr.msk.bf16.vlgmr.msra.gmra.mrb[80].mxu1 %vm4332_vm1, %v5452_v37 }
 0x542   : > { %v5366_v24 = vpop.xlane.xlu1 %5365 }
 0x543   : > { %8584 = vrcp.f32 %v5366_v24 }
 0x54d   : > { %v8585_v31 = vpop.eup %8584 }
 0x54e   : > { %v5434_v1 = vmul.f32 %v8585_v31, %v10820_v45 }
 0x550   : > { %v5451_v10 = vpack.c.bf16 %v5434_v1, %v5433_v16 }
 0x552   : > { %8239 = vmatmul.mubr.msk.bf16.vlgmr.msra.gmra.mrb[52].mxu0 %vm4332_vm1, %v5451_v10 }
 0x576   : > { %v5490_v44 = vpop.f32.mrb[24].mxu0 }
 0x577   : > { %v8156_v60 = vpop.f32.mrb[25].mxu0 }
 0x578   : > { %v5493_v62 = vpop.f32.mrb[26].mxu0 }
 0x579   : > { %v8157_v18 = vpop.f32.mrb[27].mxu0 }
 0x581   : > { %v5534_v56 = vpop.f32.mrb[52].mxu1 }
 0x582   : > { %v8162_v12 = vpop.f32.mrb[53].mxu1 }
 0x583   : > { %v5537_v53 = vpop.f32.mrb[54].mxu1 }
 0x584   : > { %v8163_v8 = vpop.f32.mrb[55].mxu1 }
 0x59d   : > { %v5578_v41 = vpop.f32.mrb[28].mxu0 }
 0x59e   : > { %v6157_v4 = vcombine.low %v5490_v44, %v5578_v41  ;;  %v6158_v43 = vcombine.high %v5490_v44, %v5578_v41  ;;  %v8168_v13 = vpop.f32.mrb[29].mxu0 }
 0x59f   : > { %v5581_v29 = vpop.f32.mrb[30].mxu0 }
 0x5a0   : > { %v6293_v20 = vcombine.low %v5493_v62, %v5581_v29  ;;  %v6294_v0 = vcombine.high %v5493_v62, %v5581_v29  ;;  %v8169_v5 = vpop.f32.mrb[31].mxu0  ;;  %v6165_v26 = vrot.slane %v6157_v4, %v9250_v3  ;;  %v6172_v39 = vrot.slane %v6158_v43, %v9250_v3 }
 0x5a2   : > { %v6301_v58 = vrot.slane %v6293_v20, %v9250_v3  ;;  %v6308_v6 = vrot.slane %v6294_v0, %v9250_v3 }
 0x5a8   : > { %v5622_v45 = vpop.f32.mrb[56].mxu1 }
 0x5a9   : > { %v6173_v42 = vcombine.low %v5534_v56, %v5622_v45  ;;  %v6174_v38 = vcombine.high %v5534_v56, %v5622_v45  ;;  %v8174_v30 = vpop.f32.mrb[57].mxu1 }
 0x5aa   : > { %v5625_v54 = vpop.f32.mrb[58].mxu1 }
 0x5ab   : > { %v6181_v17 = vrot.slane %v6173_v42, %v9250_v3  ;;  %v6188_v34 = vrot.slane %v6174_v38, %v9250_v3  ;;  %v6309_v15 = vcombine.low %v5537_v53, %v5625_v54  ;;  %v6310_v48 = vcombine.high %v5537_v53, %v5625_v54  ;;  %v8175_v36 = vpop.f32.mrb[59].mxu1 }
 0x5ac   : > { %v5666_v21 = vpop.f32.mrb[32].mxu0 }
 0x5ad   : > { %v6221_v32 = vcombine.low %v6165_v26, %v6181_v17  ;;  %v6222_v63 = vcombine.high %v6165_v26, %v6181_v17  ;;  %v6237_v51 = vcombine.low %v6172_v39, %v6188_v34  ;;  %v6238_v35 = vcombine.high %v6172_v39, %v6188_v34  ;;  %v8180_v59 = vpop.f32.mrb[33].mxu0 }
 0x5ae   : > { %v6317_v40 = vrot.slane %v6309_v15, %v9250_v3  ;;  %v6324_v28 = vrot.slane %v6310_v48, %v9250_v3  ;;  %v11018_v46 = vpop.f32.mrb[34].mxu0 }
 0x5af   : > { %v6229_v14 = vrot.slane %v6221_v32, %v9256_v11  ;;  %v6236_v27 = vrot.slane %v6222_v63, %v9256_v11  ;;  %v6245_v47 = vrot.slane %v6237_v51, %v9256_v11  ;;  %v6252_v50 = vrot.slane %v6238_v35, %v9256_v11  ;;  %v8181_v22 = vpop.f32.mrb[35].mxu0 }
 0x5b0   : > { %v6357_v9 = vcombine.low %v6301_v58, %v6317_v40  ;;  %v6358_v57 = vcombine.high %v6301_v58, %v6317_v40  ;;  %v6373_v33 = vcombine.low %v6308_v6, %v6324_v28  ;;  %v6374_v19 = vcombine.high %v6308_v6, %v6324_v28  ;;  %v11024_v52 = vpop.f32.mrb[60].mxu1 }
 0x5b1   : > { %v7841_v49 = vcombine.low %v6229_v14, %v6236_v27  ;;  %v7843_v55 = vcombine.high %v6229_v14, %v6236_v27  ;;  %v7845_v23 = vcombine.low %v6245_v47, %v6252_v50  ;;  %v7847_v61 = vcombine.high %v6245_v47, %v6252_v50  ;;  %v8186_v2 = vpop.f32.mrb[61].mxu1 }
 0x5b2   : > { %v6365_v7 = vrot.slane %v6357_v9, %v9256_v11  ;;  %v6372_v37 = vrot.slane %v6358_v57, %v9256_v11  ;;  %v6381_v24 = vrot.slane %v6373_v33, %v9256_v11  ;;  %v6388_v25 = vrot.slane %v6374_v19, %v9256_v11  ;;  %v11030_v31 = vpop.f32.mrb[62].mxu1 }
 0x5b3   : > { %v6709_v16 = vrot.slane %v7841_v49, %v9250_v3  ;;  %v6725_v1 = vrot.slane %v7843_v55, %v9250_v3  ;;  %v6741_v10 = vrot.slane %v7845_v23, %v9250_v3  ;;  %v6757_v44 = vrot.slane %v7847_v61, %v9250_v3  ;;  %v8187_v60 = vpop.f32.mrb[63].mxu1 }
 0x5b4   : > { %v7849_v62 = vcombine.low %v6365_v7, %v6372_v37  ;;  %v7851_v18 = vcombine.high %v6365_v7, %v6372_v37  ;;  %v7853_v56 = vcombine.low %v6381_v24, %v6388_v25  ;;  %v7855_v12 = vcombine.high %v6381_v24, %v6388_v25  ;;  %v5754_v53 = vpop.f32.mrb[36].mxu0 }
 0x5b5   : > { %v6189_v8 = vcombine.low %v5666_v21, %v5754_v53  ;;  %v6190_v41 = vcombine.high %v5666_v21, %v5754_v53  ;;  %v8192_v4 = vpop.f32.mrb[37].mxu0  ;;  %v6766_v43 = vcombine.high %v6709_v16, %v6725_v1  ;;  %v6798_v13 = vcombine.high %v6741_v10, %v6757_v44 }
 0x5b6   : > { %v6845_v29 = vrot.slane %v7849_v62, %v9250_v3  ;;  %v6861_v20 = vrot.slane %v7851_v18, %v9250_v3  ;;  %v6877_v0 = vrot.slane %v7853_v56, %v9250_v3  ;;  %v6893_v5 = vrot.slane %v7855_v12, %v9250_v3  ;;  %v5757_v45 = vpop.f32.mrb[38].mxu0 }
 0x5b7   : > { %v6197_v42 = vrot.slane %v6189_v8, %v9250_v3  ;;  %v6325_v38 = vcombine.low %v11018_v46, %v5757_v45  ;;  %v6326_v30 = vcombine.high %v11018_v46, %v5757_v45  ;;  %v8193_v26 = vpop.f32.mrb[39].mxu0  ;;  %v6780_v39 = vrot.slane %v6766_v43, %v9256_v11 }
 0x5b8   : > { %v6812_v54 = vrot.slane %v6798_v13, %v9256_v11  ;;  %v6902_v17 = vcombine.high %v6845_v29, %v6861_v20  ;;  %v6934_v34 = vcombine.high %v6877_v0, %v6893_v5  ;;  %v6204_v15 = vrot.slane %v6190_v41, %v9250_v3 }
 0x5b9   : > { %v6333_v48 = vrot.slane %v6325_v38, %v9250_v3  ;;  %v6765_v36 = vcombine.low %v6709_v16, %v6725_v1  ;;  %v6797_v21 = vcombine.low %v6741_v10, %v6757_v44  ;;  %v6901_v35 = vcombine.low %v6845_v29, %v6861_v20 }
 0x5ba   : > { %v6832_v32 = vcombine.high %v6780_v39, %v6812_v54  ;;  %v6916_v63 = vrot.slane %v6902_v17, %v9256_v11  ;;  %v6948_v51 = vrot.slane %v6934_v34, %v9256_v11  ;;  %v6933_v40 = vcombine.low %v6877_v0, %v6893_v5 }
 0x5bb   : > { %v11050_v58 = vrot.slane %v6765_v36, %v9256_v11  ;;  %v11053_v6 = vrot.slane %v6797_v21, %v9256_v11  ;;  %v6831_v28 = vcombine.low %v6780_v39, %v6812_v54  ;;  %v11060_v22 = vrot.slane %v6901_v35, %v9256_v11 }
 0x5bc   : > { %v5798_v59 = vpop.f32.mrb[64].mxu1  ;;  %v11057_v27 = vpop.f32.mrb[40].mxu0  ;;  %v6968_v50 = vcombine.high %v6916_v63, %v6948_v51  ;;  %v11065_v19 = vrot.slane %v6933_v40, %v9256_v11  ;;  %v6967_v49 = vcombine.low %v6916_v63, %v6948_v51  ;;  %v6340_v56 = vrot.slane %v6326_v30, %v9250_v3 }
 0x5bd   : > { %v6205_v46 = vcombine.low %v11024_v52, %v5798_v59  ;;  %v6206_v14 = vcombine.high %v11024_v52, %v5798_v59  ;;  %v8198_v47 = vpop.f32.mrb[65].mxu1  ;;  %v8204_v9 = vpop.f32.mrb[41].mxu0  ;;  %v6830_v33 = vcombine.high %v11050_v58, %v11053_v6  ;;  %v6829_v55 = vcombine.low %v11050_v58, %v11053_v6 }
 0x5be   : > { %v5801_v57 = vpop.f32.mrb[66].mxu1  ;;  %v11073_v7 = vpop.f32.mrb[42].mxu0  ;;  %v8360_v24 = vpack.i.bf16 %v6968_v50, %v6832_v32  ;;  %v6966_v25 = vcombine.high %v11060_v22, %v11065_v19  ;;  %v8355_v1 = vpack.i.bf16 %v6967_v49, %v6831_v28  ;;  %v6965_v10 = vcombine.low %v11060_v22, %v11065_v19 }
 0x5bf   : > { %v6213_v52 = vrot.slane %v6205_v46, %v9250_v3  ;;  %v6220_v23 = vrot.slane %v6206_v14, %v9250_v3  ;;  %v6341_v61 = vcombine.low %v11030_v31, %v5801_v57  ;;  %v6342_v2 = vcombine.high %v11030_v31, %v5801_v57  ;;  %v8199_v37 = vpop.f32.mrb[67].mxu1  ;;  %v8205_v16 = vpop.f32.mrb[43].mxu0 }
 0x5c0   : > { %8361 = vrot.lane.b32.xlu0 %v8360_v24, %s8791_s7  ;;  %v8350_v53 = vpack.i.bf16 %v6966_v25, %v6830_v33 }
 0x5c1   : > { %v6253_v44 = vcombine.low %v6197_v42, %v6213_v52  ;;  %v6254_v60 = vcombine.high %v6197_v42, %v6213_v52  ;;  %v6269_v62 = vcombine.low %v6204_v15, %v6220_v23  ;;  %v6270_v18 = vcombine.high %v6204_v15, %v6220_v23 }
 0x5c2   : > { %v6349_v31 = vrot.slane %v6341_v61, %v9250_v3  ;;  %v6356_v12 = vrot.slane %v6342_v2, %v9250_v3  ;;  %8351 = vrot.lane.b32.xlu1 %v8350_v53, %s8794_s15 }
 0x5c3   : > { %v6261_v8 = vrot.slane %v6253_v44, %v9256_v11  ;;  %v6268_v41 = vrot.slane %v6254_v60, %v9256_v11  ;;  %v6277_v4 = vrot.slane %v6269_v62, %v9256_v11  ;;  %v6284_v43 = vrot.slane %v6270_v18, %v9256_v11 }
 0x5c4   : > { %v6389_v13 = vcombine.low %v6333_v48, %v6349_v31  ;;  %v6390_v29 = vcombine.high %v6333_v48, %v6349_v31  ;;  %v6405_v20 = vcombine.low %v6340_v56, %v6356_v12  ;;  %v6406_v0 = vcombine.high %v6340_v56, %v6356_v12  ;;  %v11088_v30 = vpop.f32.mrb[44].mxu0 }
 0x5c5   : > { %v7842_v5 = vcombine.low %v6261_v8, %v6268_v41  ;;  %v7844_v45 = vcombine.high %v6261_v8, %v6268_v41  ;;  %v7846_v42 = vcombine.low %v6277_v4, %v6284_v43  ;;  %v7848_v38 = vcombine.high %v6277_v4, %v6284_v43  ;;  %v8216_v34 = vpop.f32.mrb[45].mxu0 }
 0x5c6   : > { %v6397_v26 = vrot.slane %v6389_v13, %v9256_v11  ;;  %v6404_v39 = vrot.slane %v6390_v29, %v9256_v11  ;;  %v6413_v54 = vrot.slane %v6405_v20, %v9256_v11  ;;  %v6420_v17 = vrot.slane %v6406_v0, %v9256_v11  ;;  %v11098_v32 = vpop.f32.mrb[46].mxu0  ;;  %8356 = vrot.lane.b32.xlu1 %v8355_v1, %s8792_s23 }
 0x5c7   : > { %v6716_v15 = vrot.slane %v7842_v5, %v9250_v3  ;;  %v6732_v48 = vrot.slane %v7844_v45, %v9250_v3  ;;  %v6748_v36 = vrot.slane %v7846_v42, %v9250_v3  ;;  %v6764_v21 = vrot.slane %v7848_v38, %v9250_v3  ;;  %v8217_v40 = vpop.f32.mrb[47].mxu0 }
 0x5c8   : > { %v7850_v63 = vcombine.low %v6397_v26, %v6404_v39  ;;  %v7852_v51 = vcombine.high %v6397_v26, %v6404_v39  ;;  %v7854_v35 = vcombine.low %v6413_v54, %v6420_v17  ;;  %v7856_v59 = vcombine.high %v6413_v54, %v6420_v17 }
 0x5c9   : > { %v6429_v28 = vcombine.low %v11057_v27, %v11088_v30  ;;  %v6430_v46 = vcombine.high %v11057_v27, %v11088_v30  ;;  %v6565_v14 = vcombine.low %v11073_v7, %v11098_v32  ;;  %v6566_v47 = vcombine.high %v11073_v7, %v11098_v32 }
 0x5ca   : > { %v6852_v50 = vrot.slane %v7850_v63, %v9250_v3  ;;  %v6868_v9 = vrot.slane %v7852_v51, %v9250_v3  ;;  %v6884_v57 = vrot.slane %v7854_v35, %v9250_v3  ;;  %v6900_v33 = vrot.slane %v7856_v59, %v9250_v3 }
 0x5cb   : > { %v6781_v49 = vcombine.low %v6716_v15, %v6732_v48  ;;  %v6813_v52 = vcombine.low %v6748_v36, %v6764_v21  ;;  %v6782_v2 = vcombine.high %v6716_v15, %v6732_v48  ;;  %v6814_v27 = vcombine.high %v6748_v36, %v6764_v21 }
 0x5cc   : > { %v6917_v23 = vcombine.low %v6852_v50, %v6868_v9  ;;  %v6949_v61 = vcombine.low %v6884_v57, %v6900_v33  ;;  %v6918_v37 = vcombine.high %v6852_v50, %v6868_v9  ;;  %v6950_v24 = vcombine.high %v6884_v57, %v6900_v33 }
 0x5cd   : > { %v6789_v25 = vrot.slane %v6781_v49, %v9256_v11  ;;  %v6821_v7 = vrot.slane %v6813_v52, %v9256_v11  ;;  %v6796_v44 = vrot.slane %v6782_v2, %v9256_v11  ;;  %v6828_v60 = vrot.slane %v6814_v27, %v9256_v11 }
 0x5ce   : > { %v6925_v16 = vrot.slane %v6917_v23, %v9256_v11  ;;  %v6957_v1 = vrot.slane %v6949_v61, %v9256_v11  ;;  %v6932_v62 = vrot.slane %v6918_v37, %v9256_v11  ;;  %v6964_v18 = vrot.slane %v6950_v24, %v9256_v11 }
 0x5cf   : > { %v6833_v56 = vcombine.low %v6789_v25, %v6821_v7  ;;  %v6834_v12 = vcombine.high %v6789_v25, %v6821_v7  ;;  %v6835_v8 = vcombine.low %v6796_v44, %v6828_v60  ;;  %v6836_v4 = vcombine.high %v6796_v44, %v6828_v60 }
 0x5d0   : > { %v6969_v31 = vcombine.low %v6925_v16, %v6957_v1  ;;  %v6970_v53 = vcombine.high %v6925_v16, %v6957_v1  ;;  %v6971_v41 = vcombine.low %v6932_v62, %v6964_v18  ;;  %v6972_v43 = vcombine.high %v6932_v62, %v6964_v18 }
 0x5d1   : > { %v6437_v17 = vrot.slane %v6429_v28, %v9250_v3  ;;  %v6444_v34 = vrot.slane %v6430_v46, %v9250_v3  ;;  %v6573_v57 = vrot.slane %v6565_v14, %v9250_v3  ;;  %v6580_v28 = vrot.slane %v6566_v47, %v9250_v3 }
 0x5d2   : > { %v8365_v13 = vpack.i.bf16 %v6969_v31, %v6833_v56  ;;  %v8370_v29 = vpack.i.bf16 %v6970_v53, %v6834_v12  ;;  %v11121_v20 = vpack.i.bf16 %v6971_v41, %v6835_v8  ;;  %v11123_v0 = vpack.i.bf16 %v6972_v43, %v6836_v4 }
 0x5d4   : > { %8366 = vrot.lane.b32.xlu0 %v8365_v13, %s8790_s9 }
 0x5d8   : > { %8371 = vrot.lane.b32.xlu0 %v8370_v29, %s8789_s21 }
 0x5f0   : > { %v5886_v5 = vpop.f32.mrb[68].mxu1 }
 0x5f1   : > { %v8210_v45 = vpop.f32.mrb[69].mxu1 }
 0x5f2   : > { %v5889_v42 = vpop.f32.mrb[70].mxu1 }
 0x5f3   : > { %v8211_v38 = vpop.f32.mrb[71].mxu1 }
 0x5f9   : > { %v5974_v30 = vpop.f32.mrb[72].mxu1 }
 0x5fa   : > { %v6445_v26 = vcombine.low %v5886_v5, %v5974_v30  ;;  %v6446_v39 = vcombine.high %v5886_v5, %v5974_v30  ;;  %v8222_v54 = vpop.f32.mrb[73].mxu1 }
 0x5fb   : > { %v5977_v15 = vpop.f32.mrb[74].mxu1 }
 0x5fc   : > { %v6453_v48 = vrot.slane %v6445_v26, %v9250_v3  ;;  %v6460_v36 = vrot.slane %v6446_v39, %v9250_v3  ;;  %v6581_v21 = vcombine.low %v5889_v42, %v5977_v15  ;;  %v6582_v32 = vcombine.high %v5889_v42, %v5977_v15  ;;  %v8223_v63 = vpop.f32.mrb[75].mxu1  ;;  %v11131_v51 = vpop.f32.mrb[48].mxu0 }
 0x5fd   : > { %v8228_v9 = vpop.f32.mrb[49].mxu0 }
 0x5fe   : > { %v6493_v35 = vcombine.low %v6437_v17, %v6453_v48  ;;  %v6494_v59 = vcombine.high %v6437_v17, %v6453_v48  ;;  %v6509_v40 = vcombine.low %v6444_v34, %v6460_v36  ;;  %v6510_v50 = vcombine.high %v6444_v34, %v6460_v36  ;;  %v11137_v49 = vpop.f32.mrb[50].mxu0 }
 0x5ff   : > { %v6589_v46 = vrot.slane %v6581_v21, %v9250_v3  ;;  %v6596_v33 = vrot.slane %v6582_v32, %v9250_v3  ;;  %v8229_v27 = vpop.f32.mrb[51].mxu0 }
 0x600   : > { %v6501_v52 = vrot.slane %v6493_v35, %v9256_v11  ;;  %v6508_v23 = vrot.slane %v6494_v59, %v9256_v11  ;;  %v6517_v61 = vrot.slane %v6509_v40, %v9256_v11  ;;  %v6524_v2 = vrot.slane %v6510_v50, %v9256_v11 }
 0x601   : > { %v6629_v37 = vcombine.low %v6573_v57, %v6589_v46  ;;  %v6630_v24 = vcombine.high %v6573_v57, %v6589_v46  ;;  %v6645_v14 = vcombine.low %v6580_v28, %v6596_v33  ;;  %v6646_v25 = vcombine.high %v6580_v28, %v6596_v33  ;;  %v11143_v47 = vpop.f32.mrb[76].mxu1 }
 0x602   : > { %v7857_v7 = vcombine.low %v6501_v52, %v6508_v23  ;;  %v7859_v16 = vcombine.high %v6501_v52, %v6508_v23  ;;  %v7861_v1 = vcombine.low %v6517_v61, %v6524_v2  ;;  %v7863_v44 = vcombine.high %v6517_v61, %v6524_v2  ;;  %v8234_v60 = vpop.f32.mrb[77].mxu1 }
 0x603   : > { %v6637_v62 = vrot.slane %v6629_v37, %v9256_v11  ;;  %v6644_v18 = vrot.slane %v6630_v24, %v9256_v11  ;;  %v6653_v56 = vrot.slane %v6645_v14, %v9256_v11  ;;  %v6660_v31 = vrot.slane %v6646_v25, %v9256_v11  ;;  %v11149_v12 = vpop.f32.mrb[78].mxu1 }
 0x604   : > { %v6981_v53 = vrot.slane %v7857_v7, %v9250_v3  ;;  %v6997_v8 = vrot.slane %v7859_v16, %v9250_v3  ;;  %v7013_v41 = vrot.slane %v7861_v1, %v9250_v3  ;;  %v7029_v4 = vrot.slane %v7863_v44, %v9250_v3  ;;  %v8235_v43 = vpop.f32.mrb[79].mxu1 }
 0x605   : > { %v7865_v13 = vcombine.low %v6637_v62, %v6644_v18  ;;  %v7867_v29 = vcombine.high %v6637_v62, %v6644_v18  ;;  %v7869_v5 = vcombine.low %v6653_v56, %v6660_v31  ;;  %v7871_v45 = vcombine.high %v6653_v56, %v6660_v31  ;;  %v8450_v18 = vld [vmem:[#allocation8 + $0xc0] sm:$0xff]   ;;  %v8451_v56 = vld [vmem:[#allocation8 + $0xc8] sm:$0xff]   ;;  %v8452_v31 = vld [vmem:[#allocation8 + $0xd0] sm:$0xff]  }
 0x606   : > { %v7038_v42 = vcombine.high %v6981_v53, %v6997_v8  ;;  %v7070_v38 = vcombine.high %v7013_v41, %v7029_v4  ;;  %v7037_v30 = vcombine.low %v6981_v53, %v6997_v8  ;;  %v7069_v26 = vcombine.low %v7013_v41, %v7029_v4  ;;  %8248 = vmatprep.subr.bf16.mxu0 %v8450_v18 }
 0x607   : > { %v7117_v39 = vrot.slane %v7865_v13, %v9250_v3  ;;  %v7133_v54 = vrot.slane %v7867_v29, %v9250_v3  ;;  %v7149_v17 = vrot.slane %v7869_v5, %v9250_v3  ;;  %v7165_v34 = vrot.slane %v7871_v45, %v9250_v3  ;;  %8249 = vmatpush3.bf16.msra.mxu0 %v8450_v18 }
 0x608   : > { %v7052_v15 = vrot.slane %v7038_v42, %v9256_v11  ;;  %v7084_v48 = vrot.slane %v7070_v38, %v9256_v11  ;;  %v11162_v36 = vrot.slane %v7037_v30, %v9256_v11  ;;  %v11165_v21 = vrot.slane %v7069_v26, %v9256_v11  ;;  %8250 = vmatprep.subr.bf16.mxu0 %v8451_v56 }
 0x609   : > { %v6150_v32 = vpop.f32.mrb[80].mxu1  ;;  %v7174_v63 = vcombine.high %v7117_v39, %v7133_v54  ;;  %v7206_v35 = vcombine.high %v7149_v17, %v7165_v34  ;;  %v7173_v59 = vcombine.low %v7117_v39, %v7133_v54  ;;  %v7205_v40 = vcombine.low %v7149_v17, %v7165_v34 }
 0x60a   : > { %v6477_v50 = vcombine.low %v11143_v47, %v6150_v32  ;;  %v6478_v9 = vcombine.high %v11143_v47, %v6150_v32  ;;  %v8246_v57 = vpop.f32.mrb[81].mxu1  ;;  %v7103_v28 = vcombine.low %v7052_v15, %v7084_v48  ;;  %v7102_v46 = vcombine.high %v11162_v36, %v11165_v21 }
 0x60b   : > { %v6153_v33 = vpop.f32.mrb[82].mxu1  ;;  %v7188_v52 = vrot.slane %v7174_v63, %v9256_v11  ;;  %v7220_v23 = vrot.slane %v7206_v35, %v9256_v11  ;;  %v11174_v61 = vrot.slane %v7173_v59, %v9256_v11  ;;  %v11177_v2 = vrot.slane %v7205_v40, %v9256_v11  ;;  %8251 = vmatpush3.bf16.msra.mxu0 %v8451_v56 }
 0x60c   : > { %v6613_v27 = vcombine.low %v11149_v12, %v6153_v33  ;;  %v6614_v37 = vcombine.high %v11149_v12, %v6153_v33  ;;  %v8247_v24 = vpop.f32.mrb[83].mxu1  ;;  %v7104_v47 = vcombine.high %v7052_v15, %v7084_v48  ;;  %v7101_v16 = vcombine.low %v11162_v36, %v11165_v21  ;;  %8252 = vmatprep.subr.bf16.mxu0 %v8452_v31  ;;  %v8453_v12 = vld [vmem:[#allocation8 + $0xd8] sm:$0xff]  }
 0x60d   : > { %v7239_v14 = vcombine.low %v7188_v52, %v7220_v23  ;;  %v7238_v25 = vcombine.high %v11174_v61, %v11177_v2  ;;  %v7240_v7 = vcombine.high %v7188_v52, %v7220_v23  ;;  %v7237_v1 = vcombine.low %v11174_v61, %v11177_v2 }
 0x60e   : > { %v6485_v43 = vrot.slane %v6477_v50, %v9250_v3  ;;  %v6628_v54 = vrot.slane %v6614_v37, %v9250_v3 }
 0x60f   : > { %v8385_v44 = vpack.i.bf16 %v7239_v14, %v7103_v28  ;;  %v8375_v60 = vpack.i.bf16 %v7238_v25, %v7102_v46  ;;  %v8390_v62 = vpack.i.bf16 %v7240_v7, %v7104_v47  ;;  %8253 = vmatpush3.bf16.msra.mxu0 %v8452_v31  ;;  %v8454_v31 = vld [vmem:[#allocation8 + $0xe0] sm:$0xff]  }
 0x610   : > { %8254 = vmatprep.subr.bf16.mxu0 %v8453_v12 }
 0x611   : > { %8386 = vrot.lane.b32.xlu1 %v8385_v44, %s8792_s23  ;;  %8376 = vrot.lane.b32.xlu0 %v8375_v60, %s8794_s15 }
 0x613   : > { %8255 = vmatpush3.bf16.msra.mxu0 %v8453_v12 }
 0x614   : > { %8256 = vmatprep.subr.bf16.mxu0 %v8454_v31 }
 0x615   : > { %8391 = vrot.lane.b32.xlu1 %v8390_v62, %s8791_s7  ;;  %8381 = vrot.lane.b32.xlu0 %v11121_v20, %s8787_s18  ;;  %v6492_v20 = vrot.slane %v6478_v9, %v9250_v3 }
 0x617   : > { %8257 = vmatpush3.bf16.msra.mxu0 %v8454_v31 }
 0x619   : > { %8411 = vrot.lane.b32.xlu0 %v11123_v0, %s8788_s20 }
 0x625   : > { %v6106_v53 = vpop.f32.mrb[52].mxu0 }
 0x626   : > { %v6461_v8 = vcombine.low %v11131_v51, %v6106_v53  ;;  %v6462_v41 = vcombine.high %v11131_v51, %v6106_v53  ;;  %v8240_v4 = vpop.f32.mrb[53].mxu0  ;;  %v6621_v51 = vrot.slane %v6613_v27, %v9250_v3 }
 0x627   : > { %v6109_v13 = vpop.f32.mrb[54].mxu0 }
 0x628   : > { %v6469_v29 = vrot.slane %v6461_v8, %v9250_v3  ;;  %v6476_v0 = vrot.slane %v6462_v41, %v9250_v3  ;;  %v6597_v5 = vcombine.low %v11137_v49, %v6109_v13  ;;  %v6598_v45 = vcombine.high %v11137_v49, %v6109_v13  ;;  %v8241_v42 = vpop.f32.mrb[55].mxu0 }
 0x629   : > { %v8455_v42 = vld [vmem:[#allocation8 + $0xe8] sm:$0xff]  }
 0x62a   : > { %v6525_v38 = vcombine.low %v6469_v29, %v6485_v43  ;;  %v6526_v30 = vcombine.high %v6469_v29, %v6485_v43  ;;  %v6541_v26 = vcombine.low %v6476_v0, %v6492_v20  ;;  %v6542_v39 = vcombine.high %v6476_v0, %v6492_v20  ;;  %8258 = vmatprep.subr.bf16.mxu0 %v8455_v42 }
 0x62b   : > { %v6605_v17 = vrot.slane %v6597_v5, %v9250_v3  ;;  %v6612_v34 = vrot.slane %v6598_v45, %v9250_v3  ;;  %8259 = vmatpush3.bf16.msra.mxu0 %v8455_v42 }
 0x62c   : > { %v6533_v15 = vrot.slane %v6525_v38, %v9256_v11  ;;  %v6540_v48 = vrot.slane %v6526_v30, %v9256_v11  ;;  %v6549_v32 = vrot.slane %v6541_v26, %v9256_v11  ;;  %v6556_v49 = vrot.slane %v6542_v39, %v9256_v11 }
 0x62d   : > { %v6661_v63 = vcombine.low %v6605_v17, %v6621_v51  ;;  %v6662_v35 = vcombine.high %v6605_v17, %v6621_v51  ;;  %v6677_v59 = vcombine.low %v6612_v34, %v6628_v54  ;;  %v6678_v40 = vcombine.high %v6612_v34, %v6628_v54 }
 0x62e   : > { %v7858_v50 = vcombine.low %v6533_v15, %v6540_v48  ;;  %v7860_v9 = vcombine.high %v6533_v15, %v6540_v48  ;;  %v7862_v57 = vcombine.low %v6549_v32, %v6556_v49  ;;  %v7864_v28 = vcombine.high %v6549_v32, %v6556_v49  ;;  %v8456_v48 = vld [vmem:[#allocation8 + $0xf0] sm:$0xff]  }
 0x62f   : > { %v6669_v46 = vrot.slane %v6661_v63, %v9256_v11  ;;  %v6676_v33 = vrot.slane %v6662_v35, %v9256_v11  ;;  %v6685_v52 = vrot.slane %v6677_v59, %v9256_v11  ;;  %v6692_v23 = vrot.slane %v6678_v40, %v9256_v11  ;;  %8260 = vmatprep.subr.bf16.mxu0 %v8456_v48 }
 0x630   : > { %v6988_v27 = vrot.slane %v7858_v50, %v9250_v3  ;;  %v7004_v37 = vrot.slane %v7860_v9, %v9250_v3  ;;  %v7020_v24 = vrot.slane %v7862_v57, %v9250_v3  ;;  %v7036_v14 = vrot.slane %v7864_v28, %v9250_v3  ;;  %8261 = vmatpush3.bf16.msra.mxu0 %v8456_v48  ;;  %v8457_v50 = vld [vmem:[#allocation8 + $0xf8] sm:$0xff]  }
 0x631   : > { %v7866_v25 = vcombine.low %v6669_v46, %v6676_v33  ;;  %v7868_v47 = vcombine.high %v6669_v46, %v6676_v33  ;;  %v7870_v7 = vcombine.low %v6685_v52, %v6692_v23  ;;  %v7872_v44 = vcombine.high %v6685_v52, %v6692_v23  ;;  %8262 = vmatprep.subr.bf16.mxu0 %v8457_v50 }
 0x632   : > { %v7053_v60 = vcombine.low %v6988_v27, %v7004_v37  ;;  %v7085_v62 = vcombine.low %v7020_v24, %v7036_v14  ;;  %v7054_v18 = vcombine.high %v6988_v27, %v7004_v37  ;;  %v7086_v56 = vcombine.high %v7020_v24, %v7036_v14 }
 0x633   : > { %v7124_v12 = vrot.slane %v7866_v25, %v9250_v3  ;;  %v7140_v53 = vrot.slane %v7868_v47, %v9250_v3  ;;  %v7156_v8 = vrot.slane %v7870_v7, %v9250_v3  ;;  %v7172_v41 = vrot.slane %v7872_v44, %v9250_v3 }
 0x634   : > { %v7061_v4 = vrot.slane %v7053_v60, %v9256_v11  ;;  %v7093_v43 = vrot.slane %v7085_v62, %v9256_v11  ;;  %v7068_v29 = vrot.slane %v7054_v18, %v9256_v11  ;;  %v7100_v0 = vrot.slane %v7086_v56, %v9256_v11  ;;  %8263 = vmatpush3.bf16.msra.mxu0 %v8457_v50  ;;  %v8352_v57 = vpop.permute.xlu1 %8351 }
 0x635   : > { %v7189_v20 = vcombine.low %v7124_v12, %v7140_v53  ;;  %v7221_v13 = vcombine.low %v7156_v8, %v7172_v41  ;;  %v7190_v26 = vcombine.high %v7124_v12, %v7140_v53  ;;  %v7222_v39 = vcombine.high %v7156_v8, %v7172_v41 }
 0x636   : > { %v7105_v5 = vcombine.low %v7061_v4, %v7093_v43  ;;  %v7106_v45 = vcombine.high %v7061_v4, %v7093_v43  ;;  %v7107_v3 = vcombine.low %v7068_v29, %v7100_v0  ;;  %v7108_v51 = vcombine.high %v7068_v29, %v7100_v0 }
 0x637   : > { %v7197_v38 = vrot.slane %v7189_v20, %v9256_v11  ;;  %v7229_v30 = vrot.slane %v7221_v13, %v9256_v11  ;;  %v7204_v34 = vrot.slane %v7190_v26, %v9256_v11  ;;  %v7236_v15 = vrot.slane %v7222_v39, %v9256_v11  ;;  %v8362_v11 = vpop.permute.xlu0 %8361 }
 0x638   : > { %v8357_v46 = vpop.permute.xlu1 %8356  ;;  %v8354_v33 = vunpack.i.h.bf16 %v8352_v57  ;;  %v8353_v52 = vunpack.i.l.bf16 %v8352_v57  ;;  %v8364_v62 = vunpack.i.h.bf16 %v8362_v11  ;;  %v8363_v18 = vunpack.i.l.bf16 %v8362_v11 }
 0x639   : > { %v7241_v54 = vcombine.low %v7197_v38, %v7229_v30  ;;  %v7242_v17 = vcombine.high %v7197_v38, %v7229_v30  ;;  %v7243_v63 = vcombine.low %v7204_v34, %v7236_v15  ;;  %v7244_v35 = vcombine.high %v7204_v34, %v7236_v15 }
 0x63a   : > { %v8359_v23 = vunpack.i.h.bf16 %v8357_v46  ;;  %v8358_v27 = vunpack.i.l.bf16 %v8357_v46  ;;  %v7357_v24 = vsel %vm4332_vm1, %v6829_v55, %v8353_v52  ;;  %v7358_v14 = vsel %vm4332_vm1, %v6965_v10, %v8354_v33 }
 0x63b   : > { %v8395_v32 = vpack.i.bf16 %v7241_v54, %v7105_v5  ;;  %v8400_v49 = vpack.i.bf16 %v7242_v17, %v7106_v45  ;;  %v8405_v59 = vpack.i.bf16 %v7243_v63, %v7107_v3  ;;  %v8415_v40 = vpack.i.bf16 %v7244_v35, %v7108_v51 }
 0x63c   : > { %v7362_v25 = vsel %vm7361_vm2, %v7357_v24, %v8358_v27  ;;  %v7363_v47 = vsel %vm7361_vm2, %v7358_v14, %v8359_v23  ;;  %v7874_v27 = vld [vmem:[%s11332_s4 + $0x3] ss:$0 sm:$0xff] }
 0x63d   : > { %8396 = vrot.lane.b32.xlu1 %v8395_v32, %s8790_s9  ;;  %v7367_v22 = vsel %vm7366_vm3, %v7362_v25, %v8363_v18  ;;  %v7368_v19 = vsel %vm7366_vm3, %v7363_v47, %v8364_v62 }
 0x641   : > { %8401 = vrot.lane.b32.xlu1 %v8400_v49, %s8789_s21 }
 0x645   : > { %8406 = vrot.lane.b32.xlu1 %v8405_v59, %s8787_s18  ;;  %s8798_s18 = smov [#allocation10]  }
 0x646   : > { %v8367_v9 = vpop.permute.xlu0 %8366 }
 0x647   : > { %v8369_v7 = vunpack.i.h.bf16 %v8367_v9  ;;  %v8368_v44 = vunpack.i.l.bf16 %v8367_v9 }
 0x649   : > { %8416 = vrot.lane.b32.xlu1 %v8415_v40, %s8788_s20  ;;  %v7372_v10 = vsel %vm7371_vm4, %v7367_v22, %v8368_v44  ;;  %v7373_v31 = vsel %vm7371_vm4, %v7368_v19, %v8369_v7  ;;  %s8709_s20 = sshll.u32 %s8798_s18, 4  ;;  %s8710_s20 = int_to_ptr.vmem [resolvable:$false] %s8709_s20 }
 0x64a   : > { %v8372_v28 = vpop.permute.xlu0 %8371  ;;  %s8711_s21 = scalar_lea.vmem %s8710_s20, 1024  ;;  %p8712_p3 = scmp.lt.s32.totalorder %s11279_s0, %s8710_s20 }
 0x64b   : > { %v8374_v56 = vunpack.i.h.bf16 %v8372_v28  ;;  %v8373_v58 = vunpack.i.l.bf16 %v8372_v28  ;;  %p8713_p9 = scmp.lt.s32.totalorder %s8711_s21, %s8705_s25 }
 0x64d   : > { %v7377_v53 = vsel %vm7376_vm5, %v7372_v10, %v8373_v58  ;;  %v7378_v8 = vsel %vm7376_vm5, %v7373_v31, %v8374_v56  ;;  %p8714_p6 = por %p8713_p9, %p8712_p3 }
 0x64f   : > { %p8715_p4 = pnand %p8714_p6, %p8708_p13 }
 0x683   : > { %v8377_v37 = vpop.permute.xlu0 %8376  ;;  %v8387_v5 = vpop.permute.xlu1 %8386 }
 0x684   : > { %v8379_v38 = vunpack.i.h.bf16 %v8377_v37  ;;  %v8378_v30 = vunpack.i.l.bf16 %v8377_v37  ;;  %v8389_v26 = vunpack.i.h.bf16 %v8387_v5  ;;  %v8388_v39 = vunpack.i.l.bf16 %v8387_v5 }
 0x686   : > { %v7360_v51 = vsel %vm4332_vm1, %v7237_v1, %v8379_v38  ;;  %v7359_v54 = vsel %vm4332_vm1, %v7101_v16, %v8378_v30 }
 0x687   : > { %v8382_v60 = vpop.permute.xlu0 %8381  ;;  %v8392_v45 = vpop.permute.xlu1 %8391  ;;  %v7364_v35 = vsel %vm7361_vm2, %v7359_v54, %v8388_v39  ;;  %v7365_v59 = vsel %vm7361_vm2, %v7360_v51, %v8389_v26 }
 0x688   : > { %v8384_v6 = vunpack.i.h.bf16 %v8382_v60  ;;  %v8383_v55 = vunpack.i.l.bf16 %v8382_v60  ;;  %v8394_v17 = vunpack.i.h.bf16 %v8392_v45  ;;  %v8393_v34 = vunpack.i.l.bf16 %v8392_v45 }
 0x68a   : > { %v7382_v43 = vsel %vm7381_vm6, %v7377_v53, %v8383_v55  ;;  %v7383_v20 = vsel %vm7381_vm6, %v7378_v8, %v8384_v6  ;;  %v7369_v2 = vsel %vm7366_vm3, %v7364_v35, %v8393_v34  ;;  %v7370_v36 = vsel %vm7366_vm3, %v7365_v59, %v8394_v17 }
 0x68b   : > { %v8412_v12 = vpop.permute.xlu0 %8411 }
 0x68c   : > { %v8414_v41 = vunpack.i.h.bf16 %v8412_v12  ;;  %v8413_v4 = vunpack.i.l.bf16 %v8412_v12 }
 0x68e   : > { %v7387_v13 = vsel %vm7386_vm7, %v7382_v43, %v8413_v4  ;;  %v7388_v29 = vsel %vm7386_vm7, %v7383_v20, %v8414_v41 }
 0x68f   : > { %v7391_v0 = vpack.c.bf16 %v7388_v29, %v7387_v13 }
 0x691   : > { %8264 = vmatprep.mubr.bf16.mxu0 %v7391_v0 }
 0x6af   : > { %v8397_v42 = vpop.permute.xlu1 %8396 }
 0x6b0   : > { %v8399_v15 = vunpack.i.h.bf16 %v8397_v42  ;;  %v8398_v48 = vunpack.i.l.bf16 %v8397_v42 }
 0x6b2   : > { %v7374_v21 = vsel %vm7371_vm4, %v7369_v2, %v8398_v48  ;;  %v7375_v16 = vsel %vm7371_vm4, %v7370_v36, %v8399_v15 }
 0x6b3   : > { %v8402_v3 = vpop.permute.xlu1 %8401 }
 0x6b4   : > { %v8404_v49 = vunpack.i.h.bf16 %v8402_v3  ;;  %v8403_v63 = vunpack.i.l.bf16 %v8402_v3 }
 0x6b6   : > { %v7379_v50 = vsel %vm7376_vm5, %v7374_v21, %v8403_v63  ;;  %v7380_v11 = vsel %vm7376_vm5, %v7375_v16, %v8404_v49 }
 0x6b7   : > { %v8407_v32 = vpop.permute.xlu1 %8406 }
 0x6b8   : > { %v8409_v40 = vunpack.i.h.bf16 %v8407_v32  ;;  %v8408_v61 = vunpack.i.l.bf16 %v8407_v32 }
 0x6ba   : > { %v7384_v28 = vsel %vm7381_vm6, %v7379_v50, %v8408_v61  ;;  %v7385_v46 = vsel %vm7381_vm6, %v7380_v11, %v8409_v40 }
 0x6bb   : > { %v8417_v1 = vpop.permute.xlu1 %8416 }
 0x6bc   : > { %v8419_v9 = vunpack.i.h.bf16 %v8417_v1  ;;  %v8418_v57 = vunpack.i.l.bf16 %v8417_v1 }
 0x6be   : > { %v7389_v33 = vsel %vm7386_vm7, %v7384_v28, %v8418_v57  ;;  %v7390_v52 = vsel %vm7386_vm7, %v7385_v46, %v8419_v9 }
 0x6bf   : > { %v7392_v23 = vpack.c.bf16 %v7390_v52, %v7389_v33 }
 0x6c1   : > { %8265 = vmatmul.mubr.bf16.vlgmr.msra.gmra.mrb[56].mxu0 %v7392_v23 }
 0x794   : > { %v8266_v37 = vpop.f32.mrb[56].mxu0 }
 0x795   : > { %v7509_v24 = vadd.f32 %v8266_v37, %v7874_v27  ;;  %v7500_v14 = vpop.f32.mrb[57].mxu0 }
 0x796   : > { %v7501_v25 = vadd.f32 %v7874_v27, %v7500_v14  ;;  %v8267_v47 = vpop.f32.mrb[58].mxu0 }
 0x797   : > { %7517 = vst [vmem:[%s334_s28 + $0x10] sm:$0xff] %v7509_v24  ;;  %v7512_v7 = vadd.f32 %v8267_v47, %v7874_v27  ;;  %v7503_v44 = vpop.f32.mrb[59].mxu0 }
 0x798   : > { %7515 = vst [vmem:[%s334_s28] sm:$0xff] %v7501_v25  ;;  %v7504_v60 = vadd.f32 %v7874_v27, %v7503_v44 }
 0x799   : > { %7518 = vst [vmem:[%s334_s28 + $0x18] sm:$0xff] %v7512_v7 }
 0x79a   : > { %7516 = vst [vmem:[%s334_s28 + $0x8] sm:$0xff] %v7504_v60 }
 0x79b   : > { %8718 = shalt.err (!%p8715_p4)
}
 0x79c   : > { %s8719_s9 = scalar_lea.hbm %s11284_s16, 512  ;;  %s8723_s7 = scalar_lea.hbm %s11333_s5, 1024 }
 0x79d   : > { %p8720_p7 = scmp.ne.s32.totalorder %s11284_s16, %s8719_s9  ;;  %p8724_p11 = scmp.lt.u32.totalorder %s11284_s16, %s11333_s5 }
 0x79e   : > { %p8725_p0 = scmp.lt.u32.totalorder %s8723_s7, %s8719_s9  ;;  %p8727_p2 = scmp.lt.u32.totalorder %s8719_s9, %s11284_s16 }
 0x79f   : > { %p8721_p5 = pnand %p8720_p7, %p11448_p12 }
 0x7a0   : > { %p8726_p1 = por %p8725_p0, %p8724_p11 }
 0x7a1   : > { %p8722_p8 = pneg %p8721_p5 }
 0x7a2   : > { %p8728_p10 = por %p8727_p2, %p8726_p1 }
 0x7a4   : > { %p8729_p13 = pnand %p8728_p10, %p8722_p8 }
 0x7a6   : > { %8732 = shalt.err (!%p8729_p13)
}
 0x7a7   : > { %s8799_s30 = smov 128   ;;  %s8800_s27 = smov 8  }
 0x7a8   : > { %8278 = dma.vmem_to_hbm [thread:$0]  (%p11448_p12), %s11279_s0, 512, %s11284_s16, %s7520_s14, %s8799_s30, %s8799_s30, %s8800_s27  }
 0x7a9 PF: > { %s11449_s24 = sld [smem:[#allocation15_spill]]  ;;  %s11450_s26 = sld [smem:[#allocation20_spill]] }
 0x7aa   : > { %s11451_s6 = sld [smem:[#allocation17_spill]] }
 0x7af   : > { %s7548_s22 = sand.u32 1, %s11449_s24   ;;  %p11452_p3 = scmp.ne.s32.totalorder %s11450_s26, 0 }
 0x7b0   : > { %p11453_p9 = scmp.ge.s32.totalorder %s11451_s6, 2  ;;  %s7549_s29 = scalar_lea.sflag [#allocation4], %s7548_s22 }
 0x7b2   : > { %p8295_p6 = pnand %p11453_p9, %p11452_p3 }
 0x7b4   : > { %8762 = dma.done.wait (!%p8295_p6), %s7549_s29, 512  }
 0x7b5   : > { %8764 = vsyncadd (!%p8295_p6), %s7549_s29, 4294966784  ;;  %s11454_s21 = sld [smem:[#allocation18_spill]]  ;;  %s11455_s28 = sld [smem:[#allocation16_spill]] }
 0x7b6   : > { %s11456_s20 = sld [smem:[#allocation19_spill]]  ;;  %s11457_s18 = smov %s8771_s19 }
 0x7bb   : > { %p22_p4 = scmp.ge.s32.totalorder %s11454_s21, 4   ;;  %s11458_s19 = smov %s11455_s28 }
 0x7bd   :  { %24 = sbr.rel (!%p22_p4) target bundleno = 11 (0xb), region = 119 }
 0x7c4   :  { %7554 = vsyncpa [#allocation3], 1 }
 0x7c5   :  { %7556 = vsyncpa [#allocation3 + $0x1], 1 }
 0x7c6   :  { %7557 = vsyncpa [#allocation6], 1 }
 0x7c7   :  { %7559 = vsyncpa [#allocation6 + $0x1], 1 }
 0x7c8   :  { %7560 = vsyncpa [#allocation9], 1 }
 0x7c9   :  { %7561 = vsyncpa [#allocation4], 1 }
 0x7ca   :  { %7563 = vsyncpa [#allocation4 + $0x1], 1 }

// kernel: tpu_custom_call.1
= control target key start
LH: loop header
LB: loop body
LE: loop exit
PB: predicated region body
PF: predicated region fallthrough
CT: control target
= control target key end

     0   :  { %s5174_s0 = inlined_call_operand.hbm [shape: bf16[64,128], index: 0, kind: input, shape index: {}]   ;;  %s5175_s1 = inlined_call_operand.hbm [shape: bf16[64,128], index: 1, kind: input, shape index: {}]   ;;  %s5176_s2 = inlined_call_operand.hbm [shape: bf16[64,128], index: 2, kind: input, shape index: {}]   ;;  %s5177_s3 = inlined_call_operand.hbm [shape: bf16[4,128,128], index: 3, kind: input, shape index: {}]   ;;  %s5178_s4 = inlined_call_operand.vmem [shape: f32[4,1,128], index: 4, kind: input, shape index: {}]   ;;  %s5179_s5 = inlined_call_operand.hbm [shape: f32[64,128], index: 5, kind: output, shape index: {}]  }
   0x1   :  { %5199 = sst [smem:[#allocation21_spill]] %s5174_s0 }
   0x2   :  { %5200 = sst [smem:[#allocation22_spill]] %s5175_s1 }
   0x3   :  { %10 = vsyncpa [#allocation3], 0 }
   0x4   :  { %12 = vsyncpa [#allocation3 + $0x1], 0 }
   0x5   :  { %13 = vsyncpa [#allocation6], 0 }
   0x6   :  { %15 = vsyncpa [#allocation6 + $0x1], 0 }
   0x7   :  { %16 = vsyncpa [#allocation9], 0 }
   0x8   :  { %17 = vsyncpa [#allocation4], 0 }
   0x9   :  { %19 = vsyncpa [#allocation4 + $0x1], 0  ;;  %s4144_s18 = smov 0   ;;  %s4146_s19 = smov 0  }
   0xa   :  { %s4148_s20 = smov 0   ;;  %s4150_s21 = smov 0  }
   0xb LB: > { %5201 = sst [smem:[#allocation15_spill]] %s4082_s18  ;;  %s4165_s22 = sadd.s32 1, %s4094_s21   ;;  %s4094_s21 = sphi %s4150_s21, %s5234_s21   ;;  %s4090_s20 = sphi %s4148_s20, %s5236_s20   ;;  %s4086_s19 = sphi %s4146_s19, %s5238_s19   ;;  %s4082_s18 = sphi %s4144_s18, %s5237_s18  }
   0xc   : > { %5202 = sst [smem:[#allocation16_spill]] %s4090_s20  ;;  %s32_s23 = sadd.s32 1, %s4090_s20 }
   0xd   : > { %5203 = sst [smem:[#allocation17_spill]] %s4094_s21  ;;  %s29_s24 = ssub.s32 %s4094_s21, %s4165_s22 }
   0xe   : > { %5204 = sst [smem:[#allocation18_spill]] %s4165_s22  ;;  %p5180_p0 = scmp.ne.s32.totalorder %s4090_s20, %s4086_s19 }
   0xf   : > { %p30_p1 = scmp.eq.s32.totalorder %s29_s24, 0  ;;  %p40_p2 = scmp.eq.s32.totalorder %s4094_s21, 0 }
  0x10   : > { %p3617_p5 = scmp.lt.s32.totalorder %s4094_s21, 2  ;;  %s205_s26 = sand.u32 1, %s4090_s20  }
  0x11   : > { %s4174_s25 = scalar_select %p30_p1, %s4090_s20, %s32_s23  }
  0x12   : > { %p41_p3 = por %p40_p2, %p5180_p0  ;;  %s4184_s27 = sshll.u32 %s205_s26, 4 }
  0x13   : > { %5205 = sst [smem:[#allocation19_spill]] %s4174_s25  ;;  %s4187_s28 = sshll.u32 %s4094_s21, 8 }
  0x14   : > { %p4189_p6 = pnand %p3617_p5, %p41_p3  ;;  %s226_s30 = sand.u32 1, %s4094_s21  }
  0x15   : > { %s5207_s1 = sld [smem:[#allocation22_spill]]  ;;  %s230_s9 = scalar_lea.vmem [#allocation5], %s4184_s27 }
  0x16   : > { %s5206_s29 = scalar_select %p4189_p6, 1, 0 }
  0x17   : > { %s237_s10 = sshll.u32 %s230_s9, 4  ;;  %s4203_s11 = scalar_lea.sflag [#allocation6], %s226_s30  ;;  %s4201_s10 = int_to_ptr.vmem [resolvable:$true] %s237_s10 }
  0x18   : > { %p4209_p8 = pneg %p4189_p6 }
  0x1a   : > { %s5208_s13 = scalar_select %p4209_p8, 1, 0 }
  0x1b   : > { %s4198_s8 = scalar_lea.hbm %s5207_s1, %s4187_s28  ;;  %s3907_s16 = scalar_lea.hbm %s5207_s1, 512 }
  0x1c   : > { %s3902_s12 = scalar_lea.hbm %s4198_s8, 256  ;;  %p3908_p11 = scmp.lt.u32.totalorder %s4198_s8, %s5207_s1 }
  0x1d   : > { %p3903_p7 = scmp.ne.s32.totalorder %s4198_s8, %s3902_s12  ;;  %p3909_p12 = scmp.lt.u32.totalorder %s3907_s16, %s3902_s12 }
  0x1e   : > { %p3911_p1 = scmp.lt.u32.totalorder %s3902_s12, %s4198_s8 }
  0x1f   : > { %p3905_p9 = pnand %p4209_p8, %p3903_p7  ;;  %p3910_p13 = por %p3909_p12, %p3908_p11 }
  0x21   : > { %p3906_p10 = pneg %p3905_p9  ;;  %p3912_p2 = por %p3911_p1, %p3910_p13 }
  0x23   : > { %p3913_p3 = pnand %p3912_p2, %p3906_p10 }
  0x25   : > { %3916 = shalt.err (!%p3913_p3)
}
  0x26   : > { %s3917_s24 = scalar_lea.vmem %s4201_s10, 256  ;;  %s4096_s30 = smov [#allocation5]  }
  0x27   : > { %p3918_p5 = scmp.ne.s32.totalorder %s4201_s10, %s3917_s24  ;;  %s3922_s6 = sshll.u32 %s4096_s30, 4  ;;  %s3923_s6 = int_to_ptr.vmem [resolvable:$false] %s3922_s6 }
  0x28   : > { %s3924_s7 = scalar_lea.vmem %s3923_s6, 512  ;;  %p3925_p4 = scmp.lt.s32.totalorder %s4201_s10, %s3923_s6 }
  0x29   : > { %p3920_p7 = pnand %p3918_p5, %p4209_p8  ;;  %p3926_p0 = scmp.lt.s32.totalorder %s3924_s7, %s3917_s24 }
  0x2b   : > { %p3921_p9 = pneg %p3920_p7  ;;  %p3927_p11 = por %p3926_p0, %p3925_p4 }
  0x2d   : > { %p3928_p12 = pnand %p3927_p11, %p3921_p9 }
  0x2f   : > { %3931 = shalt.err (!%p3928_p12)
}
  0x30   : > { %s5181_s9 = smov 64   ;;  %s5183_s12 = smov 4  }
  0x31   : > { %3608 = dma.hbm_to_vmem [thread:$0]  (!%p4189_p6), %s4198_s8, 256, %s4201_s10, %s4203_s11, %s5181_s9, %s5181_s9, %s5183_s12  }
  0x32   : > { %s4237_s14 = sadd.s32 4294967295, %s4094_s21   ;;  %s3105_s15 = sadd.s32 4294967294, %s4094_s21  }
  0x33   : > { %p45_p0 = scmp.ne.s32.totalorder %s4086_s19, %s4082_s18  ;;  %p5187_p4 = scmp.eq.s32.totalorder %s4237_s14, 0 }
  0x34   : > { %p163_p10 = scmp.eq.s32.totalorder %s4237_s14, 1  ;;  %p169_p13 = scmp.eq.s32.totalorder %s3105_s15, 1 }
  0x35   : > { %p4246_p1 = por %p5187_p4, %p45_p0  ;;  %p3106_p2 = scmp.ge.s32.totalorder %s4094_s21, 1 }
  0x36   : > { %p5210_p3 = scmp.ne.s32.totalorder %s4090_s20, %s4086_s19  ;;  %p4258_p7 = por %p169_p13, %p45_p0 }
  0x37   : > { %s5209_s16 = scalar_select %p4246_p1, 1, 0 }
  0x38   : > { %p4254_p5 = por %p163_p10, %p5210_p3  ;;  %p176_p9 = scmp.lt.s32.totalorder %s4094_s21, 3 }
  0x39   : > { %s5212_s10 = scalar_select %p4258_p7, 1, 0 }
  0x3a   : > { %s5211_s8 = scalar_select %p4254_p5, 1, 0 }
  0x3b   : > { %5213 = sst [smem:[#allocation20_spill]] %s5212_s10  ;;  %p4263_p11 = pnand %p3106_p2, %p176_p9 }
  0x3c   : > { %s4099_s23 = smov [#allocation8]   ;;  %s5215_s0 = sld [smem:[#allocation21_spill]] }
  0x3d   : > { %s5214_s17 = scalar_select %p4263_p11, 1, 0 }
  0x3e   : > { %s188_s24 = sshll.u32 %s4099_s23, 4  ;;  %p3598_p12 = pneg %p4263_p11  ;;  %s4267_s24 = int_to_ptr.vmem [resolvable:$true] %s188_s24 }
  0x3f   : > { %s209_s15 = scalar_lea.vmem [#allocation2], %s4184_s27  ;;  %s4288_s23 = scalar_lea.sflag [#allocation3], %s205_s26 }
  0x40   : > { %s216_s9 = sshll.u32 %s209_s15, 4  ;;  %p4280_p0 = pnand %p3598_p12, %p5187_p4  ;;  %s4284_s9 = int_to_ptr.vmem [resolvable:$true] %s216_s9 }
  0x42   : > { %s4275_s7 = scalar_lea.hbm %s5215_s0, %s4187_s28  ;;  %s3937_s25 = scalar_lea.hbm %s5215_s0, 512 }
  0x43   : > { %s5216_s12 = scalar_select %p4280_p0, 1, 0 }
  0x44   : > { %s3932_s1 = scalar_lea.hbm %s4275_s7, 256  ;;  %p3938_p3 = scmp.lt.u32.totalorder %s4275_s7, %s5215_s0 }
  0x45   : > { %p3933_p10 = scmp.ne.s32.totalorder %s4275_s7, %s3932_s1  ;;  %p3939_p9 = scmp.lt.u32.totalorder %s3937_s25, %s3932_s1 }
  0x46   : > { %p3941_p4 = scmp.lt.u32.totalorder %s3932_s1, %s4275_s7 }
  0x47   : > { %p3935_p13 = pnand %p3933_p10, %p4209_p8  ;;  %p3940_p12 = por %p3939_p9, %p3938_p3 }
  0x49   : > { %p3936_p2 = pneg %p3935_p13  ;;  %p3942_p7 = por %p3941_p4, %p3940_p12 }
  0x4b   : > { %p3943_p5 = pnand %p3942_p7, %p3936_p2 }
  0x4d   : > { %3946 = shalt.err (!%p3943_p5)
}
  0x4e   : > { %s3947_s26 = scalar_lea.vmem %s4284_s9, 256  ;;  %s4100_s30 = smov [#allocation2]  }
  0x4f   : > { %p3948_p10 = scmp.ne.s32.totalorder %s4284_s9, %s3947_s26  ;;  %s3952_s6 = sshll.u32 %s4100_s30, 4  ;;  %s3953_s6 = int_to_ptr.vmem [resolvable:$false] %s3952_s6 }
  0x50   : > { %s3954_s22 = scalar_lea.vmem %s3953_s6, 512  ;;  %p3955_p11 = scmp.lt.s32.totalorder %s4284_s9, %s3953_s6 }
  0x51   : > { %p3950_p13 = pnand %p3948_p10, %p4209_p8  ;;  %p3956_p0 = scmp.lt.s32.totalorder %s3954_s22, %s3947_s26 }
  0x53   : > { %p3951_p1 = pneg %p3950_p13  ;;  %p3957_p3 = por %p3956_p0, %p3955_p11 }
  0x55   : > { %p3958_p9 = pnand %p3957_p3, %p3951_p1 }
  0x57   : > { %3961 = shalt.err (!%p3958_p9)
}
  0x58   : > { %s5217_s1 = smov 4   ;;  %s5218_s25 = smov 64  }
  0x59   : > { %3605 = dma.hbm_to_vmem [thread:$0]  (!%p4189_p6), %s4275_s7, 256, %s4284_s9, %s4288_s23, %s5218_s25, %s5218_s25, %s5217_s1  }
  0x5a   : > { %s4319_s0 = scalar_lea.hbm %s5176_s2, %s4187_s28  ;;  %s3962_s22 = scalar_lea.hbm %s5177_s3, 4096 }
  0x5b   : > { %p3963_p4 = scmp.ne.s32.totalorder %s5177_s3, %s3962_s22  ;;  %p5219_p1 = scmp.ne.s32.totalorder %s5216_s12, 0 }
  0x5c   : > { %p3969_p0 = scmp.lt.u32.totalorder %s3962_s22, %s5177_s3 }
  0x5d   : > { %p3964_p5 = pneg %p5219_p1 }
  0x5f   : > { %p3965_p7 = pnand %p3964_p5, %p3963_p4 }
  0x61   : > { %p3966_p11 = pneg %p3965_p7 }
  0x63   : > { %p3971_p2 = pnand %p3969_p0, %p3966_p11 }
  0x65   : > { %3974 = shalt.err (!%p3971_p2)
}
  0x66   : > { %s3975_s28 = scalar_lea.vmem %s4267_s24, 4096  ;;  %p3983_p3 = scmp.lt.s32.totalorder %s4267_s24, %s4267_s24 }
  0x67   : > { %p3976_p12 = scmp.ne.s32.totalorder %s4267_s24, %s3975_s28  ;;  %p3984_p9 = scmp.lt.s32.totalorder %s3975_s28, %s3975_s28 }
  0x69   : > { %p3978_p10 = pnand %p3976_p12, %p3964_p5  ;;  %p3985_p6 = por %p3984_p9, %p3983_p3 }
  0x6b   : > { %p3979_p13 = pneg %p3978_p10 }
  0x6d   : > { %p3986_p8 = pnand %p3985_p6, %p3979_p13 }
  0x6f   : > { %3989 = shalt.err (!%p3986_p8)
}
  0x70   : > { %3601 = dma.hbm_to_vmem [thread:$0]  (!%p5219_p1), %s5177_s3, 4096, %s4267_s24, [#allocation9], %s5218_s25, %s5218_s25, %s5217_s1  }
  0x71   : > { %s251_s21 = scalar_lea.vmem [#allocation7], %s4184_s27  ;;  %s3990_s10 = scalar_lea.hbm %s4319_s0, 256 }
  0x72   : > { %s258_s9 = sshll.u32 %s251_s21, 4  ;;  %p3991_p6 = scmp.ne.s32.totalorder %s4319_s0, %s3990_s10  ;;  %s4346_s9 = int_to_ptr.vmem [resolvable:$true] %s258_s9 }
  0x73   : > { %p5220_p8 = scmp.ne.s32.totalorder %s5208_s13, 0  ;;  %s3995_s23 = scalar_lea.hbm %s5176_s2, 512 }
  0x74   : > { %p3996_p7 = scmp.lt.u32.totalorder %s4319_s0, %s5176_s2  ;;  %p3997_p11 = scmp.lt.u32.totalorder %s3995_s23, %s3990_s10 }
  0x75   : > { %p3993_p4 = pnand %p3991_p6, %p5220_p8  ;;  %p3999_p1 = scmp.lt.u32.totalorder %s3990_s10, %s4319_s0 }
  0x76   : > { %p3998_p0 = por %p3997_p11, %p3996_p7 }
  0x77   : > { %p3994_p5 = pneg %p3993_p4 }
  0x78   : > { %p4000_p2 = por %p3999_p1, %p3998_p0 }
  0x7a   : > { %p4001_p12 = pnand %p4000_p2, %p3994_p5 }
  0x7c   : > { %4004 = shalt.err (!%p4001_p12)
}
  0x7d   : > { %s4005_s27 = scalar_lea.vmem %s4346_s9, 256  ;;  %s4101_s24 = smov [#allocation7]  }
  0x7e   : > { %p4006_p10 = scmp.ne.s32.totalorder %s4346_s9, %s4005_s27  ;;  %s4010_s26 = sshll.u32 %s4101_s24, 4  ;;  %s4011_s26 = int_to_ptr.vmem [resolvable:$false] %s4010_s26 }
  0x7f   : > { %s4012_s6 = scalar_lea.vmem %s4011_s26, 512  ;;  %p4013_p9 = scmp.lt.s32.totalorder %s4346_s9, %s4011_s26 }
  0x80   : > { %p4008_p13 = pnand %p4006_p10, %p5220_p8  ;;  %p4014_p6 = scmp.lt.s32.totalorder %s4012_s6, %s4005_s27 }
  0x82   : > { %p4009_p3 = pneg %p4008_p13  ;;  %p4015_p4 = por %p4014_p6, %p4013_p9 }
  0x84   : > { %p4016_p7 = pnand %p4015_p4, %p4009_p3 }
  0x86   : > { %4019 = shalt.err (!%p4016_p7)
}
  0x87   : > { %p5221_p5 = scmp.ne.s32.totalorder %s5206_s29, 0  ;;  %p5222_p8 = scmp.ne.s32.totalorder %s5214_s17, 0 }
  0x88   : > { %s4376_s13 = sand.u32 (!%p5222_p8), 1, %s4086_s19   ;;  %p5223_p11 = scmp.ne.s32.totalorder (!%p5222_p8), %s5209_s16, 0 }
  0x89   : > { %3611 = dma.hbm_to_vmem [thread:$0]  (!%p5221_p5), %s4319_s0, 256, %s4346_s9, %s4203_s11, %s5218_s25, %s5218_s25, %s5217_s1  }
  0x8a   : > { %270 = sbr.rel (%p5222_p8) target bundleno = 3472 (0xd90), region = 40  ;;  %s4379_s22 = sshll.u32 (!%p5222_p8), %s4376_s13, 4 }
  0x8b   : > { %s273_s29 = scalar_lea.sflag (!%p5222_p8), [#allocation3], %s4376_s13  ;;  %s276_s28 = scalar_lea.vmem (!%p5222_p8), [#allocation2], %s4379_s22 }
  0x91   : > { %4065 = dma.done.wait (%p5223_p11), %s273_s29, 256  }
  0x92   : > { %4067 = vsyncadd (%p5223_p11), %s273_s29, 4294967040  ;;  %s281_s0 = sand.u32 1, %s4237_s14   ;;  %s285_s17 = scalar_lea.vmem [#allocation5], %s4379_s22 }
  0x93   : > { %s282_s11 = scalar_lea.sflag [#allocation6], %s281_s0 }
  0x94   : > { %4069 = dma.done.wait (%p5223_p11), %s282_s11, 512  }
  0x95   : > { %4071 = vsyncadd (%p5223_p11), %s282_s11, 4294966784  ;;  %s294_s1 = scalar_lea.vmem [#allocation7], %s4379_s22  ;;  %p5224_p0 = scmp.eq.s32.totalorder %s4237_s14, 0 }
  0x97   : > { %4073 = dma.done.wait (%p5224_p0), [#allocation9], 4096   ;;  %p5225_p1 = pmov %p5224_p0 }
  0x98   : > { %v3736_v0 = vld [vmem:[#allocation8 + $0x40] sm:$0xff]   ;;  %v3738_v2 = vld [vmem:[#allocation8 + $0x48] sm:$0xff]   ;;  %v3740_v4 = vld [vmem:[#allocation8 + $0x50] sm:$0xff]   ;;  %v4102_v20 = vmov 0.0   ;;  %vm4103_vm0 = vmmov 0   ;;  %vm758_vm1 = vcmask 130048  }
  0x99   : > { %4075 = vsyncadd (%p5225_p1), [#allocation9], 4294963200  ;;  %v3737_v1 = vld [vmem:[#allocation8] sm:$0xff]   ;;  %3334 = vmatprep.subr.bf16.mxu1 %v3736_v0  ;;  %v3739_v3 = vld [vmem:[#allocation8 + $0x8] sm:$0xff]   ;;  %s4104_s21 = smov 112   ;;  %s4105_s12 = smov 96  }
  0x9a   : > { %3335 = vmatpush3.bf16.msra.mxu1 %v3736_v0  ;;  %3314 = vmatprep.subr.bf16.mxu0 %v3737_v1  ;;  %v3741_v5 = vld [vmem:[#allocation8 + $0x10] sm:$0xff]   ;;  %v3742_v6 = vld [vmem:[#allocation8 + $0x58] sm:$0xff]   ;;  %v3744_v8 = vld [vmem:[#allocation8 + $0x60] sm:$0xff]   ;;  %s4106_s7 = smov 80   ;;  %s4107_s23 = smov 64   ;;  %vm1782_vm2 = vcmask 261120  }
  0x9b   : > { %3315 = vmatpush3.bf16.msra.mxu0 %v3737_v1  ;;  %3336 = vmatprep.subr.bf16.mxu1 %v3738_v2  ;;  %v3743_v7 = vld [vmem:[#allocation8 + $0x18] sm:$0xff]   ;;  %v3745_v9 = vld [vmem:[#allocation8 + $0x20] sm:$0xff]   ;;  %v3746_v10 = vld [vmem:[#allocation8 + $0x68] sm:$0xff]   ;;  %s4108_s15 = smov 48   ;;  %s4109_s30 = smov 32   ;;  %vm1785_vm3 = vcmask 392192  }
  0x9c   : > { %3316 = vmatprep.subr.bf16.mxu0 %v3739_v3  ;;  %v3752_v11 = vld [vmem:[%s285_s17] sm:$0xff]   ;;  %v3747_v12 = vld [vmem:[#allocation8 + $0x28] sm:$0xff]   ;;  %v3750_v16 = vld [vmem:[#allocation8 + $0x78] sm:$0xff]   ;;  %s4110_s27 = smov 16   ;;  %vm1788_vm4 = vcmask 523264   ;;  %vm1791_vm5 = vcmask 654336  }
  0x9d   : > { %v3748_v13 = vld [vmem:[#allocation8 + $0x70] sm:$0xff]   ;;  %3350 = vmatprep.mubr.bf16.mxu1 %v3752_v11  ;;  %v3751_v17 = vld [vmem:[#allocation8 + $0x38] sm:$0xff]   ;;  %v3136_v21 = vld [vmem:[%s5178_s4 + $0x1] ss:$0 sm:$0xff]  ;;  %vm1794_vm6 = vcmask 785408   ;;  %vm1797_vm7 = vcmask 916480  }
  0x9e   : > { %3337 = vmatpush3.bf16.msra.mxu1 %v3738_v2  ;;  %v3754_v14 = vld [vmem:[%s276_s28] sm:$0xff]   ;;  %v3753_v18 = vld [vmem:[%s285_s17 + $0x8] sm:$0xff]   ;;  %s3123_s24 = sshll.u32 %s4376_s13, 5  ;;  %p5228_p12 = scmp.ne.s32.totalorder %s5211_s8, 0 }
  0x9f   : > { %3317 = vmatpush3.bf16.msra.mxu0 %v3739_v3  ;;  %3338 = vmatprep.subr.bf16.mxu1 %v3740_v4  ;;  %v3749_v15 = vld [vmem:[#allocation8 + $0x30] sm:$0xff]   ;;  %v3755_v19 = vld [vmem:[%s276_s28 + $0x8] sm:$0xff]   ;;  %v3124_v22 = vld [vmem:[%s5178_s4] ss:$0 sm:$0xff]  ;;  %s334_s22 = scalar_lea.vmem [#allocation10], %s3123_s24  ;;  %s3209_s28 = sshll.u32 %s4237_s14, 9 }
  0xa0   : > { %3318 = vmatprep.subr.bf16.mxu0 %v3741_v5  ;;  %3330 = vmatprep.mubr.bf16.mxu0 %v3754_v14  ;;  %v3756_v48 = vld [vmem:[#allocation8 + $0x80] sm:$0xff]   ;;  %v3757_v49 = vld [vmem:[#allocation8 + $0x88] sm:$0xff]   ;;  %v3758_v51 = vld [vmem:[#allocation8 + $0x90] sm:$0xff]   ;;  %s2979_s29 = sshll.u32 %s334_s22, 4  ;;  %s5130_s17 = scalar_lea.hbm %s5179_s5, %s3209_s28  ;;  %s5125_s29 = int_to_ptr.vmem [resolvable:$true] %s2979_s29 }
  0xa1   : > { %v3764_v50 = vld [vmem:[%s294_s1] sm:$0xff]   ;;  %v3759_v52 = vld [vmem:[#allocation8 + $0x98] sm:$0xff]   ;;  %v3761_v54 = vld [vmem:[#allocation8 + $0xa8] sm:$0xff]   ;;  %s2966_s14 = scalar_lea.sflag [#allocation4], %s4376_s13  ;;  %s4111_s16 = smov [#allocation10]  }
  0xa2   : > { %3339 = vmatpush3.bf16.msra.mxu1 %v3740_v4  ;;  %v3760_v53 = vld [vmem:[#allocation8 + $0xa0] sm:$0xff]   ;;  %v3762_v55 = vld [vmem:[#allocation8 + $0xb0] sm:$0xff]   ;;  %v3763_v56 = vld [vmem:[#allocation8 + $0xb8] sm:$0xff]   ;;  %s4024_s25 = sshll.u32 %s4111_s16, 4  ;;  %s4025_s25 = int_to_ptr.vmem [resolvable:$false] %s4024_s25 }
  0xa3   : > { %3319 = vmatpush3.bf16.msra.mxu0 %v3741_v5  ;;  %3340 = vmatprep.subr.bf16.mxu1 %v3742_v6  ;;  %v3765_v57 = vld [vmem:[%s294_s1 + $0x8] sm:$0xff]   ;;  %s4020_s1 = scalar_lea.vmem %s5125_s29, 512  ;;  %s4026_s18 = scalar_lea.vmem %s4025_s25, 1024 }
  0xa4   : > { %3320 = vmatprep.subr.bf16.mxu0 %v3743_v7  ;;  %p4021_p2 = scmp.ne.s32.totalorder %s5125_s29, %s4020_s1  ;;  %p4027_p3 = scmp.lt.s32.totalorder %s5125_s29, %s4025_s25 }
  0xa5   : > { %p4028_p9 = scmp.lt.s32.totalorder %s4026_s18, %s4020_s1 }
  0xa6   : > { %3341 = vmatpush3.bf16.msra.mxu1 %v3742_v6  ;;  %p4022_p10 = pnand %p4021_p2, %p5228_p12 }
  0xa7   : > { %3321 = vmatpush3.bf16.msra.mxu0 %v3743_v7  ;;  %3342 = vmatprep.subr.bf16.mxu1 %v3744_v8  ;;  %p4029_p6 = por %p4028_p9, %p4027_p3 }
  0xa8   : > { %3322 = vmatprep.subr.bf16.mxu0 %v3745_v9  ;;  %p4023_p13 = pneg %p4022_p10 }
  0xaa   : > { %3343 = vmatpush3.bf16.msra.mxu1 %v3744_v8  ;;  %p4030_p4 = pnand %p4029_p6, %p4023_p13 }
  0xab   : > { %3323 = vmatpush3.bf16.msra.mxu0 %v3745_v9  ;;  %3344 = vmatprep.subr.bf16.mxu1 %v3746_v10 }
  0xac   : > { %3324 = vmatprep.subr.bf16.mxu0 %v3747_v12 }
  0xae   : > { %3345 = vmatpush3.bf16.msra.mxu1 %v3746_v10 }
  0xaf   : > { %3325 = vmatpush3.bf16.msra.mxu0 %v3747_v12  ;;  %3346 = vmatprep.subr.bf16.mxu1 %v3748_v13 }
  0xb0   : > { %3326 = vmatprep.subr.bf16.mxu0 %v3749_v15 }
  0xb2   : > { %3347 = vmatpush3.bf16.msra.mxu1 %v3748_v13  ;;  %v3148_v13 = vld [vmem:[%s5178_s4 + $0x2] ss:$0 sm:$0xff] }
  0xb3   : > { %3327 = vmatpush3.bf16.msra.mxu0 %v3749_v15  ;;  %3348 = vmatprep.subr.bf16.mxu1 %v3750_v16 }
  0xb4   : > { %3328 = vmatprep.subr.bf16.mxu0 %v3751_v17 }
  0xb6   : > { %3349 = vmatpush3.bf16.msra.mxu1 %v3750_v16 }
  0xb7   : > { %3329 = vmatpush3.bf16.msra.mxu0 %v3751_v17  ;;  %3374 = vmatprep.subr.bf16.mxu1 %v4102_v20 }
  0xb8   : > { %3354 = vmatprep.subr.bf16.mxu0 %v3756_v48 }
  0xb9   : > { %3351 = vmatmul.mubr.bf16.vlgmr.msra.gmra.mrb[0].mxu1 %v3753_v18 }
  0xba   : > { %3331 = vmatmul.mubr.bf16.vlgmr.msra.gmra.mrb[0].mxu0 %v3755_v19  ;;  %3376 = vmatprep.mubr.msk.bf16.mxu1 %vm4103_vm0, %v4102_v20 }
  0xbb   : > { %3355 = vmatpush3.bf16.msra.mxu0 %v3756_v48  ;;  %3370 = vmatprep.mubr.bf16.mxu0 %v3764_v50 }
  0xbc   : > { %3356 = vmatprep.subr.bf16.mxu0 %v3757_v49 }
  0xbf   : > { %3357 = vmatpush3.bf16.msra.mxu0 %v3757_v49 }
  0xc0   : > { %3358 = vmatprep.subr.bf16.mxu0 %v3758_v51 }
  0xc3   : > { %3359 = vmatpush3.bf16.msra.mxu0 %v3758_v51 }
  0xc4   : > { %3360 = vmatprep.subr.bf16.mxu0 %v3759_v52 }
  0xc7   : > { %3361 = vmatpush3.bf16.msra.mxu0 %v3759_v52 }
  0xc8   : > { %3362 = vmatprep.subr.bf16.mxu0 %v3760_v53 }
  0xcb   : > { %3363 = vmatpush3.bf16.msra.mxu0 %v3760_v53 }
  0xcc   : > { %3364 = vmatprep.subr.bf16.mxu0 %v3761_v54 }
  0xcf   : > { %3365 = vmatpush3.bf16.msra.mxu0 %v3761_v54 }
  0xd0   : > { %3366 = vmatprep.subr.bf16.mxu0 %v3762_v55 }
  0xd3   : > { %3367 = vmatpush3.bf16.msra.mxu0 %v3762_v55 }
  0xd4   : > { %3368 = vmatprep.subr.bf16.mxu0 %v3763_v56 }
  0xd7   : > { %3369 = vmatpush3.bf16.msra.mxu0 %v3763_v56 }
  0xd8   : > { %3422 = vmatprep.subr.bf16.mxu0 %v4102_v20 }
  0xda   : > { %3371 = vmatmul.mubr.bf16.vlgmr.msra.gmra.mrb[4].mxu0 %v3765_v57 }
  0xdb   : > { %3424 = vmatprep.mubr.msk.bf16.mxu0 %vm4103_vm0, %v4102_v20 }
 0x18c   : > { %v3352_v23 = vpop.f32.mrb[0].mxu1 }
 0x18d   : > { %v612_v24 = vadd.f32 %v3352_v23, %v3136_v21  ;;  %v603_v25 = vpop.f32.mrb[1].mxu1  ;;  %v3332_v26 = vpop.f32.mrb[0].mxu0 }
 0x18e   : > { %v3353_v27 = vpop.f32.mrb[2].mxu1  ;;  %v470_v28 = vadd.f32 %v3332_v26, %v3124_v22  ;;  %v461_v29 = vpop.f32.mrb[1].mxu0  ;;  %v604_v34 = vadd.f32 %v3136_v21, %v603_v25 }
 0x18f   : > { %v615_v30 = vadd.f32 %v3353_v27, %v3136_v21  ;;  %v606_v31 = vpop.f32.mrb[3].mxu1  ;;  %v462_v32 = vadd.f32 %v3124_v22, %v461_v29  ;;  %v3333_v33 = vpop.f32.mrb[2].mxu0 }
 0x190   : > { %v478_v35 = vmul.f32 0.25, %v470_v28  ;;  %v607_v36 = vadd.f32 %v3136_v21, %v606_v31  ;;  %v473_v37 = vadd.f32 %v3333_v33, %v3124_v22  ;;  %v464_v38 = vpop.f32.mrb[3].mxu0 }
 0x191   : > { %v4415_v39 = vpack.c.bf16 %v615_v30, %v612_v24  ;;  %v476_v40 = vmul.f32 0.25, %v462_v32  ;;  %v465_v41 = vadd.f32 %v3124_v22, %v464_v38 }
 0x192   : > { %v4417_v42 = vpack.c.bf16 %v607_v36, %v604_v34  ;;  %v479_v43 = vmul.f32 0.25, %v473_v37 }
 0x193   : > { %v477_v44 = vmul.f32 0.25, %v465_v41 }
 0x194   : > { %v4419_v45 = vpack.c.bf16 %v479_v43, %v478_v35  ;;  %v763_v46 = vsel %vm758_vm1, %v4417_v42, 0 }
 0x195   : > { %v4423_v47 = vpack.c.bf16 %v477_v44, %v476_v40  ;;  %3375 = vmatpush3.bf16.xpose.msra.mxu1 %v763_v46 }
 0x196   : > { %3380 = vmatprep.subr.bf16.mxu1 %v4102_v20 }
 0x19c   : > { %3377 = vmatmul.mubr.msk.bf16.vlgmr.msra.gmra.mrb[4].mxu1 %vm758_vm1, %v4423_v47 }
 0x19d   : > { %3382 = vmatprep.mubr.msk.bf16.mxu1 %vm4103_vm0, %v4102_v20 }
 0x1ad   : > { %v3372_v10 = vpop.f32.mrb[4].mxu0 }
 0x1ae   : > { %v741_v11 = vpop.f32.mrb[5].mxu0  ;;  %v750_v15 = vadd.f32 %v3372_v10, %v3148_v13 }
 0x1af   : > { %v3373_v12 = vpop.f32.mrb[6].mxu0  ;;  %v742_v16 = vadd.f32 %v3148_v13, %v741_v11 }
 0x1b0   : > { %v744_v14 = vpop.f32.mrb[7].mxu0  ;;  %v753_v17 = vadd.f32 %v3373_v12, %v3148_v13 }
 0x1b1   : > { %v745_v18 = vadd.f32 %v3148_v13, %v744_v14 }
 0x1b2   : > { %v4446_v19 = vpack.c.bf16 %v753_v17, %v750_v15 }
 0x1b3   : > { %v4448_v21 = vpack.c.bf16 %v745_v18, %v742_v16 }
 0x1b5   : > { %3381 = vmatpush3.bf16.msra.mxu1 %v4448_v21 }
 0x1b6   : > { %3386 = vmatprep.subr.bf16.mxu1 %v4102_v20 }
 0x26f   : > { %v799_v58 = vpop.f32.mrb[4].mxu1 }
 0x270   : > { %v3378_v59 = vpop.f32.mrb[5].mxu1  ;;  %v806_v60 = vsel %vm758_vm1, %v799_v58, -inf }
 0x271   : > { %807 = vmax.xlane.f32.xlu0 %v806_v60  ;;  %v802_v61 = vpop.f32.mrb[6].mxu1 }
 0x272   : > { %v3379_v62 = vpop.f32.mrb[7].mxu1  ;;  %v809_v63 = vsel %vm758_vm1, %v802_v61, -inf }
 0x275   : > { %810 = vmax.xlane.f32.xlu0 %v809_v63 }
 0x28b   : > { %878 = vrot.lane.b32.xlu0 %v4417_v42, %s4104_s21 }
 0x2fe   : > { %v808_v0 = vpop.xlane.xlu0 %807 }
 0x2ff   : > { %v812_v1 = vsub.f32 %v799_v58, %v808_v0 }
 0x301   : > { %v814_v2 = vmul.f32 1.442695, %v812_v1 }
 0x302   : > { %v811_v3 = vpop.xlane.xlu0 %810 }
 0x303   : > { %3774 = vpow2.f32 %v814_v2  ;;  %v813_v4 = vsub.f32 %v802_v61, %v811_v3 }
 0x305   : > { %v816_v5 = vmul.f32 1.442695, %v813_v4 }
 0x306   : > { %v879_v28 = vpop.permute.xlu0 %878 }
 0x307   : > { %3776 = vpow2.f32 %v816_v5  ;;  %v884_v30 = vsel %vm758_vm1, %v879_v28, 0 }
 0x30d   : > { %v3775_v6 = vpop.eup %3774 }
 0x30e   : > { %v818_v7 = vsel %vm758_vm1, %v3775_v6, 0.0 }
 0x30f   : > { %819 = vadd.xlane.f32.xlu1 %v818_v7 }
 0x311   : > { %v3777_v8 = vpop.eup %3776 }
 0x312   : > { %v821_v9 = vsel %vm758_vm1, %v3777_v8, 0.0 }
 0x313   : > { %822 = vadd.xlane.f32.xlu1 %v821_v9 }
 0x324   : > { %875 = vrot.lane.b32.xlu1 %v4423_v47, %s4104_s21 }
 0x39c   : > { %v820_v22 = vpop.xlane.xlu1 %819 }
 0x39d   : > { %3778 = vrcp.f32 %v820_v22 }
 0x3a0   : > { %v823_v23 = vpop.xlane.xlu1 %822 }
 0x3a1   : > { %3780 = vrcp.f32 %v823_v23 }
 0x3a4   : > { %v876_v31 = vpop.permute.xlu1 %875 }
 0x3a7   : > { %v3779_v24 = vpop.eup %3778 }
 0x3a8   : > { %v826_v26 = vmul.f32 %v3779_v24, %v3775_v6 }
 0x3ab   : > { %v3781_v25 = vpop.eup %3780 }
 0x3ac   : > { %v827_v27 = vmul.f32 %v3781_v25, %v3777_v8 }
 0x3ae   : > { %v828_v29 = vpack.c.bf16 %v827_v27, %v826_v26 }
 0x3b0   : > { %3383 = vmatmul.mubr.msk.bf16.vlgmr.msra.gmra.mrb[8].mxu1 %vm758_vm1, %v828_v29 }
 0x3b1   : > { %3387 = vmatpush3.bf16.xpose.msra.mxu1 %v884_v30  ;;  %3388 = vmatprep.mubr.msk.bf16.mxu1 %vm4103_vm0, %v4102_v20 }
 0x3b2   : > { %3392 = vmatprep.subr.bf16.mxu1 %v4102_v20 }
 0x3b8   : > { %3389 = vmatmul.mubr.msk.bf16.vlgmr.msra.gmra.mrb[12].mxu1 %vm758_vm1, %v876_v31 }
 0x3b9   : > { %3394 = vmatprep.mubr.msk.bf16.mxu1 %vm4103_vm0, %v4102_v20 }
 0x483   : > { %v4462_v32 = vpop.f32.mrb[8].mxu1 }
 0x484   : > { %v3384_v33 = vpop.f32.mrb[9].mxu1 }
 0x485   : > { %v4464_v34 = vpop.f32.mrb[10].mxu1 }
 0x486   : > { %v3385_v35 = vpop.f32.mrb[11].mxu1 }
 0x48b   : > { %v920_v36 = vpop.f32.mrb[12].mxu1 }
 0x48c   : > { %v3390_v37 = vpop.f32.mrb[13].mxu1  ;;  %v927_v38 = vsel %vm758_vm1, %v920_v36, -inf }
 0x48d   : > { %928 = vmax.xlane.f32.xlu1 %v927_v38  ;;  %v923_v40 = vpop.f32.mrb[14].mxu1 }
 0x48e   : > { %v3391_v41 = vpop.f32.mrb[15].mxu1  ;;  %v930_v43 = vsel %vm758_vm1, %v923_v40, -inf }
 0x48f   : > { %931 = vmax.xlane.f32.xlu0 %v930_v43 }
 0x51a   : > { %v929_v44 = vpop.xlane.xlu1 %928 }
 0x51b   : > { %v933_v46 = vsub.f32 %v920_v36, %v929_v44 }
 0x51c   : > { %v932_v48 = vpop.xlane.xlu0 %931 }
 0x51d   : > { %v935_v49 = vmul.f32 1.442695, %v933_v46  ;;  %v934_v50 = vsub.f32 %v923_v40, %v932_v48 }
 0x51f   : > { %3782 = vpow2.f32 %v935_v49  ;;  %v937_v51 = vmul.f32 1.442695, %v934_v50 }
 0x521   : > { %3784 = vpow2.f32 %v937_v51 }
 0x529   : > { %v3783_v52 = vpop.eup %3782 }
 0x52a   : > { %v939_v53 = vsel %vm758_vm1, %v3783_v52, 0.0 }
 0x52b   : > { %v3785_v54 = vpop.eup %3784  ;;  %940 = vadd.xlane.f32.xlu0 %v939_v53 }
 0x52c   : > { %v942_v55 = vsel %vm758_vm1, %v3785_v54, 0.0 }
 0x52d   : > { %943 = vadd.xlane.f32.xlu1 %v942_v55 }
 0x53e   : > { %1000 = vrot.lane.b32.xlu1 %v4417_v42, %s4105_s12 }
 0x541   : > { %951 = vrot.lane.b32.xlu0 %v4448_v21, %s4104_s21 }
 0x542   : > { %998 = vrot.lane.b32.xlu1 %v4423_v47, %s4105_s12 }
 0x5b8   : > { %v941_v56 = vpop.xlane.xlu0 %940 }
 0x5b9   : > { %3786 = vrcp.f32 %v941_v56 }
 0x5ba   : > { %v944_v57 = vpop.xlane.xlu1 %943 }
 0x5bb   : > { %3788 = vrcp.f32 %v944_v57 }
 0x5bc   : > { %v952_v58 = vpop.permute.xlu0 %951 }
 0x5bd   : > { %3393 = vmatpush3.bf16.msra.mxu1 %v952_v58 }
 0x5be   : > { %3398 = vmatprep.subr.bf16.mxu1 %v4102_v20  ;;  %v1001_v63 = vpop.permute.xlu1 %1000 }
 0x5bf   : > { %v1006_v1 = vsel %vm758_vm1, %v1001_v63, 0 }
 0x5c2   : > { %v999_v2 = vpop.permute.xlu1 %998 }
 0x5c3   : > { %v3787_v59 = vpop.eup %3786 }
 0x5c4   : > { %v947_v61 = vmul.f32 %v3787_v59, %v3783_v52 }
 0x5c5   : > { %v3789_v60 = vpop.eup %3788 }
 0x5c6   : > { %v948_v62 = vmul.f32 %v3789_v60, %v3785_v54  ;;  %v1806_v54 = vsel %vm758_vm1, %v4415_v39, 0 }
 0x5c8   : > { %v949_v0 = vpack.c.bf16 %v948_v62, %v947_v61 }
 0x5ca   : > { %3395 = vmatmul.mubr.msk.bf16.vlgmr.msra.gmra.mrb[16].mxu1 %vm758_vm1, %v949_v0 }
 0x5cb   : > { %3399 = vmatpush3.bf16.xpose.msra.mxu1 %v1006_v1  ;;  %3400 = vmatprep.mubr.msk.bf16.mxu1 %vm4103_vm0, %v4102_v20 }
 0x5cc   : > { %3404 = vmatprep.subr.bf16.mxu1 %v4102_v20 }
 0x5d2   : > { %3401 = vmatmul.mubr.msk.bf16.vlgmr.msra.gmra.mrb[20].mxu1 %vm758_vm1, %v999_v2 }
 0x5d3   : > { %3406 = vmatprep.mubr.msk.bf16.mxu1 %vm4103_vm0, %v4102_v20 }
 0x69d   : > { %v4485_v3 = vpop.f32.mrb[16].mxu1 }
 0x69e   : > { %v3396_v4 = vpop.f32.mrb[17].mxu1 }
 0x69f   : > { %v4487_v5 = vpop.f32.mrb[18].mxu1 }
 0x6a0   : > { %v3666_v6 = vpack.i.bf16 %v4487_v5, %v4485_v3  ;;  %v3397_v7 = vpop.f32.mrb[19].mxu1 }
 0x6a5   : > { %v1042_v8 = vpop.f32.mrb[20].mxu1 }
 0x6a6   : > { %v3402_v9 = vpop.f32.mrb[21].mxu1  ;;  %v1049_v10 = vsel %vm758_vm1, %v1042_v8, -inf }
 0x6a7   : > { %1050 = vmax.xlane.f32.xlu1 %v1049_v10  ;;  %v1045_v11 = vpop.f32.mrb[22].mxu1 }
 0x6a8   : > { %v3403_v12 = vpop.f32.mrb[23].mxu1  ;;  %v1052_v13 = vsel %vm758_vm1, %v1045_v11, -inf }
 0x6a9   : > { %1053 = vmax.xlane.f32.xlu0 %v1052_v13 }
 0x6b8   : > { %1072 = vrot.lane.b32.xlu1 %v4448_v21, %s4105_s12 }
 0x6bc   : > { %1119 = vrot.lane.b32.xlu1 %v4423_v47, %s4106_s7 }
 0x6c0   : > { %1242 = vrot.lane.b32.xlu1 %v4417_v42, %s4107_s23 }
 0x6c4   : > { %1240 = vrot.lane.b32.xlu1 %v4423_v47, %s4107_s23 }
 0x6c8   : > { %1361 = vrot.lane.b32.xlu1 %v4423_v47, %s4108_s15 }
 0x6cc   : > { %1482 = vrot.lane.b32.xlu1 %v4423_v47, %s4109_s30 }
 0x6d0   : > { %1603 = vrot.lane.b32.xlu1 %v4423_v47, %s4110_s27 }
 0x6d4   : > { %1918 = vrot.lane.b32.xlu1 %v4419_v45, %s4104_s21 }
 0x6d8   : > { %2041 = vrot.lane.b32.xlu1 %v4419_v45, %s4105_s12 }
 0x6dc   : > { %2162 = vrot.lane.b32.xlu1 %v4419_v45, %s4106_s7 }
 0x6e0   : > { %2283 = vrot.lane.b32.xlu1 %v4419_v45, %s4107_s23 }
 0x6e4   : > { %2404 = vrot.lane.b32.xlu1 %v4419_v45, %s4108_s15 }
 0x6e8   : > { %2525 = vrot.lane.b32.xlu1 %v4419_v45, %s4109_s30 }
 0x6ec   : > { %2646 = vrot.lane.b32.xlu1 %v4419_v45, %s4110_s27 }
 0x734   : > { %v1051_v47 = vpop.xlane.xlu1 %1050 }
 0x735   : > { %v1055_v14 = vsub.f32 %v1042_v8, %v1051_v47 }
 0x736   : > { %v1054_v15 = vpop.xlane.xlu0 %1053 }
 0x737   : > { %v1057_v16 = vmul.f32 1.442695, %v1055_v14  ;;  %v1056_v17 = vsub.f32 %v1045_v11, %v1054_v15 }
 0x738   : > { %v1073_v18 = vpop.permute.xlu1 %1072 }
 0x739   : > { %3790 = vpow2.f32 %v1057_v16  ;;  %v1059_v22 = vmul.f32 1.442695, %v1056_v17  ;;  %3405 = vmatpush3.bf16.msra.mxu1 %v1073_v18 }
 0x73a   : > { %3410 = vmatprep.subr.bf16.mxu1 %v4102_v20 }
 0x73b   : > { %3792 = vpow2.f32 %v1059_v22 }
 0x73c   : > { %v1120_v23 = vpop.permute.xlu1 %1119 }
 0x740   : > { %v1243_v24 = vpop.permute.xlu1 %1242 }
 0x741   : > { %v1248_v25 = vsel %vm758_vm1, %v1243_v24, 0 }
 0x742   : > { %3423 = vmatpush3.bf16.xpose.msra.mxu0 %v1248_v25 }
 0x743   : > { %v3791_v26 = vpop.eup %3790  ;;  %3434 = vmatprep.subr.bf16.mxu0 %v4102_v20 }
 0x744   : > { %v1061_v27 = vsel %vm758_vm1, %v3791_v26, 0.0  ;;  %v1241_v29 = vpop.permute.xlu1 %1240 }
 0x745   : > { %v3793_v28 = vpop.eup %3792  ;;  %1062 = vadd.xlane.f32.xlu0 %v1061_v27 }
 0x746   : > { %v1064_v30 = vsel %vm758_vm1, %v3793_v28, 0.0 }
 0x748   : > { %v1362_v46 = vpop.permute.xlu1 %1361 }
 0x749   : > { %3425 = vmatmul.mubr.msk.bf16.vlgmr.msra.gmra.mrb[8].mxu0 %vm758_vm1, %v1241_v29  ;;  %1065 = vadd.xlane.f32.xlu0 %v1064_v30 }
 0x74a   : > { %3436 = vmatprep.mubr.msk.bf16.mxu0 %vm4103_vm0, %v4102_v20 }
 0x74c   : > { %v1483_v51 = vpop.permute.xlu1 %1482 }
 0x750   : > { %v1604_v53 = vpop.permute.xlu1 %1603 }
 0x75f   : > { %1121 = vrot.lane.b32.xlu0 %v4417_v42, %s4106_s7 }
 0x763   : > { %1363 = vrot.lane.b32.xlu0 %v4417_v42, %s4108_s15 }
 0x767   : > { %1484 = vrot.lane.b32.xlu0 %v4417_v42, %s4109_s30 }
 0x76b   : > { %1605 = vrot.lane.b32.xlu0 %v4417_v42, %s4110_s27 }
 0x76f   : > { %1921 = vrot.lane.b32.xlu0 %v4415_v39, %s4104_s21 }
 0x773   : > { %2043 = vrot.lane.b32.xlu0 %v4415_v39, %s4105_s12 }
 0x777   : > { %2164 = vrot.lane.b32.xlu0 %v4415_v39, %s4106_s7 }
 0x77b   : > { %2285 = vrot.lane.b32.xlu0 %v4415_v39, %s4107_s23 }
 0x77f   : > { %2406 = vrot.lane.b32.xlu0 %v4415_v39, %s4108_s15 }
 0x783   : > { %2527 = vrot.lane.b32.xlu0 %v4415_v39, %s4109_s30 }
 0x787   : > { %2648 = vrot.lane.b32.xlu0 %v4415_v39, %s4110_s27  ;;  %v1919_v39 = vpop.permute.xlu1 %1918 }
 0x7d2   : > { %v1063_v42 = vpop.xlane.xlu0 %1062 }
 0x7d3   : > { %3794 = vrcp.f32 %v1063_v42 }
 0x7d6   : > { %v1066_v31 = vpop.xlane.xlu0 %1065 }
 0x7d7   : > { %3796 = vrcp.f32 %v1066_v31 }
 0x7da   : > { %v1122_v33 = vpop.permute.xlu0 %1121 }
 0x7db   : > { %v1127_v48 = vsel %vm758_vm1, %v1122_v33, 0 }
 0x7dd   : > { %v3795_v36 = vpop.eup %3794 }
 0x7de   : > { %v1364_v35 = vpop.permute.xlu0 %1363  ;;  %v1069_v40 = vmul.f32 %v3795_v36, %v3791_v26 }
 0x7df   : > { %v1369_v37 = vsel %vm758_vm1, %v1364_v35, 0 }
 0x7e0   : > { %3435 = vmatpush3.bf16.xpose.msra.mxu0 %v1369_v37 }
 0x7e1   : > { %v3797_v38 = vpop.eup %3796  ;;  %3446 = vmatprep.subr.bf16.mxu0 %v4102_v20 }
 0x7e2   : > { %v1070_v41 = vmul.f32 %v3797_v38, %v3793_v28  ;;  %v1485_v43 = vpop.permute.xlu0 %1484 }
 0x7e3   : > { %v1490_v49 = vsel %vm758_vm1, %v1485_v43, 0 }
 0x7e4   : > { %v1071_v44 = vpack.c.bf16 %v1070_v41, %v1069_v40 }
 0x7e6   : > { %3407 = vmatmul.mubr.msk.bf16.vlgmr.msra.gmra.mrb[24].mxu1 %vm758_vm1, %v1071_v44  ;;  %v1606_v50 = vpop.permute.xlu0 %1605 }
 0x7e7   : > { %3411 = vmatpush3.bf16.xpose.msra.mxu1 %v1127_v48  ;;  %3437 = vmatmul.mubr.msk.bf16.vlgmr.msra.gmra.mrb[12].mxu0 %vm758_vm1, %v1362_v46  ;;  %v1611_v52 = vsel %vm758_vm1, %v1606_v50, 0 }
 0x7e8   : > { %3447 = vmatpush3.bf16.xpose.msra.mxu0 %v1490_v49  ;;  %3412 = vmatprep.mubr.msk.bf16.mxu1 %vm4103_vm0, %v4102_v20 }
 0x7e9   : > { %3448 = vmatprep.mubr.msk.bf16.mxu0 %vm4103_vm0, %v4102_v20  ;;  %3458 = vmatprep.subr.bf16.mxu0 %v4102_v20 }
 0x7ea   : > { %3416 = vmatprep.subr.bf16.mxu1 %v4102_v20  ;;  %v1922_v55 = vpop.permute.xlu0 %1921 }
 0x7eb   : > { %v1927_v56 = vsel %vm758_vm1, %v1922_v55, 0 }
 0x7ee   : > { %3413 = vmatmul.mubr.msk.bf16.vlgmr.msra.gmra.mrb[28].mxu1 %vm758_vm1, %v1120_v23  ;;  %v2044_v57 = vpop.permute.xlu0 %2043 }
 0x7ef   : > { %3449 = vmatmul.mubr.msk.bf16.vlgmr.msra.gmra.mrb[16].mxu0 %vm758_vm1, %v1483_v51  ;;  %3418 = vmatprep.mubr.msk.bf16.mxu1 %vm4103_vm0, %v4102_v20  ;;  %v2049_v58 = vsel %vm758_vm1, %v2044_v57, 0 }
 0x7f0   : > { %3459 = vmatpush3.bf16.xpose.msra.mxu0 %v1611_v52  ;;  %3460 = vmatprep.mubr.msk.bf16.mxu0 %vm4103_vm0, %v4102_v20 }
 0x7f1   : > { %3470 = vmatprep.subr.bf16.mxu0 %v4102_v20 }
 0x7f2   : > { %v2165_v59 = vpop.permute.xlu0 %2164 }
 0x7f3   : > { %v2170_v60 = vsel %vm758_vm1, %v2165_v59, 0 }
 0x7f6   : > { %v2286_v61 = vpop.permute.xlu0 %2285 }
 0x7f7   : > { %3461 = vmatmul.mubr.msk.bf16.vlgmr.msra.gmra.mrb[20].mxu0 %vm758_vm1, %v1604_v53  ;;  %v2291_v63 = vsel %vm758_vm1, %v2286_v61, 0 }
 0x7f8   : > { %3471 = vmatpush3.bf16.xpose.msra.mxu0 %v1806_v54  ;;  %3472 = vmatprep.mubr.msk.bf16.mxu0 %vm4103_vm0, %v4102_v20 }
 0x7f9   : > { %3482 = vmatprep.subr.bf16.mxu0 %v4102_v20 }
 0x7fa   : > { %v2407_v0 = vpop.permute.xlu0 %2406 }
 0x7fb   : > { %v2412_v9 = vsel %vm758_vm1, %v2407_v0, 0 }
 0x7fe   : > { %v2528_v12 = vpop.permute.xlu0 %2527 }
 0x7ff   : > { %3473 = vmatmul.mubr.msk.bf16.vlgmr.msra.gmra.mrb[24].mxu0 %vm758_vm1, %v4419_v45  ;;  %v2042_v45 = vpop.permute.xlu1 %2041  ;;  %v2533_v47 = vsel %vm758_vm1, %v2528_v12, 0 }
 0x800   : > { %3483 = vmatpush3.bf16.xpose.msra.mxu0 %v1927_v56  ;;  %3484 = vmatprep.mubr.msk.bf16.mxu0 %vm4103_vm0, %v4102_v20 }
 0x801   : > { %3494 = vmatprep.subr.bf16.mxu0 %v4102_v20 }
 0x802   : > { %v2649_v14 = vpop.permute.xlu0 %2648 }
 0x803   : > { %v2163_v62 = vpop.permute.xlu1 %2162  ;;  %v2654_v16 = vsel %vm758_vm1, %v2649_v14, 0 }
 0x807   : > { %3485 = vmatmul.mubr.msk.bf16.vlgmr.msra.gmra.mrb[28].mxu0 %vm758_vm1, %v1919_v39  ;;  %v2284_v7 = vpop.permute.xlu1 %2283 }
 0x808   : > { %3495 = vmatpush3.bf16.xpose.msra.mxu0 %v2049_v58  ;;  %3496 = vmatprep.mubr.msk.bf16.mxu0 %vm4103_vm0, %v4102_v20 }
 0x809   : > { %3506 = vmatprep.subr.bf16.mxu0 %v4102_v20 }
 0x80b   : > { %v2405_v13 = vpop.permute.xlu1 %2404 }
 0x80f   : > { %3497 = vmatmul.mubr.msk.bf16.vlgmr.msra.gmra.mrb[32].mxu0 %vm758_vm1, %v2042_v45  ;;  %v2526_v15 = vpop.permute.xlu1 %2525 }
 0x810   : > { %3507 = vmatpush3.bf16.xpose.msra.mxu0 %v2170_v60  ;;  %3508 = vmatprep.mubr.msk.bf16.mxu0 %vm4103_vm0, %v4102_v20 }
 0x811   : > { %3518 = vmatprep.subr.bf16.mxu0 %v4102_v20 }
 0x813   : > { %v2647_v17 = vpop.permute.xlu1 %2646 }
 0x817   : > { %3509 = vmatmul.mubr.msk.bf16.vlgmr.msra.gmra.mrb[36].mxu0 %vm758_vm1, %v2163_v62 }
 0x818   : > { %3519 = vmatpush3.bf16.xpose.msra.mxu0 %v2291_v63  ;;  %3520 = vmatprep.mubr.msk.bf16.mxu0 %vm4103_vm0, %v4102_v20 }
 0x819   : > { %3530 = vmatprep.subr.bf16.mxu0 %v4102_v20 }
 0x81c   : > { %v4598_v1 = vpop.f32.mrb[8].mxu0 }
 0x81d   : > { %v3426_v2 = vpop.f32.mrb[9].mxu0  ;;  %v1291_v4 = vsel %vm758_vm1, %v4598_v1, -inf }
 0x81e   : > { %v4602_v8 = vpop.f32.mrb[10].mxu0  ;;  %1292 = vmax.xlane.f32.xlu0 %v1291_v4 }
 0x81f   : > { %v3427_v10 = vpop.f32.mrb[11].mxu0  ;;  %3521 = vmatmul.mubr.msk.bf16.vlgmr.msra.gmra.mrb[40].mxu0 %vm758_vm1, %v2284_v7  ;;  %v1294_v11 = vsel %vm758_vm1, %v4602_v8, -inf }
 0x820   : > { %3531 = vmatpush3.bf16.xpose.msra.mxu0 %v2412_v9  ;;  %3532 = vmatprep.mubr.msk.bf16.mxu0 %vm4103_vm0, %v4102_v20 }
 0x821   : > { %3542 = vmatprep.subr.bf16.mxu0 %v4102_v20 }
 0x822   : > { %1295 = vmax.xlane.f32.xlu0 %v1294_v11 }
 0x827   : > { %3533 = vmatmul.mubr.msk.bf16.vlgmr.msra.gmra.mrb[44].mxu0 %vm758_vm1, %v2405_v13 }
 0x828   : > { %3543 = vmatpush3.bf16.xpose.msra.mxu0 %v2533_v47  ;;  %3544 = vmatprep.mubr.msk.bf16.mxu0 %vm4103_vm0, %v4102_v20 }
 0x829   : > { %3554 = vmatprep.subr.bf16.mxu0 %v4102_v20 }
 0x82f   : > { %3545 = vmatmul.mubr.msk.bf16.vlgmr.msra.gmra.mrb[48].mxu0 %vm758_vm1, %v2526_v15 }
 0x830   : > { %3555 = vmatpush3.bf16.xpose.msra.mxu0 %v2654_v16  ;;  %3556 = vmatprep.mubr.msk.bf16.mxu0 %vm4103_vm0, %v4102_v20 }
 0x837   : > { %3557 = vmatmul.mubr.msk.bf16.vlgmr.msra.gmra.mrb[52].mxu0 %vm758_vm1, %v2647_v17 }
 0x8ab   : > { %v1293_v11 = vpop.xlane.xlu0 %1292 }
 0x8ac   : > { %v1297_v17 = vsub.f32 %v4598_v1, %v1293_v11 }
 0x8af   : > { %v1296_v16 = vpop.xlane.xlu0 %1295 }
 0x8b9   : > { %v4621_v18 = vpop.f32.mrb[24].mxu1 }
 0x8ba   : > { %v3408_v22 = vpop.f32.mrb[25].mxu1  ;;  %v4623_v23 = vpop.f32.mrb[12].mxu0 }
 0x8bb   : > { %v4625_v24 = vpop.f32.mrb[26].mxu1  ;;  %v3438_v25 = vpop.f32.mrb[13].mxu0  ;;  %v1412_v26 = vsel %vm758_vm1, %v4623_v23, -inf }
 0x8bc   : > { %v3671_v27 = vpack.i.bf16 %v4625_v24, %v4621_v18  ;;  %1413 = vmax.xlane.f32.xlu0 %v1412_v26  ;;  %v3409_v28 = vpop.f32.mrb[27].mxu1  ;;  %v4631_v29 = vpop.f32.mrb[14].mxu0 }
 0x8bd   : > { %v3439_v30 = vpop.f32.mrb[15].mxu0  ;;  %v1415_v42 = vsel %vm758_vm1, %v4631_v29, -inf  ;;  %v1298_v28 = vsub.f32 %v4602_v8, %v1296_v16 }
 0x8be   : > { %1416 = vmax.xlane.f32.xlu1 %v1415_v42 }
 0x8c1   : > { %v4635_v31 = vpop.f32.mrb[28].mxu1 }
 0x8c2   : > { %v3414_v33 = vpop.f32.mrb[29].mxu1  ;;  %v4637_v35 = vpop.f32.mrb[16].mxu0 }
 0x8c3   : > { %v4639_v36 = vpop.f32.mrb[30].mxu1  ;;  %v3450_v37 = vpop.f32.mrb[17].mxu0  ;;  %v1533_v38 = vsel %vm758_vm1, %v4637_v35, -inf }
 0x8c4   : > { %1534 = vmax.xlane.f32.xlu0 %v1533_v38  ;;  %v3415_v40 = vpop.f32.mrb[31].mxu1  ;;  %v4643_v41 = vpop.f32.mrb[18].mxu0  ;;  %v1299_v37 = vmul.f32 1.442695, %v1297_v17  ;;  %v1301_v38 = vmul.f32 1.442695, %v1298_v28 }
 0x8c5   : > { %v3451_v43 = vpop.f32.mrb[19].mxu0  ;;  %v1536_v44 = vsel %vm758_vm1, %v4643_v41, -inf }
 0x8c6   : > { %1537 = vmax.xlane.f32.xlu1 %v1536_v44  ;;  %3798 = vpow2.f32 %v1299_v37 }
 0x8c7   : > { %3800 = vpow2.f32 %v1301_v38 }
 0x8ca   : > { %v4647_v46 = vpop.f32.mrb[20].mxu0 }
 0x8cb   : > { %v3462_v48 = vpop.f32.mrb[21].mxu0  ;;  %v1654_v49 = vsel %vm758_vm1, %v4647_v46, -inf }
 0x8cc   : > { %1655 = vmax.xlane.f32.xlu0 %v1654_v49  ;;  %v4651_v50 = vpop.f32.mrb[22].mxu0 }
 0x8cd   : > { %v3463_v51 = vpop.f32.mrb[23].mxu0  ;;  %v1657_v52 = vsel %vm758_vm1, %v4651_v50, -inf }
 0x8ce   : > { %1658 = vmax.xlane.f32.xlu1 %v1657_v52 }
 0x8d2   : > { %v4655_v53 = vpop.f32.mrb[24].mxu0 }
 0x8d3   : > { %v3474_v54 = vpop.f32.mrb[25].mxu0  ;;  %v1849_v55 = vsel %vm758_vm1, %v4655_v53, -inf }
 0x8d4   : > { %1850 = vmax.xlane.f32.xlu0 %v1849_v55  ;;  %v4659_v56 = vpop.f32.mrb[26].mxu0  ;;  %v4709_v54 = vpop.eup %3798 }
 0x8d5   : > { %v3475_v57 = vpop.f32.mrb[27].mxu0  ;;  %v1852_v39 = vsel %vm758_vm1, %v4659_v56, -inf }
 0x8d6   : > { %1853 = vmax.xlane.f32.xlu1 %v1852_v39 }
 0x8da   : > { %v4663_v58 = vpop.f32.mrb[28].mxu0 }
 0x8db   : > { %v3486_v59 = vpop.f32.mrb[29].mxu0  ;;  %v1970_v45 = vsel %vm758_vm1, %v4663_v58, -inf }
 0x8dc   : > { %1971 = vmax.xlane.f32.xlu0 %v1970_v45  ;;  %v4667_v60 = vpop.f32.mrb[30].mxu0  ;;  %v4715_v59 = vpop.eup %3800  ;;  %v1303_v45 = vsel %vm758_vm1, %v4709_v54, 0.0 }
 0x8dd   : > { %v3487_v61 = vpop.f32.mrb[31].mxu0  ;;  %v1973_v62 = vsel %vm758_vm1, %v4667_v60, -inf }
 0x8de   : > { %1974 = vmax.xlane.f32.xlu1 %v1973_v62  ;;  %v1306_v61 = vsel %vm758_vm1, %v4715_v59, 0.0 }
 0x8e2   : > { %v4671_v63 = vpop.f32.mrb[32].mxu0 }
 0x8e3   : > { %v3498_v0 = vpop.f32.mrb[33].mxu0  ;;  %v2092_v2 = vsel %vm758_vm1, %v4671_v63, -inf }
 0x8e4   : > { %2093 = vmax.xlane.f32.xlu0 %v2092_v2  ;;  %v4675_v4 = vpop.f32.mrb[34].mxu0 }
 0x8e5   : > { %v3499_v7 = vpop.f32.mrb[35].mxu0  ;;  %v2095_v9 = vsel %vm758_vm1, %v4675_v4, -inf }
 0x8e6   : > { %2096 = vmax.xlane.f32.xlu1 %v2095_v9 }
 0x8ea   : > { %v4679_v10 = vpop.f32.mrb[36].mxu0 }
 0x8eb   : > { %v3510_v12 = vpop.f32.mrb[37].mxu0  ;;  %v2213_v13 = vsel %vm758_vm1, %v4679_v10, -inf }
 0x8ec   : > { %2214 = vmax.xlane.f32.xlu0 %v2213_v13  ;;  %v4683_v47 = vpop.f32.mrb[38].mxu0 }
 0x8ed   : > { %v3511_v14 = vpop.f32.mrb[39].mxu0  ;;  %v2216_v15 = vsel %vm758_vm1, %v4683_v47, -inf }
 0x8ee   : > { %2217 = vmax.xlane.f32.xlu1 %v2216_v15 }
 0x8f2   : > { %v4688_v22 = vpop.f32.mrb[40].mxu0 }
 0x8f3   : > { %v3522_v25 = vpop.f32.mrb[41].mxu0  ;;  %v2334_v26 = vsel %vm758_vm1, %v4688_v22, -inf }
 0x8f4   : > { %2335 = vmax.xlane.f32.xlu0 %v2334_v26  ;;  %v4693_v30 = vpop.f32.mrb[42].mxu0 }
 0x8f5   : > { %v3523_v42 = vpop.f32.mrb[43].mxu0  ;;  %v2337_v33 = vsel %vm758_vm1, %v4693_v30, -inf }
 0x8f6   : > { %2338 = vmax.xlane.f32.xlu1 %v2337_v33 }
 0x8fa   : > { %v4697_v1 = vpop.f32.mrb[44].mxu0 }
 0x8fb   : > { %v3534_v40 = vpop.f32.mrb[45].mxu0  ;;  %v2455_v43 = vsel %vm758_vm1, %v4697_v1, -inf }
 0x8fc   : > { %2456 = vmax.xlane.f32.xlu0 %v2455_v43  ;;  %v4701_v8 = vpop.f32.mrb[46].mxu0 }
 0x8fd   : > { %v3535_v44 = vpop.f32.mrb[47].mxu0  ;;  %v2458_v48 = vsel %vm758_vm1, %v4701_v8, -inf }
 0x8fe   : > { %2459 = vmax.xlane.f32.xlu1 %v2458_v48 }
 0x902   : > { %v4705_v49 = vpop.f32.mrb[48].mxu0 }
 0x903   : > { %v3546_v51 = vpop.f32.mrb[49].mxu0  ;;  %v2576_v52 = vsel %vm758_vm1, %v4705_v49, -inf }
 0x904   : > { %2577 = vmax.xlane.f32.xlu0 %v2576_v52  ;;  %v4711_v55 = vpop.f32.mrb[50].mxu0 }
 0x905   : > { %v3547_v57 = vpop.f32.mrb[51].mxu0  ;;  %v2579_v39 = vsel %vm758_vm1, %v4711_v55, -inf }
 0x906   : > { %2580 = vmax.xlane.f32.xlu1 %v2579_v39 }
 0x908   : > { %1304 = vadd.xlane.f32.xlu0 %v1303_v45 }
 0x90a   : > { %v4721_v62 = vpop.f32.mrb[52].mxu0  ;;  %1307 = vadd.xlane.f32.xlu1 %v1306_v61 }
 0x90b   : > { %v3558_v0 = vpop.f32.mrb[53].mxu0  ;;  %v2697_v2 = vsel %vm758_vm1, %v4721_v62, -inf }
 0x90c   : > { %v4725_v7 = vpop.f32.mrb[54].mxu0  ;;  %2698 = vmax.xlane.f32.xlu0 %v2697_v2 }
 0x90d   : > { %v3559_v9 = vpop.f32.mrb[55].mxu0  ;;  %v2700_v11 = vsel %vm758_vm1, %v4725_v7, -inf }
 0x90e   : > { %2701 = vmax.xlane.f32.xlu1 %v2700_v11 }
 0x949   : > { %v1414_v12 = vpop.xlane.xlu0 %1413 }
 0x94a   : > { %v1418_v13 = vsub.f32 %v4623_v23, %v1414_v12 }
 0x94b   : > { %v1417_v14 = vpop.xlane.xlu1 %1416 }
 0x94c   : > { %v1420_v15 = vmul.f32 1.442695, %v1418_v13  ;;  %v1419_v16 = vsub.f32 %v4631_v29, %v1417_v14 }
 0x94e   : > { %3802 = vpow2.f32 %v1420_v15  ;;  %v1422_v17 = vmul.f32 1.442695, %v1419_v16 }
 0x950   : > { %3804 = vpow2.f32 %v1422_v17 }
 0x951   : > { %v1535_v25 = vpop.xlane.xlu0 %1534 }
 0x952   : > { %v1539_v26 = vsub.f32 %v4637_v35, %v1535_v25 }
 0x953   : > { %v1538_v28 = vpop.xlane.xlu1 %1537 }
 0x954   : > { %v1541_v42 = vmul.f32 1.442695, %v1539_v26  ;;  %v1540_v33 = vsub.f32 %v4643_v41, %v1538_v28 }
 0x956   : > { %3806 = vpow2.f32 %v1541_v42  ;;  %v1543_v37 = vmul.f32 1.442695, %v1540_v33 }
 0x958   : > { %v4733_v38 = vpop.eup %3802  ;;  %3808 = vpow2.f32 %v1543_v37 }
 0x959   : > { %v1656_v23 = vpop.xlane.xlu0 %1655  ;;  %v1424_v40 = vsel %vm758_vm1, %v4733_v38, 0.0 }
 0x95a   : > { %v4737_v29 = vpop.eup %3804  ;;  %v1660_v43 = vsub.f32 %v4647_v46, %v1656_v23  ;;  %1425 = vadd.xlane.f32.xlu0 %v1424_v40 }
 0x95b   : > { %v1659_v44 = vpop.xlane.xlu1 %1658  ;;  %v1427_v35 = vsel %vm758_vm1, %v4737_v29, 0.0 }
 0x95c   : > { %v1662_v48 = vmul.f32 1.442695, %v1660_v43  ;;  %v1661_v41 = vsub.f32 %v4651_v50, %v1659_v44  ;;  %1428 = vadd.xlane.f32.xlu1 %v1427_v35 }
 0x95e   : > { %3810 = vpow2.f32 %v1662_v48  ;;  %v1664_v51 = vmul.f32 1.442695, %v1661_v41 }
 0x960   : > { %v4743_v52 = vpop.eup %3806  ;;  %3812 = vpow2.f32 %v1664_v51 }
 0x961   : > { %v1545_v57 = vsel %vm758_vm1, %v4743_v52, 0.0  ;;  %v1851_v2 = vpop.xlane.xlu0 %1850 }
 0x962   : > { %v4747_v39 = vpop.eup %3808  ;;  %1546 = vadd.xlane.f32.xlu0 %v1545_v57  ;;  %v1855_v16 = vsub.f32 %v4655_v53, %v1851_v2 }
 0x963   : > { %v1548_v46 = vsel %vm758_vm1, %v4747_v39, 0.0  ;;  %v1854_v11 = vpop.xlane.xlu1 %1853 }
 0x964   : > { %1549 = vadd.xlane.f32.xlu1 %v1548_v46  ;;  %v1857_v28 = vmul.f32 1.442695, %v1855_v16  ;;  %v1856_v53 = vsub.f32 %v4659_v56, %v1854_v11 }
 0x966   : > { %3814 = vpow2.f32 %v1857_v28  ;;  %v1859_v44 = vmul.f32 1.442695, %v1856_v53 }
 0x968   : > { %v4751_v45 = vpop.eup %3810  ;;  %3816 = vpow2.f32 %v1859_v44 }
 0x969   : > { %v1666_v50 = vsel %vm758_vm1, %v4751_v45, 0.0  ;;  %v1972_v9 = vpop.xlane.xlu0 %1971 }
 0x96a   : > { %v4755_v61 = vpop.eup %3812  ;;  %1667 = vadd.xlane.f32.xlu1 %v1666_v50  ;;  %v1976_v43 = vsub.f32 %v4663_v58, %v1972_v9  ;;  %v1170_v9 = vsel %vm758_vm1, %v4635_v31, -inf }
 0x96b   : > { %v1669_v0 = vsel %vm758_vm1, %v4755_v61, 0.0  ;;  %v1975_v13 = vpop.xlane.xlu1 %1974 }
 0x96c   : > { %v1978_v57 = vmul.f32 1.442695, %v1976_v43  ;;  %v1977_v50 = vsub.f32 %v4667_v60, %v1975_v13 }
 0x96e   : > { %1670 = vadd.xlane.f32.xlu1 %v1669_v0  ;;  %v1980_v2 = vmul.f32 1.442695, %v1977_v50 }
 0x970   : > { %v4784_v41 = vpop.eup %3814 }
 0x971   : > { %v2094_v12 = vpop.xlane.xlu0 %2093  ;;  %v1861_v58 = vsel %vm758_vm1, %v4784_v41, 0.0 }
 0x972   : > { %v4795_v11 = vpop.eup %3816 }
 0x973   : > { %v2097_v15 = vpop.xlane.xlu1 %2096  ;;  %v1864_v60 = vsel %vm758_vm1, %v4795_v11, 0.0 }
 0x978   : > { %1193 = vrot.lane.b32.xlu0 %v4448_v21, %s4106_s7 }
 0x979   : > { %v4761_v14 = vpop.xlane.xlu0 %2214 }
 0x97b   : > { %v2218_v26 = vpop.xlane.xlu1 %2217 }
 0x97f   : > { %1314 = vrot.lane.b32.xlu1 %v4448_v21, %s4107_s23 }
 0x981   : > { %v4766_v17 = vpop.xlane.xlu0 %2335 }
 0x982   : > { %v2340_v25 = vsub.f32 %v4688_v22, %v4766_v17 }
 0x983   : > { %v2339_v42 = vpop.xlane.xlu1 %2338 }
 0x989   : > { %v4770_v33 = vpop.xlane.xlu0 %2456 }
 0x98a   : > { %v2461_v37 = vsub.f32 %v4697_v1, %v4770_v33 }
 0x98b   : > { %v4774_v23 = vpop.xlane.xlu1 %2459 }
 0x98c   : > { %v2462_v40 = vsub.f32 %v4701_v8, %v4774_v23  ;;  %v2463_v22 = vmul.f32 1.442695, %v2461_v37 }
 0x991   : > { %v4780_v35 = vpop.xlane.xlu0 %2577 }
 0x992   : > { %v2582_v48 = vsub.f32 %v4705_v49, %v4780_v35 }
 0x993   : > { %v4786_v51 = vpop.xlane.xlu1 %2580 }
 0x994   : > { %v2583_v46 = vsub.f32 %v4711_v55, %v4786_v51 }
 0x995   : > { %v1305_v56 = vpop.xlane.xlu0 %1304 }
 0x996   : > { %3818 = vrcp.f32 %v1305_v56 }
 0x997   : > { %v1308_v0 = vpop.xlane.xlu1 %1307  ;;  %1862 = vadd.xlane.f32.xlu0 %v1861_v58  ;;  %3820 = vpow2.f32 %v1978_v57 }
 0x998   : > { %3822 = vrcp.f32 %v1308_v0 }
 0x999   : > { %3824 = vpow2.f32 %v1980_v2  ;;  %v2099_v2 = vsub.f32 %v4675_v4, %v2097_v15  ;;  %v4833_v4 = vpop.xlane.xlu0 %2698 }
 0x99b   : > { %1171 = vmax.xlane.f32.xlu0 %v1170_v9 }
 0x9a0   : > { %v3819_v16 = vpop.eup %3818 }
 0x9a1   : > { %v4797_v28 = vpop.eup %3820  ;;  %v4802_v53 = vmul.f32 %v3819_v16, %v4709_v54  ;;  %v1173_v54 = vsel %vm758_vm1, %v4639_v36, -inf  ;;  %v2102_v16 = vmul.f32 1.442695, %v2099_v2 }
 0x9a2   : > { %v3823_v13 = vpop.eup %3822  ;;  %v1982_v44 = vsel %vm758_vm1, %v4797_v28, 0.0 }
 0x9a3   : > { %1865 = vadd.xlane.f32.xlu1 %v1864_v60  ;;  %v4805_v43 = vmul.f32 %v3823_v13, %v4715_v59  ;;  %v4811_v50 = vpop.eup %3824  ;;  %v2098_v59 = vsub.f32 %v4671_v63, %v2094_v12  ;;  %v2219_v60 = vsub.f32 %v4679_v10, %v4761_v14  ;;  %v2220_v63 = vsub.f32 %v4683_v47, %v2218_v26  ;;  %v4839_v10 = vpop.xlane.xlu1 %2701 }
 0x9a4   : > { %v1985_v56 = vsel %vm758_vm1, %v4811_v50, 0.0 }
 0x9a5   : > { %v1313_v57 = vpack.c.bf16 %v4805_v43, %v4802_v53  ;;  %v2100_v58 = vmul.f32 1.442695, %v2098_v59  ;;  %v2221_v13 = vmul.f32 1.442695, %v2219_v60  ;;  %v2223_v12 = vmul.f32 1.442695, %v2220_v63 }
 0x9a7   : > { %1983 = vadd.xlane.f32.xlu1 %v1982_v44  ;;  %3826 = vpow2.f32 %v2100_v58  ;;  %v2341_v44 = vsub.f32 %v4693_v30, %v2339_v42 }
 0x9a8   : > { %3828 = vpow2.f32 %v2102_v16 }
 0x9a9   : > { %3830 = vpow2.f32 %v2221_v13 }
 0x9aa   : > { %3832 = vpow2.f32 %v2223_v12 }
 0x9ab   : > { %1986 = vadd.xlane.f32.xlu1 %v1985_v56  ;;  %v2344_v56 = vmul.f32 1.442695, %v2341_v44 }
 0x9ad   : > { %3834 = vpow2.f32 %v2344_v56 }
 0x9af   : > { %1174 = vmax.xlane.f32.xlu1 %v1173_v54 }
 0x9b1   : > { %1435 = vrot.lane.b32.xlu0 %v4448_v21, %s4108_s15  ;;  %v4822_v0 = vpop.eup %3826 }
 0x9b2   : > { %v2104_v9 = vsel %vm758_vm1, %v4822_v0, 0.0  ;;  %v4831_v54 = vpop.eup %3828 }
 0x9b3   : > { %v2107_v15 = vsel %vm758_vm1, %v4831_v54, 0.0  ;;  %v4837_v59 = vpop.eup %3830 }
 0x9b4   : > { %v2225_v14 = vsel %vm758_vm1, %v4837_v59, 0.0  ;;  %v4843_v30 = vpop.eup %3832 }
 0x9b5   : > { %v2228_v42 = vsel %vm758_vm1, %v4843_v30, 0.0 }
 0x9b7   : > { %v4847_v58 = vpop.eup %3834 }
 0x9c0   : > { %1556 = vrot.lane.b32.xlu1 %v4448_v21, %s4109_s30 }
 0x9d0   : > { %2105 = vadd.xlane.f32.xlu0 %v2104_v9  ;;  %v2349_v9 = vsel %vm758_vm1, %v4847_v58, 0.0 }
 0x9e4   : > { %2108 = vadd.xlane.f32.xlu1 %v2107_v15 }
 0x9e7   : > { %v1426_v47 = vpop.xlane.xlu0 %1425 }
 0x9e8   : > { %3836 = vrcp.f32 %v1426_v47  ;;  %2226 = vadd.xlane.f32.xlu1 %v2225_v14 }
 0x9e9   : > { %v1429_v26 = vpop.xlane.xlu1 %1428 }
 0x9ea   : > { %3838 = vrcp.f32 %v1429_v26 }
 0x9ec   : > { %2229 = vadd.xlane.f32.xlu1 %v2228_v42 }
 0x9ef   : > { %v1547_v2 = vpop.xlane.xlu0 %1546 }
 0x9f0   : > { %3840 = vrcp.f32 %v1547_v2  ;;  %2350 = vadd.xlane.f32.xlu1 %v2349_v9 }
 0x9f1   : > { %v1550_v16 = vpop.xlane.xlu1 %1549 }
 0x9f2   : > { %v3837_v60 = vpop.eup %3836  ;;  %3842 = vrcp.f32 %v1550_v16 }
 0x9f3   : > { %v1194_v13 = vpop.permute.xlu0 %1193  ;;  %v4852_v12 = vmul.f32 %v3837_v60, %v4733_v38 }
 0x9f4   : > { %v3839_v63 = vpop.eup %3838  ;;  %3417 = vmatpush3.bf16.msra.mxu1 %v1194_v13 }
 0x9f5   : > { %v4855_v44 = vmul.f32 %v3839_v63, %v4737_v29  ;;  %3428 = vmatprep.subr.bf16.mxu1 %v4102_v20 }
 0x9f7   : > { %v1668_v56 = vpop.xlane.xlu1 %1667  ;;  %v1434_v15 = vpack.c.bf16 %v4855_v44, %v4852_v12 }
 0x9f8   : > { %3844 = vrcp.f32 %v1668_v56 }
 0x9fa   : > { %v3841_v47 = vpop.eup %3840 }
 0x9fb   : > { %v1671_v14 = vpop.xlane.xlu1 %1670  ;;  %v4861_v42 = vmul.f32 %v3841_v47, %v4743_v52 }
 0x9fc   : > { %v3843_v26 = vpop.eup %3842  ;;  %3846 = vrcp.f32 %v1671_v14 }
 0x9fd   : > { %v4864_v38 = vmul.f32 %v3843_v26, %v4747_v39 }
 0x9ff   : > { %v4877_v47 = vpop.permute.xlu1 %1314 }
 0xa02   : > { %v3845_v2 = vpop.eup %3844 }
 0xa03   : > { %v4869_v16 = vmul.f32 %v3845_v2, %v4751_v45 }
 0xa06   : > { %v3847_v9 = vpop.eup %3846 }
 0xa07   : > { %v4872_v60 = vmul.f32 %v3847_v9, %v4755_v61 }
 0xa09   : > { %v5227_v18 = vpack.c.bf16 %v4872_v60, %v4869_v16 }
 0xa24   : > { %v1863_v63 = vpop.xlane.xlu0 %1862 }
 0xa28   : > { %v1172_v52 = vpop.xlane.xlu0 %1171 }
 0xa29   : > { %v1176_v56 = vsub.f32 %v4635_v31, %v1172_v52 }
 0xa2b   : > { %v1178_v39 = vmul.f32 1.442695, %v1176_v56 }
 0xa2d   : > { %3848 = vpow2.f32 %v1178_v39 }
 0xa2e   : > { %3850 = vrcp.f32 %v1863_v63 }
 0xa30   : > { %v1866_v14 = vpop.xlane.xlu1 %1865 }
 0xa31   : > { %3852 = vrcp.f32 %v1866_v14 }
 0xa34   : > { %v1984_v26 = vpop.xlane.xlu1 %1983 }
 0xa35   : > { %3854 = vrcp.f32 %v1984_v26 }
 0xa37   : > { %v4879_v45 = vpop.eup %3848 }
 0xa38   : > { %v1987_v61 = vpop.xlane.xlu1 %1986  ;;  %v1182_v2 = vsel %vm758_vm1, %v4879_v45, 0.0  ;;  %v3851_v9 = vpop.eup %3850 }
 0xa39   : > { %3856 = vrcp.f32 %v1987_v61  ;;  %1183 = vadd.xlane.f32.xlu0 %v1182_v2  ;;  %v4884_v31 = vmul.f32 %v3851_v9, %v4784_v41 }
 0xa3b   : > { %v3853_v13 = vpop.eup %3852 }
 0xa3c   : > { %v4887_v52 = vmul.f32 %v3853_v13, %v4795_v11  ;;  %v1175_v63 = vpop.xlane.xlu1 %1174 }
 0xa3d   : > { %v1177_v56 = vsub.f32 %v4639_v36, %v1175_v63 }
 0xa3e   : > { %v1871_v39 = vpack.c.bf16 %v4887_v52, %v4884_v31 }
 0xa3f   : > { %v1180_v14 = vmul.f32 1.442695, %v1177_v56  ;;  %v3855_v26 = vpop.eup %3854 }
 0xa40   : > { %v4893_v61 = vmul.f32 %v3855_v26, %v4797_v28  ;;  %v2342_v28 = vmul.f32 1.442695, %v2340_v25  ;;  %v4916_v13 = vpop.permute.xlu1 %1556  ;;  %v2586_v25 = vmul.f32 1.442695, %v2583_v46  ;;  %v2584_v26 = vmul.f32 1.442695, %v2582_v48 }
 0xa41   : > { %3858 = vpow2.f32 %v1180_v14 }
 0xa42   : > { %3860 = vpow2.f32 %v2342_v28  ;;  %v2703_v28 = vsub.f32 %v4721_v62, %v4833_v4  ;;  %v1436_v62 = vpop.permute.xlu0 %1435 }
 0xa43   : > { %v3857_v29 = vpop.eup %3856 }
 0xa44   : > { %v4896_v2 = vmul.f32 %v3857_v29, %v4811_v50  ;;  %v2465_v50 = vmul.f32 1.442695, %v2462_v40  ;;  %v2705_v49 = vmul.f32 1.442695, %v2703_v28 }
 0xa46   : > { %v1992_v41 = vpack.c.bf16 %v4896_v2, %v4893_v61  ;;  %3862 = vpow2.f32 %v2465_v50 }
 0xa47   : > { %3864 = vpow2.f32 %v2463_v22 }
 0xa48   : > { %3866 = vpow2.f32 %v2586_v25 }
 0xa4b   : > { %v4900_v11 = vpop.eup %3858 }
 0xa4c   : > { %v1185_v36 = vsel %vm758_vm1, %v4900_v11, 0.0  ;;  %v4914_v29 = vpop.eup %3860 }
 0xa4d   : > { %1186 = vadd.xlane.f32.xlu1 %v1185_v36 }
 0xa4f   : > { %1677 = vrot.lane.b32.xlu0 %v4448_v21, %s4110_s27  ;;  %v2346_v21 = vsel %vm758_vm1, %v4914_v29, 0.0 }
 0xa50   : > { %v4920_v9 = vpop.eup %3862 }
 0xa51   : > { %v2470_v8 = vsel %vm758_vm1, %v4920_v9, 0.0  ;;  %v4932_v63 = vpop.eup %3864 }
 0xa52   : > { %v4934_v1 = vpop.eup %3866  ;;  %v2467_v33 = vsel %vm758_vm1, %v4932_v63, 0.0 }
 0xa53   : > { %v2591_v51 = vsel %vm758_vm1, %v4934_v1, 0.0 }
 0xa5d   : > { %v2106_v4 = vpop.xlane.xlu0 %2105 }
 0xa5e   : > { %1994 = vrot.lane.b32.xlu1 %v4446_v19, %s4104_s21 }
 0xa6e   : > { %2347 = vadd.xlane.f32.xlu0 %v2346_v21 }
 0xa71   : > { %v4925_v17 = vpop.xlane.xlu1 %2108 }
 0xa72   : > { %2471 = vadd.xlane.f32.xlu0 %v2470_v8 }
 0xa75   : > { %v2227_v23 = vpop.xlane.xlu1 %2226 }
 0xa76   : > { %3868 = vrcp.f32 %v2227_v23 }
 0xa79   : > { %v2230_v40 = vpop.xlane.xlu1 %2229 }
 0xa7a   : > { %3870 = vrcp.f32 %v2230_v40 }
 0xa7b   : > { %3872 = vpow2.f32 %v2584_v26 }
 0xa80   : > { %v3869_v37 = vpop.eup %3868 }
 0xa81   : > { %v4939_v14 = vmul.f32 %v3869_v37, %v4837_v59  ;;  %v2704_v59 = vsub.f32 %v4725_v7, %v4839_v10  ;;  %v2351_v10 = vpop.xlane.xlu1 %2350 }
 0xa82   : > { %2468 = vadd.xlane.f32.xlu1 %v2467_v33 }
 0xa84   : > { %v3871_v56 = vpop.eup %3870 }
 0xa85   : > { %v4942_v55 = vmul.f32 %v3871_v56, %v4843_v30  ;;  %v2707_v30 = vmul.f32 1.442695, %v2704_v59  ;;  %v4957_v36 = vpop.eup %3872 }
 0xa86   : > { %2592 = vadd.xlane.f32.xlu1 %v2591_v51  ;;  %v2588_v50 = vsel %vm758_vm1, %v4957_v36, 0.0 }
 0xa87   : > { %v2235_v46 = vpack.c.bf16 %v4942_v55, %v4939_v14  ;;  %3874 = vpow2.f32 %v2707_v30 }
 0xa88   : > { %2115 = vrot.lane.b32.xlu0 %v4446_v19, %s4105_s12  ;;  %3876 = vpow2.f32 %v2705_v49 }
 0xa91   : > { %v4963_v21 = vpop.eup %3874 }
 0xa92   : > { %v2712_v7 = vsel %vm758_vm1, %v4963_v21, 0.0  ;;  %v4967_v35 = vpop.eup %3876 }
 0xa93   : > { %v2709_v48 = vsel %vm758_vm1, %v4967_v35, 0.0 }
 0xa97   : > { %2236 = vrot.lane.b32.xlu1 %v4446_v19, %s4106_s7 }
 0xaa7   : > { %2589 = vadd.xlane.f32.xlu0 %v2588_v50 }
 0xaab   : > { %2713 = vadd.xlane.f32.xlu0 %v2712_v7 }
 0xabb   : > { %2710 = vadd.xlane.f32.xlu1 %v2709_v48 }
 0xac1   : > { %2357 = vrot.lane.b32.xlu0 %v4446_v19, %s4107_s23 }
 0xac5   : > { %2478 = vrot.lane.b32.xlu0 %v4446_v19, %s4108_s15 }
 0xac6   : > { %v1184_v22 = vpop.xlane.xlu0 %1183 }
 0xac7   : > { %3878 = vrcp.f32 %v1184_v22 }
 0xac9   : > { %2720 = vrot.lane.b32.xlu0 %v4446_v19, %s4110_s27 }
 0xaca   : > { %v1678_v5 = vpop.permute.xlu0 %1677 }
 0xacc   : > { %2599 = vrot.lane.b32.xlu1 %v4446_v19, %s4109_s30 }
 0xacd   : > { %3667 = vrot.lane.b32.xlu0 %v3666_v6, %s4110_s27  ;;  %v5226_v6 = vpack.c.bf16 %v4864_v38, %v4861_v42 }
 0xad1   : > { %3672 = vrot.lane.b32.xlu0 %v3671_v27, %s4109_s30  ;;  %v3879_v25 = vpop.eup %3878 }
 0xad2   : > { %v1190_v40 = vmul.f32 %v3879_v25, %v4879_v45 }
 0xada   : > { %v1187_v8 = vpop.xlane.xlu1 %1186 }
 0xadb   : > { %3880 = vrcp.f32 %v1187_v8 }
 0xadc   : > { %3882 = vrcp.f32 %v4925_v17 }
 0xadd   : > { %3884 = vrcp.f32 %v2106_v4 }
 0xade   : > { %v1995_v27 = vpop.permute.xlu1 %1994 }
 0xae5   : > { %v3881_v23 = vpop.eup %3880 }
 0xae6   : > { %v1191_v33 = vmul.f32 %v3881_v23, %v4900_v11  ;;  %v3883_v43 = vpop.eup %3882 }
 0xae7   : > { %v3885_v12 = vpop.eup %3884  ;;  %v2113_v44 = vmul.f32 %v3883_v43, %v4831_v54 }
 0xae8   : > { %v1192_v3 = vpack.c.bf16 %v1191_v33, %v1190_v40  ;;  %v2112_v42 = vmul.f32 %v3885_v12, %v4822_v0 }
 0xaea   : > { %3419 = vmatmul.mubr.msk.bf16.vlgmr.msra.gmra.mrb[32].mxu1 %vm758_vm1, %v1192_v3  ;;  %v2114_v38 = vpack.c.bf16 %v2113_v44, %v2112_v42 }
 0xaeb   : > { %3429 = vmatpush3.bf16.msra.mxu1 %v4877_v47  ;;  %3430 = vmatprep.mubr.msk.bf16.mxu1 %vm4103_vm0, %v4102_v20 }
 0xaec   : > { %3440 = vmatprep.subr.bf16.mxu1 %v4102_v20 }
 0xaf2   : > { %3431 = vmatmul.mubr.msk.bf16.vlgmr.msra.gmra.mrb[36].mxu1 %vm758_vm1, %v1313_v57 }
 0xaf3   : > { %3441 = vmatpush3.bf16.msra.mxu1 %v1436_v62  ;;  %3442 = vmatprep.mubr.msk.bf16.mxu1 %vm4103_vm0, %v4102_v20 }
 0xaf4   : > { %3452 = vmatprep.subr.bf16.mxu1 %v4102_v20 }
 0xafa   : > { %3443 = vmatmul.mubr.msk.bf16.vlgmr.msra.gmra.mrb[40].mxu1 %vm758_vm1, %v1434_v15 }
 0xafb   : > { %3453 = vmatpush3.bf16.msra.mxu1 %v4916_v13  ;;  %3454 = vmatprep.mubr.msk.bf16.mxu1 %vm4103_vm0, %v4102_v20  ;;  %v2348_v24 = vpop.xlane.xlu0 %2347 }
 0xafc   : > { %3464 = vmatprep.subr.bf16.mxu1 %v4102_v20  ;;  %3886 = vrcp.f32 %v2348_v24 }
 0xafd   : > { %3888 = vrcp.f32 %v2351_v10 }
 0xb02   : > { %3455 = vmatmul.mubr.msk.bf16.vlgmr.msra.gmra.mrb[44].mxu1 %vm758_vm1, %v5226_v6 }
 0xb03   : > { %3465 = vmatpush3.bf16.msra.mxu1 %v1678_v5  ;;  %3466 = vmatprep.mubr.msk.bf16.mxu1 %vm4103_vm0, %v4102_v20 }
 0xb04   : > { %3476 = vmatprep.subr.bf16.mxu1 %v4102_v20 }
 0xb06   : > { %v3887_v54 = vpop.eup %3886 }
 0xb07   : > { %v3889_v47 = vpop.eup %3888  ;;  %v2354_v45 = vmul.f32 %v3887_v54, %v4914_v29 }
 0xb08   : > { %v2355_v31 = vmul.f32 %v3889_v47, %v4847_v58 }
 0xb0a   : > { %3467 = vmatmul.mubr.msk.bf16.vlgmr.msra.gmra.mrb[48].mxu1 %vm758_vm1, %v5227_v18 }
 0xb0b   : > { %3477 = vmatpush3.bf16.msra.mxu1 %v4446_v19  ;;  %3478 = vmatprep.mubr.msk.bf16.mxu1 %vm4103_vm0, %v4102_v20  ;;  %v2472_v19 = vpop.xlane.xlu0 %2471 }
 0xb0c   : > { %3488 = vmatprep.subr.bf16.mxu1 %v4102_v20 }
 0xb0f   : > { %v2469_v53 = vpop.xlane.xlu1 %2468  ;;  %v2116_v57 = vpop.permute.xlu0 %2115 }
 0xb10   : > { %3890 = vrcp.f32 %v2469_v53 }
 0xb11   : > { %3892 = vrcp.f32 %v2472_v19 }
 0xb12   : > { %3479 = vmatmul.mubr.msk.bf16.vlgmr.msra.gmra.mrb[52].mxu1 %vm758_vm1, %v1871_v39  ;;  %v2356_v39 = vpack.c.bf16 %v2355_v31, %v2354_v45 }
 0xb13   : > { %3489 = vmatpush3.bf16.msra.mxu1 %v1995_v27  ;;  %3490 = vmatprep.mubr.msk.bf16.mxu1 %vm4103_vm0, %v4102_v20  ;;  %v2593_v15 = vpop.xlane.xlu1 %2592 }
 0xb14   : > { %3500 = vmatprep.subr.bf16.mxu1 %v4102_v20 }
 0xb17   : > { %v2237_v16 = vpop.permute.xlu1 %2236 }
 0xb1a   : > { %3491 = vmatmul.mubr.msk.bf16.vlgmr.msra.gmra.mrb[56].mxu1 %vm758_vm1, %v1992_v41  ;;  %v3891_v61 = vpop.eup %3890 }
 0xb1b   : > { %3501 = vmatpush3.bf16.msra.mxu1 %v2116_v57  ;;  %3502 = vmatprep.mubr.msk.bf16.mxu1 %vm4103_vm0, %v4102_v20  ;;  %v3893_v41 = vpop.eup %3892  ;;  %v2475_v11 = vmul.f32 %v3891_v61, %v4932_v63 }
 0xb1c   : > { %3512 = vmatprep.subr.bf16.mxu1 %v4102_v20  ;;  %v2476_v58 = vmul.f32 %v3893_v41, %v4920_v9  ;;  %v3767_v41 = vld [vmem:[#allocation8 + $0xc8] sm:$0xff]  }
 0xb1e   : > { %v2477_v29 = vpack.c.bf16 %v2476_v58, %v2475_v11  ;;  %v3768_v11 = vld [vmem:[#allocation8 + $0xd0] sm:$0xff]  }
 0xb22   : > { %3503 = vmatmul.mubr.msk.bf16.vlgmr.msra.gmra.mrb[60].mxu1 %vm758_vm1, %v2114_v38 }
 0xb23   : > { %3513 = vmatpush3.bf16.msra.mxu1 %v2237_v16  ;;  %3514 = vmatprep.mubr.msk.bf16.mxu1 %vm4103_vm0, %v4102_v20 }
 0xb24   : > { %3524 = vmatprep.subr.bf16.mxu1 %v4102_v20 }
 0xb2a   : > { %3515 = vmatmul.mubr.msk.bf16.vlgmr.msra.gmra.mrb[64].mxu1 %vm758_vm1, %v2235_v46 }
 0xb2b   : > { %3526 = vmatprep.mubr.msk.bf16.mxu1 %vm4103_vm0, %v4102_v20 }
 0xb34   : > { %v2590_v0 = vpop.xlane.xlu0 %2589 }
 0xb35   : > { %3894 = vrcp.f32 %v2590_v0 }
 0xb36   : > { %3896 = vrcp.f32 %v2593_v15 }
 0xb38   : > { %v2714_v60 = vpop.xlane.xlu0 %2713 }
 0xb39   : > { %3898 = vrcp.f32 %v2714_v60  ;;  %v3766_v60 = vld [vmem:[#allocation8 + $0xc0] sm:$0xff]  }
 0xb3a   : > { %3566 = vmatprep.subr.bf16.mxu0 %v3766_v60 }
 0xb3b   : > { %3567 = vmatpush3.bf16.msra.mxu0 %v3766_v60 }
 0xb3c   : > { %v2358_v52 = vpop.permute.xlu0 %2357  ;;  %3568 = vmatprep.subr.bf16.mxu0 %v3767_v41 }
 0xb3d   : > { %3525 = vmatpush3.bf16.msra.mxu1 %v2358_v52 }
 0xb3e   : > { %3536 = vmatprep.subr.bf16.mxu1 %v4102_v20 }
 0xb3f   : > { %v3895_v13 = vpop.eup %3894  ;;  %3569 = vmatpush3.bf16.msra.mxu0 %v3767_v41 }
 0xb40   : > { %v2479_v2 = vpop.permute.xlu0 %2478  ;;  %3527 = vmatmul.mubr.msk.bf16.vlgmr.msra.gmra.mrb[68].mxu1 %vm758_vm1, %v2356_v39  ;;  %v3897_v37 = vpop.eup %3896  ;;  %v2596_v56 = vmul.f32 %v3895_v13, %v4957_v36  ;;  %3570 = vmatprep.subr.bf16.mxu0 %v3768_v11 }
 0xb41   : > { %3537 = vmatpush3.bf16.msra.mxu1 %v2479_v2  ;;  %3538 = vmatprep.mubr.msk.bf16.mxu1 %vm4103_vm0, %v4102_v20  ;;  %v2597_v14 = vmul.f32 %v3897_v37, %v4934_v1  ;;  %v3770_v37 = vld [vmem:[#allocation8 + $0xe0] sm:$0xff]  }
 0xb42   : > { %3548 = vmatprep.subr.bf16.mxu1 %v4102_v20 }
 0xb43   : > { %v2598_v55 = vpack.c.bf16 %v2597_v14, %v2596_v56  ;;  %v3899_v51 = vpop.eup %3898  ;;  %3571 = vmatpush3.bf16.msra.mxu0 %v3768_v11 }
 0xb44   : > { %v2721_v9 = vpop.permute.xlu0 %2720  ;;  %v2718_v26 = vmul.f32 %v3899_v51, %v4963_v21 }
 0xb48   : > { %3539 = vmatmul.mubr.msk.bf16.vlgmr.msra.gmra.mrb[72].mxu1 %vm758_vm1, %v2477_v29  ;;  %v2711_v17 = vpop.xlane.xlu1 %2710  ;;  %v3769_v29 = vld [vmem:[#allocation8 + $0xd8] sm:$0xff]  }
 0xb49   : > { %3900 = vrcp.f32 %v2711_v17  ;;  %3550 = vmatprep.mubr.msk.bf16.mxu1 %vm4103_vm0, %v4102_v20  ;;  %3572 = vmatprep.subr.bf16.mxu0 %v3769_v29 }
 0xb4a   : > { %3573 = vmatpush3.bf16.msra.mxu0 %v3769_v29 }
 0xb4b   : > { %3574 = vmatprep.subr.bf16.mxu0 %v3770_v37 }
 0xb4c   : > { %v2600_v63 = vpop.permute.xlu1 %2599 }
 0xb4d   : > { %3549 = vmatpush3.bf16.msra.mxu1 %v2600_v63 }
 0xb4e   : > { %3560 = vmatprep.subr.bf16.mxu1 %v4102_v20  ;;  %3575 = vmatpush3.bf16.msra.mxu0 %v3770_v37 }
 0xb50   : > { %3551 = vmatmul.mubr.msk.bf16.vlgmr.msra.gmra.mrb[76].mxu1 %vm758_vm1, %v2598_v55  ;;  %v3771_v55 = vld [vmem:[#allocation8 + $0xe8] sm:$0xff]  }
 0xb51   : > { %3561 = vmatpush3.bf16.msra.mxu1 %v2721_v9  ;;  %3562 = vmatprep.mubr.msk.bf16.mxu1 %vm4103_vm0, %v4102_v20 }
 0xb52   : > { %3576 = vmatprep.subr.bf16.mxu0 %v3771_v55 }
 0xb53   : > { %v3901_v46 = vpop.eup %3900  ;;  %3577 = vmatpush3.bf16.msra.mxu0 %v3771_v55 }
 0xb54   : > { %v2717_v59 = vmul.f32 %v3901_v46, %v4967_v35  ;;  %v3772_v46 = vld [vmem:[#allocation8 + $0xf0] sm:$0xff]  }
 0xb55   : > { %3578 = vmatprep.subr.bf16.mxu0 %v3772_v46 }
 0xb56   : > { %v2719_v30 = vpack.c.bf16 %v2718_v26, %v2717_v59 }
 0xb57   : > { %3579 = vmatpush3.bf16.msra.mxu0 %v3772_v46 }
 0xb58   : > { %3563 = vmatmul.mubr.msk.bf16.vlgmr.msra.gmra.mrb[80].mxu1 %vm758_vm1, %v2719_v30 }
 0xbbd   : > { %v1233_v1 = vpop.f32.mrb[32].mxu1 }
 0xbbe   : > { %v3420_v36 = vpop.f32.mrb[33].mxu1 }
 0xbbf   : > { %v1236_v28 = vpop.f32.mrb[34].mxu1 }
 0xbc0   : > { %v3676_v50 = vpack.i.bf16 %v1236_v28, %v1233_v1  ;;  %v3421_v49 = vpop.f32.mrb[35].mxu1  ;;  %v3773_v1 = vld [vmem:[#allocation8 + $0xf8] sm:$0xff]  }
 0xbc1   : > { %3580 = vmatprep.subr.bf16.mxu0 %v3773_v1 }
 0xbc2   : > { %3677 = vrot.lane.b32.xlu1 %v3676_v50, %s4108_s15  ;;  %3581 = vmatpush3.bf16.msra.mxu0 %v3773_v1 }
 0xbc5   : > { %v1354_v7 = vpop.f32.mrb[36].mxu1 }
 0xbc6   : > { %v3432_v48 = vpop.f32.mrb[37].mxu1 }
 0xbc7   : > { %v1357_v62 = vpop.f32.mrb[38].mxu1 }
 0xbc8   : > { %v3681_v4 = vpack.i.bf16 %v1357_v62, %v1354_v7  ;;  %v3433_v20 = vpop.f32.mrb[39].mxu1 }
 0xbca   : > { %3682 = vrot.lane.b32.xlu1 %v3681_v4, %s4107_s23 }
 0xbcd   : > { %v1475_v21 = vpop.f32.mrb[40].mxu1 }
 0xbce   : > { %v3444_v10 = vpop.f32.mrb[41].mxu1 }
 0xbcf   : > { %v1478_v35 = vpop.f32.mrb[42].mxu1  ;;  %v3668_v10 = vpop.permute.xlu0 %3667 }
 0xbd0   : > { %v3686_v22 = vpack.i.bf16 %v1478_v35, %v1475_v21  ;;  %v3445_v8 = vpop.f32.mrb[43].mxu1 }
 0xbd1   : > { %v3670_v8 = vunpack.i.h.bf16 %v3668_v10 }
 0xbd2   : > { %3687 = vrot.lane.b32.xlu1 %v3686_v22, %s4106_s7 }
 0xbd3   : > { %v3673_v22 = vpop.permute.xlu0 %3672 }
 0xbd5   : > { %v1596_v25 = vpop.f32.mrb[44].mxu1 }
 0xbd6   : > { %v3456_v23 = vpop.f32.mrb[45].mxu1 }
 0xbd7   : > { %v1599_v40 = vpop.f32.mrb[46].mxu1  ;;  %v3669_v23 = vunpack.i.l.bf16 %v3668_v10 }
 0xbd8   : > { %v3691_v33 = vpack.i.bf16 %v1599_v40, %v1596_v25  ;;  %v3457_v3 = vpop.f32.mrb[47].mxu1  ;;  %v3674_v40 = vunpack.i.l.bf16 %v3673_v22 }
 0xbd9   : > { %v1781_v3 = vsel %vm758_vm1, %v4464_v34, %v3670_v8 }
 0xbda   : > { %3692 = vrot.lane.b32.xlu1 %v3691_v33, %s4105_s12  ;;  %v3675_v33 = vunpack.i.h.bf16 %v3673_v22 }
 0xbdd   : > { %v1717_v5 = vpop.f32.mrb[48].mxu1 }
 0xbde   : > { %v3468_v6 = vpop.f32.mrb[49].mxu1 }
 0xbdf   : > { %v1720_v18 = vpop.f32.mrb[50].mxu1 }
 0xbe0   : > { %v3696_v24 = vpack.i.bf16 %v1720_v18, %v1717_v5  ;;  %v3469_v27 = vpop.f32.mrb[51].mxu1 }
 0xbe2   : > { %3697 = vrot.lane.b32.xlu1 %v3696_v24, %s4104_s21  ;;  %v1780_v24 = vsel %vm758_vm1, %v4462_v32, %v3669_v23 }
 0xbe5   : > { %v5077_v19 = vpop.f32.mrb[52].mxu1 }
 0xbe6   : > { %v3480_v53 = vpop.f32.mrb[53].mxu1 }
 0xbe7   : > { %v5079_v43 = vpop.f32.mrb[54].mxu1 }
 0xbe8   : > { %v3481_v57 = vpop.f32.mrb[55].mxu1 }
 0xbe9   : > { %v1783_v57 = vsel %vm1782_vm2, %v1780_v24, %v3674_v40 }
 0xbed   : > { %v2034_v12 = vpop.f32.mrb[56].mxu1 }
 0xbee   : > { %v3492_v44 = vpop.f32.mrb[57].mxu1 }
 0xbef   : > { %v2037_v15 = vpop.f32.mrb[58].mxu1 }
 0xbf0   : > { %v3701_v42 = vpack.i.bf16 %v2037_v15, %v2034_v12  ;;  %v3493_v38 = vpop.f32.mrb[59].mxu1  ;;  %v1784_v15 = vsel %vm1782_vm2, %v1781_v3, %v3675_v33  ;;  %v3192_v33 = vld [vmem:[%s5178_s4 + $0x3] ss:$0 sm:$0xff] }
 0xbf2   : > { %3702 = vrot.lane.b32.xlu0 %v3701_v42, %s4110_s27 }
 0xbf5   : > { %v2155_v16 = vpop.f32.mrb[60].mxu1 }
 0xbf6   : > { %v3504_v0 = vpop.f32.mrb[61].mxu1 }
 0xbf7   : > { %v2158_v54 = vpop.f32.mrb[62].mxu1 }
 0xbf8   : > { %v3706_v47 = vpack.i.bf16 %v2158_v54, %v2155_v16  ;;  %v3505_v45 = vpop.f32.mrb[63].mxu1 }
 0xbfa   : > { %3707 = vrot.lane.b32.xlu0 %v3706_v47, %s4109_s30 }
 0xbfd   : > { %v2276_v31 = vpop.f32.mrb[64].mxu1 }
 0xbfe   : > { %v3516_v52 = vpop.f32.mrb[65].mxu1 }
 0xbff   : > { %v2279_v39 = vpop.f32.mrb[66].mxu1 }
 0xc00   : > { %v3711_v61 = vpack.i.bf16 %v2279_v39, %v2276_v31  ;;  %v3517_v2 = vpop.f32.mrb[67].mxu1 }
 0xc02   : > { %3712 = vrot.lane.b32.xlu0 %v3711_v61, %s4108_s15 }
 0xc13   : > { %v2397_v58 = vpop.f32.mrb[68].mxu1 }
 0xc14   : > { %v3528_v13 = vpop.f32.mrb[69].mxu1 }
 0xc15   : > { %v2400_v17 = vpop.f32.mrb[70].mxu1 }
 0xc16   : > { %v3716_v56 = vpack.i.bf16 %v2400_v17, %v2397_v58  ;;  %v3529_v14 = vpop.f32.mrb[71].mxu1 }
 0xc18   : > { %3717 = vrot.lane.b32.xlu0 %v3716_v56, %s4107_s23 }
 0xc1b   : > { %v2518_v63 = vpop.f32.mrb[72].mxu1 }
 0xc1c   : > { %v3540_v9 = vpop.f32.mrb[73].mxu1 }
 0xc1d   : > { %v2521_v51 = vpop.f32.mrb[74].mxu1 }
 0xc1e   : > { %v3721_v26 = vpack.i.bf16 %v2521_v51, %v2518_v63  ;;  %v3541_v59 = vpop.f32.mrb[75].mxu1 }
 0xc20   : > { %3722 = vrot.lane.b32.xlu0 %v3721_v26, %s4106_s7 }
 0xc23   : > { %v2639_v30 = vpop.f32.mrb[76].mxu1 }
 0xc24   : > { %v3552_v36 = vpop.f32.mrb[77].mxu1 }
 0xc25   : > { %v2642_v28 = vpop.f32.mrb[78].mxu1 }
 0xc26   : > { %v3726_v50 = vpack.i.bf16 %v2642_v28, %v2639_v30  ;;  %v3553_v49 = vpop.f32.mrb[79].mxu1 }
 0xc28   : > { %3727 = vrot.lane.b32.xlu0 %v3726_v50, %s4105_s12 }
 0xc2b   : > { %v2760_v7 = vpop.f32.mrb[80].mxu1 }
 0xc2c   : > { %v3564_v48 = vpop.f32.mrb[81].mxu1 }
 0xc2d   : > { %v2763_v62 = vpop.f32.mrb[82].mxu1 }
 0xc2e   : > { %v3731_v4 = vpack.i.bf16 %v2763_v62, %v2760_v7  ;;  %v3565_v20 = vpop.f32.mrb[83].mxu1 }
 0xc30   : > { %3732 = vrot.lane.b32.xlu1 %v3731_v4, %s4104_s21 }
 0xc34   : > { %v3678_v21 = vpop.permute.xlu1 %3677 }
 0xc35   : > { %v3680_v5 = vunpack.i.h.bf16 %v3678_v21  ;;  %v3679_v6 = vunpack.i.l.bf16 %v3678_v21 }
 0xc37   : > { %v1787_v34 = vsel %vm1785_vm3, %v1784_v15, %v3680_v5  ;;  %v1786_v16 = vsel %vm1785_vm3, %v1783_v57, %v3679_v6 }
 0xc3c   : > { %v3683_v35 = vpop.permute.xlu1 %3682 }
 0xc3d   : > { %v3685_v27 = vunpack.i.h.bf16 %v3683_v35  ;;  %v3684_v53 = vunpack.i.l.bf16 %v3683_v35 }
 0xc3f   : > { %v1790_v32 = vsel %vm1788_vm4, %v1787_v34, %v3685_v27  ;;  %v1789_v0 = vsel %vm1788_vm4, %v1786_v16, %v3684_v53 }
 0xc44   : > { %v3688_v25 = vpop.permute.xlu1 %3687 }
 0xc45   : > { %v3690_v12 = vunpack.i.h.bf16 %v3688_v25  ;;  %v3689_v44 = vunpack.i.l.bf16 %v3688_v25 }
 0xc47   : > { %v1793_v60 = vsel %vm1791_vm5, %v1790_v32, %v3690_v12  ;;  %v1792_v47 = vsel %vm1791_vm5, %v1789_v0, %v3689_v44 }
 0xc4c   : > { %v3693_v18 = vpop.permute.xlu1 %3692 }
 0xc4d   : > { %v3695_v42 = vunpack.i.h.bf16 %v3693_v18  ;;  %v3694_v38 = vunpack.i.l.bf16 %v3693_v18 }
 0xc4f   : > { %v1796_v52 = vsel %vm1794_vm6, %v1793_v60, %v3695_v42  ;;  %v1795_v39 = vsel %vm1794_vm6, %v1792_v47, %v3694_v38 }
 0xc54   : > { %v3698_v54 = vpop.permute.xlu1 %3697 }
 0xc55   : > { %v3700_v45 = vunpack.i.h.bf16 %v3698_v54  ;;  %v3699_v31 = vunpack.i.l.bf16 %v3698_v54 }
 0xc57   : > { %v1798_v61 = vsel %vm1797_vm7, %v1795_v39, %v3699_v31  ;;  %v1799_v2 = vsel %vm1797_vm7, %v1796_v52, %v3700_v45 }
 0xc58   : > { %v2837_v41 = vpack.c.bf16 %v1799_v2, %v1798_v61 }
 0xc5a   : > { %3582 = vmatprep.mubr.bf16.mxu0 %v2837_v41 }
 0xc64   : > { %v3703_v11 = vpop.permute.xlu0 %3702 }
 0xc65   : > { %v3705_v29 = vunpack.i.h.bf16 %v3703_v11  ;;  %v3704_v13 = vunpack.i.l.bf16 %v3703_v11 }
 0xc67   : > { %v2824_v14 = vsel %vm758_vm1, %v5079_v43, %v3705_v29  ;;  %v2823_v63 = vsel %vm758_vm1, %v5077_v19, %v3704_v13 }
 0xc6c   : > { %v3708_v58 = vpop.permute.xlu0 %3707 }
 0xc6d   : > { %v3710_v17 = vunpack.i.h.bf16 %v3708_v58  ;;  %v3709_v37 = vunpack.i.l.bf16 %v3708_v58 }
 0xc6f   : > { %v2826_v51 = vsel %vm1782_vm2, %v2824_v14, %v3710_v17  ;;  %v2825_v46 = vsel %vm1782_vm2, %v2823_v63, %v3709_v37 }
 0xc74   : > { %v3713_v56 = vpop.permute.xlu0 %3712 }
 0xc75   : > { %v3715_v55 = vunpack.i.h.bf16 %v3713_v56  ;;  %v3714_v9 = vunpack.i.l.bf16 %v3713_v56 }
 0xc77   : > { %v2828_v26 = vsel %vm1785_vm3, %v2826_v51, %v3715_v55  ;;  %v2827_v59 = vsel %vm1785_vm3, %v2825_v46, %v3714_v9 }
 0xc8a   : > { %v3718_v30 = vpop.permute.xlu0 %3717 }
 0xc8b   : > { %v3720_v28 = vunpack.i.h.bf16 %v3718_v30  ;;  %v3719_v50 = vunpack.i.l.bf16 %v3718_v30 }
 0xc8d   : > { %v2830_v48 = vsel %vm1788_vm4, %v2828_v26, %v3720_v28  ;;  %v2829_v62 = vsel %vm1788_vm4, %v2827_v59, %v3719_v50 }
 0xc92   : > { %v3723_v1 = vpop.permute.xlu0 %3722 }
 0xc93   : > { %v3725_v49 = vunpack.i.h.bf16 %v3723_v1  ;;  %v3724_v43 = vunpack.i.l.bf16 %v3723_v1 }
 0xc95   : > { %v2832_v20 = vsel %vm1791_vm5, %v2830_v48, %v3725_v49  ;;  %v2831_v21 = vsel %vm1791_vm5, %v2829_v62, %v3724_v43 }
 0xc9a   : > { %v3728_v36 = vpop.permute.xlu0 %3727 }
 0xc9b   : > { %v3730_v7 = vunpack.i.h.bf16 %v3728_v36  ;;  %v3729_v19 = vunpack.i.l.bf16 %v3728_v36 }
 0xc9d   : > { %v2834_v22 = vsel %vm1794_vm6, %v2832_v20, %v3730_v7  ;;  %v2833_v8 = vsel %vm1794_vm6, %v2831_v21, %v3729_v19 }
 0xca2   : > { %v3733_v4 = vpop.permute.xlu1 %3732 }
 0xca3   : > { %v3735_v10 = vunpack.i.h.bf16 %v3733_v4  ;;  %v3734_v35 = vunpack.i.l.bf16 %v3733_v4 }
 0xca5   : > { %v2836_v25 = vsel %vm1797_vm7, %v2834_v22, %v3735_v10  ;;  %v2835_v23 = vsel %vm1797_vm7, %v2833_v8, %v3734_v35 }
 0xca6   : > { %v2838_v40 = vpack.c.bf16 %v2836_v25, %v2835_v23 }
 0xca8   : > { %3583 = vmatmul.mubr.bf16.vlgmr.msra.gmra.mrb[56].mxu0 %v2838_v40 }
 0xd7b   : > { %v3584_v3 = vpop.f32.mrb[56].mxu0 }
 0xd7c   : > { %v2955_v5 = vadd.f32 %v3584_v3, %v3192_v33  ;;  %v2946_v6 = vpop.f32.mrb[57].mxu0 }
 0xd7d   : > { %v2947_v18 = vadd.f32 %v3192_v33, %v2946_v6  ;;  %v3585_v24 = vpop.f32.mrb[58].mxu0 }
 0xd7e   : > { %2963 = vst [vmem:[%s334_s22 + $0x10] sm:$0xff] %v2955_v5  ;;  %v2958_v27 = vadd.f32 %v3585_v24, %v3192_v33  ;;  %v2949_v53 = vpop.f32.mrb[59].mxu0 }
 0xd7f   : > { %2961 = vst [vmem:[%s334_s22] sm:$0xff] %v2947_v18  ;;  %v2950_v57 = vadd.f32 %v3192_v33, %v2949_v53 }
 0xd80   : > { %2964 = vst [vmem:[%s334_s22 + $0x18] sm:$0xff] %v2958_v27 }
 0xd81   : > { %2962 = vst [vmem:[%s334_s22 + $0x8] sm:$0xff] %v2950_v57 }
 0xd82   : > { %4033 = shalt.err (!%p4030_p4)
}
 0xd83   : > { %s4034_s20 = scalar_lea.hbm %s5130_s17, 512  ;;  %s4038_s10 = scalar_lea.hbm %s5179_s5, 1024 }
 0xd84   : > { %p4035_p7 = scmp.ne.s32.totalorder %s5130_s17, %s4034_s20  ;;  %p4039_p11 = scmp.lt.u32.totalorder %s5130_s17, %s5179_s5 }
 0xd85   : > { %p4040_p0 = scmp.lt.u32.totalorder %s4038_s10, %s4034_s20  ;;  %p4042_p2 = scmp.lt.u32.totalorder %s4034_s20, %s5130_s17 }
 0xd86   : > { %p4036_p5 = pnand %p4035_p7, %p5228_p12 }
 0xd87   : > { %p4041_p1 = por %p4040_p0, %p4039_p11 }
 0xd88   : > { %p4037_p8 = pneg %p4036_p5 }
 0xd89   : > { %p4043_p10 = por %p4042_p2, %p4041_p1 }
 0xd8b   : > { %p4044_p13 = pnand %p4043_p10, %p4037_p8 }
 0xd8d   : > { %4047 = shalt.err (!%p4044_p13)
}
 0xd8e   : > { %s4112_s23 = smov 128   ;;  %s4113_s15 = smov 8  }
 0xd8f   : > { %3596 = dma.vmem_to_hbm [thread:$0]  (%p5228_p12), %s5125_s29, 512, %s5130_s17, %s2966_s14, %s4112_s23, %s4112_s23, %s4113_s15  }
 0xd90 PF: > { %s5229_s30 = sld [smem:[#allocation15_spill]]  ;;  %s5230_s27 = sld [smem:[#allocation20_spill]] }
 0xd91   : > { %s5231_s24 = sld [smem:[#allocation17_spill]] }
 0xd96   : > { %s2994_s26 = sand.u32 1, %s5229_s30   ;;  %p5232_p3 = scmp.ne.s32.totalorder %s5230_s27, 0 }
 0xd97   : > { %p5233_p9 = scmp.ge.s32.totalorder %s5231_s24, 2  ;;  %s2995_s6 = scalar_lea.sflag [#allocation4], %s2994_s26 }
 0xd99   : > { %p3613_p6 = pnand %p5233_p9, %p5232_p3 }
 0xd9b   : > { %4077 = dma.done.wait (!%p3613_p6), %s2995_s6, 512  }
 0xd9c   : > { %4079 = vsyncadd (!%p3613_p6), %s2995_s6, 4294966784  ;;  %s5234_s21 = sld [smem:[#allocation18_spill]]  ;;  %s5235_s22 = sld [smem:[#allocation16_spill]] }
 0xd9d   : > { %s5236_s20 = sld [smem:[#allocation19_spill]]  ;;  %s5237_s18 = smov %s4086_s19 }
 0xda2   : > { %p22_p4 = scmp.ge.s32.totalorder %s5234_s21, 4   ;;  %s5238_s19 = smov %s5235_s22 }
 0xda4   :  { %24 = sbr.rel (!%p22_p4) target bundleno = 11 (0xb), region = 119 }
 0xdab   :  { %3000 = vsyncpa [#allocation3], 1 }
 0xdac   :  { %3002 = vsyncpa [#allocation3 + $0x1], 1 }
 0xdad   :  { %3003 = vsyncpa [#allocation6], 1 }
 0xdae   :  { %3005 = vsyncpa [#allocation6 + $0x1], 1 }
 0xdaf   :  { %3006 = vsyncpa [#allocation9], 1 }
 0xdb0   :  { %3007 = vsyncpa [#allocation4], 1 }
 0xdb1   :  { %3009 = vsyncpa [#allocation4 + $0x1], 1 }

</bundles_post_ra>
